<compile_context>
chip_gen: v7x
topology: tpu7x:2x2x1
jax: 0.10.0
libtpu: 0.0.40
codegen_flags: <defaults>
</compile_context>

<pallas_src>
import numpy as np
import jax
import jax.numpy as jnp
from jax.experimental import pallas as pl
from jax.experimental.pallas import tpu as pltpu


# ----------------------------------------------------------------------------
# Kernels
# ----------------------------------------------------------------------------
def _fused_1x1_kernel(x_ref, w_ref, b_ref, o_ref):
    """Fused 1x1 conv(s) (BN scale pre-folded into W) + bias + ReLU."""
    y = jnp.dot(x_ref[...], w_ref[...], preferred_element_type=jnp.float32)
    o_ref[...] = jnp.maximum(y + b_ref[...], 0.0).astype(o_ref.dtype)


def _inception_kernel(xm_ref, r3_ref, r5_ref, w1_ref, w3_ref, w5_ref, wm_ref,
                      b_ref, o_ref):
    """All four Inception branches for one image -> one concatenated slab.

    xm_ref : (1, H+2, W+2, cin)  input, -inf spatial halo (for max-pool)
    r3_ref : (1, H+2, W+2, cr3)  reduced features, zero halo (3x3 branch)
    r5_ref : (1, H+4, W+4, cr5)  reduced features, zero halo (5x5 branch)
    w*_ref : branch weights (BN scale folded in), each embedded into its
             disjoint column block of the (.., c_total) output slab
    b_ref  : (1, c_total) folded BN bias for the whole slab
    o_ref  : (1, H, W, c_total)
    """
    _, hh, ww, ctot = o_ref.shape
    hw = hh * ww
    cin = xm_ref.shape[3]
    cr3 = r3_ref.shape[3]
    cr5 = r5_ref.shape[3]

    x_pad = xm_ref[0]                                   # (H+2, W+2, cin)
    xc = x_pad[1:1 + hh, 1:1 + ww, :].reshape(hw, cin)  # un-padded center

    # ---- 1x1 branch ---------------------------------------------------------
    acc = jnp.dot(xc, w1_ref[...], preferred_element_type=jnp.float32)

    # ---- 3x3 branch (on reduced features, zero 'same' padding) --------------
    r3p = r3_ref[0]
    for ky in range(3):
        for kx in range(3):
            patch = r3p[ky:ky + hh, kx:kx + ww, :].reshape(hw, cr3)
            acc = acc + jnp.dot(patch, w3_ref[ky * 3 + kx],
                                preferred_element_type=jnp.float32)

    # ---- 5x5 branch (on reduced features, zero 'same' padding) --------------
    r5p = r5_ref[0]
    for ky in range(5):
        for kx in range(5):
            patch = r5p[ky:ky + hh, kx:kx + ww, :].reshape(hw, cr5)
            acc = acc + jnp.dot(patch, w5_ref[ky * 5 + kx],
                                preferred_element_type=jnp.float32)

    # ---- max-pool (3x3, stride 1, -inf pad) + 1x1 conv branch ----------------
    # Separable: column max over the 3 W-shifts, then row max over 3 H-shifts.
    colmax = jnp.maximum(
        jnp.maximum(x_pad[:, 0:ww, :], x_pad[:, 1:1 + ww, :]),
        x_pad[:, 2:2 + ww, :])                           # (H+2, W, cin)
    xmax = jnp.maximum(
        jnp.maximum(colmax[0:hh], colmax[1:1 + hh]),
        colmax[2:2 + hh]).reshape(hw, cin)
    acc = acc + jnp.dot(xmax, wm_ref[...], preferred_element_type=jnp.float32)

    # ---- fused bias + ReLU epilogue, single lane-dense store -----------------
    out = jnp.maximum(acc + b_ref[...], 0.0)
    o_ref[0] = out.reshape(hh, ww, ctot).astype(o_ref.dtype)


# ----------------------------------------------------------------------------
# Glue: tiling choice, BN folding, pallas_call wrappers
# ----------------------------------------------------------------------------
def _pick_tm(m):
    """Largest tile (multiple of 8) that still leaves >=2 grid steps (v7x)."""
    for tm in (1024, 512, 256, 128, 64, 32, 16, 8):
        if m % tm == 0 and m // tm >= 2:
            return tm
    return m


def _fold_bn(conv_bias, gamma, beta, mean, var, eps=1e-5):
    scale = gamma / jnp.sqrt(var + eps)
    bias = beta + (conv_bias - mean) * scale
    return scale, bias


_COMPILER_PARAMS = pltpu.CompilerParams(
    dimension_semantics=("parallel",),
    vmem_limit_bytes=32 * 1024 * 1024,
)


def fused_pointwise(x_nhwc, w_cat, bias):
    """One matmul for all fused 1x1 convs (scale-folded) + bias + ReLU."""
    n, h, w, cin = x_nhwc.shape
    cout = w_cat.shape[1]
    m = n * h * w
    tm = _pick_tm(m)

    x2 = x_nhwc.reshape(m, cin)
    b2 = bias.reshape(1, cout).astype(jnp.float32)

    out = pl.pallas_call(
        _fused_1x1_kernel,
        out_shape=jax.ShapeDtypeStruct((m, cout), x_nhwc.dtype),
        grid_spec=pltpu.PrefetchScalarGridSpec(
            num_scalar_prefetch=0,
            grid=(m // tm,),
            in_specs=[
                pl.BlockSpec((tm, cin), lambda i: (i, 0)),
                pl.BlockSpec((cin, cout), lambda i: (0, 0)),   # resident
                pl.BlockSpec((1, cout), lambda i: (0, 0)),     # resident
            ],
            out_specs=pl.BlockSpec((tm, cout), lambda i: (i, 0)),
        ),
        compiler_params=_COMPILER_PARAMS,
    )(x2, w_cat.astype(jnp.float32), b2)
    return out.reshape(n, h, w, cout)


def inception_stage2(xm_pad, r3_pad, r5_pad, w1e, w3e, w5e, wme, b_all,
                     out_dtype):
    """One pallas_call producing the full concatenated Inception output."""
    n, hp, wp, cin = xm_pad.shape
    h, w = hp - 2, wp - 2
    cr3 = r3_pad.shape[-1]
    cr5 = r5_pad.shape[-1]
    ctot = w1e.shape[1]

    b2 = b_all.reshape(1, ctot).astype(jnp.float32)

    out = pl.pallas_call(
        _inception_kernel,
        out_shape=jax.ShapeDtypeStruct((n, h, w, ctot), out_dtype),
        grid_spec=pltpu.PrefetchScalarGridSpec(
            num_scalar_prefetch=0,
            grid=(n,),
            in_specs=[
                pl.BlockSpec((1, h + 2, w + 2, cin), lambda b: (b, 0, 0, 0)),
                pl.BlockSpec((1, h + 2, w + 2, cr3), lambda b: (b, 0, 0, 0)),
                pl.BlockSpec((1, h + 4, w + 4, cr5), lambda b: (b, 0, 0, 0)),
                pl.BlockSpec((cin, ctot), lambda b: (0, 0)),      # resident
                pl.BlockSpec((9, cr3, ctot), lambda b: (0, 0, 0)),
                pl.BlockSpec((25, cr5, ctot), lambda b: (0, 0, 0)),
                pl.BlockSpec((cin, ctot), lambda b: (0, 0)),
                pl.BlockSpec((1, ctot), lambda b: (0, 0)),
            ],
            out_specs=pl.BlockSpec((1, h, w, ctot), lambda b: (b, 0, 0, 0)),
        ),
        compiler_params=_COMPILER_PARAMS,
    )(xm_pad, r3_pad, r5_pad, w1e, w3e, w5e, wme, b2)
    return out


# ----------------------------------------------------------------------------
# Parameters (deterministic, synthetic) and the InceptionBlock forward
# ----------------------------------------------------------------------------
def make_params(key, c_in, c_red, c_out):
    def conv_init(k, cout, cin, ksz):
        kw, kb = jax.random.split(k)
        fan_in = cin * ksz * ksz
        wgt = jax.random.normal(kw, (cout, cin, ksz, ksz), jnp.float32) / np.sqrt(fan_in)
        b = 0.1 * jax.random.normal(kb, (cout,), jnp.float32)
        return wgt, b

    def bn_init(k, c):
        k1, k2, k3, k4 = jax.random.split(k, 4)
        gamma = 1.0 + 0.1 * jax.random.normal(k1, (c,), jnp.float32)
        beta = 0.1 * jax.random.normal(k2, (c,), jnp.float32)
        mean = 0.1 * jax.random.normal(k3, (c,), jnp.float32)
        var = jax.random.uniform(k4, (c,), jnp.float32, minval=0.5, maxval=1.5)
        return gamma, beta, mean, var

    keys = jax.random.split(key, 6)
    params = {}

    def branch(k, name, cin, cout, ksz):
        kc, kb = jax.random.split(k)
        wgt, b = conv_init(kc, cout, cin, ksz)
        g, be, mu, va = bn_init(kb, cout)
        s, bb = _fold_bn(b, g, be, mu, va)
        params["w_" + name] = wgt
        params["s_" + name] = s
        params["b_" + name] = bb

    branch(keys[0], "1x1", c_in, c_out["1x1"], 1)
    branch(keys[1], "3r", c_in, c_red["3x3"], 1)
    branch(keys[2], "3x3", c_red["3x3"], c_out["3x3"], 3)
    branch(keys[3], "5r", c_in, c_red["5x5"], 1)
    branch(keys[4], "5x5", c_red["5x5"], c_out["5x5"], 5)
    branch(keys[5], "max", c_in, c_out["max"], 1)
    return params


def inception_forward(x_nchw, p):
    """Pallas-backed InceptionBlock.forward.  Input/output are NCHW (PyTorch)."""
    x = jnp.transpose(x_nchw, (0, 2, 3, 1))                    # -> NHWC
    n, h, w, cin = x.shape

    c1 = p["w_1x1"].shape[0]
    cr3 = p["w_3r"].shape[0]
    cr5 = p["w_5r"].shape[0]
    c3 = p["w_3x3"].shape[0]
    c5 = p["w_5x5"].shape[0]
    cm = p["w_max"].shape[0]
    ctot = c1 + c3 + c5 + cm

    # --- Stage 1: fused 1x1 reductions (3x3 & 5x5 branches read x once).
    # BN scale folded into weight columns -> kernel epilogue is add + ReLU.
    w_red = jnp.concatenate(
        [jnp.transpose(p["w_3r"][:, :, 0, 0], (1, 0)) * p["s_3r"][None, :],
         jnp.transpose(p["w_5r"][:, :, 0, 0], (1, 0)) * p["s_5r"][None, :]],
        axis=1)                                                   # (cin, cr3+cr5)
    b_red = jnp.concatenate([p["b_3r"], p["b_5r"]])
    red = fused_pointwise(x, w_red, b_red)                        # (n,h,w,cr3+cr5)
    r3 = red[..., :cr3]
    r5 = red[..., cr3:]

    # --- Stage 2 inputs: halo-padded tiles (no K*K stack in HBM) -------------
    xm_pad = jnp.pad(x, ((0, 0), (1, 1), (1, 1), (0, 0)),
                     constant_values=-jnp.inf)                    # max-pool halo
    r3_pad = jnp.pad(r3, ((0, 0), (1, 1), (1, 1), (0, 0)))        # zero halo
    r5_pad = jnp.pad(r5, ((0, 0), (2, 2), (2, 2), (0, 0)))        # zero halo

    # Branch weights (BN scale folded in) embedded into disjoint column blocks
    # of the output slab, so every branch accumulates into one wide
    # accumulator (no narrow stores, single lane-dense epilogue).
    w1e = jnp.zeros((cin, ctot), jnp.float32).at[:, :c1].set(
        jnp.transpose(p["w_1x1"][:, :, 0, 0], (1, 0)) * p["s_1x1"][None, :])
    w3e = jnp.zeros((9, cr3, ctot), jnp.float32).at[:, :, c1:c1 + c3].set(
        jnp.transpose(p["w_3x3"], (2, 3, 1, 0)).reshape(9, cr3, c3)
        * p["s_3x3"][None, None, :])
    w5e = jnp.zeros((25, cr5, ctot), jnp.float32).at[:, :, c1 + c3:c1 + c3 + c5].set(
        jnp.transpose(p["w_5x5"], (2, 3, 1, 0)).reshape(25, cr5, c5)
        * p["s_5x5"][None, None, :])
    wme = jnp.zeros((cin, ctot), jnp.float32).at[:, c1 + c3 + c5:].set(
        jnp.transpose(p["w_max"][:, :, 0, 0], (1, 0)) * p["s_max"][None, :])
    b_all = jnp.concatenate([p["b_1x1"], p["b_3x3"], p["b_5x5"], p["b_max"]])

    out = inception_stage2(xm_pad, r3_pad, r5_pad, w1e, w3e, w5e, wme,
                           b_all, x.dtype)                        # (n,h,w,ctot)
    return jnp.transpose(out, (0, 3, 1, 2))                       # back to NCHW


# ----------------------------------------------------------------------------
# Pure-JAX reference (for correctness check only)
# ----------------------------------------------------------------------------
def reference_forward(x_nchw, p):
    x = jnp.transpose(x_nchw, (0, 2, 3, 1))

    def cbr(xx, wgt, s, b):
        ksz = wgt.shape[-1]
        pad = ksz // 2
        y = jax.lax.conv_general_dilated(
            xx, jnp.transpose(wgt, (2, 3, 1, 0)), (1, 1),
            [(pad, pad), (pad, pad)],
            dimension_numbers=("NHWC", "HWIO", "NHWC"))
        return jnp.maximum(y * s + b, 0.0)

    y1 = cbr(x, p["w_1x1"], p["s_1x1"], p["b_1x1"])
    y3 = cbr(cbr(x, p["w_3r"], p["s_3r"], p["b_3r"]),
             p["w_3x3"], p["s_3x3"], p["b_3x3"])
    y5 = cbr(cbr(x, p["w_5r"], p["s_5r"], p["b_5r"]),
             p["w_5x5"], p["s_5x5"], p["b_5x5"])
    xm = jax.lax.reduce_window(x, -jnp.inf, jax.lax.max,
                               (1, 3, 3, 1), (1, 1, 1, 1),
                               [(0, 0), (1, 1), (1, 1), (0, 0)])
    ym = cbr(xm, p["w_max"], p["s_max"], p["b_max"])
    out = jnp.concatenate([y1, y3, y5, ym], axis=-1)
    return jnp.transpose(out, (0, 3, 1, 2))


if __name__ == "__main__":
    key = jax.random.PRNGKey(0)
    k_x, k_p = jax.random.split(key)

    # Small shapes consistent with the module: NCHW input.
    N, C_IN, H, W = 2, 4, 16, 16
    c_red = {"3x3": 4, "5x5": 4}
    c_out = {"1x1": 4, "3x3": 8, "5x5": 8, "max": 4}

    x = jax.random.normal(k_x, (N, C_IN, H, W), jnp.float32)
    params = make_params(k_p, C_IN, c_red, c_out)

    fwd = jax.jit(inception_forward)
    y = fwd(x, params)
    y = jax.block_until_ready(y)

    assert y.shape == (N, sum(c_out.values()), H, W), y.shape

    y_ref = jax.block_until_ready(reference_forward(x, params))
    np.testing.assert_allclose(np.asarray(y), np.asarray(y_ref),
                               rtol=2e-2, atol=2e-2)

    print("KERNEL_OK")
</pallas_src>

<mosaic_0001>
module attributes {stable_mosaic.version = 11 : i64} {
  func.func @_fused_1x1_kernel(%arg0: i32, %arg1: memref<256x4xf32, #tpu.memory_space<vmem>>, %arg2: memref<4x8xf32, #tpu.memory_space<vmem>>, %arg3: memref<1x8xf32, #tpu.memory_space<vmem>>, %arg4: memref<256x8xf32, #tpu.memory_space<vmem>>) attributes {dimension_semantics = [#tpu.dimension_semantics<parallel>], iteration_bounds = array<i64: 2>, scalar_prefetch = 0 : i64, scratch_operands = 0 : i64, tpu.core_type = #tpu.core_type<tc>, window_params = [{transform_indices = @transform_0, window_bounds = array<i64: 256, 4>}, {pipeline_mode = #tpu.pipeline_mode<synchronous>, transform_indices = @transform_1, window_bounds = array<i64: 4, 8>}, {pipeline_mode = #tpu.pipeline_mode<synchronous>, transform_indices = @transform_2, window_bounds = array<i64: 1, 8>}, {transform_indices = @transform_3, window_bounds = array<i64: 256, 8>}]} {
    %c0 = arith.constant 0 : index
    %c0_0 = arith.constant 0 : index
    %0 = vector.load %arg1[%c0, %c0_0] : memref<256x4xf32, #tpu.memory_space<vmem>>, vector<256x4xf32>
    %c0_1 = arith.constant 0 : index
    %c0_2 = arith.constant 0 : index
    %1 = vector.load %arg2[%c0_1, %c0_2] : memref<4x8xf32, #tpu.memory_space<vmem>>, vector<4x8xf32>
    %cst = arith.constant dense<0.000000e+00> : vector<256x8xf32>
    %2 = tpu.matmul %0, %1, %cst {dimension_numbers = #tpu.dot_dimension_numbers<[1], [0], [0], [1], [0, 0, 1, 1], [], []>} : vector<256x4xf32>, vector<4x8xf32>, vector<256x8xf32> -> vector<256x8xf32>
    %c0_3 = arith.constant 0 : index
    %c0_4 = arith.constant 0 : index
    %3 = vector.load %arg3[%c0_3, %c0_4] : memref<1x8xf32, #tpu.memory_space<vmem>>, vector<1x8xf32>
    %4 = vector.broadcast %3 : vector<1x8xf32> to vector<256x8xf32>
    %5 = arith.addf %2, %4 : vector<256x8xf32>
    %cst_5 = arith.constant 0.000000e+00 : f32
    %6 = vector.broadcast %cst_5 : f32 to vector<256x8xf32>
    %7 = arith.maximumf %5, %6 : vector<256x8xf32>
    %c0_6 = arith.constant 0 : index
    %c0_7 = arith.constant 0 : index
    %8 = vector.load %arg4[%c0_6, %c0_7] : memref<256x8xf32, #tpu.memory_space<vmem>>, vector<256x8xf32>
    tpu.vector_store %arg4[%c0_6, %c0_7], %7 {strides = array<i32>} : memref<256x8xf32, #tpu.memory_space<vmem>>, vector<256x8xf32>,
    return
  }
  func.func @transform_0(%arg0: i32) -> (i32, i32) {
    %c0_i32 = arith.constant 0 : i32
    %c0_i32_0 = arith.constant 0 : i32
    return %arg0, %c0_i32 : i32, i32
  }
  func.func @transform_1(%arg0: i32) -> (i32, i32) {
    %c0_i32 = arith.constant 0 : i32
    %c0_i32_0 = arith.constant 0 : i32
    %c0_i32_1 = arith.constant 0 : i32
    return %c0_i32, %c0_i32_0 : i32, i32
  }
  func.func @transform_2(%arg0: i32) -> (i32, i32) {
    %c0_i32 = arith.constant 0 : i32
    %c0_i32_0 = arith.constant 0 : i32
    %c0_i32_1 = arith.constant 0 : i32
    return %c0_i32, %c0_i32_0 : i32, i32
  }
  func.func @transform_3(%arg0: i32) -> (i32, i32) {
    %c0_i32 = arith.constant 0 : i32
    %c0_i32_0 = arith.constant 0 : i32
    return %arg0, %c0_i32 : i32, i32
  }
}

module attributes {stable_mosaic.version = 11 : i64} {
  func.func @_inception_kernel(%arg0: i32, %arg1: memref<1x18x18x4xf32, #tpu.memory_space<vmem>>, %arg2: memref<1x18x18x4xf32, #tpu.memory_space<vmem>>, %arg3: memref<1x20x20x4xf32, #tpu.memory_space<vmem>>, %arg4: memref<4x24xf32, #tpu.memory_space<vmem>>, %arg5: memref<9x4x24xf32, #tpu.memory_space<vmem>>, %arg6: memref<25x4x24xf32, #tpu.memory_space<vmem>>, %arg7: memref<4x24xf32, #tpu.memory_space<vmem>>, %arg8: memref<1x24xf32, #tpu.memory_space<vmem>>, %arg9: memref<1x16x16x24xf32, #tpu.memory_space<vmem>>) attributes {dimension_semantics = [#tpu.dimension_semantics<parallel>], iteration_bounds = array<i64: 2>, scalar_prefetch = 0 : i64, scratch_operands = 0 : i64, tpu.core_type = #tpu.core_type<tc>, window_params = [{transform_indices = @transform_0, window_bounds = array<i64: 1, 18, 18, 4>}, {transform_indices = @transform_1, window_bounds = array<i64: 1, 18, 18, 4>}, {transform_indices = @transform_2, window_bounds = array<i64: 1, 20, 20, 4>}, {pipeline_mode = #tpu.pipeline_mode<synchronous>, transform_indices = @transform_3, window_bounds = array<i64: 4, 24>}, {pipeline_mode = #tpu.pipeline_mode<synchronous>, transform_indices = @transform_4, window_bounds = array<i64: 9, 4, 24>}, {pipeline_mode = #tpu.pipeline_mode<synchronous>, transform_indices = @transform_5, window_bounds = array<i64: 25, 4, 24>}, {pipeline_mode = #tpu.pipeline_mode<synchronous>, transform_indices = @transform_6, window_bounds = array<i64: 4, 24>}, {pipeline_mode = #tpu.pipeline_mode<synchronous>, transform_indices = @transform_7, window_bounds = array<i64: 1, 24>}, {transform_indices = @transform_8, window_bounds = array<i64: 1, 16, 16, 24>}]} {
    %c0 = arith.constant 0 : index
    %c0_0 = arith.constant 0 : index
    %c0_1 = arith.constant 0 : index
    %c0_2 = arith.constant 0 : index
    %0 = vector.load %arg1[%c0, %c0_0, %c0_1, %c0_2] : memref<1x18x18x4xf32, #tpu.memory_space<vmem>>, vector<1x18x18x4xf32>
    %1 = vector.shape_cast %0 : vector<1x18x18x4xf32> to vector<18x18x4xf32>
    %2 = vector.extract_strided_slice %1 {offsets = [1, 1, 0], sizes = [16, 16, 4], strides = [1, 1, 1]} : vector<18x18x4xf32> to vector<16x16x4xf32>
    %3 = vector.shape_cast %2 : vector<16x16x4xf32> to vector<256x4xf32>
    %c0_3 = arith.constant 0 : index
    %c0_4 = arith.constant 0 : index
    %4 = vector.load %arg4[%c0_3, %c0_4] : memref<4x24xf32, #tpu.memory_space<vmem>>, vector<4x24xf32>
    %cst = arith.constant dense<0.000000e+00> : vector<256x24xf32>
    %5 = tpu.matmul %3, %4, %cst {dimension_numbers = #tpu.dot_dimension_numbers<[1], [0], [0], [1], [0, 0, 1, 1], [], []>} : vector<256x4xf32>, vector<4x24xf32>, vector<256x24xf32> -> vector<256x24xf32>
    %c0_5 = arith.constant 0 : index
    %c0_6 = arith.constant 0 : index
    %c0_7 = arith.constant 0 : index
    %c0_8 = arith.constant 0 : index
    %6 = vector.load %arg2[%c0_5, %c0_6, %c0_7, %c0_8] : memref<1x18x18x4xf32, #tpu.memory_space<vmem>>, vector<1x18x18x4xf32>
    %7 = vector.shape_cast %6 : vector<1x18x18x4xf32> to vector<18x18x4xf32>
    %8 = vector.extract_strided_slice %7 {offsets = [0, 0, 0], sizes = [16, 16, 4], strides = [1, 1, 1]} : vector<18x18x4xf32> to vector<16x16x4xf32>
    %9 = vector.shape_cast %8 : vector<16x16x4xf32> to vector<256x4xf32>
    %c0_9 = arith.constant 0 : index
    %c0_10 = arith.constant 0 : index
    %c0_11 = arith.constant 0 : index
    %10 = vector.load %arg5[%c0_9, %c0_10, %c0_11] : memref<9x4x24xf32, #tpu.memory_space<vmem>>, vector<1x4x24xf32>
    %11 = vector.shape_cast %10 : vector<1x4x24xf32> to vector<4x24xf32>
    %cst_12 = arith.constant dense<0.000000e+00> : vector<256x24xf32>
    %12 = tpu.matmul %9, %11, %cst_12 {dimension_numbers = #tpu.dot_dimension_numbers<[1], [0], [0], [1], [0, 0, 1, 1], [], []>} : vector<256x4xf32>, vector<4x24xf32>, vector<256x24xf32> -> vector<256x24xf32>
    %13 = arith.addf %5, %12 : vector<256x24xf32>
    %14 = vector.extract_strided_slice %7 {offsets = [0, 1, 0], sizes = [16, 16, 4], strides = [1, 1, 1]} : vector<18x18x4xf32> to vector<16x16x4xf32>
    %15 = vector.shape_cast %14 : vector<16x16x4xf32> to vector<256x4xf32>
    %c1 = arith.constant 1 : index
    %c0_13 = arith.constant 0 : index
    %c0_14 = arith.constant 0 : index
    %16 = vector.load %arg5[%c1, %c0_13, %c0_14] : memref<9x4x24xf32, #tpu.memory_space<vmem>>, vector<1x4x24xf32>
    %17 = vector.shape_cast %16 : vector<1x4x24xf32> to vector<4x24xf32>
    %cst_15 = arith.constant dense<0.000000e+00> : vector<256x24xf32>
    %18 = tpu.matmul %15, %17, %cst_15 {dimension_numbers = #tpu.dot_dimension_numbers<[1], [0], [0], [1], [0, 0, 1, 1], [], []>} : vector<256x4xf32>, vector<4x24xf32>, vector<256x24xf32> -> vector<256x24xf32>
    %19 = arith.addf %13, %18 : vector<256x24xf32>
    %20 = vector.extract_strided_slice %7 {offsets = [0, 2, 0], sizes = [16, 16, 4], strides = [1, 1, 1]} : vector<18x18x4xf32> to vector<16x16x4xf32>
    %21 = vector.shape_cast %20 : vector<16x16x4xf32> to vector<256x4xf32>
    %c2 = arith.constant 2 : index
    %c0_16 = arith.constant 0 : index
    %c0_17 = arith.constant 0 : index
    %22 = vector.load %arg5[%c2, %c0_16, %c0_17] : memref<9x4x24xf32, #tpu.memory_space<vmem>>, vector<1x4x24xf32>
    %23 = vector.shape_cast %22 : vector<1x4x24xf32> to vector<4x24xf32>
    %cst_18 = arith.constant dense<0.000000e+00> : vector<256x24xf32>
    %24 = tpu.matmul %21, %23, %cst_18 {dimension_numbers = #tpu.dot_dimension_numbers<[1], [0], [0], [1], [0, 0, 1, 1], [], []>} : vector<256x4xf32>, vector<4x24xf32>, vector<256x24xf32> -> vector<256x24xf32>
    %25 = arith.addf %19, %24 : vector<256x24xf32>
    %26 = vector.extract_strided_slice %7 {offsets = [1, 0, 0], sizes = [16, 16, 4], strides = [1, 1, 1]} : vector<18x18x4xf32> to vector<16x16x4xf32>
    %27 = vector.shape_cast %26 : vector<16x16x4xf32> to vector<256x4xf32>
    %c3 = arith.constant 3 : index
    %c0_19 = arith.constant 0 : index
    %c0_20 = arith.constant 0 : index
    %28 = vector.load %arg5[%c3, %c0_19, %c0_20] : memref<9x4x24xf32, #tpu.memory_space<vmem>>, vector<1x4x24xf32>
    %29 = vector.shape_cast %28 : vector<1x4x24xf32> to vector<4x24xf32>
    %cst_21 = arith.constant dense<0.000000e+00> : vector<256x24xf32>
    %30 = tpu.matmul %27, %29, %cst_21 {dimension_numbers = #tpu.dot_dimension_numbers<[1], [0], [0], [1], [0, 0, 1, 1], [], []>} : vector<256x4xf32>, vector<4x24xf32>, vector<256x24xf32> -> vector<256x24xf32>
    %31 = arith.addf %25, %30 : vector<256x24xf32>
    %32 = vector.extract_strided_slice %7 {offsets = [1, 1, 0], sizes = [16, 16, 4], strides = [1, 1, 1]} : vector<18x18x4xf32> to vector<16x16x4xf32>
    %33 = vector.shape_cast %32 : vector<16x16x4xf32> to vector<256x4xf32>
    %c4 = arith.constant 4 : index
    %c0_22 = arith.constant 0 : index
    %c0_23 = arith.constant 0 : index
    %34 = vector.load %arg5[%c4, %c0_22, %c0_23] : memref<9x4x24xf32, #tpu.memory_space<vmem>>, vector<1x4x24xf32>
    %35 = vector.shape_cast %34 : vector<1x4x24xf32> to vector<4x24xf32>
    %cst_24 = arith.constant dense<0.000000e+00> : vector<256x24xf32>
    %36 = tpu.matmul %33, %35, %cst_24 {dimension_numbers = #tpu.dot_dimension_numbers<[1], [0], [0], [1], [0, 0, 1, 1], [], []>} : vector<256x4xf32>, vector<4x24xf32>, vector<256x24xf32> -> vector<256x24xf32>
    %37 = arith.addf %31, %36 : vector<256x24xf32>
    %38 = vector.extract_strided_slice %7 {offsets = [1, 2, 0], sizes = [16, 16, 4], strides = [1, 1, 1]} : vector<18x18x4xf32> to vector<16x16x4xf32>
    %39 = vector.shape_cast %38 : vector<16x16x4xf32> to vector<256x4xf32>
    %c5 = arith.constant 5 : index
    %c0_25 = arith.constant 0 : index
    %c0_26 = arith.constant 0 : index
    %40 = vector.load %arg5[%c5, %c0_25, %c0_26] : memref<9x4x24xf32, #tpu.memory_space<vmem>>, vector<1x4x24xf32>
    %41 = vector.shape_cast %40 : vector<1x4x24xf32> to vector<4x24xf32>
    %cst_27 = arith.constant dense<0.000000e+00> : vector<256x24xf32>
    %42 = tpu.matmul %39, %41, %cst_27 {dimension_numbers = #tpu.dot_dimension_numbers<[1], [0], [0], [1], [0, 0, 1, 1], [], []>} : vector<256x4xf32>, vector<4x24xf32>, vector<256x24xf32> -> vector<256x24xf32>
    %43 = arith.addf %37, %42 : vector<256x24xf32>
    %44 = vector.extract_strided_slice %7 {offsets = [2, 0, 0], sizes = [16, 16, 4], strides = [1, 1, 1]} : vector<18x18x4xf32> to vector<16x16x4xf32>
    %45 = vector.shape_cast %44 : vector<16x16x4xf32> to vector<256x4xf32>
    %c6 = arith.constant 6 : index
    %c0_28 = arith.constant 0 : index
    %c0_29 = arith.constant 0 : index
    %46 = vector.load %arg5[%c6, %c0_28, %c0_29] : memref<9x4x24xf32, #tpu.memory_space<vmem>>, vector<1x4x24xf32>
    %47 = vector.shape_cast %46 : vector<1x4x24xf32> to vector<4x24xf32>
    %cst_30 = arith.constant dense<0.000000e+00> : vector<256x24xf32>
    %48 = tpu.matmul %45, %47, %cst_30 {dimension_numbers = #tpu.dot_dimension_numbers<[1], [0], [0], [1], [0, 0, 1, 1], [], []>} : vector<256x4xf32>, vector<4x24xf32>, vector<256x24xf32> -> vector<256x24xf32>
    %49 = arith.addf %43, %48 : vector<256x24xf32>
    %50 = vector.extract_strided_slice %7 {offsets = [2, 1, 0], sizes = [16, 16, 4], strides = [1, 1, 1]} : vector<18x18x4xf32> to vector<16x16x4xf32>
    %51 = vector.shape_cast %50 : vector<16x16x4xf32> to vector<256x4xf32>
    %c7 = arith.constant 7 : index
    %c0_31 = arith.constant 0 : index
    %c0_32 = arith.constant 0 : index
    %52 = vector.load %arg5[%c7, %c0_31, %c0_32] : memref<9x4x24xf32, #tpu.memory_space<vmem>>, vector<1x4x24xf32>
    %53 = vector.shape_cast %52 : vector<1x4x24xf32> to vector<4x24xf32>
    %cst_33 = arith.constant dense<0.000000e+00> : vector<256x24xf32>
    %54 = tpu.matmul %51, %53, %cst_33 {dimension_numbers = #tpu.dot_dimension_numbers<[1], [0], [0], [1], [0, 0, 1, 1], [], []>} : vector<256x4xf32>, vector<4x24xf32>, vector<256x24xf32> -> vector<256x24xf32>
    %55 = arith.addf %49, %54 : vector<256x24xf32>
    %56 = vector.extract_strided_slice %7 {offsets = [2, 2, 0], sizes = [16, 16, 4], strides = [1, 1, 1]} : vector<18x18x4xf32> to vector<16x16x4xf32>
    %57 = vector.shape_cast %56 : vector<16x16x4xf32> to vector<256x4xf32>
    %c8 = arith.constant 8 : index
    %c0_34 = arith.constant 0 : index
    %c0_35 = arith.constant 0 : index
    %58 = vector.load %arg5[%c8, %c0_34, %c0_35] : memref<9x4x24xf32, #tpu.memory_space<vmem>>, vector<1x4x24xf32>
    %59 = vector.shape_cast %58 : vector<1x4x24xf32> to vector<4x24xf32>
    %cst_36 = arith.constant dense<0.000000e+00> : vector<256x24xf32>
    %60 = tpu.matmul %57, %59, %cst_36 {dimension_numbers = #tpu.dot_dimension_numbers<[1], [0], [0], [1], [0, 0, 1, 1], [], []>} : vector<256x4xf32>, vector<4x24xf32>, vector<256x24xf32> -> vector<256x24xf32>
    %61 = arith.addf %55, %60 : vector<256x24xf32>
    %c0_37 = arith.constant 0 : index
    %c0_38 = arith.constant 0 : index
    %c0_39 = arith.constant 0 : index
    %c0_40 = arith.constant 0 : index
    %62 = vector.load %arg3[%c0_37, %c0_38, %c0_39, %c0_40] : memref<1x20x20x4xf32, #tpu.memory_space<vmem>>, vector<1x20x20x4xf32>
    %63 = vector.shape_cast %62 : vector<1x20x20x4xf32> to vector<20x20x4xf32>
    %64 = vector.extract_strided_slice %63 {offsets = [0, 0, 0], sizes = [16, 16, 4], strides = [1, 1, 1]} : vector<20x20x4xf32> to vector<16x16x4xf32>
    %65 = vector.shape_cast %64 : vector<16x16x4xf32> to vector<256x4xf32>
    %c0_41 = arith.constant 0 : index
    %c0_42 = arith.constant 0 : index
    %c0_43 = arith.constant 0 : index
    %66 = vector.load %arg6[%c0_41, %c0_42, %c0_43] : memref<25x4x24xf32, #tpu.memory_space<vmem>>, vector<1x4x24xf32>
    %67 = vector.shape_cast %66 : vector<1x4x24xf32> to vector<4x24xf32>
    %cst_44 = arith.constant dense<0.000000e+00> : vector<256x24xf32>
    %68 = tpu.matmul %65, %67, %cst_44 {dimension_numbers = #tpu.dot_dimension_numbers<[1], [0], [0], [1], [0, 0, 1, 1], [], []>} : vector<256x4xf32>, vector<4x24xf32>, vector<256x24xf32> -> vector<256x24xf32>
    %69 = arith.addf %61, %68 : vector<256x24xf32>
    %70 = vector.extract_strided_slice %63 {offsets = [0, 1, 0], sizes = [16, 16, 4], strides = [1, 1, 1]} : vector<20x20x4xf32> to vector<16x16x4xf32>
    %71 = vector.shape_cast %70 : vector<16x16x4xf32> to vector<256x4xf32>
    %c1_45 = arith.constant 1 : index
    %c0_46 = arith.constant 0 : index
    %c0_47 = arith.constant 0 : index
    %72 = vector.load %arg6[%c1_45, %c0_46, %c0_47] : memref<25x4x24xf32, #tpu.memory_space<vmem>>, vector<1x4x24xf32>
    %73 = vector.shape_cast %72 : vector<1x4x24xf32> to vector<4x24xf32>
    %cst_48 = arith.constant dense<0.000000e+00> : vector<256x24xf32>
    %74 = tpu.matmul %71, %73, %cst_48 {dimension_numbers = #tpu.dot_dimension_numbers<[1], [0], [0], [1], [0, 0, 1, 1], [], []>} : vector<256x4xf32>, vector<4x24xf32>, vector<256x24xf32> -> vector<256x24xf32>
    %75 = arith.addf %69, %74 : vector<256x24xf32>
    %76 = vector.extract_strided_slice %63 {offsets = [0, 2, 0], sizes = [16, 16, 4], strides = [1, 1, 1]} : vector<20x20x4xf32> to vector<16x16x4xf32>
    %77 = vector.shape_cast %76 : vector<16x16x4xf32> to vector<256x4xf32>
    %c2_49 = arith.constant 2 : index
    %c0_50 = arith.constant 0 : index
    %c0_51 = arith.constant 0 : index
    %78 = vector.load %arg6[%c2_49, %c0_50, %c0_51] : memref<25x4x24xf32, #tpu.memory_space<vmem>>, vector<1x4x24xf32>
    %79 = vector.shape_cast %78 : vector<1x4x24xf32> to vector<4x24xf32>
    %cst_52 = arith.constant dense<0.000000e+00> : vector<256x24xf32>
    %80 = tpu.matmul %77, %79, %cst_52 {dimension_numbers = #tpu.dot_dimension_numbers<[1], [0], [0], [1], [0, 0, 1, 1], [], []>} : vector<256x4xf32>, vector<4x24xf32>, vector<256x24xf32> -> vector<256x24xf32>
    %81 = arith.addf %75, %80 : vector<256x24xf32>
    %82 = vector.extract_strided_slice %63 {offsets = [0, 3, 0], sizes = [16, 16, 4], strides = [1, 1, 1]} : vector<20x20x4xf32> to vector<16x16x4xf32>
    %83 = vector.shape_cast %82 : vector<16x16x4xf32> to vector<256x4xf32>
    %c3_53 = arith.constant 3 : index
    %c0_54 = arith.constant 0 : index
    %c0_55 = arith.constant 0 : index
    %84 = vector.load %arg6[%c3_53, %c0_54, %c0_55] : memref<25x4x24xf32, #tpu.memory_space<vmem>>, vector<1x4x24xf32>
    %85 = vector.shape_cast %84 : vector<1x4x24xf32> to vector<4x24xf32>
    %cst_56 = arith.constant dense<0.000000e+00> : vector<256x24xf32>
    %86 = tpu.matmul %83, %85, %cst_56 {dimension_numbers = #tpu.dot_dimension_numbers<[1], [0], [0], [1], [0, 0, 1, 1], [], []>} : vector<256x4xf32>, vector<4x24xf32>, vector<256x24xf32> -> vector<256x24xf32>
    %87 = arith.addf %81, %86 : vector<256x24xf32>
    %88 = vector.extract_strided_slice %63 {offsets = [0, 4, 0], sizes = [16, 16, 4], strides = [1, 1, 1]} : vector<20x20x4xf32> to vector<16x16x4xf32>
    %89 = vector.shape_cast %88 : vector<16x16x4xf32> to vector<256x4xf32>
    %c4_57 = arith.constant 4 : index
    %c0_58 = arith.constant 0 : index
    %c0_59 = arith.constant 0 : index
    %90 = vector.load %arg6[%c4_57, %c0_58, %c0_59] : memref<25x4x24xf32, #tpu.memory_space<vmem>>, vector<1x4x24xf32>
    %91 = vector.shape_cast %90 : vector<1x4x24xf32> to vector<4x24xf32>
    %cst_60 = arith.constant dense<0.000000e+00> : vector<256x24xf32>
    %92 = tpu.matmul %89, %91, %cst_60 {dimension_numbers = #tpu.dot_dimension_numbers<[1], [0], [0], [1], [0, 0, 1, 1], [], []>} : vector<256x4xf32>, vector<4x24xf32>, vector<256x24xf32> -> vector<256x24xf32>
    %93 = arith.addf %87, %92 : vector<256x24xf32>
    %94 = vector.extract_strided_slice %63 {offsets = [1, 0, 0], sizes = [16, 16, 4], strides = [1, 1, 1]} : vector<20x20x4xf32> to vector<16x16x4xf32>
    %95 = vector.shape_cast %94 : vector<16x16x4xf32> to vector<256x4xf32>
    %c5_61 = arith.constant 5 : index
    %c0_62 = arith.constant 0 : index
    %c0_63 = arith.constant 0 : index
    %96 = vector.load %arg6[%c5_61, %c0_62, %c0_63] : memref<25x4x24xf32, #tpu.memory_space<vmem>>, vector<1x4x24xf32>
    %97 = vector.shape_cast %96 : vector<1x4x24xf32> to vector<4x24xf32>
    %cst_64 = arith.constant dense<0.000000e+00> : vector<256x24xf32>
    %98 = tpu.matmul %95, %97, %cst_64 {dimension_numbers = #tpu.dot_dimension_numbers<[1], [0], [0], [1], [0, 0, 1, 1], [], []>} : vector<256x4xf32>, vector<4x24xf32>, vector<256x24xf32> -> vector<256x24xf32>
    %99 = arith.addf %93, %98 : vector<256x24xf32>
    %100 = vector.extract_strided_slice %63 {offsets = [1, 1, 0], sizes = [16, 16, 4], strides = [1, 1, 1]} : vector<20x20x4xf32> to vector<16x16x4xf32>
    %101 = vector.shape_cast %100 : vector<16x16x4xf32> to vector<256x4xf32>
    %c6_65 = arith.constant 6 : index
    %c0_66 = arith.constant 0 : index
    %c0_67 = arith.constant 0 : index
    %102 = vector.load %arg6[%c6_65, %c0_66, %c0_67] : memref<25x4x24xf32, #tpu.memory_space<vmem>>, vector<1x4x24xf32>
    %103 = vector.shape_cast %102 : vector<1x4x24xf32> to vector<4x24xf32>
    %cst_68 = arith.constant dense<0.000000e+00> : vector<256x24xf32>
    %104 = tpu.matmul %101, %103, %cst_68 {dimension_numbers = #tpu.dot_dimension_numbers<[1], [0], [0], [1], [0, 0, 1, 1], [], []>} : vector<256x4xf32>, vector<4x24xf32>, vector<256x24xf32> -> vector<256x24xf32>
    %105 = arith.addf %99, %104 : vector<256x24xf32>
    %106 = vector.extract_strided_slice %63 {offsets = [1, 2, 0], sizes = [16, 16, 4], strides = [1, 1, 1]} : vector<20x20x4xf32> to vector<16x16x4xf32>
    %107 = vector.shape_cast %106 : vector<16x16x4xf32> to vector<256x4xf32>
    %c7_69 = arith.constant 7 : index
    %c0_70 = arith.constant 0 : index
    %c0_71 = arith.constant 0 : index
    %108 = vector.load %arg6[%c7_69, %c0_70, %c0_71] : memref<25x4x24xf32, #tpu.memory_space<vmem>>, vector<1x4x24xf32>
    %109 = vector.shape_cast %108 : vector<1x4x24xf32> to vector<4x24xf32>
    %cst_72 = arith.constant dense<0.000000e+00> : vector<256x24xf32>
    %110 = tpu.matmul %107, %109, %cst_72 {dimension_numbers = #tpu.dot_dimension_numbers<[1], [0], [0], [1], [0, 0, 1, 1], [], []>} : vector<256x4xf32>, vector<4x24xf32>, vector<256x24xf32> -> vector<256x24xf32>
    %111 = arith.addf %105, %110 : vector<256x24xf32>
    %112 = vector.extract_strided_slice %63 {offsets = [1, 3, 0], sizes = [16, 16, 4], strides = [1, 1, 1]} : vector<20x20x4xf32> to vector<16x16x4xf32>
    %113 = vector.shape_cast %112 : vector<16x16x4xf32> to vector<256x4xf32>
    %c8_73 = arith.constant 8 : index
    %c0_74 = arith.constant 0 : index
    %c0_75 = arith.constant 0 : index
    %114 = vector.load %arg6[%c8_73, %c0_74, %c0_75] : memref<25x4x24xf32, #tpu.memory_space<vmem>>, vector<1x4x24xf32>
    %115 = vector.shape_cast %114 : vector<1x4x24xf32> to vector<4x24xf32>
    %cst_76 = arith.constant dense<0.000000e+00> : vector<256x24xf32>
    %116 = tpu.matmul %113, %115, %cst_76 {dimension_numbers = #tpu.dot_dimension_numbers<[1], [0], [0], [1], [0, 0, 1, 1], [], []>} : vector<256x4xf32>, vector<4x24xf32>, vector<256x24xf32> -> vector<256x24xf32>
    %117 = arith.addf %111, %116 : vector<256x24xf32>
    %118 = vector.extract_strided_slice %63 {offsets = [1, 4, 0], sizes = [16, 16, 4], strides = [1, 1, 1]} : vector<20x20x4xf32> to vector<16x16x4xf32>
    %119 = vector.shape_cast %118 : vector<16x16x4xf32> to vector<256x4xf32>
    %c9 = arith.constant 9 : index
    %c0_77 = arith.constant 0 : index
    %c0_78 = arith.constant 0 : index
    %120 = vector.load %arg6[%c9, %c0_77, %c0_78] : memref<25x4x24xf32, #tpu.memory_space<vmem>>, vector<1x4x24xf32>
    %121 = vector.shape_cast %120 : vector<1x4x24xf32> to vector<4x24xf32>
    %cst_79 = arith.constant dense<0.000000e+00> : vector<256x24xf32>
    %122 = tpu.matmul %119, %121, %cst_79 {dimension_numbers = #tpu.dot_dimension_numbers<[1], [0], [0], [1], [0, 0, 1, 1], [], []>} : vector<256x4xf32>, vector<4x24xf32>, vector<256x24xf32> -> vector<256x24xf32>
    %123 = arith.addf %117, %122 : vector<256x24xf32>
    %124 = vector.extract_strided_slice %63 {offsets = [2, 0, 0], sizes = [16, 16, 4], strides = [1, 1, 1]} : vector<20x20x4xf32> to vector<16x16x4xf32>
    %125 = vector.shape_cast %124 : vector<16x16x4xf32> to vector<256x4xf32>
    %c10 = arith.constant 10 : index
    %c0_80 = arith.constant 0 : index
    %c0_81 = arith.constant 0 : index
    %126 = vector.load %arg6[%c10, %c0_80, %c0_81] : memref<25x4x24xf32, #tpu.memory_space<vmem>>, vector<1x4x24xf32>
    %127 = vector.shape_cast %126 : vector<1x4x24xf32> to vector<4x24xf32>
    %cst_82 = arith.constant dense<0.000000e+00> : vector<256x24xf32>
    %128 = tpu.matmul %125, %127, %cst_82 {dimension_numbers = #tpu.dot_dimension_numbers<[1], [0], [0], [1], [0, 0, 1, 1], [], []>} : vector<256x4xf32>, vector<4x24xf32>, vector<256x24xf32> -> vector<256x24xf32>
    %129 = arith.addf %123, %128 : vector<256x24xf32>
    %130 = vector.extract_strided_slice %63 {offsets = [2, 1, 0], sizes = [16, 16, 4], strides = [1, 1, 1]} : vector<20x20x4xf32> to vector<16x16x4xf32>
    %131 = vector.shape_cast %130 : vector<16x16x4xf32> to vector<256x4xf32>
    %c11 = arith.constant 11 : index
    %c0_83 = arith.constant 0 : index
    %c0_84 = arith.constant 0 : index
    %132 = vector.load %arg6[%c11, %c0_83, %c0_84] : memref<25x4x24xf32, #tpu.memory_space<vmem>>, vector<1x4x24xf32>
    %133 = vector.shape_cast %132 : vector<1x4x24xf32> to vector<4x24xf32>
    %cst_85 = arith.constant dense<0.000000e+00> : vector<256x24xf32>
    %134 = tpu.matmul %131, %133, %cst_85 {dimension_numbers = #tpu.dot_dimension_numbers<[1], [0], [0], [1], [0, 0, 1, 1], [], []>} : vector<256x4xf32>, vector<4x24xf32>, vector<256x24xf32> -> vector<256x24xf32>
    %135 = arith.addf %129, %134 : vector<256x24xf32>
    %136 = vector.extract_strided_slice %63 {offsets = [2, 2, 0], sizes = [16, 16, 4], strides = [1, 1, 1]} : vector<20x20x4xf32> to vector<16x16x4xf32>
    %137 = vector.shape_cast %136 : vector<16x16x4xf32> to vector<256x4xf32>
    %c12 = arith.constant 12 : index
    %c0_86 = arith.constant 0 : index
    %c0_87 = arith.constant 0 : index
    %138 = vector.load %arg6[%c12, %c0_86, %c0_87] : memref<25x4x24xf32, #tpu.memory_space<vmem>>, vector<1x4x24xf32>
    %139 = vector.shape_cast %138 : vector<1x4x24xf32> to vector<4x24xf32>
    %cst_88 = arith.constant dense<0.000000e+00> : vector<256x24xf32>
    %140 = tpu.matmul %137, %139, %cst_88 {dimension_numbers = #tpu.dot_dimension_numbers<[1], [0], [0], [1], [0, 0, 1, 1], [], []>} : vector<256x4xf32>, vector<4x24xf32>, vector<256x24xf32> -> vector<256x24xf32>
    %141 = arith.addf %135, %140 : vector<256x24xf32>
    %142 = vector.extract_strided_slice %63 {offsets = [2, 3, 0], sizes = [16, 16, 4], strides = [1, 1, 1]} : vector<20x20x4xf32> to vector<16x16x4xf32>
    %143 = vector.shape_cast %142 : vector<16x16x4xf32> to vector<256x4xf32>
    %c13 = arith.constant 13 : index
    %c0_89 = arith.constant 0 : index
    %c0_90 = arith.constant 0 : index
    %144 = vector.load %arg6[%c13, %c0_89, %c0_90] : memref<25x4x24xf32, #tpu.memory_space<vmem>>, vector<1x4x24xf32>
    %145 = vector.shape_cast %144 : vector<1x4x24xf32> to vector<4x24xf32>
    %cst_91 = arith.constant dense<0.000000e+00> : vector<256x24xf32>
    %146 = tpu.matmul %143, %145, %cst_91 {dimension_numbers = #tpu.dot_dimension_numbers<[1], [0], [0], [1], [0, 0, 1, 1], [], []>} : vector<256x4xf32>, vector<4x24xf32>, vector<256x24xf32> -> vector<256x24xf32>
    %147 = arith.addf %141, %146 : vector<256x24xf32>
    %148 = vector.extract_strided_slice %63 {offsets = [2, 4, 0], sizes = [16, 16, 4], strides = [1, 1, 1]} : vector<20x20x4xf32> to vector<16x16x4xf32>
    %149 = vector.shape_cast %148 : vector<16x16x4xf32> to vector<256x4xf32>
    %c14 = arith.constant 14 : index
    %c0_92 = arith.constant 0 : index
    %c0_93 = arith.constant 0 : index
    %150 = vector.load %arg6[%c14, %c0_92, %c0_93] : memref<25x4x24xf32, #tpu.memory_space<vmem>>, vector<1x4x24xf32>
    %151 = vector.shape_cast %150 : vector<1x4x24xf32> to vector<4x24xf32>
    %cst_94 = arith.constant dense<0.000000e+00> : vector<256x24xf32>
    %152 = tpu.matmul %149, %151, %cst_94 {dimension_numbers = #tpu.dot_dimension_numbers<[1], [0], [0], [1], [0, 0, 1, 1], [], []>} : vector<256x4xf32>, vector<4x24xf32>, vector<256x24xf32> -> vector<256x24xf32>
    %153 = arith.addf %147, %152 : vector<256x24xf32>
    %154 = vector.extract_strided_slice %63 {offsets = [3, 0, 0], sizes = [16, 16, 4], strides = [1, 1, 1]} : vector<20x20x4xf32> to vector<16x16x4xf32>
    %155 = vector.shape_cast %154 : vector<16x16x4xf32> to vector<256x4xf32>
    %c15 = arith.constant 15 : index
    %c0_95 = arith.constant 0 : index
    %c0_96 = arith.constant 0 : index
    %156 = vector.load %arg6[%c15, %c0_95, %c0_96] : memref<25x4x24xf32, #tpu.memory_space<vmem>>, vector<1x4x24xf32>
    %157 = vector.shape_cast %156 : vector<1x4x24xf32> to vector<4x24xf32>
    %cst_97 = arith.constant dense<0.000000e+00> : vector<256x24xf32>
    %158 = tpu.matmul %155, %157, %cst_97 {dimension_numbers = #tpu.dot_dimension_numbers<[1], [0], [0], [1], [0, 0, 1, 1], [], []>} : vector<256x4xf32>, vector<4x24xf32>, vector<256x24xf32> -> vector<256x24xf32>
    %159 = arith.addf %153, %158 : vector<256x24xf32>
    %160 = vector.extract_strided_slice %63 {offsets = [3, 1, 0], sizes = [16, 16, 4], strides = [1, 1, 1]} : vector<20x20x4xf32> to vector<16x16x4xf32>
    %161 = vector.shape_cast %160 : vector<16x16x4xf32> to vector<256x4xf32>
    %c16 = arith.constant 16 : index
    %c0_98 = arith.constant 0 : index
    %c0_99 = arith.constant 0 : index
    %162 = vector.load %arg6[%c16, %c0_98, %c0_99] : memref<25x4x24xf32, #tpu.memory_space<vmem>>, vector<1x4x24xf32>
    %163 = vector.shape_cast %162 : vector<1x4x24xf32> to vector<4x24xf32>
    %cst_100 = arith.constant dense<0.000000e+00> : vector<256x24xf32>
    %164 = tpu.matmul %161, %163, %cst_100 {dimension_numbers = #tpu.dot_dimension_numbers<[1], [0], [0], [1], [0, 0, 1, 1], [], []>} : vector<256x4xf32>, vector<4x24xf32>, vector<256x24xf32> -> vector<256x24xf32>
    %165 = arith.addf %159, %164 : vector<256x24xf32>
    %166 = vector.extract_strided_slice %63 {offsets = [3, 2, 0], sizes = [16, 16, 4], strides = [1, 1, 1]} : vector<20x20x4xf32> to vector<16x16x4xf32>
    %167 = vector.shape_cast %166 : vector<16x16x4xf32> to vector<256x4xf32>
    %c17 = arith.constant 17 : index
    %c0_101 = arith.constant 0 : index
    %c0_102 = arith.constant 0 : index
    %168 = vector.load %arg6[%c17, %c0_101, %c0_102] : memref<25x4x24xf32, #tpu.memory_space<vmem>>, vector<1x4x24xf32>
    %169 = vector.shape_cast %168 : vector<1x4x24xf32> to vector<4x24xf32>
    %cst_103 = arith.constant dense<0.000000e+00> : vector<256x24xf32>
    %170 = tpu.matmul %167, %169, %cst_103 {dimension_numbers = #tpu.dot_dimension_numbers<[1], [0], [0], [1], [0, 0, 1, 1], [], []>} : vector<256x4xf32>, vector<4x24xf32>, vector<256x24xf32> -> vector<256x24xf32>
    %171 = arith.addf %165, %170 : vector<256x24xf32>
    %172 = vector.extract_strided_slice %63 {offsets = [3, 3, 0], sizes = [16, 16, 4], strides = [1, 1, 1]} : vector<20x20x4xf32> to vector<16x16x4xf32>
    %173 = vector.shape_cast %172 : vector<16x16x4xf32> to vector<256x4xf32>
    %c18 = arith.constant 18 : index
    %c0_104 = arith.constant 0 : index
    %c0_105 = arith.constant 0 : index
    %174 = vector.load %arg6[%c18, %c0_104, %c0_105] : memref<25x4x24xf32, #tpu.memory_space<vmem>>, vector<1x4x24xf32>
    %175 = vector.shape_cast %174 : vector<1x4x24xf32> to vector<4x24xf32>
    %cst_106 = arith.constant dense<0.000000e+00> : vector<256x24xf32>
    %176 = tpu.matmul %173, %175, %cst_106 {dimension_numbers = #tpu.dot_dimension_numbers<[1], [0], [0], [1], [0, 0, 1, 1], [], []>} : vector<256x4xf32>, vector<4x24xf32>, vector<256x24xf32> -> vector<256x24xf32>
    %177 = arith.addf %171, %176 : vector<256x24xf32>
    %178 = vector.extract_strided_slice %63 {offsets = [3, 4, 0], sizes = [16, 16, 4], strides = [1, 1, 1]} : vector<20x20x4xf32> to vector<16x16x4xf32>
    %179 = vector.shape_cast %178 : vector<16x16x4xf32> to vector<256x4xf32>
    %c19 = arith.constant 19 : index
    %c0_107 = arith.constant 0 : index
    %c0_108 = arith.constant 0 : index
    %180 = vector.load %arg6[%c19, %c0_107, %c0_108] : memref<25x4x24xf32, #tpu.memory_space<vmem>>, vector<1x4x24xf32>
    %181 = vector.shape_cast %180 : vector<1x4x24xf32> to vector<4x24xf32>
    %cst_109 = arith.constant dense<0.000000e+00> : vector<256x24xf32>
    %182 = tpu.matmul %179, %181, %cst_109 {dimension_numbers = #tpu.dot_dimension_numbers<[1], [0], [0], [1], [0, 0, 1, 1], [], []>} : vector<256x4xf32>, vector<4x24xf32>, vector<256x24xf32> -> vector<256x24xf32>
    %183 = arith.addf %177, %182 : vector<256x24xf32>
    %184 = vector.extract_strided_slice %63 {offsets = [4, 0, 0], sizes = [16, 16, 4], strides = [1, 1, 1]} : vector<20x20x4xf32> to vector<16x16x4xf32>
    %185 = vector.shape_cast %184 : vector<16x16x4xf32> to vector<256x4xf32>
    %c20 = arith.constant 20 : index
    %c0_110 = arith.constant 0 : index
    %c0_111 = arith.constant 0 : index
    %186 = vector.load %arg6[%c20, %c0_110, %c0_111] : memref<25x4x24xf32, #tpu.memory_space<vmem>>, vector<1x4x24xf32>
    %187 = vector.shape_cast %186 : vector<1x4x24xf32> to vector<4x24xf32>
    %cst_112 = arith.constant dense<0.000000e+00> : vector<256x24xf32>
    %188 = tpu.matmul %185, %187, %cst_112 {dimension_numbers = #tpu.dot_dimension_numbers<[1], [0], [0], [1], [0, 0, 1, 1], [], []>} : vector<256x4xf32>, vector<4x24xf32>, vector<256x24xf32> -> vector<256x24xf32>
    %189 = arith.addf %183, %188 : vector<256x24xf32>
    %190 = vector.extract_strided_slice %63 {offsets = [4, 1, 0], sizes = [16, 16, 4], strides = [1, 1, 1]} : vector<20x20x4xf32> to vector<16x16x4xf32>
    %191 = vector.shape_cast %190 : vector<16x16x4xf32> to vector<256x4xf32>
    %c21 = arith.constant 21 : index
    %c0_113 = arith.constant 0 : index
    %c0_114 = arith.constant 0 : index
    %192 = vector.load %arg6[%c21, %c0_113, %c0_114] : memref<25x4x24xf32, #tpu.memory_space<vmem>>, vector<1x4x24xf32>
    %193 = vector.shape_cast %192 : vector<1x4x24xf32> to vector<4x24xf32>
    %cst_115 = arith.constant dense<0.000000e+00> : vector<256x24xf32>
    %194 = tpu.matmul %191, %193, %cst_115 {dimension_numbers = #tpu.dot_dimension_numbers<[1], [0], [0], [1], [0, 0, 1, 1], [], []>} : vector<256x4xf32>, vector<4x24xf32>, vector<256x24xf32> -> vector<256x24xf32>
    %195 = arith.addf %189, %194 : vector<256x24xf32>
    %196 = vector.extract_strided_slice %63 {offsets = [4, 2, 0], sizes = [16, 16, 4], strides = [1, 1, 1]} : vector<20x20x4xf32> to vector<16x16x4xf32>
    %197 = vector.shape_cast %196 : vector<16x16x4xf32> to vector<256x4xf32>
    %c22 = arith.constant 22 : index
    %c0_116 = arith.constant 0 : index
    %c0_117 = arith.constant 0 : index
    %198 = vector.load %arg6[%c22, %c0_116, %c0_117] : memref<25x4x24xf32, #tpu.memory_space<vmem>>, vector<1x4x24xf32>
    %199 = vector.shape_cast %198 : vector<1x4x24xf32> to vector<4x24xf32>
    %cst_118 = arith.constant dense<0.000000e+00> : vector<256x24xf32>
    %200 = tpu.matmul %197, %199, %cst_118 {dimension_numbers = #tpu.dot_dimension_numbers<[1], [0], [0], [1], [0, 0, 1, 1], [], []>} : vector<256x4xf32>, vector<4x24xf32>, vector<256x24xf32> -> vector<256x24xf32>
    %201 = arith.addf %195, %200 : vector<256x24xf32>
    %202 = vector.extract_strided_slice %63 {offsets = [4, 3, 0], sizes = [16, 16, 4], strides = [1, 1, 1]} : vector<20x20x4xf32> to vector<16x16x4xf32>
    %203 = vector.shape_cast %202 : vector<16x16x4xf32> to vector<256x4xf32>
    %c23 = arith.constant 23 : index
    %c0_119 = arith.constant 0 : index
    %c0_120 = arith.constant 0 : index
    %204 = vector.load %arg6[%c23, %c0_119, %c0_120] : memref<25x4x24xf32, #tpu.memory_space<vmem>>, vector<1x4x24xf32>
    %205 = vector.shape_cast %204 : vector<1x4x24xf32> to vector<4x24xf32>
    %cst_121 = arith.constant dense<0.000000e+00> : vector<256x24xf32>
    %206 = tpu.matmul %203, %205, %cst_121 {dimension_numbers = #tpu.dot_dimension_numbers<[1], [0], [0], [1], [0, 0, 1, 1], [], []>} : vector<256x4xf32>, vector<4x24xf32>, vector<256x24xf32> -> vector<256x24xf32>
    %207 = arith.addf %201, %206 : vector<256x24xf32>
    %208 = vector.extract_strided_slice %63 {offsets = [4, 4, 0], sizes = [16, 16, 4], strides = [1, 1, 1]} : vector<20x20x4xf32> to vector<16x16x4xf32>
    %209 = vector.shape_cast %208 : vector<16x16x4xf32> to vector<256x4xf32>
    %c24 = arith.constant 24 : index
    %c0_122 = arith.constant 0 : index
    %c0_123 = arith.constant 0 : index
    %210 = vector.load %arg6[%c24, %c0_122, %c0_123] : memref<25x4x24xf32, #tpu.memory_space<vmem>>, vector<1x4x24xf32>
    %211 = vector.shape_cast %210 : vector<1x4x24xf32> to vector<4x24xf32>
    %cst_124 = arith.constant dense<0.000000e+00> : vector<256x24xf32>
    %212 = tpu.matmul %209, %211, %cst_124 {dimension_numbers = #tpu.dot_dimension_numbers<[1], [0], [0], [1], [0, 0, 1, 1], [], []>} : vector<256x4xf32>, vector<4x24xf32>, vector<256x24xf32> -> vector<256x24xf32>
    %213 = arith.addf %207, %212 : vector<256x24xf32>
    %214 = vector.extract_strided_slice %1 {offsets = [0, 0, 0], sizes = [18, 16, 4], strides = [1, 1, 1]} : vector<18x18x4xf32> to vector<18x16x4xf32>
    %215 = vector.extract_strided_slice %1 {offsets = [0, 1, 0], sizes = [18, 16, 4], strides = [1, 1, 1]} : vector<18x18x4xf32> to vector<18x16x4xf32>
    %216 = arith.maximumf %214, %215 : vector<18x16x4xf32>
    %217 = vector.extract_strided_slice %1 {offsets = [0, 2, 0], sizes = [18, 16, 4], strides = [1, 1, 1]} : vector<18x18x4xf32> to vector<18x16x4xf32>
    %218 = arith.maximumf %216, %217 : vector<18x16x4xf32>
    %219 = vector.extract_strided_slice %218 {offsets = [0, 0, 0], sizes = [16, 16, 4], strides = [1, 1, 1]} : vector<18x16x4xf32> to vector<16x16x4xf32>
    %220 = vector.extract_strided_slice %218 {offsets = [1, 0, 0], sizes = [16, 16, 4], strides = [1, 1, 1]} : vector<18x16x4xf32> to vector<16x16x4xf32>
    %221 = arith.maximumf %219, %220 : vector<16x16x4xf32>
    %222 = vector.extract_strided_slice %218 {offsets = [2, 0, 0], sizes = [16, 16, 4], strides = [1, 1, 1]} : vector<18x16x4xf32> to vector<16x16x4xf32>
    %223 = arith.maximumf %221, %222 : vector<16x16x4xf32>
    %224 = vector.shape_cast %223 : vector<16x16x4xf32> to vector<256x4xf32>
    %c0_125 = arith.constant 0 : index
    %c0_126 = arith.constant 0 : index
    %225 = vector.load %arg7[%c0_125, %c0_126] : memref<4x24xf32, #tpu.memory_space<vmem>>, vector<4x24xf32>
    %cst_127 = arith.constant dense<0.000000e+00> : vector<256x24xf32>
    %226 = tpu.matmul %224, %225, %cst_127 {dimension_numbers = #tpu.dot_dimension_numbers<[1], [0], [0], [1], [0, 0, 1, 1], [], []>} : vector<256x4xf32>, vector<4x24xf32>, vector<256x24xf32> -> vector<256x24xf32>
    %227 = arith.addf %213, %226 : vector<256x24xf32>
    %c0_128 = arith.constant 0 : index
    %c0_129 = arith.constant 0 : index
    %228 = vector.load %arg8[%c0_128, %c0_129] : memref<1x24xf32, #tpu.memory_space<vmem>>, vector<1x24xf32>
    %229 = vector.broadcast %228 : vector<1x24xf32> to vector<256x24xf32>
    %230 = arith.addf %227, %229 : vector<256x24xf32>
    %cst_130 = arith.constant 0.000000e+00 : f32
    %231 = vector.broadcast %cst_130 : f32 to vector<256x24xf32>
    %232 = arith.maximumf %230, %231 : vector<256x24xf32>
    %233 = vector.shape_cast %232 : vector<256x24xf32> to vector<16x16x24xf32>
    %c0_131 = arith.constant 0 : index
    %c0_132 = arith.constant 0 : index
    %c0_133 = arith.constant 0 : index
    %c0_134 = arith.constant 0 : index
    %234 = vector.load %arg9[%c0_131, %c0_132, %c0_133, %c0_134] : memref<1x16x16x24xf32, #tpu.memory_space<vmem>>, vector<1x16x16x24xf32>
    %235 = vector.shape_cast %234 : vector<1x16x16x24xf32> to vector<16x16x24xf32>
    %236 = vector.shape_cast %233 : vector<16x16x24xf32> to vector<1x16x16x24xf32>
    tpu.vector_store %arg9[%c0_131, %c0_132, %c0_133, %c0_134], %236 {strides = array<i32>} : memref<1x16x16x24xf32, #tpu.memory_space<vmem>>, vector<1x16x16x24xf32>,
    return
  }
  func.func @transform_0(%arg0: i32) -> (i32, i32, i32, i32) {
    %c0_i32 = arith.constant 0 : i32
    %c0_i32_0 = arith.constant 0 : i32
    %c0_i32_1 = arith.constant 0 : i32
    %c0_i32_2 = arith.constant 0 : i32
    return %arg0, %c0_i32, %c0_i32_0, %c0_i32_1 : i32, i32, i32, i32
  }
  func.func @transform_1(%arg0: i32) -> (i32, i32, i32, i32) {
    %c0_i32 = arith.constant 0 : i32
    %c0_i32_0 = arith.constant 0 : i32
    %c0_i32_1 = arith.constant 0 : i32
    %c0_i32_2 = arith.constant 0 : i32
    return %arg0, %c0_i32, %c0_i32_0, %c0_i32_1 : i32, i32, i32, i32
  }
  func.func @transform_2(%arg0: i32) -> (i32, i32, i32, i32) {
    %c0_i32 = arith.constant 0 : i32
    %c0_i32_0 = arith.constant 0 : i32
    %c0_i32_1 = arith.constant 0 : i32
    %c0_i32_2 = arith.constant 0 : i32
    return %arg0, %c0_i32, %c0_i32_0, %c0_i32_1 : i32, i32, i32, i32
  }
  func.func @transform_3(%arg0: i32) -> (i32, i32) {
    %c0_i32 = arith.constant 0 : i32
    %c0_i32_0 = arith.constant 0 : i32
    %c0_i32_1 = arith.constant 0 : i32
    return %c0_i32, %c0_i32_0 : i32, i32
  }
  func.func @transform_4(%arg0: i32) -> (i32, i32, i32) {
    %c0_i32 = arith.constant 0 : i32
    %c0_i32_0 = arith.constant 0 : i32
    %c0_i32_1 = arith.constant 0 : i32
    %c0_i32_2 = arith.constant 0 : i32
    return %c0_i32, %c0_i32_0, %c0_i32_1 : i32, i32, i32
  }
  func.func @transform_5(%arg0: i32) -> (i32, i32, i32) {
    %c0_i32 = arith.constant 0 : i32
    %c0_i32_0 = arith.constant 0 : i32
    %c0_i32_1 = arith.constant 0 : i32
    %c0_i32_2 = arith.constant 0 : i32
    return %c0_i32, %c0_i32_0, %c0_i32_1 : i32, i32, i32
  }
  func.func @transform_6(%arg0: i32) -> (i32, i32) {
    %c0_i32 = arith.constant 0 : i32
    %c0_i32_0 = arith.constant 0 : i32
    %c0_i32_1 = arith.constant 0 : i32
    return %c0_i32, %c0_i32_0 : i32, i32
  }
  func.func @transform_7(%arg0: i32) -> (i32, i32) {
    %c0_i32 = arith.constant 0 : i32
    %c0_i32_0 = arith.constant 0 : i32
    %c0_i32_1 = arith.constant 0 : i32
    return %c0_i32, %c0_i32_0 : i32, i32
  }
  func.func @transform_8(%arg0: i32) -> (i32, i32, i32, i32) {
    %c0_i32 = arith.constant 0 : i32
    %c0_i32_0 = arith.constant 0 : i32
    %c0_i32_1 = arith.constant 0 : i32
    %c0_i32_2 = arith.constant 0 : i32
    return %arg0, %c0_i32, %c0_i32_0, %c0_i32_1 : i32, i32, i32, i32
  }
}

</mosaic_0001>

<bundles_post_ra>
// kernel: inception_forward.2
= control target key start
LH: loop header
LB: loop body
LE: loop exit
PB: predicated region body
PF: predicated region fallthrough
CT: control target
= control target key end

     0   :  { %s827_s12 = smov 0   ;;  %s1023_s0 = inlined_call_operand.vmem [shape: f32[512,4], index: 0, kind: input, shape index: {}]   ;;  %s1024_s1 = inlined_call_operand.vmem [shape: f32[4,8], index: 1, kind: input, shape index: {}]   ;;  %s1025_s2 = inlined_call_operand.vmem [shape: f32[1,8], index: 2, kind: input, shape index: {}]   ;;  %s1026_s3 = inlined_call_operand.vmem [shape: f32[512,8], index: 3, kind: output, shape index: {}]  }
   0x1 LB: > { %s661_s13 = sadd.s32 4294967295, %s805_s12   ;;  %p665_p0 = scmp.ge.s32.totalorder %s805_s12, 1  ;;  %s805_s12 = sphi %s827_s12, %s13_s12  }
   0x2   : > { %p138_p1 = scmp.lt.s32.totalorder %s805_s12, 3 }
   0x4   : > { %p139_p2 = pnand %p665_p0, %p138_p1 }
   0x5   : > { %v206_v0 = vld [vmem:[%s1024_s1] sm:$0xf] (!%p139_p2)  ;;  %vm311_vm0 = vcmask (!%p139_p2), 1043456   ;;  %s666_s16 = sshll.u32 (!%p139_p2), %s661_s13, 5  ;;  %vm214_vm1 = vcmask (!%p139_p2), 31744   ;;  %vm572_vm2 = vcmask (!%p139_p2), 64512  }
   0x6   : > { %142 = sbr.rel (%p139_p2) target bundleno = 265 (0x109), region = 32  ;;  %739 = vmatprep.subr.msk.mxu0 (!%p139_p2), %vm311_vm0, %v206_v0  ;;  %789 = vmatprep.subr.msk.mxu1 (!%p139_p2), %vm311_vm0, %v206_v0  ;;  %p163_p3 = scmp.lt.s32.totalorder (!%p139_p2), %s666_s16, 63  ;;  %v915_v33 = vld [vmem:[%s1025_s2] ss:$0 sm:$0xff] (!%p139_p2) }
   0x7   : > { %740 = vmatpush3.msk.msra.mxu0 (!%p139_p2), %vm311_vm0, %v206_v0  ;;  %790 = vmatpush3.msk.msra.mxu1 (!%p139_p2), %vm311_vm0, %v206_v0 }
   0xd   : > { %s1028_s16 = smov (!%p163_p3, %s666_s16), 63 }
   0xe   : > { %s667_s17 = sshll.u32 %s1028_s16, 3 }
   0xf   : > { %s846_s20 = scalar_lea.vmem %s1023_s0, %s667_s17  ;;  %s924_s25 = scalar_lea.vmem %s1026_s3, %s667_s17 }
  0x10   : > { %v174_v1 = vld [vmem:[%s846_s20] sm:$0xff]  ;;  %v175_v3 = vld [vmem:[%s846_s20 + $0x8] sm:$0xff]  ;;  %v176_v5 = vld [vmem:[%s846_s20 + $0x10] sm:$0xff] }
  0x11   : > { %v190_v2 = vld [vmem:[%s846_s20 + $0x80] sm:$0xff]  ;;  %741 = vmatprep.mubr.msk.f32.mxu0 %vm214_vm1, %v174_v1  ;;  %v191_v4 = vld [vmem:[%s846_s20 + $0x88] sm:$0xff]  ;;  %v192_v6 = vld [vmem:[%s846_s20 + $0x90] sm:$0xff] }
  0x12   : > { %765 = vmatprep.mubr.msk.f32.mxu1 %vm214_vm1, %v190_v2  ;;  %742 = vmatmul.mubr.msk.f32.vlgmr.msra.gmra.mrb[0].mxu0 %vm214_vm1, %v175_v3  ;;  %v177_v7 = vld [vmem:[%s846_s20 + $0x18] sm:$0xff]  ;;  %v178_v9 = vld [vmem:[%s846_s20 + $0x20] sm:$0xff]  ;;  %v179_v11 = vld [vmem:[%s846_s20 + $0x28] sm:$0xff] }
  0x13   : > { %766 = vmatmul.mubr.msk.f32.vlgmr.msra.gmra.mrb[0].mxu1 %vm214_vm1, %v191_v4  ;;  %744 = vmatprep.mubr.msk.f32.mxu0 %vm214_vm1, %v176_v5  ;;  %v193_v8 = vld [vmem:[%s846_s20 + $0x98] sm:$0xff]  ;;  %v194_v10 = vld [vmem:[%s846_s20 + $0xa0] sm:$0xff]  ;;  %v195_v12 = vld [vmem:[%s846_s20 + $0xa8] sm:$0xff] }
  0x14   : > { %768 = vmatprep.mubr.msk.f32.mxu1 %vm214_vm1, %v192_v6  ;;  %v180_v13 = vld [vmem:[%s846_s20 + $0x30] sm:$0xff]  ;;  %v181_v15 = vld [vmem:[%s846_s20 + $0x38] sm:$0xff]  ;;  %v182_v17 = vld [vmem:[%s846_s20 + $0x40] sm:$0xff] }
  0x15   : > { %v196_v14 = vld [vmem:[%s846_s20 + $0xb0] sm:$0xff]  ;;  %v197_v16 = vld [vmem:[%s846_s20 + $0xb8] sm:$0xff]  ;;  %v198_v18 = vld [vmem:[%s846_s20 + $0xc0] sm:$0xff] }
  0x16   : > { %745 = vmatmul.mubr.msk.f32.gmra.mrb[2].mxu0 %vm214_vm1, %v177_v7  ;;  %v183_v19 = vld [vmem:[%s846_s20 + $0x48] sm:$0xff]  ;;  %v184_v21 = vld [vmem:[%s846_s20 + $0x50] sm:$0xff]  ;;  %v185_v23 = vld [vmem:[%s846_s20 + $0x58] sm:$0xff] }
  0x17   : > { %769 = vmatmul.mubr.msk.f32.gmra.mrb[2].mxu1 %vm214_vm1, %v193_v8  ;;  %747 = vmatprep.mubr.msk.f32.mxu0 %vm214_vm1, %v178_v9  ;;  %v199_v20 = vld [vmem:[%s846_s20 + $0xc8] sm:$0xff]  ;;  %v200_v22 = vld [vmem:[%s846_s20 + $0xd0] sm:$0xff]  ;;  %v201_v24 = vld [vmem:[%s846_s20 + $0xd8] sm:$0xff] }
  0x18   : > { %771 = vmatprep.mubr.msk.f32.mxu1 %vm214_vm1, %v194_v10  ;;  %v186_v25 = vld [vmem:[%s846_s20 + $0x60] sm:$0xff]  ;;  %v187_v27 = vld [vmem:[%s846_s20 + $0x68] sm:$0xff]  ;;  %v188_v29 = vld [vmem:[%s846_s20 + $0x70] sm:$0xff] }
  0x19   : > { %v202_v26 = vld [vmem:[%s846_s20 + $0xe0] sm:$0xff]  ;;  %v203_v28 = vld [vmem:[%s846_s20 + $0xe8] sm:$0xff]  ;;  %v204_v30 = vld [vmem:[%s846_s20 + $0xf0] sm:$0xff] }
  0x1a   : > { %748 = vmatmul.mubr.msk.f32.gmra.mrb[4].mxu0 %vm214_vm1, %v179_v11  ;;  %v189_v31 = vld [vmem:[%s846_s20 + $0x78] sm:$0xff] }
  0x1b   : > { %772 = vmatmul.mubr.msk.f32.gmra.mrb[4].mxu1 %vm214_vm1, %v195_v12  ;;  %750 = vmatprep.mubr.msk.f32.mxu0 %vm214_vm1, %v180_v13  ;;  %v205_v32 = vld [vmem:[%s846_s20 + $0xf8] sm:$0xff] }
  0x1c   : > { %774 = vmatprep.mubr.msk.f32.mxu1 %vm214_vm1, %v196_v14 }
  0x1e   : > { %751 = vmatmul.mubr.msk.f32.gmra.mrb[6].mxu0 %vm214_vm1, %v181_v15 }
  0x1f   : > { %775 = vmatmul.mubr.msk.f32.gmra.mrb[6].mxu1 %vm214_vm1, %v197_v16  ;;  %753 = vmatprep.mubr.msk.f32.mxu0 %vm214_vm1, %v182_v17 }
  0x20   : > { %777 = vmatprep.mubr.msk.f32.mxu1 %vm214_vm1, %v198_v18 }
  0x22   : > { %754 = vmatmul.mubr.msk.f32.gmra.mrb[8].mxu0 %vm214_vm1, %v183_v19 }
  0x23   : > { %778 = vmatmul.mubr.msk.f32.gmra.mrb[8].mxu1 %vm214_vm1, %v199_v20  ;;  %756 = vmatprep.mubr.msk.f32.mxu0 %vm214_vm1, %v184_v21 }
  0x24   : > { %780 = vmatprep.mubr.msk.f32.mxu1 %vm214_vm1, %v200_v22 }
  0x26   : > { %757 = vmatmul.mubr.msk.f32.gmra.mrb[10].mxu0 %vm214_vm1, %v185_v23 }
  0x27   : > { %781 = vmatmul.mubr.msk.f32.gmra.mrb[10].mxu1 %vm214_vm1, %v201_v24  ;;  %759 = vmatprep.mubr.msk.f32.mxu0 %vm214_vm1, %v186_v25 }
  0x28   : > { %783 = vmatprep.mubr.msk.f32.mxu1 %vm214_vm1, %v202_v26 }
  0x2a   : > { %760 = vmatmul.mubr.msk.f32.gmra.mrb[12].mxu0 %vm214_vm1, %v187_v27 }
  0x2b   : > { %784 = vmatmul.mubr.msk.f32.gmra.mrb[12].mxu1 %vm214_vm1, %v203_v28  ;;  %762 = vmatprep.mubr.msk.f32.mxu0 %vm214_vm1, %v188_v29 }
  0x2c   : > { %786 = vmatprep.mubr.msk.f32.mxu1 %vm214_vm1, %v204_v30 }
  0x2e   : > { %763 = vmatmul.mubr.msk.f32.gmra.mrb[14].mxu0 %vm214_vm1, %v189_v31 }
  0x2f   : > { %787 = vmatmul.mubr.msk.f32.gmra.mrb[14].mxu1 %vm214_vm1, %v205_v32 }
  0xe5   : > { %v743_v34 = vpop.f32.mrb[0].mxu0 }
  0xe6   : > { %v767_v35 = vpop.f32.mrb[0].mxu1  ;;  %v387_v36 = vadd.f32 %v743_v34, %v915_v33  ;;  %v381_v38 = vpop.f32.mrb[1].mxu0 }
  0xe7   : > { %v467_v37 = vadd.f32 %v767_v35, %v915_v33  ;;  %v461_v39 = vpop.f32.mrb[1].mxu1  ;;  %v382_v40 = vadd.f32 %v915_v33, %v381_v38 }
  0xe8   : > { %v462_v41 = vadd.f32 %v915_v33, %v461_v39  ;;  %v541_v42 = vmax.f32 %v387_v36, 0.0 }
  0xe9   : > { %v557_v43 = vmax.f32 %v467_v37, 0.0  ;;  %v540_v44 = vmax.f32 %v382_v40, 0.0  ;;  %v746_v46 = vpop.f32.mrb[2].mxu0 }
  0xea   : > { %v556_v45 = vmax.f32 %v462_v41, 0.0  ;;  %v770_v47 = vpop.f32.mrb[2].mxu1  ;;  %574 = vst.msk [vmem:[%s924_s25 + $0x8] sm:$0xff] %vm572_vm2, %v541_v42  ;;  %v397_v48 = vadd.f32 %v746_v46, %v915_v33  ;;  %v391_v50 = vpop.f32.mrb[3].mxu0 }
  0xeb   : > { %590 = vst.msk [vmem:[%s924_s25 + $0x88] sm:$0xff] %vm572_vm2, %v557_v43  ;;  %v477_v49 = vadd.f32 %v770_v47, %v915_v33  ;;  %v471_v51 = vpop.f32.mrb[3].mxu1  ;;  %573 = vst.msk [vmem:[%s924_s25] sm:$0xff] %vm572_vm2, %v540_v44  ;;  %v392_v52 = vadd.f32 %v915_v33, %v391_v50 }
  0xec   : > { %589 = vst.msk [vmem:[%s924_s25 + $0x80] sm:$0xff] %vm572_vm2, %v556_v45  ;;  %v472_v53 = vadd.f32 %v915_v33, %v471_v51  ;;  %v543_v54 = vmax.f32 %v397_v48, 0.0 }
  0xed   : > { %v559_v55 = vmax.f32 %v477_v49, 0.0  ;;  %v542_v56 = vmax.f32 %v392_v52, 0.0  ;;  %v749_v58 = vpop.f32.mrb[4].mxu0 }
  0xee   : > { %v558_v57 = vmax.f32 %v472_v53, 0.0  ;;  %v773_v59 = vpop.f32.mrb[4].mxu1  ;;  %576 = vst.msk [vmem:[%s924_s25 + $0x18] sm:$0xff] %vm572_vm2, %v543_v54  ;;  %v407_v60 = vadd.f32 %v749_v58, %v915_v33  ;;  %v401_v62 = vpop.f32.mrb[5].mxu0 }
  0xef   : > { %592 = vst.msk [vmem:[%s924_s25 + $0x98] sm:$0xff] %vm572_vm2, %v559_v55  ;;  %v487_v61 = vadd.f32 %v773_v59, %v915_v33  ;;  %v481_v63 = vpop.f32.mrb[5].mxu1  ;;  %575 = vst.msk [vmem:[%s924_s25 + $0x10] sm:$0xff] %vm572_vm2, %v542_v56  ;;  %v402_v0 = vadd.f32 %v915_v33, %v401_v62 }
  0xf0   : > { %591 = vst.msk [vmem:[%s924_s25 + $0x90] sm:$0xff] %vm572_vm2, %v558_v57  ;;  %v482_v1 = vadd.f32 %v915_v33, %v481_v63  ;;  %v545_v2 = vmax.f32 %v407_v60, 0.0 }
  0xf1   : > { %v561_v3 = vmax.f32 %v487_v61, 0.0  ;;  %v544_v4 = vmax.f32 %v402_v0, 0.0  ;;  %v752_v6 = vpop.f32.mrb[6].mxu0 }
  0xf2   : > { %v560_v5 = vmax.f32 %v482_v1, 0.0  ;;  %v776_v7 = vpop.f32.mrb[6].mxu1  ;;  %578 = vst.msk [vmem:[%s924_s25 + $0x28] sm:$0xff] %vm572_vm2, %v545_v2  ;;  %v417_v8 = vadd.f32 %v752_v6, %v915_v33  ;;  %v411_v10 = vpop.f32.mrb[7].mxu0 }
  0xf3   : > { %594 = vst.msk [vmem:[%s924_s25 + $0xa8] sm:$0xff] %vm572_vm2, %v561_v3  ;;  %v497_v9 = vadd.f32 %v776_v7, %v915_v33  ;;  %v491_v11 = vpop.f32.mrb[7].mxu1  ;;  %577 = vst.msk [vmem:[%s924_s25 + $0x20] sm:$0xff] %vm572_vm2, %v544_v4  ;;  %v412_v12 = vadd.f32 %v915_v33, %v411_v10 }
  0xf4   : > { %593 = vst.msk [vmem:[%s924_s25 + $0xa0] sm:$0xff] %vm572_vm2, %v560_v5  ;;  %v492_v13 = vadd.f32 %v915_v33, %v491_v11  ;;  %v547_v14 = vmax.f32 %v417_v8, 0.0 }
  0xf5   : > { %v563_v15 = vmax.f32 %v497_v9, 0.0  ;;  %v546_v16 = vmax.f32 %v412_v12, 0.0  ;;  %v755_v18 = vpop.f32.mrb[8].mxu0 }
  0xf6   : > { %v562_v17 = vmax.f32 %v492_v13, 0.0  ;;  %v779_v19 = vpop.f32.mrb[8].mxu1  ;;  %580 = vst.msk [vmem:[%s924_s25 + $0x38] sm:$0xff] %vm572_vm2, %v547_v14  ;;  %v427_v20 = vadd.f32 %v755_v18, %v915_v33  ;;  %v421_v22 = vpop.f32.mrb[9].mxu0 }
  0xf7   : > { %596 = vst.msk [vmem:[%s924_s25 + $0xb8] sm:$0xff] %vm572_vm2, %v563_v15  ;;  %v507_v21 = vadd.f32 %v779_v19, %v915_v33  ;;  %v501_v23 = vpop.f32.mrb[9].mxu1  ;;  %579 = vst.msk [vmem:[%s924_s25 + $0x30] sm:$0xff] %vm572_vm2, %v546_v16  ;;  %v422_v24 = vadd.f32 %v915_v33, %v421_v22 }
  0xf8   : > { %595 = vst.msk [vmem:[%s924_s25 + $0xb0] sm:$0xff] %vm572_vm2, %v562_v17  ;;  %v502_v25 = vadd.f32 %v915_v33, %v501_v23  ;;  %v549_v26 = vmax.f32 %v427_v20, 0.0 }
  0xf9   : > { %v565_v27 = vmax.f32 %v507_v21, 0.0  ;;  %v548_v28 = vmax.f32 %v422_v24, 0.0  ;;  %v758_v30 = vpop.f32.mrb[10].mxu0 }
  0xfa   : > { %v564_v29 = vmax.f32 %v502_v25, 0.0  ;;  %v782_v31 = vpop.f32.mrb[10].mxu1  ;;  %582 = vst.msk [vmem:[%s924_s25 + $0x48] sm:$0xff] %vm572_vm2, %v549_v26  ;;  %v437_v32 = vadd.f32 %v758_v30, %v915_v33  ;;  %v431_v35 = vpop.f32.mrb[11].mxu0 }
  0xfb   : > { %598 = vst.msk [vmem:[%s924_s25 + $0xc8] sm:$0xff] %vm572_vm2, %v565_v27  ;;  %v517_v34 = vadd.f32 %v782_v31, %v915_v33  ;;  %v511_v36 = vpop.f32.mrb[11].mxu1  ;;  %581 = vst.msk [vmem:[%s924_s25 + $0x40] sm:$0xff] %vm572_vm2, %v548_v28  ;;  %v432_v37 = vadd.f32 %v915_v33, %v431_v35 }
  0xfc   : > { %597 = vst.msk [vmem:[%s924_s25 + $0xc0] sm:$0xff] %vm572_vm2, %v564_v29  ;;  %v512_v38 = vadd.f32 %v915_v33, %v511_v36  ;;  %v551_v39 = vmax.f32 %v437_v32, 0.0 }
  0xfd   : > { %v567_v40 = vmax.f32 %v517_v34, 0.0  ;;  %v550_v41 = vmax.f32 %v432_v37, 0.0  ;;  %v761_v43 = vpop.f32.mrb[12].mxu0 }
  0xfe   : > { %v566_v42 = vmax.f32 %v512_v38, 0.0  ;;  %v785_v44 = vpop.f32.mrb[12].mxu1  ;;  %584 = vst.msk [vmem:[%s924_s25 + $0x58] sm:$0xff] %vm572_vm2, %v551_v39  ;;  %v447_v45 = vadd.f32 %v761_v43, %v915_v33  ;;  %v441_v47 = vpop.f32.mrb[13].mxu0 }
  0xff   : > { %600 = vst.msk [vmem:[%s924_s25 + $0xd8] sm:$0xff] %vm572_vm2, %v567_v40  ;;  %v527_v46 = vadd.f32 %v785_v44, %v915_v33  ;;  %v521_v48 = vpop.f32.mrb[13].mxu1  ;;  %583 = vst.msk [vmem:[%s924_s25 + $0x50] sm:$0xff] %vm572_vm2, %v550_v41  ;;  %v442_v49 = vadd.f32 %v915_v33, %v441_v47 }
 0x100   : > { %599 = vst.msk [vmem:[%s924_s25 + $0xd0] sm:$0xff] %vm572_vm2, %v566_v42  ;;  %v522_v50 = vadd.f32 %v915_v33, %v521_v48  ;;  %v553_v51 = vmax.f32 %v447_v45, 0.0 }
 0x101   : > { %v569_v52 = vmax.f32 %v527_v46, 0.0  ;;  %v552_v53 = vmax.f32 %v442_v49, 0.0  ;;  %v764_v55 = vpop.f32.mrb[14].mxu0 }
 0x102   : > { %v568_v54 = vmax.f32 %v522_v50, 0.0  ;;  %v788_v56 = vpop.f32.mrb[14].mxu1  ;;  %586 = vst.msk [vmem:[%s924_s25 + $0x68] sm:$0xff] %vm572_vm2, %v553_v51  ;;  %v457_v57 = vadd.f32 %v764_v55, %v915_v33  ;;  %v451_v59 = vpop.f32.mrb[15].mxu0 }
 0x103   : > { %602 = vst.msk [vmem:[%s924_s25 + $0xe8] sm:$0xff] %vm572_vm2, %v569_v52  ;;  %v537_v58 = vadd.f32 %v788_v56, %v915_v33  ;;  %v531_v60 = vpop.f32.mrb[15].mxu1  ;;  %585 = vst.msk [vmem:[%s924_s25 + $0x60] sm:$0xff] %vm572_vm2, %v552_v53  ;;  %v452_v61 = vadd.f32 %v915_v33, %v451_v59 }
 0x104   : > { %601 = vst.msk [vmem:[%s924_s25 + $0xe0] sm:$0xff] %vm572_vm2, %v568_v54  ;;  %v532_v62 = vadd.f32 %v915_v33, %v531_v60  ;;  %v555_v63 = vmax.f32 %v457_v57, 0.0 }
 0x105   : > { %v571_v0 = vmax.f32 %v537_v58, 0.0  ;;  %v554_v1 = vmax.f32 %v452_v61, 0.0 }
 0x106   : > { %v570_v2 = vmax.f32 %v532_v62, 0.0  ;;  %588 = vst.msk [vmem:[%s924_s25 + $0x78] sm:$0xff] %vm572_vm2, %v555_v63 }
 0x107   : > { %604 = vst.msk [vmem:[%s924_s25 + $0xf8] sm:$0xff] %vm572_vm2, %v571_v0  ;;  %587 = vst.msk [vmem:[%s924_s25 + $0x70] sm:$0xff] %vm572_vm2, %v554_v1 }
 0x108   : > { %603 = vst.msk [vmem:[%s924_s25 + $0xf0] sm:$0xff] %vm572_vm2, %v570_v2 }
 0x109 PF: > { %s13_s12 = sadd.s32 1, %s805_s12  }
 0x10a   : > { %p10_p4 = scmp.ge.s32.totalorder %s13_s12, 4  }
 0x10c   :  { %12 = sbr.rel (!%p10_p4) target bundleno = 1 (0x1), region = 62 }

// kernel: inception_forward.3
= control target key start
LH: loop header
LB: loop body
LE: loop exit
PB: predicated region body
PF: predicated region fallthrough
CT: control target
= control target key end

     0   :  { %13 = vsyncpa [#allocation3], 0  ;;  %s22561_s0 = inlined_call_operand.vmem [shape: f32[2,18,18,4], index: 0, kind: input, shape index: {}]   ;;  %s22562_s1 = inlined_call_operand.vmem [shape: f32[2,18,18,4], index: 1, kind: input, shape index: {}]   ;;  %s22563_s2 = inlined_call_operand.vmem [shape: f32[2,20,20,4], index: 2, kind: input, shape index: {}]   ;;  %s22564_s3 = inlined_call_operand.vmem [shape: f32[4,24], index: 3, kind: input, shape index: {}]   ;;  %s22565_s4 = inlined_call_operand.vmem [shape: f32[9,4,24], index: 4, kind: input, shape index: {}]   ;;  %s22566_s5 = inlined_call_operand.vmem [shape: f32[25,4,24], index: 5, kind: input, shape index: {}]   ;;  %s22567_s6 = inlined_call_operand.vmem [shape: f32[4,24], index: 6, kind: input, shape index: {}]   ;;  %s22568_s7 = inlined_call_operand.vmem [shape: f32[1,24], index: 7, kind: input, shape index: {}]   ;;  %s22569_s8 = inlined_call_operand.hbm [shape: f32[2,16,16,24], index: 8, kind: output, shape index: {}]  }
   0x1   :  { %15 = vsyncpa [#allocation3 + $0x1], 0  ;;  %s17657_s27 = smov 0   ;;  %s17659_s28 = smov 0  }
   0x2   :  { %s17661_s29 = smov 0   ;;  %s17663_s30 = smov 0  }
   0x3 LB: > { %s17678_s9 = sadd.s32 4294967295, %s17607_s30   ;;  %s11997_s10 = sadd.s32 4294967294, %s17607_s30   ;;  %s17607_s30 = sphi %s17663_s30, %s24123_s30   ;;  %s17603_s29 = sphi %s17661_s29, %s24122_s29   ;;  %s17599_s28 = sphi %s17659_s28, %s24121_s28   ;;  %s17595_s27 = sphi %s17657_s27, %s24120_s27  }
   0x4   : > { %s17682_s11 = sadd.s32 1, %s17607_s30   ;;  %s211_s12 = sadd.s32 1, %s17603_s29 }
   0x5   : > { %s208_s13 = ssub.s32 %s17607_s30, %s17682_s11  ;;  %p221_p0 = scmp.ne.s32.totalorder %s17603_s29, %s17599_s28 }
   0x6   : > { %p209_p1 = scmp.eq.s32.totalorder %s208_s13, 0  ;;  %p222_p2 = scmp.eq.s32.totalorder %s17678_s9, 1 }
   0x7   : > { %p227_p3 = scmp.ne.s32.totalorder %s17599_s28, %s17595_s27  ;;  %p228_p4 = scmp.eq.s32.totalorder %s11997_s10, 1 }
   0x8   : > { %s17693_s14 = scalar_select %p209_p1, %s17603_s29, %s211_s12  }
   0x9   : > { %p17695_p5 = por %p222_p2, %p221_p0  ;;  %p17699_p6 = por %p228_p4, %p227_p3 }
   0xa   : > { %p12000_p7 = scmp.ge.s32.totalorder %s17607_s30, 1  ;;  %p285_p8 = scmp.lt.s32.totalorder %s17607_s30, 3 }
   0xc   : > { %p286_p9 = pnand %p12000_p7, %p285_p8 }
   0xe   : > { %289 = sbr.rel (%p286_p9) target bundleno = 1416 (0x588), region = 52 }
  0x15   : > { %v582_v0 = vld [vmem:[%s22565_s4] sm:$0xf]  ;;  %vm680_vm0 = vcmask 1043456   ;;  %p329_p10 = scmp.lt.s32.totalorder %s17678_s9, 1  ;;  %v12648_v3 = vld [vmem:[%s22566_s5 + $0x24] sm:$0xf] }
  0x16   : > { %14420 = vmatprep.subr.msk.mxu1 %vm680_vm0, %v582_v0  ;;  %v12614_v1 = vld [vmem:[%s22566_s5 + $0x20] sm:$0xf]  ;;  %vm583_vm1 = vcmask 31744   ;;  %vm4897_vm2 = vcmask 1044480   ;;  %v17757_v11 = vld [vmem:[%s22565_s4 + $0x4] sm:$0xf] }
  0x17   : > { %v527_v2 = vld [vmem:[%s22564_s3] sm:$0xf]  ;;  %14421 = vmatpush3.msk.msra.mxu1 %vm680_vm0, %v582_v0  ;;  %s17721_s25 = scalar_select %p329_p10, %s17678_s9, 1  ;;  %15320 = vmatprep.subr.msk.mxu0 %vm680_vm0, %v12614_v1  ;;  %vm446_vm3 = vcmask 1046528   ;;  %v17807_v29 = vld [vmem:[%s22566_s5 + $0x28] sm:$0xf] }
  0x18   : > { %15321 = vmatpush3.msk.msra.mxu0 %vm680_vm0, %v12614_v1  ;;  %14470 = vmatprep.subr.msk.mxu1 %vm680_vm0, %v527_v2  ;;  %vm1623_vm4 = vcmask 1045504   ;;  %vm11864_vm5 = vcmask 195584   ;;  %s17609_s22 = smov [#allocation2]  }
  0x19   : > { %s17340_s26 = smul.u32 432, %s17721_s25  ;;  %15370 = vmatprep.subr.msk.mxu0 %vm680_vm0, %v12648_v3  ;;  %s17549_s23 = sshll.u32 %s17609_s22, 4  ;;  %s17550_s23 = int_to_ptr.vmem [resolvable:$false] %s17549_s23 }
  0x1a   : > { %s17341_s10 = smul.u32 480, %s17721_s25  ;;  %s13231_s25 = sshll.u32 %s17678_s9, 12 }
  0x1b   : > { %s17734_s17 = scalar_lea.vmem %s22562_s1, %s17340_s26  ;;  %s18005_s13 = scalar_lea.vmem %s22561_s0, %s17340_s26 }
  0x1c   : > { %s17739_s20 = scalar_lea.vmem %s22563_s2, %s17341_s10  ;;  %v528_v4 = vld [vmem:[%s17734_s17] sm:$0xff]  ;;  %v17743_v5 = vld [vmem:[%s17734_s17 + $0x8] sm:$0xff]  ;;  %v531_v6 = vld [vmem:[%s17734_s17 + $0x18] sm:$0xff]  ;;  %s22510_s19 = scalar_lea.hbm %s22569_s8, %s13231_s25 }
  0x1d   : > { %23173 = vst [vmem:[#allocation5_spill] sm:$0xff] %v17743_v5  ;;  %14422 = vmatprep.mubr.msk.f32.mxu1 %vm583_vm1, %v528_v4  ;;  %v1217_v7 = vrot.slane %v528_v4, 1  ;;  %v22570_v8 = vrot.slane %v17743_v5, 1  ;;  %v17749_v9 = vld [vmem:[%s17739_s20 + $0x18] sm:$0xff]  ;;  %v17752_v10 = vld [vmem:[%s17739_s20 + $0x20] sm:$0xff]  ;;  %v17771_v17 = vld [vmem:[%s17739_s20 + $0x30] sm:$0xff] }
  0x1e   : > { %14423 = vmatmul.mubr.msk.f32.vlgmr.msra.gmra.mrb[0].mxu1 %vm583_vm1, %v17743_v5  ;;  %v4903_v12 = vrot.slane %v17749_v9, 3  ;;  %v4904_v13 = vrot.slane %v17752_v10, 3  ;;  %v17764_v14 = vld [vmem:[%s17739_s20 + $0x28] sm:$0xf]  ;;  %v532_v16 = vld [vmem:[%s17734_s17 + $0x20] sm:$0xff]  ;;  %v17774_v18 = vld [vmem:[%s17739_s20 + $0x38] sm:$0xff] }
  0x1f   : > { %14425 = vmatprep.mubr.msk.f32.mxu1 %vm583_vm1, %v531_v6  ;;  %14471 = vmatpush3.msk.msra.mxu1 %vm680_vm0, %v527_v2  ;;  %v4906_v15 = vrot.slane %v17764_v14, 3  ;;  %v17779_v19 = vsel %vm446_vm3, %v1217_v7, %v22570_v8  ;;  %v4908_v21 = vrot.slane %v17771_v17, 3  ;;  %v534_v22 = vld [vmem:[%s17734_s17 + $0x30] sm:$0xff]  ;;  %v17787_v23 = vld [vmem:[%s17739_s20 + $0x40] sm:$0xf]  ;;  %v4909_v25 = vrot.slane %v17774_v18, 3 }
  0x20   : > { %23174 = vst [vmem:[#allocation6_spill] sm:$0xff] %v17779_v19  ;;  %v17782_v20 = vsel %vm4897_vm2, %v4903_v12, %v4904_v13  ;;  %14520 = vmatprep.subr.msk.mxu1 %vm680_vm0, %v17757_v11  ;;  %v4911_v26 = vrot.slane %v17787_v23, 3  ;;  %v17799_v27 = vld [vmem:[%s17739_s20 + $0x48] sm:$0xff]  ;;  %v17802_v28 = vld [vmem:[%s17739_s20 + $0x50] sm:$0xff]  ;;  %v17815_v32 = vld [vmem:[%s17739_s20 + $0x58] sm:$0xf] }
  0x21   : > { %23175 = vst [vmem:[#allocation7_spill] sm:$0xff] %v17782_v20  ;;  %15322 = vmatprep.mubr.msk.f32.mxu0 %vm583_vm1, %v17782_v20  ;;  %v17794_v24 = vsel %vm4897_vm2, %v4904_v13, %v4906_v15  ;;  %v4913_v30 = vrot.slane %v17799_v27, 3  ;;  %v4914_v31 = vrot.slane %v17802_v28, 3  ;;  %v17819_v33 = vsel %vm4897_vm2, %v4908_v21, %v4909_v25  ;;  %v535_v35 = vld [vmem:[%s17734_s17 + $0x38] sm:$0xff]  ;;  %v17828_v37 = vld [vmem:[%s17739_s20 + $0x60] sm:$0xff]  ;;  %v17831_v38 = vld [vmem:[%s17739_s20 + $0x68] sm:$0xff] }
  0x22   : > { %23176 = vst [vmem:[#allocation8_spill] sm:$0xff] %v17794_v24  ;;  %15323 = vmatmul.mubr.msk.f32.vlgmr.msra.gmra.mrb[0].mxu0 %vm583_vm1, %v17794_v24  ;;  %14426 = vmatmul.mubr.msk.f32.gmra.mrb[2].mxu1 %vm583_vm1, %v532_v16  ;;  %23177 = vst [vmem:[#allocation9_spill] sm:$0xff] %v17819_v33  ;;  %v17823_v34 = vsel %vm4897_vm2, %v4909_v25, %v4911_v26  ;;  %v4916_v36 = vrot.slane %v17815_v32, 3  ;;  %v537_v40 = vld [vmem:[%s17734_s17 + $0x48] sm:$0xff]  ;;  %v4918_v41 = vrot.slane %v17828_v37, 3  ;;  %v4919_v42 = vrot.slane %v17831_v38, 3 }
  0x23   : > { %15371 = vmatpush3.msk.msra.mxu0 %vm680_vm0, %v12648_v3  ;;  %14428 = vmatprep.mubr.msk.f32.mxu1 %vm583_vm1, %v534_v22  ;;  %23178 = vst [vmem:[#allocation10_spill] sm:$0xff] %v17823_v34  ;;  %v17836_v39 = vsel %vm4897_vm2, %v4913_v30, %v4914_v31  ;;  %v17842_v43 = vld [vmem:[%s17739_s20 + $0x70] sm:$0xf]  ;;  %v17847_v44 = vld [vmem:[%s17739_s20 + $0x78] sm:$0xff]  ;;  %v17850_v45 = vld [vmem:[%s17739_s20 + $0x80] sm:$0xff]  ;;  %v5309_v6 = vrot.slane %v17749_v9, 4 }
  0x24   : > { %15325 = vmatprep.mubr.msk.f32.mxu0 %vm583_vm1, %v17819_v33  ;;  %23179 = vst [vmem:[#allocation11_spill] sm:$0xff] %v17836_v39  ;;  %15420 = vmatprep.subr.msk.mxu0 %vm680_vm0, %v17807_v29  ;;  %v17859_v46 = vsel %vm4897_vm2, %v4914_v31, %v4916_v36  ;;  %v538_v47 = vld [vmem:[%s17734_s17 + $0x50] sm:$0xff]  ;;  %v4921_v48 = vrot.slane %v17842_v43, 3  ;;  %v17864_v49 = vsel %vm4897_vm2, %v4918_v41, %v4919_v42  ;;  %v540_v50 = vld [vmem:[%s17734_s17 + $0x60] sm:$0xff]  ;;  %v4923_v51 = vrot.slane %v17847_v44, 3  ;;  %v17876_v55 = vld [vmem:[%s17739_s20 + $0x98] sm:$0xff] }
  0x25   : > { %23180 = vst [vmem:[#allocation12_spill] sm:$0xff] %v17859_v46  ;;  %23181 = vst [vmem:[#allocation13_spill] sm:$0xff] %v17864_v49  ;;  %v4924_v52 = vrot.slane %v17850_v45, 3  ;;  %v17870_v53 = vld [vmem:[%s17739_s20 + $0x88] sm:$0xf]  ;;  %v17873_v54 = vld [vmem:[%s17739_s20 + $0x90] sm:$0xff] }
  0x26   : > { %15326 = vmatmul.mubr.msk.f32.gmra.mrb[2].mxu0 %vm583_vm1, %v17823_v34  ;;  %14429 = vmatmul.mubr.msk.f32.gmra.mrb[4].mxu1 %vm583_vm1, %v535_v35  ;;  %v17885_v56 = vsel %vm4897_vm2, %v4919_v42, %v4921_v48  ;;  %v541_v57 = vld [vmem:[%s17734_s17 + $0x68] sm:$0xff]  ;;  %v4926_v58 = vrot.slane %v17870_v53, 3  ;;  %v543_v60 = vld [vmem:[%s17734_s17 + $0x78] sm:$0xff]  ;;  %v4928_v61 = vrot.slane %v17873_v54, 3  ;;  %v4929_v62 = vrot.slane %v17876_v55, 3  ;;  %v17902_v1 = vld [vmem:[%s17739_s20 + $0xb0] sm:$0xff] }
  0x27   : > { %15328 = vmatprep.mubr.msk.f32.mxu0 %vm583_vm1, %v17836_v39  ;;  %14431 = vmatprep.mubr.msk.f32.mxu1 %vm583_vm1, %v537_v40  ;;  %23182 = vst [vmem:[#allocation14_spill] sm:$0xff] %v17885_v56  ;;  %v17890_v59 = vsel %vm4897_vm2, %v4923_v51, %v4924_v52  ;;  %v17896_v63 = vld [vmem:[%s17739_s20 + $0xa0] sm:$0xf]  ;;  %v17899_v0 = vld [vmem:[%s17739_s20 + $0xa8] sm:$0xff]  ;;  %v17905_v2 = vld [vmem:[%s17739_s20 + $0xb8] sm:$0xf] }
  0x28   : > { %23183 = vst [vmem:[#allocation15_spill] sm:$0xff] %v17890_v59  ;;  %v17911_v3 = vld [vmem:[%s17739_s20 + $0xc0] sm:$0xff]  ;;  %v17914_v4 = vld [vmem:[%s17739_s20 + $0xc8] sm:$0xff]  ;;  %v5310_v7 = vrot.slane %v17752_v10, 4  ;;  %v5312_v12 = vrot.slane %v17764_v14, 4  ;;  %v17923_v13 = vsel %vm4897_vm2, %v4924_v52, %v4926_v58  ;;  %v4931_v9 = vrot.slane %v17896_v63, 3 }
  0x29   : > { %23184 = vst [vmem:[#allocation16_spill] sm:$0xff] %v17923_v13  ;;  %v544_v15 = vld [vmem:[%s17734_s17 + $0x80] sm:$0xff]  ;;  %v17928_v16 = vld [vmem:[%s17739_s20 + $0xd0] sm:$0xf]  ;;  %v5314_v10 = vrot.slane %v17771_v17, 4  ;;  %v17933_v21 = vsel %vm4897_vm2, %v4928_v61, %v4929_v62  ;;  %v4933_v25 = vrot.slane %v17899_v0, 3 }
  0x2a   : > { %15329 = vmatmul.mubr.msk.f32.gmra.mrb[4].mxu0 %vm583_vm1, %v17859_v46  ;;  %14432 = vmatmul.mubr.msk.f32.gmra.mrb[6].mxu1 %vm583_vm1, %v538_v47  ;;  %23185 = vst [vmem:[#allocation17_spill] sm:$0xff] %v17928_v16  ;;  %23186 = vst [vmem:[#allocation18_spill] sm:$0xff] %v17933_v21  ;;  %v546_v22 = vld [vmem:[%s17734_s17 + $0x90] sm:$0xff]  ;;  %v4934_v26 = vrot.slane %v17902_v1, 3  ;;  %v4936_v30 = vrot.slane %v17905_v2, 3  ;;  %v17940_v31 = vld [vmem:[%s17739_s20 + $0xd8] sm:$0xff]  ;;  %v17965_v51 = vsel %vm680_vm0, %v5309_v6, %v5310_v7 }
  0x2b   : > { %15331 = vmatprep.mubr.msk.f32.mxu0 %vm583_vm1, %v17864_v49  ;;  %14434 = vmatprep.mubr.msk.f32.mxu1 %vm583_vm1, %v540_v50  ;;  %23187 = vst [vmem:[#allocation19_spill] sm:$0xff] %v17940_v31  ;;  %v17943_v35 = vld [vmem:[%s17739_s20 + $0xe0] sm:$0xff]  ;;  %v4938_v17 = vrot.slane %v17911_v3, 3  ;;  %v4939_v36 = vrot.slane %v17914_v4, 3  ;;  %v17948_v40 = vld [vmem:[%s17739_s20 + $0xe8] sm:$0xf]  ;;  %v17971_v52 = vsel %vm4897_vm2, %v4929_v62, %v4931_v9 }
  0x2c   : > { %23188 = vst [vmem:[#allocation20_spill] sm:$0xff] %v17943_v35  ;;  %23189 = vst [vmem:[#allocation21_spill] sm:$0xff] %v17948_v40  ;;  %v17951_v41 = vld [vmem:[%s17739_s20 + $0xf0] sm:$0xff]  ;;  %v17954_v42 = vld [vmem:[%s17739_s20 + $0xf8] sm:$0xff]  ;;  %v4941_v48 = vrot.slane %v17928_v16, 3  ;;  %v4944_v58 = vrot.slane %v17943_v35, 3 }
  0x2d   : > { %23190 = vst [vmem:[#allocation22_spill] sm:$0xff] %v17951_v41  ;;  %23191 = vst [vmem:[#allocation23_spill] sm:$0xff] %v17954_v42  ;;  %v547_v47 = vld [vmem:[%s17734_s17 + $0x98] sm:$0xff]  ;;  %v17962_v50 = vld [vmem:[%s17739_s20 + $0x100] sm:$0xf]  ;;  %v4946_v62 = vrot.slane %v17948_v40, 3 }
  0x2e   : > { %15332 = vmatmul.mubr.msk.f32.gmra.mrb[6].mxu0 %vm583_vm1, %v17885_v56  ;;  %14435 = vmatmul.mubr.msk.f32.gmra.mrb[8].mxu1 %vm583_vm1, %v541_v57  ;;  %23192 = vst [vmem:[#allocation24_spill] sm:$0xff] %v17962_v50  ;;  %23193 = vst [vmem:[#allocation25_spill] sm:$0xff] %v17965_v51  ;;  %v4943_v57 = vrot.slane %v17940_v31, 3  ;;  %v17979_v61 = vld [vmem:[%s17739_s20 + $0x110] sm:$0xff]  ;;  %v17982_v6 = vld [vmem:[%s17739_s20 + $0x118] sm:$0xf] }
  0x2f   : > { %15334 = vmatprep.mubr.msk.f32.mxu0 %vm583_vm1, %v17890_v59  ;;  %14437 = vmatprep.mubr.msk.f32.mxu1 %vm583_vm1, %v543_v60  ;;  %23194 = vst [vmem:[#allocation26_spill] sm:$0xff] %v17971_v52  ;;  %v17976_v60 = vld [vmem:[%s17739_s20 + $0x108] sm:$0xff]  ;;  %23196 = vst [vmem:[#allocation28_spill] sm:$0xff] %v17979_v61  ;;  %v4948_v9 = vrot.slane %v17951_v41, 3  ;;  %v4949_v14 = vrot.slane %v17954_v42, 3  ;;  %v17995_v24 = vld [vmem:[%s17739_s20 + $0x120] sm:$0xff]  ;;  %v18040_v59 = vsel %vm4897_vm2, %v4939_v36, %v4941_v48 }
  0x30   : > { %23195 = vst [vmem:[#allocation27_spill] sm:$0xff] %v17976_v60  ;;  %23197 = vst [vmem:[#allocation29_spill] sm:$0xff] %v17982_v6  ;;  %v549_v8 = vld [vmem:[%s17734_s17 + $0xa8] sm:$0xff]  ;;  %v4956_v56 = vrot.slane %v17982_v6, 3  ;;  %v4958_v49 = vrot.slane %v17995_v24, 3  ;;  %v552_v39 = vld [vmem:[%s17734_s17 + $0xc0] sm:$0xff]  ;;  %v18049_v34 = vsel %vm4897_vm2, %v4944_v58, %v4946_v62 }
  0x31   : > { %23200 = vst [vmem:[#allocation32_spill] sm:$0xff] %v17995_v24  ;;  %v17998_v20 = vld [vmem:[%s17739_s20 + $0x128] sm:$0xff]  ;;  %23209 = vst [vmem:[#allocation40_spill] sm:$0xff] %v18040_v59  ;;  %v348_v48 = vld [vmem:[%s18005_s13 + $0x20] sm:$0xff] }
  0x32   : > { %15335 = vmatmul.mubr.msk.f32.gmra.mrb[8].mxu0 %vm583_vm1, %v17923_v13  ;;  %14438 = vmatmul.mubr.msk.f32.gmra.mrb[10].mxu1 %vm583_vm1, %v544_v15  ;;  %v17985_v15 = vsel %vm680_vm0, %v5310_v7, %v5312_v12  ;;  %23201 = vst [vmem:[#allocation33_spill] sm:$0xff] %v17998_v20  ;;  %v18008_v7 = vsel %vm4897_vm2, %v4934_v26, %v4936_v30  ;;  %v4953_v30 = vrot.slane %v17976_v60, 3  ;;  %v4959_v46 = vrot.slane %v17998_v20, 3  ;;  %v18061_v19 = vld [vmem:[%s17739_s20 + $0x148] sm:$0xf]  ;;  %v350_v20 = vld [vmem:[%s18005_s13 + $0x30] sm:$0xff] }
  0x33   : > { %15337 = vmatprep.mubr.msk.f32.mxu0 %vm583_vm1, %v17933_v21  ;;  %14440 = vmatprep.mubr.msk.f32.mxu1 %vm583_vm1, %v546_v22  ;;  %23198 = vst [vmem:[#allocation30_spill] sm:$0xff] %v17985_v15  ;;  %v17988_v22 = vsel %vm4897_vm2, %v4933_v25, %v4934_v26  ;;  %23202 = vst [vmem:[#allocation34_spill] sm:$0xff] %v18008_v7  ;;  %v18011_v12 = vsel %vm4897_vm2, %v4938_v17, %v4939_v36  ;;  %v18014_v25 = vld [vmem:[%s17739_s20 + $0x130] sm:$0xf]  ;;  %v23205_v21 = vrot.slane %v17774_v18, 4  ;;  %v347_v36 = vld [vmem:[%s18005_s13 + $0x18] sm:$0xff] }
  0x34   : > { %23199 = vst [vmem:[#allocation31_spill] sm:$0xff] %v17988_v22  ;;  %23203 = vst [vmem:[#allocation35_spill] sm:$0xff] %v18011_v12  ;;  %v4951_v26 = vrot.slane %v17962_v50, 3  ;;  %v4954_v17 = vrot.slane %v17979_v61, 3  ;;  %v448_v62 = vrot.slane %v348_v48, 1  ;;  %v555_v24 = vld [vmem:[%s17734_s17 + $0xd8] sm:$0xff] }
  0x35   : > { %23204 = vst [vmem:[#allocation36_spill] sm:$0xff] %v18014_v25  ;;  %v18019_v13 = vsel %vm680_vm0, %v5314_v10, %v23205_v21  ;;  %v18030_v10 = vld [vmem:[%s17739_s20 + $0x138] sm:$0xff]  ;;  %v18033_v21 = vld [vmem:[%s17739_s20 + $0x140] sm:$0xff]  ;;  %23211 = vst [vmem:[#allocation42_spill] sm:$0xff] %v18049_v34  ;;  %v452_v42 = vrot.slane %v350_v20, 1 }
  0x36   : > { %23206 = vst [vmem:[#allocation37_spill] sm:$0xff] %v18019_v13  ;;  %15338 = vmatmul.mubr.msk.f32.gmra.mrb[10].mxu0 %vm583_vm1, %v17971_v52  ;;  %14441 = vmatmul.mubr.msk.f32.gmra.mrb[12].mxu1 %vm583_vm1, %v547_v47  ;;  %23207 = vst [vmem:[#allocation38_spill] sm:$0xff] %v18030_v10  ;;  %v550_v47 = vld [vmem:[%s17734_s17 + $0xb0] sm:$0xff]  ;;  %v18043_v52 = vsel %vm4897_vm2, %v4943_v57, %v4944_v58  ;;  %v4963_v33 = vrot.slane %v18030_v10, 3  ;;  %v447_v58 = vrot.slane %v347_v36, 1  ;;  %v11215_v10 = vrot.slane %v347_v36, 2 }
  0x37   : > { %23208 = vst [vmem:[#allocation39_spill] sm:$0xff] %v18033_v21  ;;  %15340 = vmatprep.mubr.msk.f32.mxu0 %vm583_vm1, %v17988_v22  ;;  %14443 = vmatprep.mubr.msk.f32.mxu1 %vm583_vm1, %v549_v8  ;;  %23210 = vst [vmem:[#allocation41_spill] sm:$0xff] %v18043_v52  ;;  %v18052_v22 = vsel %vm4897_vm2, %v4948_v9, %v4949_v14  ;;  %v4961_v8 = vrot.slane %v18014_v25, 3  ;;  %v18067_v9 = vsel %vm4897_vm2, %v4949_v14, %v4951_v26  ;;  %v349_v25 = vld [vmem:[%s18005_s13 + $0x28] sm:$0x3] }
  0x38   : > { %23212 = vst [vmem:[#allocation43_spill] sm:$0xff] %v18052_v22  ;;  %23213 = vst [vmem:[#allocation44_spill] sm:$0xff] %v18061_v19  ;;  %v18070_v57 = vsel %vm4897_vm2, %v4953_v30, %v4954_v17  ;;  %v18073_v5 = vsel %vm4897_vm2, %v4954_v17, %v4956_v56  ;;  %v18085_v14 = vld [vmem:[%s18005_s13 + $0x8] sm:$0xff]  ;;  %v18088_v26 = vsel %vm446_vm3, %v447_v58, %v448_v62  ;;  %v11216_v56 = vrot.slane %v348_v48, 2  ;;  %v351_v30 = vld [vmem:[%s18005_s13 + $0x38] sm:$0xff] }
  0x39   : > { %23214 = vst [vmem:[#allocation45_spill] sm:$0xff] %v18067_v9  ;;  %23215 = vst [vmem:[#allocation46_spill] sm:$0xff] %v18070_v57  ;;  %v11176_v6 = vmax.f32 %v347_v36, %v18088_v26  ;;  %v23220_v61 = vrot.slane %v18033_v21, 3  ;;  %v11218_v50 = vrot.slane %v349_v25, 2  ;;  %v346_v17 = vld [vmem:[%s18005_s13 + $0x10] sm:$0x3] }
  0x3a   : > { %15341 = vmatmul.mubr.msk.f32.gmra.mrb[12].mxu0 %vm583_vm1, %v18008_v7  ;;  %14444 = vmatmul.mubr.msk.f32.gmra.mrb[14].mxu1 %vm583_vm1, %v550_v47  ;;  %23216 = vst [vmem:[#allocation47_spill] sm:$0xff] %v18073_v5  ;;  %v553_v7 = vld [vmem:[%s17734_s17 + $0xc8] sm:$0xff]  ;;  %v18082_v47 = vsel %vm4897_vm2, %v4958_v49, %v4959_v46  ;;  %23218 = vst [vmem:[#allocation49_spill] sm:$0xff] %v18085_v14  ;;  %v450_v49 = vrot.slane %v349_v25, 1  ;;  %v11217_v58 = vsel %vm1623_vm4, %v11215_v10, %v11216_v56  ;;  %v556_v25 = vld [vmem:[%s17734_s17 + $0xe0] sm:$0xff] }
  0x3b   : > { %15343 = vmatprep.mubr.msk.f32.mxu0 %vm583_vm1, %v18011_v12  ;;  %14446 = vmatprep.mubr.msk.f32.mxu1 %vm583_vm1, %v552_v39  ;;  %23217 = vst [vmem:[#allocation48_spill] sm:$0xff] %v18082_v47  ;;  %v18094_v12 = vsel %vm4897_vm2, %v4959_v46, %v4961_v8  ;;  %v18101_v60 = vsel %vm4897_vm2, %v4963_v33, %v23220_v61  ;;  %v352_v46 = vld [vmem:[%s18005_s13 + $0x40] sm:$0x3]  ;;  %v453_v61 = vrot.slane %v351_v30, 1  ;;  %v353_v8 = vld [vmem:[%s18005_s13 + $0x48] sm:$0xff] }
  0x3c   : > { %23219 = vst [vmem:[#allocation50_spill] sm:$0xff] %v18094_v12  ;;  %23221 = vst [vmem:[#allocation51_spill] sm:$0xff] %v18101_v60  ;;  %v18110_v36 = vmax.f32 %v11176_v6, %v11217_v58  ;;  %v18113_v33 = vsel %vm446_vm3, %v448_v62, %v450_v49  ;;  %v11219_v39 = vsel %vm1623_vm4, %v11216_v56, %v11218_v50  ;;  %v558_v6 = vld [vmem:[%s17734_s17 + $0xf0] sm:$0xff]  ;;  %v455_v49 = vrot.slane %v352_v46, 1  ;;  %v355_v41 = vld [vmem:[%s18005_s13 + $0x58] sm:$0x3] }
  0x3d   : > { %v11177_v10 = vmax.f32 %v348_v48, %v18113_v33  ;;  %v18125_v62 = vsel %vm446_vm3, %v452_v42, %v453_v61  ;;  %v11213_v56 = vrot.slane %v346_v17, 2  ;;  %v23224_v58 = vrot.slane %v18085_v14, 1  ;;  %v561_v40 = vld [vmem:[%s17734_s17 + $0x108] sm:$0xff]  ;;  %v367_v31 = vld [vmem:[%s18005_s13 + $0xb8] sm:$0x3] }
  0x3e   : > { %15344 = vmatmul.mubr.msk.f32.gmra.mrb[14].mxu0 %vm583_vm1, %v18040_v59  ;;  %14447 = vmatmul.mubr.msk.f32.gmra.mrb[16].mxu1 %vm583_vm1, %v553_v7  ;;  %23222 = vst [vmem:[#allocation52_spill] sm:$0xff] %v18110_v36  ;;  %v11220_v7 = vrot.slane %v350_v20, 2  ;;  %v11221_v59 = vrot.slane %v351_v30, 2  ;;  %v11131_v36 = vrot.slane %v346_v17, 1  ;;  %v11178_v48 = vmax.f32 %v350_v20, %v18125_v62  ;;  %v559_v17 = vld [vmem:[%s17734_s17 + $0xf8] sm:$0xff] }
  0x3f   : > { %15346 = vmatprep.mubr.msk.f32.mxu0 %vm583_vm1, %v18043_v52  ;;  %14449 = vmatprep.mubr.msk.f32.mxu1 %vm583_vm1, %v555_v24  ;;  %v354_v52 = vld [vmem:[%s18005_s13 + $0x50] sm:$0xff]  ;;  %v18128_v24 = vmax.f32 %v11177_v10, %v11219_v39  ;;  %v18136_v42 = vsel %vm446_vm3, %v453_v61, %v455_v49  ;;  %v11223_v10 = vrot.slane %v352_v46, 2  ;;  %v457_v20 = vrot.slane %v353_v8, 1 }
  0x40   : > { %v11222_v50 = vsel %vm1623_vm4, %v11220_v7, %v11221_v59  ;;  %v11132_v39 = vsel %vm446_vm3, %v23224_v58, %v11131_v36  ;;  %v11179_v61 = vmax.f32 %v351_v30, %v18136_v42  ;;  %v458_v49 = vrot.slane %v354_v52, 1 }
  0x41   : > { %23223 = vst [vmem:[#allocation53_spill] sm:$0xff] %v18128_v24  ;;  %v18146_v7 = vmax.f32 %v11178_v48, %v11222_v50  ;;  %v23226_v46 = vrot.slane %v18085_v14, 2  ;;  %v11224_v58 = vsel %vm1623_vm4, %v11221_v59, %v11223_v10  ;;  %v18157_v48 = vld [vmem:[%s18005_s13 + $0x68] sm:$0xff]  ;;  %v11228_v10 = vrot.slane %v355_v41, 2 }
  0x42   : > { %15347 = vmatmul.mubr.msk.f32.gmra.mrb[16].mxu0 %vm583_vm1, %v18049_v34  ;;  %14450 = vmatmul.mubr.msk.f32.gmra.mrb[18].mxu1 %vm583_vm1, %v556_v25  ;;  %v11175_v25 = vmax.f32 %v18085_v14, %v11132_v39  ;;  %v356_v34 = vld [vmem:[%s18005_s13 + $0x60] sm:$0xff]  ;;  %v18159_v39 = vmax.f32 %v11179_v61, %v11224_v58  ;;  %v18162_v30 = vsel %vm446_vm3, %v457_v20, %v458_v49  ;;  %v562_v20 = vld [vmem:[%s17734_s17 + $0x110] sm:$0xff]  ;;  %v18184_v58 = vld [vmem:[%s17739_s20 + $0x158] sm:$0xff] }
  0x43   : > { %15349 = vmatprep.mubr.msk.f32.mxu0 %vm583_vm1, %v18052_v22  ;;  %14452 = vmatprep.mubr.msk.f32.mxu1 %vm583_vm1, %v558_v6  ;;  %23225 = vst [vmem:[#allocation54_spill] sm:$0xff] %v18146_v7  ;;  %v11214_v36 = vsel %vm1623_vm4, %v23226_v46, %v11213_v56  ;;  %v11225_v22 = vrot.slane %v353_v8, 2  ;;  %v11226_v6 = vrot.slane %v354_v52, 2  ;;  %v460_v7 = vrot.slane %v355_v41, 1  ;;  %v18175_v61 = vld [vmem:[%s17739_s20 + $0x150] sm:$0xff]  ;;  %23229 = vst [vmem:[#allocation57_spill] sm:$0xff] %v18184_v58 }
  0x44   : > { %v11337_v50 = vmax.f32 %v11175_v25, %v11214_v36  ;;  %23227 = vst [vmem:[#allocation55_spill] sm:$0xff] %v18159_v39  ;;  %v11180_v59 = vmax.f32 %v353_v8, %v18162_v30  ;;  %v462_v46 = vrot.slane %v356_v34, 1  ;;  %v358_v25 = vld [vmem:[%s18005_s13 + $0x70] sm:$0x3]  ;;  %23228 = vst [vmem:[#allocation56_spill] sm:$0xff] %v18175_v61  ;;  %v11230_v41 = vrot.slane %v356_v34, 2 }
  0x45   : > { %v11227_v56 = vsel %vm1623_vm4, %v11225_v22, %v11226_v6  ;;  %v463_v22 = vrot.slane %v18157_v48, 1  ;;  %v564_v8 = vld [vmem:[%s17734_s17 + $0x120] sm:$0xff]  ;;  %v11233_v35 = vrot.slane %v358_v25, 2 }
  0x46   : > { %15350 = vmatmul.mubr.msk.f32.gmra.mrb[18].mxu0 %vm583_vm1, %v18067_v9  ;;  %14453 = vmatmul.mubr.msk.f32.gmra.mrb[20].mxu1 %vm583_vm1, %v559_v17  ;;  %v11373_v36 = vmax.f32 %v11337_v50, %v18128_v24  ;;  %v18179_v17 = vsel %vm446_vm3, %v458_v49, %v460_v7  ;;  %v18186_v14 = vmax.f32 %v11180_v59, %v11227_v56  ;;  %v11231_v9 = vrot.slane %v18157_v48, 2  ;;  %v359_v50 = vld [vmem:[%s18005_s13 + $0x78] sm:$0xff]  ;;  %v18199_v59 = vld [vmem:[%s18005_s13 + $0x80] sm:$0xff] }
  0x47   : > { %15352 = vmatprep.mubr.msk.f32.mxu0 %vm583_vm1, %v18070_v57  ;;  %14455 = vmatprep.mubr.msk.f32.mxu1 %vm583_vm1, %v561_v40  ;;  %v11181_v40 = vmax.f32 %v354_v52, %v18179_v17  ;;  %v11229_v57 = vsel %vm1623_vm4, %v11226_v6, %v11228_v10  ;;  %v18196_v49 = vsel %vm446_vm3, %v462_v46, %v463_v22  ;;  %v465_v24 = vrot.slane %v358_v25, 1  ;;  %v18206_v6 = vld [vmem:[%s17739_s20 + $0x160] sm:$0xf]  ;;  %v361_v25 = vld [vmem:[%s18005_s13 + $0x88] sm:$0x3] }
  0x48   : > { %23230 = vst [vmem:[#allocation58_spill] sm:$0xff] %v18186_v14  ;;  %v18193_v7 = vmax.f32 %v11373_v36, %v18159_v39  ;;  %v4968_v52 = vrot.slane %v18175_v61, 3  ;;  %23232 = vst [vmem:[#allocation60_spill] sm:$0xff] %v18206_v6  ;;  %v11182_v10 = vmax.f32 %v356_v34, %v18196_v49  ;;  %v11232_v46 = vsel %vm1623_vm4, %v11230_v41, %v11231_v9  ;;  %v18217_v36 = vld [vmem:[%s17734_s17 + $0x128] sm:$0xff]  ;;  %v18287_v61 = vld [vmem:[%s17739_s20 + $0x180] sm:$0xff] }
  0x49   : > { %v18208_v56 = vmax.f32 %v11181_v40, %v11229_v57  ;;  %23234 = vst [vmem:[#allocation62_spill] sm:$0xff] %v18217_v36  ;;  %v18224_v57 = vsel %vm446_vm3, %v463_v22, %v465_v24  ;;  %v11234_v34 = vsel %vm1623_vm4, %v11231_v9, %v11233_v35  ;;  %v467_v41 = vrot.slane %v359_v50, 1  ;;  %v567_v40 = vld [vmem:[%s17734_s17 + $0x138] sm:$0xff] }
  0x4a   : > { %23231 = vst [vmem:[#allocation59_spill] sm:$0xff] %v18193_v7  ;;  %15353 = vmatmul.mubr.msk.f32.gmra.mrb[20].mxu0 %vm583_vm1, %v18073_v5  ;;  %14456 = vmatmul.mubr.msk.f32.gmra.mrb[22].mxu1 %vm583_vm1, %v562_v20  ;;  %v4969_v20 = vrot.slane %v18184_v58, 3  ;;  %v18221_v7 = vld [vmem:[%s17739_s20 + $0x168] sm:$0xff]  ;;  %v18231_v14 = vmax.f32 %v11182_v10, %v11232_v46  ;;  %v468_v39 = vrot.slane %v18199_v59, 1  ;;  %v23238_v5 = vrot.slane %v18061_v19, 3  ;;  %v362_v46 = vld [vmem:[%s18005_s13 + $0x90] sm:$0xff] }
  0x4b   : > { %23233 = vst [vmem:[#allocation61_spill] sm:$0xff] %v18208_v56  ;;  %15355 = vmatprep.mubr.msk.f32.mxu0 %vm583_vm1, %v18082_v47  ;;  %14458 = vmatprep.mubr.msk.f32.mxu1 %vm583_vm1, %v564_v8  ;;  %23235 = vst [vmem:[#allocation63_spill] sm:$0xff] %v18221_v7  ;;  %v18229_v56 = vld [vmem:[%s17739_s20 + $0x170] sm:$0xff]  ;;  %v11183_v8 = vmax.f32 %v18157_v48, %v18224_v57  ;;  %v11235_v47 = vrot.slane %v359_v50, 2  ;;  %v23239_v24 = vrot.slane %v18033_v21, 3  ;;  %v4971_v35 = vrot.slane %v18206_v6, 3 }
  0x4c   : > { %23236 = vst [vmem:[#allocation64_spill] sm:$0xff] %v18229_v56  ;;  %23237 = vst [vmem:[#allocation65_spill] sm:$0xff] %v18231_v14  ;;  %v11236_v9 = vrot.slane %v18199_v59, 2  ;;  %v470_v10 = vrot.slane %v361_v25, 1  ;;  %v18247_v48 = vld [vmem:[%s18005_s13 + $0x98] sm:$0xff]  ;;  %v18257_v14 = vsel %vm446_vm3, %v467_v41, %v468_v39  ;;  %v11238_v6 = vrot.slane %v361_v25, 2 }
  0x4d   : > { %v18241_v22 = vsel %vm4897_vm2, %v23239_v24, %v23238_v5  ;;  %v4973_v5 = vrot.slane %v18221_v7, 3  ;;  %v18254_v24 = vmax.f32 %v11183_v8, %v11234_v34  ;;  %v18263_v58 = vld [vmem:[%s17734_s17 + $0x140] sm:$0xff]  ;;  %v18270_v34 = vld [vmem:[%s17739_s20 + $0x178] sm:$0xf]  ;;  %v11184_v41 = vmax.f32 %v359_v50, %v18257_v14  ;;  %v18326_v21 = vld [vmem:[%s17739_s20 + $0x190] sm:$0xf] }
  0x4e   : > { %23240 = vst [vmem:[#allocation66_spill] sm:$0xff] %v18241_v22  ;;  %15356 = vmatmul.mubr.msk.f32.gmra.mrb[22].mxu0 %vm583_vm1, %v18094_v12  ;;  %14459 = vmatmul.mubr.msk.f32.gmra.mrb[24].mxu1 %vm583_vm1, %v18217_v36  ;;  %23242 = vst [vmem:[#allocation68_spill] sm:$0xff] %v18263_v58  ;;  %v18266_v12 = vsel %vm4897_vm2, %v4968_v52, %v4969_v20  ;;  %v4974_v36 = vrot.slane %v18229_v56, 3  ;;  %v11237_v25 = vsel %vm1623_vm4, %v11235_v47, %v11236_v9  ;;  %v364_v8 = vld [vmem:[%s18005_s13 + $0xa0] sm:$0x3]  ;;  %v18290_v47 = vld [vmem:[%s17739_s20 + $0x188] sm:$0xff] }
  0x4f   : > { %23241 = vst [vmem:[#allocation67_spill] sm:$0xff] %v18254_v24  ;;  %15358 = vmatprep.mubr.msk.f32.mxu0 %vm583_vm1, %v18101_v60  ;;  %14461 = vmatprep.mubr.msk.f32.mxu1 %vm583_vm1, %v567_v40  ;;  %23243 = vst [vmem:[#allocation69_spill] sm:$0xff] %v18266_v12  ;;  %v18276_v24 = vld [vmem:[%s17734_s17 + $0x150] sm:$0xff]  ;;  %v18279_v60 = vsel %vm446_vm3, %v468_v39, %v470_v10  ;;  %v11239_v40 = vsel %vm1623_vm4, %v11236_v9, %v11238_v6  ;;  %v472_v7 = vrot.slane %v362_v46, 1 }
  0x50   : > { %23244 = vst [vmem:[#allocation70_spill] sm:$0xff] %v18270_v34  ;;  %23245 = vst [vmem:[#allocation71_spill] sm:$0xff] %v18276_v24  ;;  %v473_v52 = vrot.slane %v18247_v48, 1  ;;  %v18284_v56 = vsel %vm4897_vm2, %v4969_v20, %v4971_v35  ;;  %v18292_v50 = vmax.f32 %v11184_v41, %v11237_v25  ;;  %v11185_v39 = vmax.f32 %v18199_v59, %v18279_v60  ;;  %v365_v41 = vld [vmem:[%s18005_s13 + $0xa8] sm:$0xff]  ;;  %v18311_v59 = vld [vmem:[%s17734_s17 + $0x158] sm:$0xff] }
  0x51   : > { %23246 = vst [vmem:[#allocation72_spill] sm:$0xff] %v18284_v56  ;;  %v11240_v10 = vrot.slane %v362_v46, 2  ;;  %v4976_v6 = vrot.slane %v18270_v34, 3  ;;  %v11241_v35 = vrot.slane %v18247_v48, 2  ;;  %v475_v9 = vrot.slane %v364_v8, 1  ;;  %v366_v34 = vld [vmem:[%s18005_s13 + $0xb0] sm:$0xff] }
  0x52   : > { %23247 = vst [vmem:[#allocation73_spill] sm:$0xff] %v18292_v50  ;;  %15359 = vmatmul.mubr.msk.f32.gmra.mrb[24].mxu0 %vm583_vm1, %v18241_v22  ;;  %14462 = vmatmul.mubr.msk.f32.gmra.mrb[26].mxu1 %vm583_vm1, %v18263_v58  ;;  %v18302_v20 = vsel %vm446_vm3, %v472_v7, %v473_v52  ;;  %v18314_v25 = vsel %vm4897_vm2, %v4973_v5, %v4974_v36  ;;  %v18317_v50 = vld [vmem:[%s17734_s17 + $0x168] sm:$0xff]  ;;  %v11243_v58 = vrot.slane %v364_v8, 2  ;;  %v6521_v19 = vrot.slane %v18287_v61, 3 }
  0x53   : > { %15361 = vmatprep.mubr.msk.f32.mxu0 %vm583_vm1, %v18266_v12  ;;  %14464 = vmatprep.mubr.msk.f32.mxu1 %vm583_vm1, %v18276_v24  ;;  %23248 = vst [vmem:[#allocation74_spill] sm:$0xff] %v18314_v25  ;;  %23249 = vst [vmem:[#allocation75_spill] sm:$0xff] %v18317_v50  ;;  %v18319_v7 = vmax.f32 %v11185_v39, %v11239_v40  ;;  %v11186_v22 = vmax.f32 %v362_v46, %v18302_v20  ;;  %v6522_v12 = vrot.slane %v18290_v47, 3 }
  0x54   : > { %v11242_v24 = vsel %vm1623_vm4, %v11240_v10, %v11241_v35  ;;  %v18330_v5 = vsel %vm446_vm3, %v473_v52, %v475_v9  ;;  %v11244_v8 = vsel %vm1623_vm4, %v11241_v35, %v11243_v58  ;;  %v477_v40 = vrot.slane %v365_v41, 1  ;;  %v18350_v58 = vld [vmem:[%s17734_s17 + $0x170] sm:$0xff] }
  0x55   : > { %23250 = vst [vmem:[#allocation76_spill] sm:$0xff] %v18319_v7  ;;  %v18333_v16 = vmax.f32 %v11186_v22, %v11242_v24  ;;  %v11187_v46 = vmax.f32 %v18247_v48, %v18330_v5  ;;  %v18343_v52 = vsel %vm4897_vm2, %v4974_v36, %v4976_v6  ;;  %v478_v39 = vrot.slane %v366_v34, 1  ;;  %v368_v36 = vld [vmem:[%s18005_s13 + $0xc0] sm:$0xff]  ;;  %v369_v6 = vld [vmem:[%s18005_s13 + $0xc8] sm:$0xff] }
  0x56   : > { %15362 = vmatmul.mubr.msk.f32.gmra.mrb[26].mxu0 %vm583_vm1, %v18284_v56  ;;  %14465 = vmatmul.mubr.msk.f32.gmra.mrb[28].mxu1 %vm583_vm1, %v18311_v59  ;;  %23252 = vst [vmem:[#allocation78_spill] sm:$0xff] %v18343_v52  ;;  %v11245_v22 = vrot.slane %v365_v41, 2  ;;  %v11246_v24 = vrot.slane %v366_v34, 2  ;;  %v6524_v48 = vrot.slane %v18326_v21, 3  ;;  %v480_v35 = vrot.slane %v367_v31, 1 }
  0x57   : > { %23251 = vst [vmem:[#allocation77_spill] sm:$0xff] %v18333_v16  ;;  %15364 = vmatprep.mubr.msk.f32.mxu0 %vm583_vm1, %v18314_v25  ;;  %14467 = vmatprep.mubr.msk.f32.mxu1 %vm583_vm1, %v18317_v50  ;;  %v18353_v10 = vmax.f32 %v11187_v46, %v11244_v8  ;;  %v11248_v9 = vrot.slane %v367_v31, 2  ;;  %v18358_v16 = vsel %vm4897_vm2, %v6521_v19, %v6522_v12  ;;  %v23255_v7 = vrot.slane %v17787_v23, 4 }
  0x58   : > { %23254 = vst [vmem:[#allocation80_spill] sm:$0xff] %v18358_v16  ;;  %v23256_v25 = vrot.slane %v17774_v18, 4  ;;  %v18368_v50 = vsel %vm446_vm3, %v477_v40, %v478_v39  ;;  %v11247_v46 = vsel %vm1623_vm4, %v11245_v22, %v11246_v24  ;;  %v5322_v8 = vrot.slane %v17815_v32, 4 }
  0x59   : > { %23253 = vst [vmem:[#allocation79_spill] sm:$0xff] %v18353_v10  ;;  %v11188_v31 = vmax.f32 %v365_v41, %v18368_v50  ;;  %v18374_v19 = vsel %vm446_vm3, %v478_v39, %v480_v35  ;;  %v11249_v23 = vsel %vm1623_vm4, %v11246_v24, %v11248_v9  ;;  %v370_v10 = vld [vmem:[%s18005_s13 + $0xd0] sm:$0x3]  ;;  %v23258_v18 = vrot.slane %v17802_v28, 4  ;;  %v371_v35 = vld [vmem:[%s18005_s13 + $0xd8] sm:$0xff] }
  0x5a   : > { %v18365_v56 = vsel %vm680_vm0, %v23256_v25, %v23255_v7  ;;  %15365 = vmatmul.mubr.msk.f32.gmra.mrb[28].mxu0 %vm583_vm1, %v18343_v52  ;;  %14468 = vmatmul.mubr.msk.f32.gmra.mrb[30].mxu1 %vm583_vm1, %v18350_v58  ;;  %v23259_v25 = vrot.slane %v17799_v27, 4  ;;  %v11189_v41 = vmax.f32 %v366_v34, %v18374_v19  ;;  %v482_v7 = vrot.slane %v368_v36, 1 }
  0x5b   : > { %23257 = vst [vmem:[#allocation81_spill] sm:$0xff] %v18365_v56  ;;  %v483_v40 = vrot.slane %v369_v6, 1  ;;  %15367 = vmatprep.mubr.msk.f32.mxu0 %vm583_vm1, %v18358_v16  ;;  %14472 = vmatprep.mubr.msk.f32.mxu1 %vm583_vm1, %v18088_v26  ;;  %v18395_v39 = vsel %vm4897_vm2, %v6522_v12, %v6524_v48  ;;  %v18397_v22 = vmax.f32 %v11188_v31, %v11247_v46  ;;  %v11250_v27 = vrot.slane %v368_v36, 2  ;;  %v372_v16 = vld [vmem:[%s18005_s13 + $0xe0] sm:$0xff]  ;;  %v373_v31 = vld [vmem:[%s18005_s13 + $0xe8] sm:$0x3] }
  0x5c   : > { %v18387_v32 = vsel %vm680_vm0, %v23259_v25, %v23258_v18  ;;  %23261 = vst [vmem:[#allocation83_spill] sm:$0xff] %v18395_v39  ;;  %v11251_v24 = vrot.slane %v369_v6, 2  ;;  %v18400_v9 = vmax.f32 %v11189_v41, %v11249_v23  ;;  %v485_v18 = vrot.slane %v370_v10, 1 }
  0x5d   : > { %23260 = vst [vmem:[#allocation82_spill] sm:$0xff] %v18387_v32  ;;  %23262 = vst [vmem:[#allocation84_spill] sm:$0xff] %v18397_v22  ;;  %v18403_v34 = vsel %vm446_vm3, %v482_v7, %v483_v40  ;;  %v11253_v25 = vrot.slane %v370_v10, 2  ;;  %v23264_v52 = vrot.slane %v17802_v28, 4  ;;  %v5324_v12 = vrot.slane %v17828_v37, 4  ;;  %v18927_v22 = vld [vmem:[%s17734_s17 + $0x68] sm:$0xff] }
  0x5e   : > { %23263 = vst [vmem:[#allocation85_spill] sm:$0xff] %v18400_v9  ;;  %v11190_v48 = vmax.f32 %v368_v36, %v18403_v34  ;;  %v11252_v46 = vsel %vm1623_vm4, %v11250_v27, %v11251_v24  ;;  %15368 = vmatmul.mubr.msk.f32.gmra.mrb[30].mxu0 %vm583_vm1, %v18395_v39  ;;  %14473 = vmatmul.mubr.msk.f32.vlgmr.msra.gmra.mrb[0].mxu1 %vm583_vm1, %v18113_v33  ;;  %v5325_v10 = vrot.slane %v17831_v38, 4  ;;  %v18427_v36 = vld [vmem:[%s22565_s4 + $0x8] sm:$0xf]  ;;  %v11255_v23 = vrot.slane %v371_v35, 2  ;;  %v18923_v9 = vld [vmem:[%s17734_s17 + $0x60] sm:$0xff] }
  0x5f   : > { %v18409_v26 = vsel %vm680_vm0, %v23264_v52, %v5322_v8  ;;  %v18421_v28 = vsel %vm446_vm3, %v483_v40, %v485_v18  ;;  %v11254_v37 = vsel %vm1623_vm4, %v11251_v24, %v11253_v25  ;;  %v487_v52 = vrot.slane %v371_v35, 1  ;;  %15372 = vmatprep.mubr.msk.f32.mxu0 %vm583_vm1, %v17965_v51  ;;  %14475 = vmatprep.mubr.msk.f32.mxu1 %vm583_vm1, %v18125_v62  ;;  %v374_v24 = vld [vmem:[%s18005_s13 + $0xf0] sm:$0xff]  ;;  %v375_v18 = vld [vmem:[%s18005_s13 + $0xf8] sm:$0xff] }
  0x60   : > { %23265 = vst [vmem:[#allocation86_spill] sm:$0xff] %v18409_v26  ;;  %v18433_v38 = vmax.f32 %v11190_v48, %v11252_v46  ;;  %v11191_v33 = vmax.f32 %v369_v6, %v18421_v28  ;;  %v488_v8 = vrot.slane %v372_v16, 1  ;;  %14521 = vmatpush3.msk.msra.mxu1 %vm680_vm0, %v17757_v11  ;;  %v5327_v41 = vrot.slane %v17842_v43, 4  ;;  %v18453_v11 = vld [vmem:[%s22566_s5 + $0x2c] sm:$0xf]  ;;  %v19085_v39 = vld [vmem:[%s17734_s17 + $0xd8] sm:$0xff] }
  0x61   : > { %v5329_v7 = vrot.slane %v17847_v44, 4  ;;  %v11256_v40 = vrot.slane %v372_v16, 2  ;;  %v490_v27 = vrot.slane %v373_v31, 1  ;;  %v5330_v62 = vrot.slane %v17850_v45, 4  ;;  %14570 = vmatprep.subr.msk.mxu1 %vm680_vm0, %v18427_v36  ;;  %v376_v46 = vld [vmem:[%s18005_s13 + $0x100] sm:$0x3] }
  0x62   : > { %23266 = vst [vmem:[#allocation87_spill] sm:$0xff] %v18433_v38  ;;  %v18443_v25 = vmax.f32 %v11191_v33, %v11254_v37  ;;  %v18446_v6 = vsel %vm446_vm3, %v487_v52, %v488_v8  ;;  %v11258_v48 = vrot.slane %v373_v31, 2  ;;  %15373 = vmatmul.mubr.msk.f32.vlgmr.msra.gmra.mrb[0].mxu0 %vm583_vm1, %v17985_v15  ;;  %14476 = vmatmul.mubr.msk.f32.gmra.mrb[2].mxu1 %vm583_vm1, %v18136_v42  ;;  %v492_v37 = vrot.slane %v374_v24, 1 }
  0x63   : > { %v18460_v43 = vsel %vm680_vm0, %v5324_v12, %v5325_v10  ;;  %v11192_v44 = vmax.f32 %v371_v35, %v18446_v6  ;;  %v11257_v45 = vsel %vm1623_vm4, %v11255_v23, %v11256_v40  ;;  %15421 = vmatpush3.msk.msra.mxu0 %vm680_vm0, %v17807_v29  ;;  %15375 = vmatprep.mubr.msk.f32.mxu0 %vm583_vm1, %v18019_v13  ;;  %v493_v12 = vrot.slane %v375_v18, 1 }
  0x64   : > { %23267 = vst [vmem:[#allocation88_spill] sm:$0xff] %v18443_v25  ;;  %23268 = vst [vmem:[#allocation89_spill] sm:$0xff] %v18460_v43  ;;  %v18470_v31 = vsel %vm446_vm3, %v488_v8, %v490_v27  ;;  %v11259_v42 = vsel %vm1623_vm4, %v11256_v40, %v11258_v48  ;;  %14478 = vmatprep.mubr.msk.f32.mxu1 %vm583_vm1, %v18162_v30  ;;  %v18476_v35 = vsel %vm680_vm0, %v5325_v10, %v5327_v41  ;;  %v377_v10 = vld [vmem:[%s18005_s13 + $0x108] sm:$0xff]  ;;  %v378_v48 = vld [vmem:[%s18005_s13 + $0x110] sm:$0xff] }
  0x65   : > { %23269 = vst [vmem:[#allocation90_spill] sm:$0xff] %v18476_v35  ;;  %v18478_v52 = vmax.f32 %v11192_v44, %v11257_v45  ;;  %v11193_v29 = vmax.f32 %v372_v16, %v18470_v31  ;;  %v11260_v33 = vrot.slane %v374_v24, 2  ;;  %15470 = vmatprep.subr.msk.mxu0 %vm680_vm0, %v18453_v11  ;;  %v18484_v8 = vsel %vm680_vm0, %v5329_v7, %v5330_v62 }
  0x66   : > { %23271 = vst [vmem:[#allocation92_spill] sm:$0xff] %v18484_v8  ;;  %v18487_v23 = vsel %vm446_vm3, %v492_v37, %v493_v12  ;;  %v11261_v40 = vrot.slane %v375_v18, 2  ;;  %v495_v30 = vrot.slane %v376_v46, 1  ;;  %15376 = vmatmul.mubr.msk.f32.gmra.mrb[2].mxu0 %vm583_vm1, %v18365_v56  ;;  %14479 = vmatmul.mubr.msk.f32.gmra.mrb[4].mxu1 %vm583_vm1, %v18179_v17  ;;  %v5332_v16 = vrot.slane %v17870_v53, 4  ;;  %23358 = vst [vmem:[#allocation130_spill] sm:$0xff] %v19085_v39 }
  0x67   : > { %23270 = vst [vmem:[#allocation91_spill] sm:$0xff] %v18478_v52  ;;  %v18495_v41 = vmax.f32 %v11193_v29, %v11259_v42  ;;  %v11194_v7 = vmax.f32 %v374_v24, %v18487_v23  ;;  %v11263_v27 = vrot.slane %v376_v46, 2  ;;  %15378 = vmatprep.mubr.msk.f32.mxu0 %vm583_vm1, %v18387_v32  ;;  %14481 = vmatprep.mubr.msk.f32.mxu1 %vm583_vm1, %v18196_v49  ;;  %v5334_v44 = vrot.slane %v17873_v54, 4  ;;  %v379_v42 = vld [vmem:[%s18005_s13 + $0x118] sm:$0x3] }
  0x68   : > { %v5335_v45 = vrot.slane %v17876_v55, 4  ;;  %v11262_v17 = vsel %vm1623_vm4, %v11260_v33, %v11261_v40  ;;  %v18507_v53 = vsel %vm446_vm3, %v493_v12, %v495_v30  ;;  %v497_v29 = vrot.slane %v377_v10, 1  ;;  %v380_v30 = vld [vmem:[%s18005_s13 + $0x120] sm:$0xff]  ;;  %v19061_v32 = vld [vmem:[%s17734_s17 + $0xd0] sm:$0x3] }
  0x69   : > { %23272 = vst [vmem:[#allocation93_spill] sm:$0xff] %v18495_v41  ;;  %v18510_v24 = vmax.f32 %v11194_v7, %v11262_v17  ;;  %v11195_v46 = vmax.f32 %v375_v18, %v18507_v53  ;;  %v11264_v37 = vsel %vm1623_vm4, %v11261_v40, %v11263_v27  ;;  %v5337_v49 = vrot.slane %v17896_v63, 4  ;;  %v381_v7 = vld [vmem:[%s18005_s13 + $0x128] sm:$0xff] }
  0x6a   : > { %v498_v54 = vrot.slane %v378_v48, 1  ;;  %v11265_v41 = vrot.slane %v377_v10, 2  ;;  %v11266_v55 = vrot.slane %v378_v48, 2  ;;  %15379 = vmatmul.mubr.msk.f32.gmra.mrb[4].mxu0 %vm583_vm1, %v18409_v26  ;;  %14482 = vmatmul.mubr.msk.f32.gmra.mrb[6].mxu1 %vm583_vm1, %v18224_v57  ;;  %v18520_v12 = vsel %vm680_vm0, %v5330_v62, %v5332_v16 }
  0x6b   : > { %23273 = vst [vmem:[#allocation94_spill] sm:$0xff] %v18510_v24  ;;  %23274 = vst [vmem:[#allocation95_spill] sm:$0xff] %v18520_v12  ;;  %v18522_v33 = vmax.f32 %v11195_v46, %v11264_v37  ;;  %v500_v18 = vrot.slane %v379_v42, 1  ;;  %v11268_v40 = vrot.slane %v379_v42, 2  ;;  %15381 = vmatprep.mubr.msk.f32.mxu0 %vm583_vm1, %v18460_v43  ;;  %14484 = vmatprep.mubr.msk.f32.mxu1 %vm583_vm1, %v18257_v14  ;;  %v5339_v57 = vrot.slane %v17899_v0, 4  ;;  %v19057_v43 = vld [vmem:[%s17734_s17 + $0xc8] sm:$0xff] }
  0x6c   : > { %v18531_v63 = vsel %vm680_vm0, %v5334_v44, %v5335_v45  ;;  %v18535_v62 = vsel %vm446_vm3, %v497_v29, %v498_v54  ;;  %v11267_v16 = vsel %vm1623_vm4, %v11265_v41, %v11266_v55  ;;  %v5340_v27 = vrot.slane %v17902_v1, 4  ;;  %v382_v46 = vld [vmem:[%s18005_s13 + $0x130] sm:$0x3]  ;;  %23355 = vst [vmem:[#allocation127_spill] sm:$0xff] %v19057_v43 }
  0x6d   : > { %23275 = vst [vmem:[#allocation96_spill] sm:$0xff] %v18522_v33  ;;  %23276 = vst [vmem:[#allocation97_spill] sm:$0xff] %v18531_v63  ;;  %v11196_v17 = vmax.f32 %v377_v10, %v18535_v62  ;;  %v18541_v42 = vsel %vm446_vm3, %v498_v54, %v500_v18  ;;  %v11269_v14 = vsel %vm1623_vm4, %v11266_v55, %v11268_v40  ;;  %v502_v37 = vrot.slane %v380_v30, 1  ;;  %v23286_v33 = vld [vmem:[#allocation20_spill] sm:$0xff] }
  0x6e   : > { %v18546_v44 = vsel %vm680_vm0, %v5335_v45, %v5337_v49  ;;  %v11197_v0 = vmax.f32 %v378_v48, %v18541_v42  ;;  %v503_v29 = vrot.slane %v381_v7, 1  ;;  %15382 = vmatmul.mubr.msk.f32.gmra.mrb[6].mxu0 %vm583_vm1, %v18476_v35  ;;  %14485 = vmatmul.mubr.msk.f32.gmra.mrb[8].mxu1 %vm583_vm1, %v18279_v60  ;;  %v5342_v1 = vrot.slane %v17905_v2, 4  ;;  %v383_v45 = vld [vmem:[%s18005_s13 + $0x138] sm:$0xff]  ;;  %v384_v2 = vld [vmem:[%s18005_s13 + $0x140] sm:$0xff] }
  0x6f   : > { %23277 = vst [vmem:[#allocation98_spill] sm:$0xff] %v18546_v44  ;;  %v18554_v10 = vmax.f32 %v11196_v17, %v11267_v16  ;;  %v11270_v41 = vrot.slane %v380_v30, 2  ;;  %v11271_v54 = vrot.slane %v381_v7, 2  ;;  %15384 = vmatprep.mubr.msk.f32.mxu0 %vm583_vm1, %v18484_v8  ;;  %14487 = vmatprep.mubr.msk.f32.mxu1 %vm583_vm1, %v18302_v20  ;;  %v505_v60 = vrot.slane %v382_v46, 1  ;;  %v19053_v8 = vld [vmem:[%s17734_s17 + $0xc0] sm:$0xff] }
  0x70   : > { %v18561_v48 = vmax.f32 %v11197_v0, %v11269_v14  ;;  %v18564_v49 = vsel %vm446_vm3, %v502_v37, %v503_v29  ;;  %v11273_v55 = vrot.slane %v382_v46, 2  ;;  %v18568_v18 = vsel %vm680_vm0, %v5339_v57, %v5340_v27 }
  0x71   : > { %23278 = vst [vmem:[#allocation99_spill] sm:$0xff] %v18554_v10  ;;  %23280 = vst [vmem:[#allocation101_spill] sm:$0xff] %v18568_v18  ;;  %v5344_v40 = vrot.slane %v17911_v3, 4  ;;  %v11198_v16 = vmax.f32 %v380_v30, %v18564_v49  ;;  %v11272_v17 = vsel %vm1623_vm4, %v11270_v41, %v11271_v54  ;;  %v385_v10 = vld [vmem:[%s18005_s13 + $0x148] sm:$0x3]  ;;  %v5345_v20 = vrot.slane %v17914_v4, 4 }
  0x72   : > { %23279 = vst [vmem:[#allocation100_spill] sm:$0xff] %v18561_v48  ;;  %v18576_v14 = vsel %vm446_vm3, %v503_v29, %v505_v60  ;;  %v11274_v0 = vsel %vm1623_vm4, %v11271_v54, %v11273_v55  ;;  %v507_v46 = vrot.slane %v383_v45, 1  ;;  %15385 = vmatmul.mubr.msk.f32.gmra.mrb[8].mxu0 %vm583_vm1, %v18520_v12  ;;  %14488 = vmatmul.mubr.msk.f32.gmra.mrb[10].mxu1 %vm583_vm1, %v18330_v5  ;;  %v508_v57 = vrot.slane %v384_v2, 1  ;;  %v23283_v29 = vld [vmem:[#allocation17_spill] sm:$0xff]  ;;  %v386_v60 = vld [vmem:[%s18005_s13 + $0x150] sm:$0xff]  ;;  %v387_v48 = vld [vmem:[%s18005_s13 + $0x158] sm:$0xff] }
  0x73   : > { %v18583_v3 = vmax.f32 %v11198_v16, %v11272_v17  ;;  %v11199_v30 = vmax.f32 %v381_v7, %v18576_v14  ;;  %v11275_v4 = vrot.slane %v383_v45, 2  ;;  %15387 = vmatprep.mubr.msk.f32.mxu0 %vm583_vm1, %v18531_v63  ;;  %14490 = vmatprep.mubr.msk.f32.mxu1 %vm583_vm1, %v18368_v50  ;;  %v18591_v37 = vsel %vm680_vm0, %v5340_v27, %v5342_v1  ;;  %v23284_v55 = vld [vmem:[#allocation19_spill] sm:$0xff] }
  0x74   : > { %23282 = vst [vmem:[#allocation103_spill] sm:$0xff] %v18591_v37  ;;  %v5347_v41 = vrot.slane %v23283_v29, 4  ;;  %v11276_v5 = vrot.slane %v384_v2, 2  ;;  %v510_v54 = vrot.slane %v385_v10, 1  ;;  %v5349_v16 = vrot.slane %v23284_v55, 4  ;;  %v390_v55 = vld [vmem:[%s18005_s13 + $0x170] sm:$0xff] }
  0x75   : > { %23281 = vst [vmem:[#allocation102_spill] sm:$0xff] %v18583_v3  ;;  %v18596_v7 = vmax.f32 %v11199_v30, %v11274_v0  ;;  %v18599_v17 = vsel %vm446_vm3, %v507_v46, %v508_v57  ;;  %v11278_v3 = vrot.slane %v385_v10, 2  ;;  %v5350_v24 = vrot.slane %v23286_v33, 4  ;;  %v388_v29 = vld [vmem:[%s18005_s13 + $0x160] sm:$0x3] }
  0x76   : > { %v11200_v50 = vmax.f32 %v383_v45, %v18599_v17  ;;  %v11277_v27 = vsel %vm1623_vm4, %v11275_v4, %v11276_v5  ;;  %v18606_v1 = vsel %vm446_vm3, %v508_v57, %v510_v54  ;;  %15388 = vmatmul.mubr.msk.f32.gmra.mrb[10].mxu0 %vm583_vm1, %v18546_v44  ;;  %14491 = vmatmul.mubr.msk.f32.gmra.mrb[12].mxu1 %vm583_vm1, %v18374_v19  ;;  %v512_v0 = vrot.slane %v386_v60, 1  ;;  %v19029_v44 = vld [vmem:[%s17734_s17 + $0xb8] sm:$0x3] }
  0x77   : > { %23285 = vst [vmem:[#allocation17_spill] sm:$0xff] %v18596_v7  ;;  %v18614_v10 = vsel %vm680_vm0, %v5344_v40, %v5345_v20  ;;  %v11201_v33 = vmax.f32 %v384_v2, %v18606_v1  ;;  %v11279_v45 = vsel %vm1623_vm4, %v11276_v5, %v11278_v3  ;;  %15390 = vmatprep.mubr.msk.f32.mxu0 %vm583_vm1, %v18568_v18  ;;  %v513_v30 = vrot.slane %v387_v48, 1  ;;  %v23290_v40 = vld [vmem:[#allocation21_spill] sm:$0xff]  ;;  %v389_v5 = vld [vmem:[%s18005_s13 + $0x168] sm:$0xff] }
  0x78   : > { %23287 = vst [vmem:[#allocation19_spill] sm:$0xff] %v18614_v10  ;;  %14493 = vmatprep.mubr.msk.f32.mxu1 %vm583_vm1, %v18403_v34  ;;  %v18622_v46 = vmax.f32 %v11200_v50, %v11277_v27  ;;  %v11280_v57 = vrot.slane %v386_v60, 2  ;;  %v11281_v19 = vrot.slane %v387_v48, 2  ;;  %v18625_v4 = vsel %vm680_vm0, %v5345_v20, %v5347_v41  ;;  %v23293_v20 = vld [vmem:[#allocation22_spill] sm:$0xff] }
  0x79   : > { %23289 = vst [vmem:[#allocation104_spill] sm:$0xff] %v18625_v4  ;;  %v5352_v2 = vrot.slane %v23290_v40, 4  ;;  %v18628_v54 = vmax.f32 %v11201_v33, %v11279_v45  ;;  %v515_v3 = vrot.slane %v388_v29, 1  ;;  %v18633_v7 = vsel %vm680_vm0, %v5349_v16, %v5350_v24  ;;  %v23294_v33 = vld [vmem:[#allocation23_spill] sm:$0xff] }
  0x7a   : > { %23288 = vst [vmem:[#allocation20_spill] sm:$0xff] %v18622_v46  ;;  %23292 = vst [vmem:[#allocation105_spill] sm:$0xff] %v18633_v7  ;;  %v18636_v34 = vsel %vm446_vm3, %v512_v0, %v513_v30  ;;  %v11282_v50 = vsel %vm1623_vm4, %v11280_v57, %v11281_v19  ;;  %v11283_v27 = vrot.slane %v388_v29, 2  ;;  %15391 = vmatmul.mubr.msk.f32.gmra.mrb[12].mxu0 %vm583_vm1, %v18591_v37  ;;  %14494 = vmatmul.mubr.msk.f32.gmra.mrb[14].mxu1 %vm583_vm1, %v18421_v28  ;;  %v391_v0 = vld [vmem:[%s18005_s13 + $0x178] sm:$0x3]  ;;  %v19025_v37 = vld [vmem:[%s17734_s17 + $0xb0] sm:$0xff] }
  0x7b   : > { %23291 = vst [vmem:[#allocation21_spill] sm:$0xff] %v18628_v54  ;;  %v5354_v41 = vrot.slane %v23293_v20, 4  ;;  %v5355_v45 = vrot.slane %v23294_v33, 4  ;;  %v11202_v16 = vmax.f32 %v386_v60, %v18636_v34  ;;  %v18647_v40 = vsel %vm446_vm3, %v513_v30, %v515_v3  ;;  %15393 = vmatprep.mubr.msk.f32.mxu0 %vm583_vm1, %v18614_v10  ;;  %14496 = vmatprep.mubr.msk.f32.mxu1 %vm583_vm1, %v18446_v6  ;;  %v392_v54 = vld [vmem:[%s18005_s13 + $0x180] sm:$0xff]  ;;  %v23297_v46 = vld [vmem:[#allocation24_spill] sm:$0xff] }
  0x7c   : > { %v11203_v28 = vmax.f32 %v387_v48, %v18647_v40  ;;  %v11284_v29 = vsel %vm1623_vm4, %v11281_v19, %v11283_v27  ;;  %v517_v57 = vrot.slane %v389_v5, 1  ;;  %v518_v20 = vrot.slane %v390_v55, 1  ;;  %v393_v19 = vld [vmem:[%s18005_s13 + $0x188] sm:$0xff]  ;;  %v23300_v27 = vld [vmem:[#allocation27_spill] sm:$0xff] }
  0x7d   : > { %v18657_v33 = vsel %vm680_vm0, %v5350_v24, %v5352_v2  ;;  %v18659_v60 = vmax.f32 %v11202_v16, %v11282_v50  ;;  %v11285_v30 = vrot.slane %v389_v5, 2  ;;  %v11286_v3 = vrot.slane %v390_v55, 2 }
  0x7e   : > { %23295 = vst [vmem:[#allocation22_spill] sm:$0xff] %v18657_v33  ;;  %v5357_v52 = vrot.slane %v23297_v46, 4  ;;  %v18663_v25 = vmax.f32 %v11203_v28, %v11284_v29  ;;  %v18666_v6 = vsel %vm446_vm3, %v517_v57, %v518_v20  ;;  %v520_v48 = vrot.slane %v391_v0, 1  ;;  %15394 = vmatmul.mubr.msk.f32.gmra.mrb[14].mxu0 %vm583_vm1, %v18625_v4  ;;  %14497 = vmatmul.mubr.msk.f32.gmra.mrb[16].mxu1 %vm583_vm1, %v18470_v31  ;;  %v23301_v28 = vld [vmem:[#allocation28_spill] sm:$0xff]  ;;  %v394_v57 = vld [vmem:[%s18005_s13 + $0x190] sm:$0x3] }
  0x7f   : > { %23296 = vst [vmem:[#allocation23_spill] sm:$0xff] %v18659_v60  ;;  %v18674_v24 = vsel %vm680_vm0, %v5354_v41, %v5355_v45  ;;  %v11204_v2 = vmax.f32 %v389_v5, %v18666_v6  ;;  %v11287_v46 = vsel %vm1623_vm4, %v11285_v30, %v11286_v3  ;;  %v11288_v50 = vrot.slane %v391_v0, 2  ;;  %15396 = vmatprep.mubr.msk.f32.mxu0 %vm583_vm1, %v18633_v7  ;;  %v19021_v4 = vld [vmem:[%s17734_s17 + $0xa8] sm:$0xff] }
  0x80   : > { %23298 = vst [vmem:[#allocation24_spill] sm:$0xff] %v18663_v25  ;;  %23299 = vst [vmem:[#allocation106_spill] sm:$0xff] %v18674_v24  ;;  %14499 = vmatprep.mubr.msk.f32.mxu1 %vm583_vm1, %v18487_v23  ;;  %v5359_v16 = vrot.slane %v23300_v27, 4  ;;  %v5360_v29 = vrot.slane %v23301_v28, 4  ;;  %v18685_v31 = vsel %vm446_vm3, %v518_v20, %v520_v48  ;;  %v522_v41 = vrot.slane %v392_v54, 1  ;;  %v23308_v28 = vld [vmem:[#allocation33_spill] sm:$0xff] }
  0x81   : > { %v18688_v25 = vmax.f32 %v11204_v2, %v11287_v46  ;;  %v11205_v5 = vmax.f32 %v390_v55, %v18685_v31  ;;  %v11289_v0 = vsel %vm1623_vm4, %v11286_v3, %v11288_v50  ;;  %v523_v30 = vrot.slane %v393_v19, 1  ;;  %v23307_v50 = vld [vmem:[#allocation32_spill] sm:$0xff] }
  0x82   : > { %v18693_v60 = vsel %vm680_vm0, %v5355_v45, %v5357_v52  ;;  %v11290_v23 = vrot.slane %v392_v54, 2  ;;  %v11291_v38 = vrot.slane %v393_v19, 2  ;;  %15397 = vmatmul.mubr.msk.f32.gmra.mrb[16].mxu0 %vm583_vm1, %v18657_v33  ;;  %14500 = vmatmul.mubr.msk.f32.gmra.mrb[18].mxu1 %vm583_vm1, %v18507_v53  ;;  %v525_v2 = vrot.slane %v394_v57, 1  ;;  %v23306_v45 = vld [vmem:[#allocation29_spill] sm:$0xff] }
  0x83   : > { %23302 = vst [vmem:[#allocation27_spill] sm:$0xff] %v18688_v25  ;;  %23303 = vst [vmem:[#allocation28_spill] sm:$0xff] %v18693_v60  ;;  %v18699_v20 = vmax.f32 %v11205_v5, %v11289_v0  ;;  %v524_v48 = vsel %vm446_vm3, %v522_v41, %v523_v30  ;;  %v11293_v55 = vrot.slane %v394_v57, 2  ;;  %15399 = vmatprep.mubr.msk.f32.mxu0 %vm583_vm1, %v18674_v24  ;;  %14502 = vmatprep.mubr.msk.f32.mxu1 %vm583_vm1, %v18535_v62  ;;  %v18997_v24 = vld [vmem:[%s17734_s17 + $0xa0] sm:$0x3] }
  0x84   : > { %v18707_v52 = vsel %vm680_vm0, %v5359_v16, %v5360_v29  ;;  %v5362_v3 = vrot.slane %v23306_v45, 4  ;;  %v11206_v46 = vmax.f32 %v392_v54, %v524_v48  ;;  %v11292_v53 = vsel %vm1623_vm4, %v11290_v23, %v11291_v38 }
  0x85   : > { %23304 = vst [vmem:[#allocation107_spill] sm:$0xff] %v18699_v20  ;;  %23305 = vst [vmem:[#allocation108_spill] sm:$0xff] %v18707_v52  ;;  %v5364_v27 = vrot.slane %v23307_v50, 4  ;;  %v5365_v41 = vrot.slane %v23308_v28, 4  ;;  %v18714_v57 = vsel %vm446_vm3, %v523_v30, %v525_v2  ;;  %v11294_v5 = vsel %vm1623_vm4, %v11291_v38, %v11293_v55  ;;  %v23311_v38 = vld [vmem:[#allocation36_spill] sm:$0xff]  ;;  %v23315_v55 = vld [vmem:[#allocation39_spill] sm:$0xff] }
  0x86   : > { %v18717_v0 = vmax.f32 %v11206_v46, %v11292_v53  ;;  %v11207_v62 = vmax.f32 %v393_v19, %v18714_v57  ;;  %15400 = vmatmul.mubr.msk.f32.gmra.mrb[18].mxu0 %vm583_vm1, %v18693_v60  ;;  %14503 = vmatmul.mubr.msk.f32.gmra.mrb[20].mxu1 %vm583_vm1, %v18541_v42  ;;  %v18729_v54 = vsel %vm680_vm0, %v5360_v29, %v5362_v3  ;;  %v5367_v16 = vrot.slane %v23311_v38, 4  ;;  %v23314_v42 = vld [vmem:[#allocation38_spill] sm:$0xff]  ;;  %v23317_v3 = vld [vmem:[#allocation44_spill] sm:$0xff]  ;;  %v23320_v28 = vld [vmem:[#allocation57_spill] sm:$0xff] }
  0x87   : > { %15402 = vmatprep.mubr.msk.f32.mxu0 %vm583_vm1, %v18707_v52  ;;  %14505 = vmatprep.mubr.msk.f32.mxu1 %vm583_vm1, %v18564_v49  ;;  %23310 = vst [vmem:[#allocation32_spill] sm:$0xff] %v18729_v54  ;;  %v18737_v23 = vsel %vm680_vm0, %v5364_v27, %v5365_v41  ;;  %v5369_v2 = vrot.slane %v23314_v42, 4  ;;  %v5370_v45 = vrot.slane %v23315_v55, 4  ;;  %v5372_v46 = vrot.slane %v23317_v3, 4  ;;  %v23319_v50 = vld [vmem:[#allocation56_spill] sm:$0xff]  ;;  %v23324_v38 = vld [vmem:[#allocation63_spill] sm:$0xff] }
  0x88   : > { %23309 = vst [vmem:[#allocation29_spill] sm:$0xff] %v18717_v0  ;;  %v18734_v30 = vmax.f32 %v11207_v62, %v11294_v5  ;;  %23313 = vst [vmem:[#allocation36_spill] sm:$0xff] %v18737_v23  ;;  %v18752_v29 = vsel %vm680_vm0, %v5365_v41, %v5367_v16  ;;  %v5374_v27 = vrot.slane %v23319_v50, 4  ;;  %v5375_v5 = vrot.slane %v23320_v28, 4  ;;  %v23325_v42 = vld [vmem:[#allocation64_spill] sm:$0xff]  ;;  %v18883_v49 = vld [vmem:[%s17734_s17 + $0x50] sm:$0xff] }
  0x89   : > { %23316 = vst [vmem:[#allocation38_spill] sm:$0xff] %v18752_v29  ;;  %v18756_v53 = vsel %vm680_vm0, %v5369_v2, %v5370_v45  ;;  %v5379_v16 = vrot.slane %v23324_v38, 4  ;;  %v6793_v28 = vrot.slane %v18290_v47, 4  ;;  %v18813_v38 = vld [vmem:[%s17734_s17 + $0x20] sm:$0xff]  ;;  %23342 = vst [vmem:[#allocation114_spill] sm:$0xff] %v18883_v49  ;;  %v1233_v19 = vrot.slane %v18883_v49, 1 }
  0x8a   : > { %23312 = vst [vmem:[#allocation33_spill] sm:$0xff] %v18734_v30  ;;  %15403 = vmatmul.mubr.msk.f32.gmra.mrb[20].mxu0 %vm583_vm1, %v18729_v54  ;;  %14506 = vmatmul.mubr.msk.f32.gmra.mrb[22].mxu1 %vm583_vm1, %v18576_v14  ;;  %23318 = vst [vmem:[#allocation39_spill] sm:$0xff] %v18756_v53  ;;  %v18769_v14 = vsel %vm680_vm0, %v5370_v45, %v5372_v46  ;;  %v18773_v62 = vsel %vm680_vm0, %v5374_v27, %v5375_v5  ;;  %v23327_v45 = vld [vmem:[#allocation70_spill] sm:$0xff]  ;;  %v18887_v30 = vld [vmem:[%s17734_s17 + $0x58] sm:$0x3]  ;;  %v1238_v15 = vrot.slane %v18927_v22, 1 }
  0x8b   : > { %15405 = vmatprep.mubr.msk.f32.mxu0 %vm583_vm1, %v18737_v23  ;;  %14508 = vmatprep.mubr.msk.f32.mxu1 %vm583_vm1, %v18599_v17  ;;  %23321 = vst [vmem:[#allocation44_spill] sm:$0xff] %v18769_v14  ;;  %v23322_v17 = vld [vmem:[#allocation60_spill] sm:$0xff]  ;;  %23323 = vst [vmem:[#allocation56_spill] sm:$0xff] %v18773_v62  ;;  %v5382_v3 = vrot.slane %v23327_v45, 4  ;;  %v17384_v46 = vld [vmem:[%s17734_s17 + $0x8] sm:$0xff]  ;;  %v1235_v20 = vrot.slane %v18887_v30, 1 }
  0x8c   : > { %v5377_v41 = vrot.slane %v23322_v17, 4  ;;  %v1625_v50 = vrot.slane %v17384_v46, 2  ;;  %v530_v17 = vld [vmem:[%s17734_s17 + $0x10] sm:$0x3]  ;;  %23331 = vst [vmem:[#allocation70_spill] sm:$0xff] %v18813_v38  ;;  %v23335_v45 = vld [vmem:[#allocation5_spill] sm:$0xff] }
  0x8d   : > { %v18950_v51 = vsel %vm446_vm3, %v1233_v19, %v1235_v20  ;;  %v18968_v20 = vld [vmem:[%s17739_s20 + $0x68] sm:$0xff]  ;;  %v18989_v23 = vld [vmem:[%s17734_s17 + $0x90] sm:$0xff]  ;;  %v18993_v52 = vld [vmem:[%s17734_s17 + $0x98] sm:$0xff]  ;;  %v1250_v33 = vrot.slane %v18997_v24, 1  ;;  %v1252_v10 = vrot.slane %v19021_v4, 1  ;;  %v1253_v18 = vrot.slane %v19025_v37, 1 }
  0x8e   : > { %15406 = vmatmul.mubr.msk.f32.gmra.mrb[22].mxu0 %vm583_vm1, %v18752_v29  ;;  %14509 = vmatmul.mubr.msk.f32.gmra.mrb[24].mxu1 %vm583_vm1, %v18606_v1  ;;  %v5380_v1 = vrot.slane %v23325_v42, 4  ;;  %v18787_v55 = vsel %vm680_vm0, %v5375_v5, %v5377_v41  ;;  %v6795_v5 = vrot.slane %v18326_v21, 4  ;;  %v18809_v41 = vld [vmem:[%s17734_s17 + $0x18] sm:$0xff]  ;;  %v1627_v21 = vrot.slane %v530_v17, 2  ;;  %23347 = vst [vmem:[#allocation119_spill] sm:$0xff] %v18950_v51 }
  0x8f   : > { %15408 = vmatprep.mubr.msk.f32.mxu0 %vm583_vm1, %v18756_v53  ;;  %14511 = vmatprep.mubr.msk.f32.mxu1 %vm583_vm1, %v18636_v34  ;;  %v17383_v34 = vld [vmem:[%s17734_s17] sm:$0xff]  ;;  %23326 = vst [vmem:[#allocation57_spill] sm:$0xff] %v18787_v55  ;;  %23330 = vst [vmem:[#allocation64_spill] sm:$0xff] %v18809_v41  ;;  %v1222_v47 = vrot.slane %v18809_v41, 1  ;;  %v1247_v54 = vrot.slane %v18989_v23, 1  ;;  %v1248_v60 = vrot.slane %v18993_v52, 1  ;;  %v19050_v12 = vsel %vm446_vm3, %v1252_v10, %v1253_v18 }
  0x90   : > { %v1624_v2 = vrot.slane %v17383_v34, 2  ;;  %v18792_v27 = vsel %vm680_vm0, %v5379_v16, %v5380_v1  ;;  %v18834_v34 = vsel %vm680_vm0, %v6793_v28, %v6795_v5  ;;  %v18854_v5 = vld [vmem:[%s17734_s17 + $0x38] sm:$0xff]  ;;  %v1255_v63 = vrot.slane %v19029_v44, 1  ;;  %23354 = vst [vmem:[#allocation126_spill] sm:$0xff] %v19050_v12  ;;  %v19071_v10 = vld [vmem:[%s17739_s20 + $0xc0] sm:$0xff] }
  0x91   : > { %23328 = vst [vmem:[#allocation60_spill] sm:$0xff] %v18792_v27  ;;  %23338 = vst [vmem:[#allocation110_spill] sm:$0xff] %v18854_v5  ;;  %v19018_v7 = vsel %vm446_vm3, %v1247_v54, %v1248_v60  ;;  %v19039_v54 = vld [vmem:[%s17739_s20 + $0xa8] sm:$0xff]  ;;  %v1257_v35 = vrot.slane %v19053_v8, 1  ;;  %v1258_v26 = vrot.slane %v19057_v43, 1  ;;  %v1260_v56 = vrot.slane %v19061_v32, 1 }
  0x92   : > { %15409 = vmatmul.mubr.msk.f32.gmra.mrb[24].mxu0 %vm583_vm1, %v18769_v14  ;;  %14512 = vmatmul.mubr.msk.f32.gmra.mrb[26].mxu1 %vm583_vm1, %v18647_v40  ;;  %v6792_v40 = vrot.slane %v18287_v61, 4  ;;  %v1220_v61 = vrot.slane %v530_v17, 1  ;;  %v18823_v42 = vsel %vm1623_vm4, %v1624_v2, %v1625_v50  ;;  %v23336_v2 = vrot.slane %v23335_v45, 1  ;;  %v18847_v17 = vld [vmem:[%s17734_s17 + $0x40] sm:$0x3]  ;;  %23352 = vst [vmem:[#allocation124_spill] sm:$0xff] %v19018_v7 }
  0x93   : > { %15411 = vmatprep.mubr.msk.f32.mxu0 %vm583_vm1, %v18773_v62  ;;  %14514 = vmatprep.mubr.msk.f32.mxu1 %vm583_vm1, %v18666_v6  ;;  %v18805_v6 = vsel %vm680_vm0, %v5380_v1, %v5382_v3  ;;  %v23333_v1 = vld [vmem:[#allocation6_spill] sm:$0xff]  ;;  %v1230_v45 = vrot.slane %v18847_v17, 1  ;;  %v19082_v13 = vsel %vm446_vm3, %v1257_v35, %v1258_v26  ;;  %v19103_v35 = vld [vmem:[%s17739_s20 + $0xd8] sm:$0xff] }
  0x94   : > { %23329 = vst [vmem:[#allocation63_spill] sm:$0xff] %v18805_v6  ;;  %v18817_v16 = vsel %vm680_vm0, %v6792_v40, %v6793_v28  ;;  %23334 = vst [vmem:[#allocation6_spill] sm:$0xff] %v18834_v34  ;;  %v1221_v3 = vsel %vm446_vm3, %v23336_v2, %v1220_v61  ;;  %v18841_v40 = vsel %vm1623_vm4, %v1625_v50, %v1627_v21  ;;  %v1228_v61 = vrot.slane %v18854_v5, 1  ;;  %v18863_v50 = vld [vmem:[%s22565_s4 + $0xc] sm:$0xf] }
  0x95   : > { %23332 = vst [vmem:[#allocation109_spill] sm:$0xff] %v18817_v16  ;;  %v18879_v2 = vld [vmem:[%s17734_s17 + $0x48] sm:$0xff]  ;;  %23357 = vst [vmem:[#allocation129_spill] sm:$0xff] %v19082_v13 }
  0x96   : > { %15412 = vmatmul.mubr.msk.f32.gmra.mrb[26].mxu0 %vm583_vm1, %v18787_v55  ;;  %14515 = vmatmul.mubr.msk.f32.gmra.mrb[28].mxu1 %vm583_vm1, %v18685_v31  ;;  %v1223_v31 = vrot.slane %v18813_v38, 1  ;;  %23341 = vst [vmem:[#allocation113_spill] sm:$0xff] %v18879_v2  ;;  %v18914_v0 = vsel %vm446_vm3, %v1228_v61, %v1230_v45  ;;  %v18936_v45 = vld [vmem:[%s17739_s20 + $0x50] sm:$0xff]  ;;  %v18961_v55 = vld [vmem:[%s17734_s17 + $0x80] sm:$0xff]  ;;  %v18965_v14 = vld [vmem:[%s17734_s17 + $0x88] sm:$0x3] }
  0x97   : > { %15414 = vmatprep.mubr.msk.f32.mxu0 %vm583_vm1, %v18792_v27  ;;  %14517 = vmatprep.mubr.msk.f32.mxu1 %vm583_vm1, %v524_v48  ;;  %v18820_v48 = vld [vmem:[%s17734_s17 + $0x28] sm:$0x3]  ;;  %23345 = vst [vmem:[#allocation117_spill] sm:$0xff] %v18914_v0  ;;  %v1243_v62 = vrot.slane %v18961_v55, 1  ;;  %v1245_v53 = vrot.slane %v18965_v14, 1 }
  0x98   : > { %v1225_v46 = vrot.slane %v18820_v48, 1 }
  0x9a   : > { %15415 = vmatmul.mubr.msk.f32.gmra.mrb[28].mxu0 %vm583_vm1, %v18805_v6  ;;  %14518 = vmatmul.mubr.msk.f32.gmra.mrb[30].mxu1 %vm583_vm1, %v18714_v57  ;;  %v18844_v57 = vsel %vm446_vm3, %v1222_v47, %v1223_v31  ;;  %v18866_v47 = vld [vmem:[%s17739_s20 + $0x30] sm:$0xff]  ;;  %v18873_v21 = vsel %vm446_vm3, %v1223_v31, %v1225_v46  ;;  %v18900_v46 = vld [vmem:[%s17739_s20 + $0x38] sm:$0xff] }
  0x9b   : > { %15417 = vmatprep.mubr.msk.f32.mxu0 %vm583_vm1, %v18817_v16  ;;  %14522 = vmatprep.mubr.msk.f32.mxu1 %vm583_vm1, %v23333_v1  ;;  %23337 = vst [vmem:[#allocation5_spill] sm:$0xff] %v18844_v57  ;;  %v18850_v1 = vld [vmem:[%s17734_s17 + $0x30] sm:$0xff]  ;;  %23339 = vst [vmem:[#allocation111_spill] sm:$0xff] %v18866_v47  ;;  %v18957_v6 = vld [vmem:[%s17734_s17 + $0x78] sm:$0xff] }
  0x9c   : > { %v1227_v28 = vrot.slane %v18850_v1, 1  ;;  %23340 = vst [vmem:[#allocation112_spill] sm:$0xff] %v18873_v21  ;;  %23344 = vst [vmem:[#allocation116_spill] sm:$0xff] %v18900_v46  ;;  %v1242_v27 = vrot.slane %v18957_v6, 1 }
  0x9e   : > { %15418 = vmatmul.mubr.msk.f32.gmra.mrb[30].mxu0 %vm583_vm1, %v18834_v34  ;;  %14523 = vmatmul.mubr.msk.f32.vlgmr.msra.gmra.mrb[0].mxu1 %vm583_vm1, %v1221_v3  ;;  %v1232_v3 = vrot.slane %v18879_v2, 1  ;;  %v18890_v31 = vsel %vm446_vm3, %v1227_v28, %v1228_v61  ;;  %v18909_v28 = vld [vmem:[%s17739_s20 + $0x48] sm:$0xff]  ;;  %v18931_v61 = vld [vmem:[%s17734_s17 + $0x70] sm:$0x3]  ;;  %v18986_v29 = vsel %vm446_vm3, %v1242_v27, %v1243_v62 }
  0x9f   : > { %15422 = vmatprep.mubr.msk.f32.mxu0 %vm583_vm1, %v18866_v47  ;;  %14525 = vmatprep.mubr.msk.f32.mxu1 %vm583_vm1, %v18844_v57  ;;  %23343 = vst [vmem:[#allocation115_spill] sm:$0xff] %v18890_v31  ;;  %v1240_v34 = vrot.slane %v18931_v61, 1  ;;  %23350 = vst [vmem:[#allocation122_spill] sm:$0xff] %v18986_v29  ;;  %v19007_v27 = vld [vmem:[%s17739_s20 + $0x90] sm:$0xff] }
  0xa0   : > { %14571 = vmatpush3.msk.msra.mxu1 %vm680_vm0, %v18427_v36  ;;  %v18897_v36 = vld [vmem:[%s22566_s5 + $0x30] sm:$0xf]  ;;  %v18920_v25 = vsel %vm446_vm3, %v1232_v3, %v1233_v19  ;;  %v18943_v3 = vld [vmem:[%s17739_s20 + $0x60] sm:$0xff]  ;;  %v18975_v19 = vld [vmem:[%s17739_s20 + $0x78] sm:$0xff] }
  0xa1   : > { %14620 = vmatprep.subr.msk.mxu1 %vm680_vm0, %v18863_v50  ;;  %23346 = vst [vmem:[#allocation118_spill] sm:$0xff] %v18920_v25  ;;  %v19153_v57 = vld [vmem:[%s17734_s17 + $0x110] sm:$0xff] }
  0xa2   : > { %15423 = vmatmul.mubr.msk.f32.vlgmr.msra.gmra.mrb[0].mxu0 %vm583_vm1, %v18900_v46  ;;  %14526 = vmatmul.mubr.msk.f32.gmra.mrb[2].mxu1 %vm583_vm1, %v18873_v21  ;;  %v19149_v21 = vld [vmem:[%s17734_s17 + $0x108] sm:$0xff]  ;;  %23369 = vst [vmem:[#allocation141_spill] sm:$0xff] %v19153_v57 }
  0xa3   : > { %15471 = vmatpush3.msk.msra.mxu0 %vm680_vm0, %v18453_v11  ;;  %15425 = vmatprep.mubr.msk.f32.mxu0 %vm583_vm1, %v18909_v28  ;;  %v1237_v11 = vrot.slane %v18923_v9, 1  ;;  %23368 = vst [vmem:[#allocation140_spill] sm:$0xff] %v19149_v21 }
  0xa4   : > { %14528 = vmatprep.mubr.msk.f32.mxu1 %vm583_vm1, %v18890_v31  ;;  %15520 = vmatprep.subr.msk.mxu0 %vm680_vm0, %v18897_v36 }
  0xa5   : > { %v18954_v16 = vsel %vm446_vm3, %v1237_v11, %v1238_v15  ;;  %v18982_v11 = vsel %vm446_vm3, %v1238_v15, %v1240_v34  ;;  %v19000_v15 = vld [vmem:[%s17739_s20 + $0x80] sm:$0xff]  ;;  %v19014_v34 = vsel %vm446_vm3, %v1243_v62, %v1245_v53  ;;  %v19032_v53 = vld [vmem:[%s17739_s20 + $0x98] sm:$0xff]  ;;  %v19046_v62 = vsel %vm446_vm3, %v1248_v60, %v1250_v33  ;;  %v19064_v33 = vld [vmem:[%s17739_s20 + $0xb0] sm:$0xff] }
  0xa6   : > { %15426 = vmatmul.mubr.msk.f32.gmra.mrb[2].mxu0 %vm583_vm1, %v18936_v45  ;;  %14529 = vmatmul.mubr.msk.f32.gmra.mrb[4].mxu1 %vm583_vm1, %v18914_v0  ;;  %23348 = vst [vmem:[#allocation120_spill] sm:$0xff] %v18954_v16  ;;  %23349 = vst [vmem:[#allocation121_spill] sm:$0xff] %v18982_v11  ;;  %v19078_v60 = vsel %vm446_vm3, %v1253_v18, %v1255_v63  ;;  %v19096_v63 = vld [vmem:[%s17739_s20 + $0xc8] sm:$0xff]  ;;  %v19110_v18 = vsel %vm446_vm3, %v1258_v26, %v1260_v56  ;;  %v19128_v56 = vld [vmem:[%s17739_s20 + $0xe0] sm:$0xff] }
  0xa7   : > { %15428 = vmatprep.mubr.msk.f32.mxu0 %vm583_vm1, %v18943_v3  ;;  %14531 = vmatprep.mubr.msk.f32.mxu1 %vm583_vm1, %v18920_v25  ;;  %23351 = vst [vmem:[#allocation123_spill] sm:$0xff] %v19014_v34  ;;  %23353 = vst [vmem:[#allocation125_spill] sm:$0xff] %v19046_v62  ;;  %v19135_v26 = vld [vmem:[%s17739_s20 + $0xf0] sm:$0xff] }
  0xa8   : > { %23356 = vst [vmem:[#allocation128_spill] sm:$0xff] %v19078_v60  ;;  %23361 = vst [vmem:[#allocation133_spill] sm:$0xff] %v19110_v18 }
  0xaa   : > { %15429 = vmatmul.mubr.msk.f32.gmra.mrb[4].mxu0 %vm583_vm1, %v18968_v20  ;;  %14532 = vmatmul.mubr.msk.f32.gmra.mrb[6].mxu1 %vm583_vm1, %v18950_v51  ;;  %v19121_v51 = vld [vmem:[%s17734_s17 + $0xf8] sm:$0xff] }
  0xab   : > { %15431 = vmatprep.mubr.msk.f32.mxu0 %vm583_vm1, %v18975_v19  ;;  %14534 = vmatprep.mubr.msk.f32.mxu1 %vm583_vm1, %v18954_v16  ;;  %v19117_v16 = vld [vmem:[%s17734_s17 + $0xf0] sm:$0xff]  ;;  %23364 = vst [vmem:[#allocation136_spill] sm:$0xff] %v19121_v51  ;;  %v1268_v25 = vrot.slane %v19121_v51, 1  ;;  %v1273_v51 = vrot.slane %v19153_v57, 1 }
  0xac   : > { %23363 = vst [vmem:[#allocation135_spill] sm:$0xff] %v19117_v16 }
  0xae   : > { %15432 = vmatmul.mubr.msk.f32.gmra.mrb[6].mxu0 %vm583_vm1, %v19000_v15  ;;  %14535 = vmatmul.mubr.msk.f32.gmra.mrb[8].mxu1 %vm583_vm1, %v18982_v11 }
  0xaf   : > { %15434 = vmatprep.mubr.msk.f32.mxu0 %vm583_vm1, %v19007_v27  ;;  %14537 = vmatprep.mubr.msk.f32.mxu1 %vm583_vm1, %v18986_v29 }
  0xb2   : > { %15435 = vmatmul.mubr.msk.f32.gmra.mrb[8].mxu0 %vm583_vm1, %v19032_v53  ;;  %14538 = vmatmul.mubr.msk.f32.gmra.mrb[10].mxu1 %vm583_vm1, %v19014_v34 }
  0xb3   : > { %15437 = vmatprep.mubr.msk.f32.mxu0 %vm583_vm1, %v19039_v54  ;;  %14540 = vmatprep.mubr.msk.f32.mxu1 %vm583_vm1, %v19018_v7  ;;  %v19089_v7 = vld [vmem:[%s17734_s17 + $0xe0] sm:$0xff] }
  0xb4   : > { %23359 = vst [vmem:[#allocation131_spill] sm:$0xff] %v19089_v7  ;;  %v1263_v34 = vrot.slane %v19089_v7, 1 }
  0xb6   : > { %15438 = vmatmul.mubr.msk.f32.gmra.mrb[10].mxu0 %vm583_vm1, %v19064_v33  ;;  %14541 = vmatmul.mubr.msk.f32.gmra.mrb[12].mxu1 %vm583_vm1, %v19046_v62  ;;  %v1262_v62 = vrot.slane %v19085_v39, 1 }
  0xb7   : > { %15440 = vmatprep.mubr.msk.f32.mxu0 %vm583_vm1, %v19071_v10  ;;  %14543 = vmatprep.mubr.msk.f32.mxu1 %vm583_vm1, %v19050_v12  ;;  %v19093_v12 = vld [vmem:[%s17734_s17 + $0xe8] sm:$0x3] }
  0xb8   : > { %23360 = vst [vmem:[#allocation132_spill] sm:$0xff] %v19093_v12  ;;  %v1265_v29 = vrot.slane %v19093_v12, 1  ;;  %v19114_v11 = vsel %vm446_vm3, %v1262_v62, %v1263_v34  ;;  %v19186_v12 = vld [vmem:[%s17734_s17 + $0x130] sm:$0x3] }
  0xb9   : > { %23362 = vst [vmem:[#allocation134_spill] sm:$0xff] %v19114_v11 }
  0xba   : > { %15441 = vmatmul.mubr.msk.f32.gmra.mrb[12].mxu0 %vm583_vm1, %v19096_v63  ;;  %14544 = vmatmul.mubr.msk.f32.gmra.mrb[14].mxu1 %vm583_vm1, %v19078_v60  ;;  %v1267_v60 = vrot.slane %v19117_v16, 1  ;;  %v19142_v62 = vsel %vm446_vm3, %v1263_v34, %v1265_v29  ;;  %v19160_v29 = vld [vmem:[%s17739_s20 + $0xf8] sm:$0xff]  ;;  %v19167_v34 = vld [vmem:[%s17739_s20 + $0x108] sm:$0xff] }
  0xbb   : > { %15443 = vmatprep.mubr.msk.f32.mxu0 %vm583_vm1, %v19103_v35  ;;  %14546 = vmatprep.mubr.msk.f32.mxu1 %vm583_vm1, %v19082_v13  ;;  %v19125_v13 = vld [vmem:[%s17734_s17 + $0x100] sm:$0x3]  ;;  %23366 = vst [vmem:[#allocation138_spill] sm:$0xff] %v19142_v62  ;;  %23371 = vst [vmem:[#allocation143_spill] sm:$0xff] %v19160_v29  ;;  %v23376_v16 = vld [vmem:[#allocation62_spill] sm:$0xff] }
  0xbc   : > { %23365 = vst [vmem:[#allocation137_spill] sm:$0xff] %v19125_v13  ;;  %v1270_v0 = vrot.slane %v19125_v13, 1  ;;  %v19146_v31 = vsel %vm446_vm3, %v1267_v60, %v1268_v25  ;;  %23372 = vst [vmem:[#allocation144_spill] sm:$0xff] %v19167_v34  ;;  %v19181_v13 = vld [vmem:[%s17734_s17 + $0x120] sm:$0xff] }
  0xbd   : > { %23367 = vst [vmem:[#allocation139_spill] sm:$0xff] %v19146_v31  ;;  %23375 = vst [vmem:[#allocation147_spill] sm:$0xff] %v19181_v13 }
  0xbe   : > { %15444 = vmatmul.mubr.msk.f32.gmra.mrb[14].mxu0 %vm583_vm1, %v19128_v56  ;;  %14547 = vmatmul.mubr.msk.f32.gmra.mrb[16].mxu1 %vm583_vm1, %v19110_v18  ;;  %v1272_v18 = vrot.slane %v19149_v21, 1  ;;  %v19174_v60 = vsel %vm446_vm3, %v1268_v25, %v1270_v0  ;;  %23377 = vst [vmem:[#allocation62_spill] sm:$0xff] %v19186_v12  ;;  %v19196_v25 = vld [vmem:[%s17739_s20 + $0x120] sm:$0xff] }
  0xbf   : > { %15446 = vmatprep.mubr.msk.f32.mxu0 %vm583_vm1, %v19135_v26  ;;  %14549 = vmatprep.mubr.msk.f32.mxu1 %vm583_vm1, %v19114_v11  ;;  %v19157_v11 = vld [vmem:[%s17734_s17 + $0x118] sm:$0x3]  ;;  %23373 = vst [vmem:[#allocation145_spill] sm:$0xff] %v19174_v60  ;;  %23379 = vst [vmem:[#allocation149_spill] sm:$0xff] %v19196_v25 }
  0xc0   : > { %23370 = vst [vmem:[#allocation142_spill] sm:$0xff] %v19157_v11  ;;  %v1275_v57 = vrot.slane %v19157_v11, 1  ;;  %v19178_v21 = vsel %vm446_vm3, %v1272_v18, %v1273_v51  ;;  %v23383_v11 = vld [vmem:[#allocation68_spill] sm:$0xff] }
  0xc1   : > { %23374 = vst [vmem:[#allocation146_spill] sm:$0xff] %v19178_v21 }
  0xc2   : > { %15447 = vmatmul.mubr.msk.f32.gmra.mrb[16].mxu0 %vm583_vm1, %v19160_v29  ;;  %14550 = vmatmul.mubr.msk.f32.gmra.mrb[18].mxu1 %vm583_vm1, %v19142_v62  ;;  %v1277_v62 = vrot.slane %v19181_v13, 1  ;;  %v19203_v0 = vsel %vm446_vm3, %v1273_v51, %v1275_v57  ;;  %v19210_v13 = vld [vmem:[%s17734_s17 + $0x138] sm:$0xff] }
  0xc3   : > { %15449 = vmatprep.mubr.msk.f32.mxu0 %vm583_vm1, %v19167_v34  ;;  %14552 = vmatprep.mubr.msk.f32.mxu1 %vm583_vm1, %v19146_v31  ;;  %v1278_v34 = vrot.slane %v23376_v16, 1  ;;  %v19189_v31 = vld [vmem:[%s17739_s20 + $0x110] sm:$0xff]  ;;  %23380 = vst [vmem:[#allocation150_spill] sm:$0xff] %v19203_v0  ;;  %v1280_v16 = vrot.slane %v19186_v12, 1  ;;  %23382 = vst [vmem:[#allocation152_spill] sm:$0xff] %v19210_v13  ;;  %v19225_v51 = vld [vmem:[%s17739_s20 + $0x138] sm:$0xff] }
  0xc4   : > { %23378 = vst [vmem:[#allocation148_spill] sm:$0xff] %v19189_v31  ;;  %23386 = vst [vmem:[#allocation154_spill] sm:$0xff] %v19225_v51  ;;  %v1288_v12 = vrot.slane %v18311_v59, 1 }
  0xc5   : > { %v19207_v18 = vsel %vm446_vm3, %v1277_v62, %v1278_v34  ;;  %v19232_v57 = vsel %vm446_vm3, %v1278_v34, %v1280_v16  ;;  %v19251_v34 = vld [vmem:[%s17739_s20 + $0x150] sm:$0xff] }
  0xc6   : > { %15450 = vmatmul.mubr.msk.f32.gmra.mrb[18].mxu0 %vm583_vm1, %v19189_v31  ;;  %14553 = vmatmul.mubr.msk.f32.gmra.mrb[20].mxu1 %vm583_vm1, %v19174_v60  ;;  %23381 = vst [vmem:[#allocation151_spill] sm:$0xff] %v19207_v18  ;;  %v1282_v60 = vrot.slane %v19210_v13, 1  ;;  %v1283_v31 = vrot.slane %v23383_v11, 1  ;;  %23387 = vst [vmem:[#allocation155_spill] sm:$0xff] %v19232_v57  ;;  %v23389_v13 = vld [vmem:[#allocation71_spill] sm:$0xff] }
  0xc7   : > { %15452 = vmatprep.mubr.msk.f32.mxu0 %vm583_vm1, %v19196_v25  ;;  %14555 = vmatprep.mubr.msk.f32.mxu1 %vm583_vm1, %v19178_v21  ;;  %v19215_v25 = vld [vmem:[%s17734_s17 + $0x148] sm:$0x3]  ;;  %23390 = vst [vmem:[#allocation71_spill] sm:$0xff] %v19251_v34  ;;  %v23393_v16 = vld [vmem:[#allocation75_spill] sm:$0xff] }
  0xc8   : > { %23384 = vst [vmem:[#allocation68_spill] sm:$0xff] %v19215_v25  ;;  %v19218_v21 = vld [vmem:[%s17739_s20 + $0x128] sm:$0xff]  ;;  %v1285_v11 = vrot.slane %v19215_v25, 1  ;;  %v19236_v62 = vsel %vm446_vm3, %v1282_v60, %v1283_v31  ;;  %v19267_v25 = vld [vmem:[%s17734_s17 + $0x178] sm:$0x3] }
  0xc9   : > { %23385 = vst [vmem:[#allocation153_spill] sm:$0xff] %v19218_v21  ;;  %23388 = vst [vmem:[#allocation156_spill] sm:$0xff] %v19236_v62 }
  0xca   : > { %15453 = vmatmul.mubr.msk.f32.gmra.mrb[20].mxu0 %vm583_vm1, %v19218_v21  ;;  %14556 = vmatmul.mubr.msk.f32.gmra.mrb[22].mxu1 %vm583_vm1, %v19203_v0  ;;  %v1287_v0 = vrot.slane %v23389_v13, 1  ;;  %v19241_v21 = vld [vmem:[%s17734_s17 + $0x160] sm:$0x3]  ;;  %v19258_v13 = vsel %vm446_vm3, %v1283_v31, %v1285_v11  ;;  %23394 = vst [vmem:[#allocation75_spill] sm:$0xff] %v19267_v25  ;;  %v19277_v31 = vld [vmem:[%s17739_s20 + $0x168] sm:$0xff] }
  0xcb   : > { %15455 = vmatprep.mubr.msk.f32.mxu0 %vm583_vm1, %v19225_v51  ;;  %14558 = vmatprep.mubr.msk.f32.mxu1 %vm583_vm1, %v19207_v18  ;;  %v19244_v51 = vld [vmem:[%s17739_s20 + $0x140] sm:$0xff]  ;;  %23391 = vst [vmem:[#allocation157_spill] sm:$0xff] %v19258_v13  ;;  %v1290_v59 = vrot.slane %v19241_v21, 1  ;;  %v1293_v18 = vrot.slane %v18350_v58, 1 }
  0xcc   : > { %v19262_v60 = vsel %vm446_vm3, %v1287_v0, %v1288_v12  ;;  %v1295_v0 = vrot.slane %v19267_v25, 1  ;;  %v19315_v25 = vld [vmem:[%s17739_s20 + $0x188] sm:$0xff] }
  0xcd   : > { %23392 = vst [vmem:[#allocation158_spill] sm:$0xff] %v19262_v60  ;;  %v19284_v58 = vsel %vm446_vm3, %v1288_v12, %v1290_v59  ;;  %v1630_v59 = vrot.slane %v18813_v38, 2  ;;  %23400 = vst [vmem:[#allocation164_spill] sm:$0xff] %v19315_v25  ;;  %v1632_v38 = vrot.slane %v18820_v48, 2 }
  0xce   : > { %15456 = vmatmul.mubr.msk.f32.gmra.mrb[22].mxu0 %vm583_vm1, %v19244_v51  ;;  %14559 = vmatmul.mubr.msk.f32.gmra.mrb[24].mxu1 %vm583_vm1, %v19232_v57  ;;  %v1292_v57 = vrot.slane %v23393_v16, 1  ;;  %23396 = vst [vmem:[#allocation160_spill] sm:$0xff] %v19284_v58  ;;  %v19291_v16 = vld [vmem:[%s17739_s20 + $0x170] sm:$0xff]  ;;  %v19305_v12 = vsel %vm446_vm3, %v1293_v18, %v1295_v0 }
  0xcf   : > { %15458 = vmatprep.mubr.msk.f32.mxu0 %vm583_vm1, %v19251_v34  ;;  %14561 = vmatprep.mubr.msk.f32.mxu1 %vm583_vm1, %v19236_v62  ;;  %v19270_v34 = vld [vmem:[%s17739_s20 + $0x158] sm:$0xff]  ;;  %23398 = vst [vmem:[#allocation162_spill] sm:$0xff] %v19305_v12  ;;  %v4096_v62 = vrot.slane %v18900_v46, 1  ;;  %v4101_v46 = vrot.slane %v18936_v45, 1 }
  0xd0   : > { %23395 = vst [vmem:[#allocation159_spill] sm:$0xff] %v19270_v34  ;;  %v19288_v11 = vsel %vm446_vm3, %v1292_v57, %v1293_v18  ;;  %v1629_v57 = vrot.slane %v18809_v41, 2  ;;  %v19322_v18 = vld [vmem:[%s17739_s20 + $0x40] sm:$0xf]  ;;  %v4100_v41 = vrot.slane %v18909_v28, 1 }
  0xd1   : > { %23397 = vst [vmem:[#allocation161_spill] sm:$0xff] %v19288_v11  ;;  %23401 = vst [vmem:[#allocation165_spill] sm:$0xff] %v19322_v18  ;;  %v4098_v0 = vrot.slane %v19322_v18, 1 }
  0xd2   : > { %15459 = vmatmul.mubr.msk.f32.gmra.mrb[24].mxu0 %vm583_vm1, %v19270_v34  ;;  %14562 = vmatmul.mubr.msk.f32.gmra.mrb[26].mxu1 %vm583_vm1, %v19258_v13  ;;  %v19298_v13 = vld [vmem:[%s17739_s20 + $0x180] sm:$0xff]  ;;  %v19339_v18 = vsel %vm1623_vm4, %v1629_v57, %v1630_v59 }
  0xd3   : > { %15461 = vmatprep.mubr.msk.f32.mxu0 %vm583_vm1, %v19277_v31  ;;  %14564 = vmatprep.mubr.msk.f32.mxu1 %vm583_vm1, %v19262_v60  ;;  %v19310_v60 = vld [vmem:[%s17739_s20 + $0x198] sm:$0xff]  ;;  %23404 = vst [vmem:[#allocation168_spill] sm:$0xff] %v19339_v18  ;;  %v19348_v48 = vsel %vm446_vm3, %v4096_v62, %v4098_v0  ;;  %v1637_v0 = vrot.slane %v18847_v17, 2  ;;  %v19384_v17 = vld [vmem:[%s22566_s5 + $0x34] sm:$0xf] }
  0xd4   : > { %23399 = vst [vmem:[#allocation163_spill] sm:$0xff] %v19310_v60  ;;  %23405 = vst [vmem:[#allocation169_spill] sm:$0xff] %v19348_v48 }
  0xd6   : > { %15462 = vmatmul.mubr.msk.f32.gmra.mrb[26].mxu0 %vm583_vm1, %v19291_v16  ;;  %14565 = vmatmul.mubr.msk.f32.gmra.mrb[28].mxu1 %vm583_vm1, %v19284_v58  ;;  %v4095_v58 = vrot.slane %v18866_v47, 1  ;;  %v1634_v47 = vrot.slane %v18850_v1, 2 }
  0xd7   : > { %15464 = vmatprep.mubr.msk.f32.mxu0 %vm583_vm1, %v19298_v13  ;;  %14567 = vmatprep.mubr.msk.f32.mxu1 %vm583_vm1, %v19288_v11  ;;  %v19330_v11 = vld [vmem:[%s17739_s20 + $0x1a0] sm:$0xff] }
  0xd8   : > { %23402 = vst [vmem:[#allocation166_spill] sm:$0xff] %v19330_v11 }
  0xda   : > { %15465 = vmatmul.mubr.msk.f32.gmra.mrb[28].mxu0 %vm583_vm1, %v19315_v25  ;;  %14568 = vmatmul.mubr.msk.f32.gmra.mrb[30].mxu1 %vm583_vm1, %v19305_v12  ;;  %v19336_v12 = vsel %vm446_vm3, %v4095_v58, %v4096_v62  ;;  %v19360_v58 = vsel %vm1623_vm4, %v1630_v59, %v1632_v38  ;;  %v19366_v62 = vld [vmem:[%s17739_s20 + $0x58] sm:$0xf]  ;;  %v1640_v38 = vrot.slane %v18883_v49, 2 }
  0xdb   : > { %15467 = vmatprep.mubr.msk.f32.mxu0 %vm583_vm1, %v19310_v60  ;;  %14572 = vmatprep.mubr.msk.f32.mxu1 %vm583_vm1, %v18823_v42  ;;  %23403 = vst [vmem:[#allocation167_spill] sm:$0xff] %v19336_v12  ;;  %v1635_v60 = vrot.slane %v18854_v5, 2  ;;  %v19353_v42 = vld [vmem:[%s22565_s4 + $0x10] sm:$0xf]  ;;  %23406 = vst [vmem:[#allocation170_spill] sm:$0xff] %v19360_v58  ;;  %v4103_v57 = vrot.slane %v19366_v62, 1 }
  0xdc   : > { %v1639_v5 = vrot.slane %v18879_v2, 2  ;;  %v4111_v2 = vrot.slane %v19000_v15, 1 }
  0xdd   : > { %v19400_v49 = vsel %vm446_vm3, %v4101_v46, %v4103_v57  ;;  %v1645_v57 = vrot.slane %v18927_v22, 2 }
  0xde   : > { %15468 = vmatmul.mubr.msk.f32.gmra.mrb[30].mxu0 %vm583_vm1, %v19330_v11  ;;  %14573 = vmatmul.mubr.msk.f32.vlgmr.msra.gmra.mrb[0].mxu1 %vm583_vm1, %v18841_v40  ;;  %v19363_v40 = vsel %vm446_vm3, %v4100_v41, %v4101_v46  ;;  %v19377_v41 = vsel %vm1623_vm4, %v1634_v47, %v1635_v60  ;;  %v1642_v47 = vrot.slane %v18887_v30, 2  ;;  %23409 = vst [vmem:[#allocation173_spill] sm:$0xff] %v19400_v49  ;;  %v1644_v46 = vrot.slane %v18923_v9, 2 }
  0xdf   : > { %15472 = vmatprep.mubr.msk.f32.mxu0 %vm583_vm1, %v19336_v12  ;;  %14575 = vmatprep.mubr.msk.f32.mxu1 %vm583_vm1, %v19339_v18  ;;  %23407 = vst [vmem:[#allocation171_spill] sm:$0xff] %v19363_v40  ;;  %v4105_v12 = vrot.slane %v18943_v3, 1  ;;  %v4106_v18 = vrot.slane %v18968_v20, 1  ;;  %23408 = vst [vmem:[#allocation172_spill] sm:$0xff] %v19377_v41 }
  0xe0   : > { %14621 = vmatpush3.msk.msra.mxu1 %vm680_vm0, %v18863_v50  ;;  %v19391_v50 = vld [vmem:[%s17739_s20 + $0x70] sm:$0xf] }
  0xe1   : > { %14670 = vmatprep.subr.msk.mxu1 %vm680_vm0, %v19353_v42  ;;  %v4108_v59 = vrot.slane %v19391_v50, 1  ;;  %v19410_v30 = vsel %vm446_vm3, %v4105_v12, %v4106_v18 }
  0xe2   : > { %15473 = vmatmul.mubr.msk.f32.vlgmr.msra.gmra.mrb[0].mxu0 %vm583_vm1, %v19348_v48  ;;  %14576 = vmatmul.mubr.msk.f32.gmra.mrb[2].mxu1 %vm583_vm1, %v19360_v58  ;;  %v19403_v48 = vsel %vm1623_vm4, %v1635_v60, %v1637_v0  ;;  %v4110_v58 = vrot.slane %v18975_v19, 1  ;;  %23411 = vst [vmem:[#allocation175_spill] sm:$0xff] %v19410_v30  ;;  %v19437_v0 = vld [vmem:[%s17739_s20 + $0x88] sm:$0xf] }
  0xe3   : > { %15521 = vmatpush3.msk.msra.mxu0 %vm680_vm0, %v18897_v36  ;;  %15475 = vmatprep.mubr.msk.f32.mxu0 %vm583_vm1, %v19363_v40  ;;  %23410 = vst [vmem:[#allocation174_spill] sm:$0xff] %v19403_v48  ;;  %v19413_v36 = vsel %vm1623_vm4, %v1639_v5, %v1640_v38  ;;  %v19424_v60 = vsel %vm446_vm3, %v4106_v18, %v4108_v59  ;;  %v1647_v40 = vrot.slane %v18931_v61, 2  ;;  %v4115_v18 = vrot.slane %v19007_v27, 1 }
  0xe4   : > { %14578 = vmatprep.mubr.msk.f32.mxu1 %vm583_vm1, %v19377_v41  ;;  %23412 = vst [vmem:[#allocation176_spill] sm:$0xff] %v19413_v36  ;;  %15570 = vmatprep.subr.msk.mxu0 %vm680_vm0, %v19384_v17  ;;  %23413 = vst [vmem:[#allocation177_spill] sm:$0xff] %v19424_v60  ;;  %v19427_v5 = vsel %vm1623_vm4, %v1640_v38, %v1642_v47  ;;  %v19434_v12 = vsel %vm446_vm3, %v4110_v58, %v4111_v2  ;;  %v4116_v59 = vrot.slane %v19032_v53, 1  ;;  %v19453_v58 = vld [vmem:[%s17739_s20 + $0xa0] sm:$0xf] }
  0xe5   : > { %23414 = vst [vmem:[#allocation178_spill] sm:$0xff] %v19427_v5  ;;  %23415 = vst [vmem:[#allocation179_spill] sm:$0xff] %v19434_v12  ;;  %v19443_v38 = vsel %vm1623_vm4, %v1644_v46, %v1645_v57  ;;  %v1649_v47 = vrot.slane %v18957_v6, 2  ;;  %v4118_v61 = vrot.slane %v19453_v58, 1 }
  0xe6   : > { %15476 = vmatmul.mubr.msk.f32.gmra.mrb[2].mxu0 %vm583_vm1, %v19400_v49  ;;  %14579 = vmatmul.mubr.msk.f32.gmra.mrb[4].mxu1 %vm583_vm1, %v19403_v48  ;;  %v4113_v49 = vrot.slane %v19437_v0, 1  ;;  %23416 = vst [vmem:[#allocation180_spill] sm:$0xff] %v19443_v38  ;;  %v4121_v48 = vrot.slane %v19064_v33, 1  ;;  %v19470_v41 = vsel %vm446_vm3, %v4115_v18, %v4116_v59 }
  0xe7   : > { %15478 = vmatprep.mubr.msk.f32.mxu0 %vm583_vm1, %v19410_v30  ;;  %14581 = vmatprep.mubr.msk.f32.mxu1 %vm583_vm1, %v19413_v36  ;;  %v1650_v30 = vrot.slane %v18961_v55, 2  ;;  %v1652_v36 = vrot.slane %v18965_v14, 2  ;;  %23419 = vst [vmem:[#allocation183_spill] sm:$0xff] %v19470_v41 }
  0xe8   : > { %v19462_v46 = vsel %vm446_vm3, %v4111_v2, %v4113_v49  ;;  %v19482_v49 = vsel %vm446_vm3, %v4116_v59, %v4118_v61  ;;  %v4125_v59 = vrot.slane %v19071_v10, 1  ;;  %v1659_v61 = vrot.slane %v19021_v4, 2 }
  0xe9   : > { %23417 = vst [vmem:[#allocation181_spill] sm:$0xff] %v19462_v46  ;;  %v19473_v14 = vsel %vm1623_vm4, %v1649_v47, %v1650_v30  ;;  %23421 = vst [vmem:[#allocation185_spill] sm:$0xff] %v19482_v49  ;;  %v19485_v2 = vsel %vm1623_vm4, %v1650_v30, %v1652_v36  ;;  %v1657_v47 = vrot.slane %v18997_v24, 2  ;;  %v4126_v36 = vrot.slane %v19096_v63, 1 }
  0xea   : > { %15479 = vmatmul.mubr.msk.f32.gmra.mrb[4].mxu0 %vm583_vm1, %v19424_v60  ;;  %14582 = vmatmul.mubr.msk.f32.gmra.mrb[6].mxu1 %vm583_vm1, %v19427_v5  ;;  %v19465_v60 = vsel %vm1623_vm4, %v1645_v57, %v1647_v40  ;;  %v4120_v5 = vrot.slane %v19039_v54, 1  ;;  %23420 = vst [vmem:[#allocation184_spill] sm:$0xff] %v19473_v14  ;;  %23422 = vst [vmem:[#allocation186_spill] sm:$0xff] %v19485_v2  ;;  %v19495_v57 = vld [vmem:[%s17739_s20 + $0xb8] sm:$0xf] }
  0xeb   : > { %15481 = vmatprep.mubr.msk.f32.mxu0 %vm583_vm1, %v19434_v12  ;;  %14584 = vmatprep.mubr.msk.f32.mxu1 %vm583_vm1, %v19443_v38  ;;  %23418 = vst [vmem:[#allocation182_spill] sm:$0xff] %v19465_v60  ;;  %v1654_v12 = vrot.slane %v18989_v23, 2  ;;  %v1655_v38 = vrot.slane %v18993_v52, 2  ;;  %v4123_v18 = vrot.slane %v19495_v57, 1 }
  0xec   : > { %v19492_v40 = vsel %vm446_vm3, %v4120_v5, %v4121_v48  ;;  %v19511_v5 = vld [vmem:[%s17739_s20 + $0xd0] sm:$0xf] }
  0xed   : > { %23423 = vst [vmem:[#allocation187_spill] sm:$0xff] %v19492_v40  ;;  %v19501_v30 = vsel %vm1623_vm4, %v1654_v12, %v1655_v38  ;;  %v4128_v24 = vrot.slane %v19511_v5, 1  ;;  %v19520_v12 = vsel %vm446_vm3, %v4121_v48, %v4123_v18 }
  0xee   : > { %15482 = vmatmul.mubr.msk.f32.gmra.mrb[6].mxu0 %vm583_vm1, %v19462_v46  ;;  %14585 = vmatmul.mubr.msk.f32.gmra.mrb[8].mxu1 %vm583_vm1, %v19465_v60  ;;  %23424 = vst [vmem:[#allocation188_spill] sm:$0xff] %v19501_v30  ;;  %v1662_v46 = vrot.slane %v19029_v44, 2  ;;  %23425 = vst [vmem:[#allocation189_spill] sm:$0xff] %v19520_v12  ;;  %v19528_v60 = vsel %vm446_vm3, %v4125_v59, %v4126_v36 }
  0xef   : > { %15484 = vmatprep.mubr.msk.f32.mxu0 %vm583_vm1, %v19470_v41  ;;  %14587 = vmatprep.mubr.msk.f32.mxu1 %vm583_vm1, %v19473_v14  ;;  %v1660_v41 = vrot.slane %v19025_v37, 2  ;;  %v4131_v14 = vrot.slane %v19128_v56, 1  ;;  %23427 = vst [vmem:[#allocation191_spill] sm:$0xff] %v19528_v60  ;;  %v19540_v48 = vsel %vm446_vm3, %v4126_v36, %v4128_v24  ;;  %v4135_v36 = vrot.slane %v19135_v26, 1 }
  0xf0   : > { %23429 = vst [vmem:[#allocation193_spill] sm:$0xff] %v19540_v48  ;;  %v1669_v24 = vrot.slane %v19085_v39, 2 }
  0xf1   : > { %v19531_v44 = vsel %vm1623_vm4, %v1659_v61, %v1660_v41  ;;  %v1667_v61 = vrot.slane %v19061_v32, 2 }
  0xf2   : > { %15485 = vmatmul.mubr.msk.f32.gmra.mrb[8].mxu0 %vm583_vm1, %v19482_v49  ;;  %14588 = vmatmul.mubr.msk.f32.gmra.mrb[10].mxu1 %vm583_vm1, %v19485_v2  ;;  %v19523_v49 = vsel %vm1623_vm4, %v1655_v38, %v1657_v47  ;;  %v4130_v2 = vrot.slane %v19103_v35, 1  ;;  %23428 = vst [vmem:[#allocation192_spill] sm:$0xff] %v19531_v44  ;;  %v19543_v38 = vsel %vm1623_vm4, %v1660_v41, %v1662_v46  ;;  %v19553_v47 = vld [vmem:[%s17739_s20 + $0xe8] sm:$0xf]  ;;  %v4136_v46 = vrot.slane %v19160_v29, 1 }
  0xf3   : > { %15487 = vmatprep.mubr.msk.f32.mxu0 %vm583_vm1, %v19492_v40  ;;  %14590 = vmatprep.mubr.msk.f32.mxu1 %vm583_vm1, %v19501_v30  ;;  %23426 = vst [vmem:[#allocation190_spill] sm:$0xff] %v19523_v49  ;;  %v1664_v40 = vrot.slane %v19053_v8, 2  ;;  %v1665_v30 = vrot.slane %v19057_v43, 2  ;;  %23430 = vst [vmem:[#allocation194_spill] sm:$0xff] %v19543_v38  ;;  %v4133_v59 = vrot.slane %v19553_v47, 1 }
  0xf4   : > { %v19550_v18 = vsel %vm446_vm3, %v4130_v2, %v4131_v14  ;;  %v19569_v2 = vld [vmem:[%s17739_s20 + $0x100] sm:$0xf] }
  0xf5   : > { %23431 = vst [vmem:[#allocation195_spill] sm:$0xff] %v19550_v18  ;;  %v19559_v41 = vsel %vm1623_vm4, %v1664_v40, %v1665_v30  ;;  %23433 = vst [vmem:[#allocation197_spill] sm:$0xff] %v19569_v2  ;;  %v4138_v32 = vrot.slane %v19569_v2, 1  ;;  %v19578_v40 = vsel %vm446_vm3, %v4131_v14, %v4133_v59  ;;  %v19586_v2 = vsel %vm446_vm3, %v4135_v36, %v4136_v46 }
  0xf6   : > { %15488 = vmatmul.mubr.msk.f32.gmra.mrb[10].mxu0 %vm583_vm1, %v19520_v12  ;;  %14591 = vmatmul.mubr.msk.f32.gmra.mrb[12].mxu1 %vm583_vm1, %v19523_v49  ;;  %23432 = vst [vmem:[#allocation196_spill] sm:$0xff] %v19559_v41  ;;  %v23434_v12 = vld [vmem:[#allocation132_spill] sm:$0xff] }
  0xf7   : > { %15490 = vmatprep.mubr.msk.f32.mxu0 %vm583_vm1, %v19528_v60  ;;  %14593 = vmatprep.mubr.msk.f32.mxu1 %vm583_vm1, %v19531_v44  ;;  %v1670_v60 = vrot.slane %v19089_v7, 2  ;;  %v1672_v44 = vrot.slane %v23434_v12, 2  ;;  %23435 = vst [vmem:[#allocation132_spill] sm:$0xff] %v19578_v40  ;;  %v23438_v7 = vld [vmem:[#allocation148_spill] sm:$0xff]  ;;  %v19598_v14 = vsel %vm446_vm3, %v4136_v46, %v4138_v32  ;;  %v23448_v46 = vld [vmem:[#allocation149_spill] sm:$0xff] }
  0xf8   : > { %v4141_v39 = vrot.slane %v23438_v7, 1  ;;  %23443 = vst [vmem:[#allocation199_spill] sm:$0xff] %v19598_v14  ;;  %v4145_v32 = vrot.slane %v23448_v46, 1  ;;  %v23454_v46 = vld [vmem:[#allocation142_spill] sm:$0xff] }
  0xf9   : > { %v19589_v12 = vsel %vm1623_vm4, %v1669_v24, %v1670_v60  ;;  %v23447_v24 = vld [vmem:[#allocation137_spill] sm:$0xff] }
  0xfa   : > { %15491 = vmatmul.mubr.msk.f32.gmra.mrb[12].mxu0 %vm583_vm1, %v19540_v48  ;;  %14594 = vmatmul.mubr.msk.f32.gmra.mrb[14].mxu1 %vm583_vm1, %v19543_v38  ;;  %v19581_v48 = vsel %vm1623_vm4, %v1665_v30, %v1667_v61  ;;  %v23437_v38 = vld [vmem:[#allocation144_spill] sm:$0xff]  ;;  %23440 = vst [vmem:[#allocation148_spill] sm:$0xff] %v19589_v12  ;;  %v19601_v30 = vsel %vm1623_vm4, %v1670_v60, %v1672_v44  ;;  %v23450_v44 = vld [vmem:[#allocation153_spill] sm:$0xff] }
  0xfb   : > { %15493 = vmatprep.mubr.msk.f32.mxu0 %vm583_vm1, %v19550_v18  ;;  %14596 = vmatprep.mubr.msk.f32.mxu1 %vm583_vm1, %v19559_v41  ;;  %23436 = vst [vmem:[#allocation198_spill] sm:$0xff] %v19581_v48  ;;  %v4140_v49 = vrot.slane %v23437_v38, 1  ;;  %23439 = vst [vmem:[#allocation144_spill] sm:$0xff] %v19586_v2  ;;  %v23441_v18 = vld [vmem:[#allocation135_spill] sm:$0xff]  ;;  %v23442_v41 = vld [vmem:[#allocation136_spill] sm:$0xff] }
  0xfc   : > { %v1674_v43 = vrot.slane %v23441_v18, 2  ;;  %v1675_v29 = vrot.slane %v23442_v41, 2  ;;  %23444 = vst [vmem:[#allocation200_spill] sm:$0xff] %v19601_v30  ;;  %v19611_v61 = vld [vmem:[%s17739_s20 + $0x118] sm:$0xf]  ;;  %v23452_v18 = vld [vmem:[#allocation141_spill] sm:$0xff] }
  0xfd   : > { %v19608_v59 = vsel %vm446_vm3, %v4140_v49, %v4141_v39  ;;  %23446 = vst [vmem:[#allocation202_spill] sm:$0xff] %v19611_v61  ;;  %v4143_v36 = vrot.slane %v19611_v61, 1  ;;  %v19627_v49 = vld [vmem:[%s17739_s20 + $0x130] sm:$0xf] }
  0xfe   : > { %15494 = vmatmul.mubr.msk.f32.gmra.mrb[14].mxu0 %vm583_vm1, %v19578_v40  ;;  %14597 = vmatmul.mubr.msk.f32.gmra.mrb[16].mxu1 %vm583_vm1, %v19581_v48  ;;  %23445 = vst [vmem:[#allocation201_spill] sm:$0xff] %v19608_v59  ;;  %v1677_v40 = vrot.slane %v23447_v24, 2  ;;  %v19617_v60 = vsel %vm1623_vm4, %v1674_v43, %v1675_v29  ;;  %v4146_v48 = vrot.slane %v23450_v44, 1  ;;  %23453 = vst [vmem:[#allocation203_spill] sm:$0xff] %v19627_v49  ;;  %v4148_v24 = vrot.slane %v19627_v49, 1 }
  0xff   : > { %15496 = vmatprep.mubr.msk.f32.mxu0 %vm583_vm1, %v19586_v2  ;;  %14599 = vmatprep.mubr.msk.f32.mxu1 %vm583_vm1, %v19589_v12  ;;  %23449 = vst [vmem:[#allocation137_spill] sm:$0xff] %v19617_v60  ;;  %v23451_v2 = vld [vmem:[#allocation140_spill] sm:$0xff]  ;;  %v1680_v12 = vrot.slane %v23452_v18, 2  ;;  %v1682_v43 = vrot.slane %v23454_v46, 2  ;;  %v19636_v18 = vsel %vm446_vm3, %v4141_v39, %v4143_v36  ;;  %v4151_v44 = vrot.slane %v19244_v51, 1 }
 0x100   : > { %v1679_v41 = vrot.slane %v23451_v2, 2  ;;  %23455 = vst [vmem:[#allocation142_spill] sm:$0xff] %v19636_v18  ;;  %v19644_v49 = vsel %vm446_vm3, %v4145_v32, %v4146_v48  ;;  %v19672_v36 = vld [vmem:[%s17739_s20 + $0x148] sm:$0xf] }
 0x101   : > { %v4153_v32 = vrot.slane %v19672_v36, 1 }
 0x102   : > { %15497 = vmatmul.mubr.msk.f32.gmra.mrb[16].mxu0 %vm583_vm1, %v19598_v14  ;;  %14600 = vmatmul.mubr.msk.f32.gmra.mrb[18].mxu1 %vm583_vm1, %v19601_v30  ;;  %v19639_v14 = vsel %vm1623_vm4, %v1675_v29, %v1677_v40  ;;  %v23457_v30 = vld [vmem:[#allocation154_spill] sm:$0xff]  ;;  %v19647_v46 = vsel %vm1623_vm4, %v1679_v41, %v1680_v12  ;;  %v19659_v29 = vsel %vm446_vm3, %v4146_v48, %v4148_v24  ;;  %v23466_v24 = vld [vmem:[#allocation71_spill] sm:$0xff] }
 0x103   : > { %15499 = vmatprep.mubr.msk.f32.mxu0 %vm583_vm1, %v19608_v59  ;;  %14602 = vmatprep.mubr.msk.f32.mxu1 %vm583_vm1, %v19617_v60  ;;  %23456 = vst [vmem:[#allocation204_spill] sm:$0xff] %v19639_v14  ;;  %v4150_v2 = vrot.slane %v23457_v30, 1  ;;  %23458 = vst [vmem:[#allocation154_spill] sm:$0xff] %v19644_v49  ;;  %v23460_v59 = vld [vmem:[#allocation147_spill] sm:$0xff]  ;;  %v19651_v60 = vld [vmem:[%s17734_s17 + $0x128] sm:$0xff]  ;;  %v19662_v41 = vsel %vm1623_vm4, %v1680_v12, %v1682_v43  ;;  %v4156_v43 = vrot.slane %v19270_v34, 1 }
 0x104   : > { %23459 = vst [vmem:[#allocation205_spill] sm:$0xff] %v19647_v46  ;;  %v1684_v61 = vrot.slane %v23460_v59, 2  ;;  %23461 = vst [vmem:[#allocation147_spill] sm:$0xff] %v19651_v60  ;;  %v1685_v39 = vrot.slane %v19651_v60, 2 }
 0x105   : > { %23462 = vst [vmem:[#allocation206_spill] sm:$0xff] %v19659_v29  ;;  %23463 = vst [vmem:[#allocation207_spill] sm:$0xff] %v19662_v41  ;;  %v19669_v40 = vsel %vm446_vm3, %v4150_v2, %v4151_v44 }
 0x106   : > { %15500 = vmatmul.mubr.msk.f32.gmra.mrb[18].mxu0 %vm583_vm1, %v19636_v18  ;;  %14603 = vmatmul.mubr.msk.f32.gmra.mrb[20].mxu1 %vm583_vm1, %v19639_v14  ;;  %23464 = vst [vmem:[#allocation208_spill] sm:$0xff] %v19669_v40  ;;  %v23465_v18 = vld [vmem:[#allocation62_spill] sm:$0xff]  ;;  %v4155_v14 = vrot.slane %v23466_v24, 1  ;;  %v19678_v12 = vsel %vm1623_vm4, %v1684_v61, %v1685_v39  ;;  %v23471_v24 = vld [vmem:[#allocation68_spill] sm:$0xff] }
 0x107   : > { %15502 = vmatprep.mubr.msk.f32.mxu0 %vm583_vm1, %v19644_v49  ;;  %14605 = vmatprep.mubr.msk.f32.mxu1 %vm583_vm1, %v19647_v46  ;;  %v1687_v48 = vrot.slane %v23465_v18, 2  ;;  %23467 = vst [vmem:[#allocation62_spill] sm:$0xff] %v19678_v12  ;;  %v23468_v49 = vld [vmem:[#allocation152_spill] sm:$0xff]  ;;  %v19683_v46 = vld [vmem:[%s17734_s17 + $0x140] sm:$0xff]  ;;  %v1692_v34 = vrot.slane %v23471_v24, 2 }
 0x108   : > { %v1689_v60 = vrot.slane %v23468_v49, 2  ;;  %23469 = vst [vmem:[#allocation209_spill] sm:$0xff] %v19683_v46  ;;  %v1690_v2 = vrot.slane %v19683_v46, 2  ;;  %v19691_v18 = vld [vmem:[%s17739_s20 + $0x160] sm:$0xf]  ;;  %v19700_v46 = vsel %vm446_vm3, %v4151_v44, %v4153_v32  ;;  %v4161_v49 = vrot.slane %v19291_v16, 1 }
 0x109   : > { %23470 = vst [vmem:[#allocation210_spill] sm:$0xff] %v19691_v18  ;;  %v4158_v61 = vrot.slane %v19691_v18, 1  ;;  %23472 = vst [vmem:[#allocation68_spill] sm:$0xff] %v19700_v46  ;;  %v19708_v18 = vsel %vm446_vm3, %v4155_v14, %v4156_v43  ;;  %v19718_v44 = vld [vmem:[%s17734_s17 + $0x158] sm:$0xff] }
 0x10a   : > { %15503 = vmatmul.mubr.msk.f32.gmra.mrb[20].mxu0 %vm583_vm1, %v19659_v29  ;;  %14606 = vmatmul.mubr.msk.f32.gmra.mrb[22].mxu1 %vm583_vm1, %v19662_v41  ;;  %v19703_v29 = vsel %vm1623_vm4, %v1685_v39, %v1687_v48  ;;  %v4160_v41 = vrot.slane %v19277_v31, 1  ;;  %23474 = vst [vmem:[#allocation212_spill] sm:$0xff] %v19708_v18  ;;  %v19711_v24 = vsel %vm1623_vm4, %v1689_v60, %v1690_v2  ;;  %23476 = vst [vmem:[#allocation214_spill] sm:$0xff] %v19718_v44  ;;  %v19739_v48 = vld [vmem:[%s17739_s20 + $0x178] sm:$0xf] }
 0x10b   : > { %15505 = vmatprep.mubr.msk.f32.mxu0 %vm583_vm1, %v19669_v40  ;;  %14608 = vmatprep.mubr.msk.f32.mxu1 %vm583_vm1, %v19678_v12  ;;  %23473 = vst [vmem:[#allocation211_spill] sm:$0xff] %v19703_v29  ;;  %23475 = vst [vmem:[#allocation213_spill] sm:$0xff] %v19711_v24  ;;  %v19714_v40 = vld [vmem:[%s17734_s17 + $0x150] sm:$0xff]  ;;  %v1695_v39 = vrot.slane %v19718_v44, 2  ;;  %v19726_v14 = vsel %vm446_vm3, %v4156_v43, %v4158_v61  ;;  %v19729_v60 = vsel %vm1623_vm4, %v1690_v2, %v1692_v34 }
 0x10c   : > { %v1694_v12 = vrot.slane %v19714_v40, 2  ;;  %23477 = vst [vmem:[#allocation215_spill] sm:$0xff] %v19726_v14  ;;  %23478 = vst [vmem:[#allocation216_spill] sm:$0xff] %v19729_v60  ;;  %v19736_v32 = vsel %vm446_vm3, %v4160_v41, %v4161_v49  ;;  %v1697_v43 = vrot.slane %v19241_v21, 2  ;;  %v5979_v61 = vrot.slane %v19298_v13, 1  ;;  %v19753_v41 = vld [vmem:[%s17734_s17 + $0x170] sm:$0xff] }
 0x10d   : > { %23479 = vst [vmem:[#allocation217_spill] sm:$0xff] %v19736_v32  ;;  %v5980_v2 = vrot.slane %v19315_v25, 1  ;;  %23482 = vst [vmem:[#allocation220_spill] sm:$0xff] %v19753_v41  ;;  %v23488_v25 = vld [vmem:[#allocation163_spill] sm:$0xff] }
 0x10e   : > { %15506 = vmatmul.mubr.msk.f32.gmra.mrb[22].mxu0 %vm583_vm1, %v19700_v46  ;;  %14609 = vmatmul.mubr.msk.f32.gmra.mrb[24].mxu1 %vm583_vm1, %v19703_v29  ;;  %v4163_v46 = vrot.slane %v19739_v48, 1  ;;  %v19745_v34 = vsel %vm1623_vm4, %v1694_v12, %v1695_v39  ;;  %v1700_v29 = vrot.slane %v19753_v41, 2  ;;  %v19768_v12 = vsel %vm1623_vm4, %v1695_v39, %v1697_v43 }
 0x10f   : > { %15508 = vmatprep.mubr.msk.f32.mxu0 %vm583_vm1, %v19708_v18  ;;  %14611 = vmatprep.mubr.msk.f32.mxu1 %vm583_vm1, %v19711_v24  ;;  %23480 = vst [vmem:[#allocation218_spill] sm:$0xff] %v19745_v34  ;;  %v19749_v18 = vld [vmem:[%s17734_s17 + $0x168] sm:$0xff]  ;;  %23484 = vst [vmem:[#allocation222_spill] sm:$0xff] %v19768_v12 }
 0x110   : > { %23481 = vst [vmem:[#allocation219_spill] sm:$0xff] %v19749_v18  ;;  %v1699_v24 = vrot.slane %v19749_v18, 2  ;;  %v19765_v21 = vsel %vm446_vm3, %v4161_v49, %v4163_v46  ;;  %v19771_v18 = vld [vmem:[%s17739_s20 + $0x190] sm:$0xf]  ;;  %v7333_v49 = vrot.slane %v19330_v11, 1 }
 0x111   : > { %23483 = vst [vmem:[#allocation221_spill] sm:$0xff] %v19765_v21  ;;  %v5982_v41 = vrot.slane %v19771_v18, 1  ;;  %v19784_v46 = vld [vmem:[%s17739_s20 + $0x1a8] sm:$0xf] }
 0x112   : > { %15509 = vmatmul.mubr.msk.f32.gmra.mrb[24].mxu0 %vm583_vm1, %v19726_v14  ;;  %14612 = vmatmul.mubr.msk.f32.gmra.mrb[26].mxu1 %vm583_vm1, %v19729_v60  ;;  %v23485_v14 = vld [vmem:[#allocation75_spill] sm:$0xff]  ;;  %v19776_v60 = vsel %vm446_vm3, %v5979_v61, %v5980_v2 }
 0x113   : > { %15511 = vmatprep.mubr.msk.f32.mxu0 %vm583_vm1, %v19736_v32  ;;  %14614 = vmatprep.mubr.msk.f32.mxu1 %vm583_vm1, %v19745_v34  ;;  %v1702_v44 = vrot.slane %v23485_v14, 2  ;;  %23486 = vst [vmem:[#allocation75_spill] sm:$0xff] %v19776_v60  ;;  %v19779_v32 = vsel %vm1623_vm4, %v1699_v24, %v1700_v29  ;;  %v7332_v34 = vrot.slane %v23488_v25, 1  ;;  %v19795_v24 = vsel %vm446_vm3, %v5980_v2, %v5982_v41  ;;  %v23491_v61 = vld [vmem:[#allocation111_spill] sm:$0xff] }
 0x114   : > { %23487 = vst [vmem:[#allocation223_spill] sm:$0xff] %v19779_v32  ;;  %23489 = vst [vmem:[#allocation163_spill] sm:$0xff] %v19795_v24  ;;  %v7335_v14 = vrot.slane %v19784_v46, 1 }
 0x115   : > { %v19798_v39 = vsel %vm1623_vm4, %v1700_v29, %v1702_v44  ;;  %v19802_v43 = vsel %vm446_vm3, %v7332_v34, %v7333_v49  ;;  %v23493_v29 = vld [vmem:[#allocation64_spill] sm:$0xff]  ;;  %v23495_v34 = vld [vmem:[#allocation165_spill] sm:$0xff] }
 0x116   : > { %15512 = vmatmul.mubr.msk.f32.gmra.mrb[26].mxu0 %vm583_vm1, %v19765_v21  ;;  %14615 = vmatmul.mubr.msk.f32.gmra.mrb[28].mxu1 %vm583_vm1, %v19768_v12  ;;  %23490 = vst [vmem:[#allocation224_spill] sm:$0xff] %v19802_v43  ;;  %v4501_v21 = vrot.slane %v23491_v61, 2  ;;  %v23492_v12 = vld [vmem:[#allocation116_spill] sm:$0xff]  ;;  %v19815_v44 = vsel %vm446_vm3, %v7333_v49, %v7335_v14  ;;  %v4504_v2 = vrot.slane %v23495_v34, 2  ;;  %v4507_v61 = vrot.slane %v18936_v45, 2 }
 0x117   : > { %15514 = vmatprep.mubr.msk.f32.mxu0 %vm583_vm1, %v19776_v60  ;;  %14617 = vmatprep.mubr.msk.f32.mxu1 %vm583_vm1, %v19779_v32  ;;  %v4502_v11 = vrot.slane %v23492_v12, 2  ;;  %23494 = vst [vmem:[#allocation111_spill] sm:$0xff] %v19815_v44  ;;  %v4506_v12 = vrot.slane %v18909_v28, 2  ;;  %v19830_v49 = vld [vmem:[%s22565_s4 + $0x14] sm:$0xf]  ;;  %v4509_v45 = vrot.slane %v19366_v62, 2 }
 0x118   : > { %v4512_v14 = vrot.slane %v18968_v20, 2  ;;  %v4514_v20 = vrot.slane %v19391_v50, 2  ;;  %v4517_v34 = vrot.slane %v19000_v15, 2 }
 0x119   : > { %v19819_v41 = vsel %vm1623_vm4, %v4501_v21, %v4502_v11  ;;  %v19837_v28 = vsel %vm1623_vm4, %v4502_v11, %v4504_v2  ;;  %v19843_v21 = vsel %vm1623_vm4, %v4506_v12, %v4507_v61  ;;  %v23500_v11 = vld [vmem:[#allocation110_spill] sm:$0xff]  ;;  %v4521_v2 = vrot.slane %v19007_v27, 2 }
 0x11a   : > { %15515 = vmatmul.mubr.msk.f32.gmra.mrb[28].mxu0 %vm583_vm1, %v19795_v24  ;;  %14618 = vmatmul.mubr.msk.f32.gmra.mrb[30].mxu1 %vm583_vm1, %v19798_v39  ;;  %23496 = vst [vmem:[#allocation116_spill] sm:$0xff] %v19819_v41  ;;  %v23497_v24 = vld [vmem:[#allocation70_spill] sm:$0xff]  ;;  %23498 = vst [vmem:[#allocation64_spill] sm:$0xff] %v19837_v28  ;;  %v19884_v50 = vsel %vm1623_vm4, %v4512_v14, %v4514_v20  ;;  %v4522_v12 = vrot.slane %v19032_v53, 2  ;;  %v4526_v53 = vrot.slane %v19039_v54, 2  ;;  %v4547_v20 = vrot.slane %v23438_v7, 2 }
 0x11b   : > { %15517 = vmatprep.mubr.msk.f32.mxu0 %vm583_vm1, %v19802_v43  ;;  %14622 = vmatprep.mubr.msk.f32.mxu1 %vm583_vm1, %v23493_v29  ;;  %23499 = vst [vmem:[#allocation165_spill] sm:$0xff] %v19843_v21  ;;  %v4516_v29 = vrot.slane %v18975_v19, 2  ;;  %23504 = vst [vmem:[#allocation110_spill] sm:$0xff] %v19884_v50  ;;  %v4519_v19 = vrot.slane %v19437_v0, 2  ;;  %v4524_v0 = vrot.slane %v19453_v58, 2  ;;  %v4532_v58 = vrot.slane %v19096_v63, 2 }
 0x11c   : > { %v19905_v27 = vsel %vm1623_vm4, %v4521_v2, %v4522_v12  ;;  %v4536_v63 = vrot.slane %v19103_v35, 2  ;;  %v23525_v7 = vld [vmem:[#allocation149_spill] sm:$0xff] }
 0x11d   : > { %v19888_v15 = vsel %vm1623_vm4, %v4516_v29, %v4517_v34  ;;  %23507 = vst [vmem:[#allocation225_spill] sm:$0xff] %v19905_v27  ;;  %v23521_v29 = vld [vmem:[#allocation135_spill] sm:$0xff]  ;;  %v4551_v2 = vrot.slane %v23525_v7, 2  ;;  %v6250_v7 = vrot.slane %v19298_v13, 2  ;;  %v6253_v13 = vrot.slane %v19771_v18, 2 }
 0x11e   : > { %15518 = vmatmul.mubr.msk.f32.gmra.mrb[30].mxu0 %vm583_vm1, %v19815_v44  ;;  %14623 = vmatmul.mubr.msk.f32.vlgmr.msra.gmra.mrb[0].mxu1 %vm583_vm1, %v23497_v24  ;;  %v4511_v24 = vrot.slane %v18943_v3, 2  ;;  %v19863_v3 = vsel %vm1623_vm4, %v4507_v61, %v4509_v45  ;;  %v4527_v61 = vrot.slane %v19064_v33, 2  ;;  %v4531_v33 = vrot.slane %v19071_v10, 2 }
 0x11f   : > { %15522 = vmatprep.mubr.msk.f32.mxu0 %vm583_vm1, %v19819_v41  ;;  %14625 = vmatprep.mubr.msk.f32.mxu1 %vm583_vm1, %v18850_v1  ;;  %v19852_v1 = vld [vmem:[%s22566_s5 + $0x38] sm:$0xf]  ;;  %23501 = vst [vmem:[#allocation70_spill] sm:$0xff] %v19863_v3 }
 0x120   : > { %14671 = vmatpush3.msk.msra.mxu1 %vm680_vm0, %v19353_v42  ;;  %v23502_v42 = vld [vmem:[#allocation113_spill] sm:$0xff]  ;;  %v19869_v62 = vsel %vm1623_vm4, %v4511_v24, %v4512_v14  ;;  %v19922_v54 = vsel %vm1623_vm4, %v4526_v53, %v4527_v61  ;;  %v19939_v10 = vsel %vm1623_vm4, %v4531_v33, %v4532_v58  ;;  %v23527_v53 = vld [vmem:[#allocation136_spill] sm:$0xff]  ;;  %v23530_v33 = vld [vmem:[#allocation203_spill] sm:$0xff] }
 0x121   : > { %14720 = vmatprep.subr.msk.mxu1 %vm680_vm0, %v19830_v49  ;;  %23505 = vst [vmem:[#allocation113_spill] sm:$0xff] %v19888_v15  ;;  %23509 = vst [vmem:[#allocation227_spill] sm:$0xff] %v19922_v54  ;;  %v23518_v24 = vld [vmem:[#allocation197_spill] sm:$0xff]  ;;  %v23574_v41 = vld [vmem:[#allocation124_spill] sm:$0xff] }
 0x122   : > { %15523 = vmatmul.mubr.msk.f32.vlgmr.msra.gmra.mrb[0].mxu0 %vm583_vm1, %v19837_v28  ;;  %14626 = vmatmul.mubr.msk.f32.gmra.mrb[2].mxu1 %vm583_vm1, %v23500_v11  ;;  %23511 = vst [vmem:[#allocation229_spill] sm:$0xff] %v19939_v10  ;;  %v4544_v14 = vrot.slane %v23518_v24, 2  ;;  %v4546_v11 = vrot.slane %v23437_v38, 2  ;;  %v23537_v24 = vld [vmem:[#allocation147_spill] sm:$0xff]  ;;  %v23573_v28 = vld [vmem:[#allocation18_spill] sm:$0xff] }
 0x123   : > { %15571 = vmatpush3.msk.msra.mxu0 %vm680_vm0, %v19384_v17  ;;  %15525 = vmatprep.mubr.msk.f32.mxu0 %vm583_vm1, %v19843_v21  ;;  %v23503_v17 = vld [vmem:[#allocation114_spill] sm:$0xff] }
 0x124   : > { %14628 = vmatprep.mubr.msk.f32.mxu1 %vm583_vm1, %v23502_v42  ;;  %15620 = vmatprep.subr.msk.mxu0 %vm680_vm0, %v19852_v1  ;;  %v23520_v42 = vld [vmem:[#allocation131_spill] sm:$0xff]  ;;  %v19990_v38 = vsel %vm1623_vm4, %v4546_v11, %v4547_v20 }
 0x125   : > { %23524 = vst [vmem:[#allocation197_spill] sm:$0xff] %v19990_v38 }
 0x126   : > { %15526 = vmatmul.mubr.msk.f32.gmra.mrb[2].mxu0 %vm583_vm1, %v19863_v3  ;;  %14629 = vmatmul.mubr.msk.f32.gmra.mrb[4].mxu1 %vm583_vm1, %v23503_v17  ;;  %v23523_v17 = vld [vmem:[#allocation202_spill] sm:$0xff] }
 0x127   : > { %15528 = vmatprep.mubr.msk.f32.mxu0 %vm583_vm1, %v19869_v62  ;;  %14631 = vmatprep.mubr.msk.f32.mxu1 %vm583_vm1, %v18923_v9  ;;  %v19901_v9 = vsel %vm1623_vm4, %v4517_v34, %v4519_v19  ;;  %v4549_v19 = vrot.slane %v23523_v17, 2  ;;  %v23542_v17 = vld [vmem:[#allocation209_spill] sm:$0xff] }
 0x128   : > { %23506 = vst [vmem:[#allocation114_spill] sm:$0xff] %v19901_v9 }
 0x12a   : > { %15529 = vmatmul.mubr.msk.f32.gmra.mrb[4].mxu0 %vm583_vm1, %v19884_v50  ;;  %14632 = vmatmul.mubr.msk.f32.gmra.mrb[6].mxu1 %vm583_vm1, %v18927_v22  ;;  %v19918_v22 = vsel %vm1623_vm4, %v4522_v12, %v4524_v0  ;;  %v23526_v12 = vld [vmem:[#allocation153_spill] sm:$0xff] }
 0x12b   : > { %15531 = vmatprep.mubr.msk.f32.mxu0 %vm583_vm1, %v19888_v15  ;;  %14634 = vmatprep.mubr.msk.f32.mxu1 %vm583_vm1, %v18957_v6  ;;  %23508 = vst [vmem:[#allocation226_spill] sm:$0xff] %v19918_v22  ;;  %v4529_v6 = vrot.slane %v19495_v57, 2  ;;  %v4537_v57 = vrot.slane %v19128_v56, 2  ;;  %v4541_v56 = vrot.slane %v19135_v26, 2  ;;  %v4552_v0 = vrot.slane %v23526_v12, 2  ;;  %v23636_v15 = vld [vmem:[#allocation188_spill] sm:$0xff] }
 0x12d   : > { %v19956_v35 = vsel %vm1623_vm4, %v4536_v63, %v4537_v57  ;;  %v4556_v63 = vrot.slane %v23457_v30, 2 }
 0x12e   : > { %15532 = vmatmul.mubr.msk.f32.gmra.mrb[6].mxu0 %vm583_vm1, %v19901_v9  ;;  %14635 = vmatmul.mubr.msk.f32.gmra.mrb[8].mxu1 %vm583_vm1, %v18961_v55  ;;  %v4534_v55 = vrot.slane %v19511_v5, 2  ;;  %23513 = vst [vmem:[#allocation231_spill] sm:$0xff] %v19956_v35  ;;  %v23514_v5 = vld [vmem:[#allocation143_spill] sm:$0xff]  ;;  %v23634_v9 = vld [vmem:[#allocation186_spill] sm:$0xff] }
 0x12f   : > { %15534 = vmatprep.mubr.msk.f32.mxu0 %vm583_vm1, %v19905_v27  ;;  %14637 = vmatprep.mubr.msk.f32.mxu1 %vm583_vm1, %v18989_v23  ;;  %v19935_v23 = vsel %vm1623_vm4, %v4527_v61, %v4529_v6  ;;  %v4542_v45 = vrot.slane %v23514_v5, 2  ;;  %v23528_v61 = vld [vmem:[#allocation140_spill] sm:$0xff]  ;;  %v20003_v6 = vsel %vm1623_vm4, %v4547_v20, %v4549_v19  ;;  %v4559_v5 = vrot.slane %v19672_v36, 2 }
 0x130   : > { %23510 = vst [vmem:[#allocation228_spill] sm:$0xff] %v19935_v23  ;;  %23529 = vst [vmem:[#allocation131_spill] sm:$0xff] %v20003_v6  ;;  %v23632_v27 = vld [vmem:[#allocation184_spill] sm:$0xff] }
 0x131   : > { %v19973_v26 = vsel %vm1623_vm4, %v4541_v56, %v4542_v45  ;;  %v19986_v34 = vsel %vm1623_vm4, %v4542_v45, %v4544_v14  ;;  %v23540_v14 = vld [vmem:[#allocation210_spill] sm:$0xff] }
 0x132   : > { %15535 = vmatmul.mubr.msk.f32.gmra.mrb[8].mxu0 %vm583_vm1, %v19918_v22  ;;  %14638 = vmatmul.mubr.msk.f32.gmra.mrb[10].mxu1 %vm583_vm1, %v18993_v52  ;;  %v4539_v52 = vrot.slane %v19553_v47, 2  ;;  %v4564_v11 = vrot.slane %v23540_v14, 2  ;;  %v20118_v14 = vld [vmem:[%s22565_s4 + $0x18] sm:$0xf] }
 0x133   : > { %15537 = vmatprep.mubr.msk.f32.mxu0 %vm583_vm1, %v19922_v54  ;;  %14640 = vmatprep.mubr.msk.f32.mxu1 %vm583_vm1, %v19021_v4  ;;  %v19952_v4 = vsel %vm1623_vm4, %v4532_v58, %v4534_v55  ;;  %v4554_v58 = vrot.slane %v23530_v33, 2  ;;  %v20007_v55 = vsel %vm1623_vm4, %v4551_v2, %v4552_v0  ;;  %v23545_v2 = vld [vmem:[#allocation164_spill] sm:$0xff]  ;;  %v20078_v33 = vld [vmem:[%s17734_s17 + $0x180] sm:$0xff] }
 0x134   : > { %23512 = vst [vmem:[#allocation230_spill] sm:$0xff] %v19952_v4  ;;  %v19969_v47 = vsel %vm1623_vm4, %v4537_v57, %v4539_v52  ;;  %23531 = vst [vmem:[#allocation135_spill] sm:$0xff] %v20007_v55  ;;  %v4557_v57 = vrot.slane %v19244_v51, 2  ;;  %v23532_v52 = vld [vmem:[#allocation141_spill] sm:$0xff]  ;;  %v23535_v51 = vld [vmem:[#allocation71_spill] sm:$0xff]  ;;  %v6251_v12 = vrot.slane %v23545_v2, 2 }
 0x135   : > { %23517 = vst [vmem:[#allocation143_spill] sm:$0xff] %v19969_v47  ;;  %v20020_v56 = vsel %vm1623_vm4, %v4552_v0, %v4554_v58  ;;  %v4561_v45 = vrot.slane %v23535_v51, 2  ;;  %v23546_v0 = vld [vmem:[#allocation214_spill] sm:$0xff]  ;;  %v7603_v58 = vrot.slane %v23488_v25, 2  ;;  %v7606_v51 = vrot.slane %v19784_v46, 2  ;;  %v23561_v2 = vld [vmem:[#allocation11_spill] sm:$0xff] }
 0x136   : > { %15538 = vmatmul.mubr.msk.f32.gmra.mrb[10].mxu0 %vm583_vm1, %v19935_v23  ;;  %14641 = vmatmul.mubr.msk.f32.gmra.mrb[12].mxu1 %vm583_vm1, %v19025_v37  ;;  %v23515_v37 = vld [vmem:[#allocation127_spill] sm:$0xff]  ;;  %23533 = vst [vmem:[#allocation202_spill] sm:$0xff] %v20020_v56  ;;  %v20024_v30 = vsel %vm1623_vm4, %v4556_v63, %v4557_v57  ;;  %v20037_v36 = vsel %vm1623_vm4, %v4557_v57, %v4559_v5  ;;  %v23550_v63 = vld [vmem:[#allocation166_spill] sm:$0xff]  ;;  %v23613_v54 = vld [vmem:[#allocation80_spill] sm:$0xff] }
 0x137   : > { %15540 = vmatprep.mubr.msk.f32.mxu0 %vm583_vm1, %v19939_v10  ;;  %14643 = vmatprep.mubr.msk.f32.mxu1 %vm583_vm1, %v19053_v8  ;;  %v23516_v8 = vld [vmem:[#allocation130_spill] sm:$0xff]  ;;  %23519 = vst [vmem:[#allocation127_spill] sm:$0xff] %v19973_v26  ;;  %23534 = vst [vmem:[#allocation149_spill] sm:$0xff] %v20024_v30  ;;  %v7604_v57 = vrot.slane %v23550_v63, 2  ;;  %v20091_v18 = vsel %vm1623_vm4, %v6251_v12, %v6253_v13  ;;  %v23564_v13 = vld [vmem:[#allocation119_spill] sm:$0xff]  ;;  %v7875_v10 = vrot.slane %v23550_v63, 3 }
 0x138   : > { %23522 = vst [vmem:[#allocation130_spill] sm:$0xff] %v19986_v34  ;;  %23539 = vst [vmem:[#allocation153_spill] sm:$0xff] %v20037_v36  ;;  %v20094_v5 = vld [vmem:[%s17734_s17 + $0x188] sm:$0xff]  ;;  %v23615_v63 = vld [vmem:[#allocation83_spill] sm:$0xff] }
 0x139   : > { %v23611_v23 = vld [vmem:[#allocation78_spill] sm:$0xff]  ;;  %v23631_v22 = vld [vmem:[#allocation92_spill] sm:$0xff] }
 0x13a   : > { %15541 = vmatmul.mubr.msk.f32.gmra.mrb[12].mxu0 %vm583_vm1, %v19952_v4  ;;  %14644 = vmatmul.mubr.msk.f32.gmra.mrb[14].mxu1 %vm583_vm1, %v23515_v37  ;;  %v23536_v37 = vld [vmem:[#allocation159_spill] sm:$0xff]  ;;  %v7874_v4 = vrot.slane %v23488_v25, 3 }
 0x13b   : > { %15543 = vmatprep.mubr.msk.f32.mxu0 %vm583_vm1, %v19956_v35  ;;  %14646 = vmatprep.mubr.msk.f32.mxu1 %vm583_vm1, %v23516_v8  ;;  %v4562_v8 = vrot.slane %v23536_v37, 2  ;;  %23552 = vst [vmem:[#allocation159_spill] sm:$0xff] %v20091_v18  ;;  %v23554_v37 = vld [vmem:[#allocation5_spill] sm:$0xff] }
 0x13c   : > { %v20265_v25 = vsel %vm4897_vm2, %v7874_v4, %v7875_v10  ;;  %v23618_v4 = vld [vmem:[#allocation170_spill] sm:$0xff] }
 0x13d   : > { %v20041_v20 = vsel %vm1623_vm4, %v4561_v45, %v4562_v8  ;;  %v20054_v19 = vsel %vm1623_vm4, %v4562_v8, %v4564_v11  ;;  %v20098_v45 = vsel %vm1623_vm4, %v7603_v58, %v7604_v57  ;;  %v20109_v8 = vsel %vm1623_vm4, %v7604_v57, %v7606_v51  ;;  %v23557_v11 = vld [vmem:[#allocation9_spill] sm:$0xff]  ;;  %v23566_v57 = vld [vmem:[#allocation120_spill] sm:$0xff]  ;;  %23614 = vst [vmem:[#allocation210_spill] sm:$0xff] %v20265_v25 }
 0x13e   : > { %15544 = vmatmul.mubr.msk.f32.gmra.mrb[14].mxu0 %vm583_vm1, %v19969_v47  ;;  %14647 = vmatmul.mubr.msk.f32.gmra.mrb[16].mxu1 %vm583_vm1, %v23520_v42  ;;  %23541 = vst [vmem:[#allocation136_spill] sm:$0xff] %v20041_v20  ;;  %v4566_v42 = vrot.slane %v19277_v31, 2  ;;  %23543 = vst [vmem:[#allocation140_spill] sm:$0xff] %v20054_v19  ;;  %v4569_v31 = vrot.slane %v19739_v48, 2  ;;  %v23565_v58 = vld [vmem:[#allocation13_spill] sm:$0xff] }
 0x13f   : > { %15546 = vmatprep.mubr.msk.f32.mxu0 %vm583_vm1, %v19973_v26  ;;  %14649 = vmatprep.mubr.msk.f32.mxu1 %vm583_vm1, %v23521_v29  ;;  %v4567_v29 = vrot.slane %v19291_v16, 2  ;;  %23553 = vst [vmem:[#allocation147_spill] sm:$0xff] %v20098_v45  ;;  %v23568_v51 = vld [vmem:[#allocation121_spill] sm:$0xff]  ;;  %v23608_v26 = vld [vmem:[#allocation160_spill] sm:$0xff] }
 0x140   : > { %v23610_v47 = vld [vmem:[#allocation161_spill] sm:$0xff] }
 0x141   : > { %v20058_v16 = vsel %vm1623_vm4, %v4566_v42, %v4567_v29  ;;  %v20071_v48 = vsel %vm1623_vm4, %v4567_v29, %v4569_v31  ;;  %v23558_v42 = vld [vmem:[#allocation115_spill] sm:$0xff]  ;;  %v20131_v29 = vld [vmem:[%s22566_s5 + $0x3c] sm:$0xf]  ;;  %v23559_v31 = vld [vmem:[#allocation10_spill] sm:$0xff] }
 0x142   : > { %15547 = vmatmul.mubr.msk.f32.gmra.mrb[16].mxu0 %vm583_vm1, %v19986_v34  ;;  %14650 = vmatmul.mubr.msk.f32.gmra.mrb[18].mxu1 %vm583_vm1, %v23527_v53  ;;  %23544 = vst [vmem:[#allocation203_spill] sm:$0xff] %v20058_v16  ;;  %v23547_v53 = vld [vmem:[#allocation219_spill] sm:$0xff]  ;;  %23548 = vst [vmem:[#allocation141_spill] sm:$0xff] %v20071_v48  ;;  %v23607_v34 = vld [vmem:[#allocation72_spill] sm:$0xff] }
 0x143   : > { %15549 = vmatprep.mubr.msk.f32.mxu0 %vm583_vm1, %v19990_v38  ;;  %14652 = vmatprep.mubr.msk.f32.mxu1 %vm583_vm1, %v23528_v61  ;;  %v20075_v61 = vsel %vm1623_vm4, %v6250_v7, %v6251_v12  ;;  %v23560_v7 = vld [vmem:[#allocation117_spill] sm:$0xff]  ;;  %v23563_v12 = vld [vmem:[#allocation12_spill] sm:$0xff]  ;;  %v2300_v38 = vrot.slane %v20094_v5, 1 }
 0x144   : > { %23549 = vst [vmem:[#allocation71_spill] sm:$0xff] %v20075_v61 }
 0x146   : > { %15550 = vmatmul.mubr.msk.f32.gmra.mrb[18].mxu0 %vm583_vm1, %v20003_v6  ;;  %14653 = vmatmul.mubr.msk.f32.gmra.mrb[20].mxu1 %vm583_vm1, %v23532_v52  ;;  %v23551_v52 = vld [vmem:[#allocation220_spill] sm:$0xff]  ;;  %v23606_v6 = vld [vmem:[#allocation158_spill] sm:$0xff] }
 0x147   : > { %15552 = vmatprep.mubr.msk.f32.mxu0 %vm583_vm1, %v20007_v55  ;;  %14655 = vmatprep.mubr.msk.f32.mxu1 %vm583_vm1, %v23460_v59  ;;  %v23538_v59 = vld [vmem:[#allocation152_spill] sm:$0xff]  ;;  %v23604_v55 = vld [vmem:[#allocation157_spill] sm:$0xff] }
 0x148   : > { %23555 = vst [vmem:[#allocation152_spill] sm:$0xff] %v20109_v8 }
 0x14a   : > { %15553 = vmatmul.mubr.msk.f32.gmra.mrb[20].mxu0 %vm583_vm1, %v20020_v56  ;;  %14656 = vmatmul.mubr.msk.f32.gmra.mrb[22].mxu1 %vm583_vm1, %v23537_v24  ;;  %v23602_v56 = vld [vmem:[#allocation156_spill] sm:$0xff] }
 0x14b   : > { %15555 = vmatprep.mubr.msk.f32.mxu0 %vm583_vm1, %v20024_v30  ;;  %14658 = vmatprep.mubr.msk.f32.mxu1 %vm583_vm1, %v23538_v59  ;;  %v23556_v59 = vld [vmem:[#allocation112_spill] sm:$0xff]  ;;  %v23601_v30 = vld [vmem:[#allocation51_spill] sm:$0xff] }
 0x14e   : > { %15556 = vmatmul.mubr.msk.f32.gmra.mrb[22].mxu0 %vm583_vm1, %v20037_v36  ;;  %14659 = vmatmul.mubr.msk.f32.gmra.mrb[24].mxu1 %vm583_vm1, %v23542_v17  ;;  %v23599_v36 = vld [vmem:[#allocation50_spill] sm:$0xff] }
 0x14f   : > { %15558 = vmatprep.mubr.msk.f32.mxu0 %vm583_vm1, %v20041_v20  ;;  %14661 = vmatprep.mubr.msk.f32.mxu1 %vm583_vm1, %v19714_v40  ;;  %v23597_v20 = vld [vmem:[#allocation48_spill] sm:$0xff] }
 0x152   : > { %15559 = vmatmul.mubr.msk.f32.gmra.mrb[24].mxu0 %vm583_vm1, %v20054_v19  ;;  %14662 = vmatmul.mubr.msk.f32.gmra.mrb[26].mxu1 %vm583_vm1, %v23546_v0  ;;  %v23594_v19 = vld [vmem:[#allocation146_spill] sm:$0xff] }
 0x153   : > { %15561 = vmatprep.mubr.msk.f32.mxu0 %vm583_vm1, %v20058_v16  ;;  %14664 = vmatprep.mubr.msk.f32.mxu1 %vm583_vm1, %v23547_v53  ;;  %v23592_v16 = vld [vmem:[#allocation145_spill] sm:$0xff] }
 0x156   : > { %15562 = vmatmul.mubr.msk.f32.gmra.mrb[26].mxu0 %vm583_vm1, %v20071_v48  ;;  %14665 = vmatmul.mubr.msk.f32.gmra.mrb[28].mxu1 %vm583_vm1, %v23551_v52  ;;  %v23590_v48 = vld [vmem:[#allocation139_spill] sm:$0xff] }
 0x157   : > { %15564 = vmatprep.mubr.msk.f32.mxu0 %vm583_vm1, %v20075_v61  ;;  %14667 = vmatprep.mubr.msk.f32.mxu1 %vm583_vm1, %v20078_v33  ;;  %v23588_v61 = vld [vmem:[#allocation138_spill] sm:$0xff] }
 0x15a   : > { %15565 = vmatmul.mubr.msk.f32.gmra.mrb[28].mxu0 %vm583_vm1, %v20091_v18  ;;  %14668 = vmatmul.mubr.msk.f32.gmra.mrb[30].mxu1 %vm583_vm1, %v20094_v5  ;;  %v23586_v18 = vld [vmem:[#allocation134_spill] sm:$0xff] }
 0x15b   : > { %15567 = vmatprep.mubr.msk.f32.mxu0 %vm583_vm1, %v20098_v45  ;;  %14672 = vmatprep.mubr.msk.f32.mxu1 %vm583_vm1, %v23554_v37  ;;  %v23569_v37 = vld [vmem:[#allocation15_spill] sm:$0xff]  ;;  %v23584_v45 = vld [vmem:[#allocation133_spill] sm:$0xff] }
 0x15e   : > { %15568 = vmatmul.mubr.msk.f32.gmra.mrb[30].mxu0 %vm583_vm1, %v20109_v8  ;;  %14673 = vmatmul.mubr.msk.f32.vlgmr.msra.gmra.mrb[0].mxu1 %vm583_vm1, %v23556_v59  ;;  %v23570_v59 = vld [vmem:[#allocation122_spill] sm:$0xff]  ;;  %v23582_v8 = vld [vmem:[#allocation129_spill] sm:$0xff] }
 0x15f   : > { %15572 = vmatprep.mubr.msk.f32.mxu0 %vm583_vm1, %v23557_v11  ;;  %14675 = vmatprep.mubr.msk.f32.mxu1 %vm583_vm1, %v23558_v42  ;;  %v23572_v11 = vld [vmem:[#allocation123_spill] sm:$0xff] }
 0x160   : > { %14721 = vmatpush3.msk.msra.mxu1 %vm680_vm0, %v19830_v49  ;;  %v23562_v49 = vld [vmem:[#allocation118_spill] sm:$0xff] }
 0x161   : > { %14770 = vmatprep.subr.msk.mxu1 %vm680_vm0, %v20118_v14 }
 0x162   : > { %15573 = vmatmul.mubr.msk.f32.vlgmr.msra.gmra.mrb[0].mxu0 %vm583_vm1, %v23559_v31  ;;  %14676 = vmatmul.mubr.msk.f32.gmra.mrb[2].mxu1 %vm583_vm1, %v23560_v7  ;;  %v23571_v31 = vld [vmem:[#allocation16_spill] sm:$0xff] }
 0x163   : > { %15621 = vmatpush3.msk.msra.mxu0 %vm680_vm0, %v19852_v1  ;;  %15575 = vmatprep.mubr.msk.f32.mxu0 %vm583_vm1, %v23561_v2  ;;  %v23567_v1 = vld [vmem:[#allocation14_spill] sm:$0xff]  ;;  %v23580_v2 = vld [vmem:[#allocation128_spill] sm:$0xff] }
 0x164   : > { %14678 = vmatprep.mubr.msk.f32.mxu1 %vm583_vm1, %v23562_v49  ;;  %15670 = vmatprep.subr.msk.mxu0 %vm680_vm0, %v20131_v29 }
 0x166   : > { %15576 = vmatmul.mubr.msk.f32.gmra.mrb[2].mxu0 %vm583_vm1, %v23563_v12  ;;  %14679 = vmatmul.mubr.msk.f32.gmra.mrb[4].mxu1 %vm583_vm1, %v23564_v13  ;;  %v23578_v12 = vld [vmem:[#allocation126_spill] sm:$0xff] }
 0x167   : > { %15578 = vmatprep.mubr.msk.f32.mxu0 %vm583_vm1, %v23565_v58  ;;  %14681 = vmatprep.mubr.msk.f32.mxu1 %vm583_vm1, %v23566_v57  ;;  %v23576_v58 = vld [vmem:[#allocation125_spill] sm:$0xff] }
 0x16a   : > { %15579 = vmatmul.mubr.msk.f32.gmra.mrb[4].mxu0 %vm583_vm1, %v23567_v1  ;;  %14682 = vmatmul.mubr.msk.f32.gmra.mrb[6].mxu1 %vm583_vm1, %v23568_v51  ;;  %v23575_v1 = vld [vmem:[#allocation26_spill] sm:$0xff] }
 0x16b   : > { %15581 = vmatprep.mubr.msk.f32.mxu0 %vm583_vm1, %v23569_v37  ;;  %14684 = vmatprep.mubr.msk.f32.mxu1 %vm583_vm1, %v23570_v59  ;;  %v23577_v37 = vld [vmem:[#allocation31_spill] sm:$0xff] }
 0x16e   : > { %15582 = vmatmul.mubr.msk.f32.gmra.mrb[6].mxu0 %vm583_vm1, %v23571_v31  ;;  %14685 = vmatmul.mubr.msk.f32.gmra.mrb[8].mxu1 %vm583_vm1, %v23572_v11  ;;  %v23579_v31 = vld [vmem:[#allocation34_spill] sm:$0xff] }
 0x16f   : > { %15584 = vmatprep.mubr.msk.f32.mxu0 %vm583_vm1, %v23573_v28  ;;  %14687 = vmatprep.mubr.msk.f32.mxu1 %vm583_vm1, %v23574_v41  ;;  %v23581_v28 = vld [vmem:[#allocation35_spill] sm:$0xff] }
 0x172   : > { %15585 = vmatmul.mubr.msk.f32.gmra.mrb[8].mxu0 %vm583_vm1, %v23575_v1  ;;  %14688 = vmatmul.mubr.msk.f32.gmra.mrb[10].mxu1 %vm583_vm1, %v23576_v58  ;;  %v23583_v1 = vld [vmem:[#allocation40_spill] sm:$0xff] }
 0x173   : > { %15587 = vmatprep.mubr.msk.f32.mxu0 %vm583_vm1, %v23577_v37  ;;  %14690 = vmatprep.mubr.msk.f32.mxu1 %vm583_vm1, %v23578_v12  ;;  %v23585_v37 = vld [vmem:[#allocation41_spill] sm:$0xff] }
 0x176   : > { %15588 = vmatmul.mubr.msk.f32.gmra.mrb[10].mxu0 %vm583_vm1, %v23579_v31  ;;  %14691 = vmatmul.mubr.msk.f32.gmra.mrb[12].mxu1 %vm583_vm1, %v23580_v2  ;;  %v23587_v31 = vld [vmem:[#allocation42_spill] sm:$0xff] }
 0x177   : > { %15590 = vmatprep.mubr.msk.f32.mxu0 %vm583_vm1, %v23581_v28  ;;  %14693 = vmatprep.mubr.msk.f32.mxu1 %vm583_vm1, %v23582_v8  ;;  %v23589_v28 = vld [vmem:[#allocation43_spill] sm:$0xff] }
 0x17a   : > { %15591 = vmatmul.mubr.msk.f32.gmra.mrb[12].mxu0 %vm583_vm1, %v23583_v1  ;;  %14694 = vmatmul.mubr.msk.f32.gmra.mrb[14].mxu1 %vm583_vm1, %v23584_v45  ;;  %v23591_v1 = vld [vmem:[#allocation45_spill] sm:$0xff] }
 0x17b   : > { %15593 = vmatprep.mubr.msk.f32.mxu0 %vm583_vm1, %v23585_v37  ;;  %14696 = vmatprep.mubr.msk.f32.mxu1 %vm583_vm1, %v23586_v18  ;;  %v23593_v37 = vld [vmem:[#allocation46_spill] sm:$0xff] }
 0x17e   : > { %15594 = vmatmul.mubr.msk.f32.gmra.mrb[14].mxu0 %vm583_vm1, %v23587_v31  ;;  %14697 = vmatmul.mubr.msk.f32.gmra.mrb[16].mxu1 %vm583_vm1, %v23588_v61  ;;  %v23595_v31 = vld [vmem:[#allocation47_spill] sm:$0xff] }
 0x17f   : > { %15596 = vmatprep.mubr.msk.f32.mxu0 %vm583_vm1, %v23589_v28  ;;  %14699 = vmatprep.mubr.msk.f32.mxu1 %vm583_vm1, %v23590_v48  ;;  %v23596_v28 = vld [vmem:[#allocation150_spill] sm:$0xff] }
 0x182   : > { %15597 = vmatmul.mubr.msk.f32.gmra.mrb[16].mxu0 %vm583_vm1, %v23591_v1  ;;  %14700 = vmatmul.mubr.msk.f32.gmra.mrb[18].mxu1 %vm583_vm1, %v23592_v16  ;;  %v23598_v1 = vld [vmem:[#allocation151_spill] sm:$0xff] }
 0x183   : > { %15599 = vmatprep.mubr.msk.f32.mxu0 %vm583_vm1, %v23593_v37  ;;  %14702 = vmatprep.mubr.msk.f32.mxu1 %vm583_vm1, %v23594_v19  ;;  %v23600_v37 = vld [vmem:[#allocation155_spill] sm:$0xff] }
 0x186   : > { %15600 = vmatmul.mubr.msk.f32.gmra.mrb[18].mxu0 %vm583_vm1, %v23595_v31  ;;  %14703 = vmatmul.mubr.msk.f32.gmra.mrb[20].mxu1 %vm583_vm1, %v23596_v28  ;;  %v23603_v31 = vld [vmem:[#allocation66_spill] sm:$0xff] }
 0x187   : > { %15602 = vmatprep.mubr.msk.f32.mxu0 %vm583_vm1, %v23597_v20  ;;  %14705 = vmatprep.mubr.msk.f32.mxu1 %vm583_vm1, %v23598_v1  ;;  %v23605_v20 = vld [vmem:[#allocation69_spill] sm:$0xff] }
 0x18a   : > { %15603 = vmatmul.mubr.msk.f32.gmra.mrb[20].mxu0 %vm583_vm1, %v23599_v36  ;;  %14706 = vmatmul.mubr.msk.f32.gmra.mrb[22].mxu1 %vm583_vm1, %v23600_v37  ;;  %v2299_v36 = vrot.slane %v20078_v33, 1 }
 0x18b   : > { %15605 = vmatprep.mubr.msk.f32.mxu0 %vm583_vm1, %v23601_v30  ;;  %14708 = vmatprep.mubr.msk.f32.mxu1 %vm583_vm1, %v23602_v56  ;;  %v20236_v30 = vld [vmem:[%s17734_s17 + $0x190] sm:$0x3] }
 0x18c   : > { %v20248_v35 = vsel %vm446_vm3, %v2299_v36, %v2300_v38  ;;  %v7877_v36 = vrot.slane %v19784_v46, 3 }
 0x18e   : > { %15606 = vmatmul.mubr.msk.f32.gmra.mrb[22].mxu0 %vm583_vm1, %v23603_v31  ;;  %14709 = vmatmul.mubr.msk.f32.gmra.mrb[24].mxu1 %vm583_vm1, %v23604_v55  ;;  %v23609_v31 = vld [vmem:[#allocation74_spill] sm:$0xff] }
 0x18f   : > { %15608 = vmatprep.mubr.msk.f32.mxu0 %vm583_vm1, %v23605_v20  ;;  %14711 = vmatprep.mubr.msk.f32.mxu1 %vm583_vm1, %v23606_v6  ;;  %v2302_v20 = vrot.slane %v20236_v30, 1 }
 0x192   : > { %15609 = vmatmul.mubr.msk.f32.gmra.mrb[24].mxu0 %vm583_vm1, %v23607_v34  ;;  %14712 = vmatmul.mubr.msk.f32.gmra.mrb[26].mxu1 %vm583_vm1, %v23608_v26  ;;  %v23612_v34 = vld [vmem:[#allocation162_spill] sm:$0xff] }
 0x193   : > { %15611 = vmatprep.mubr.msk.f32.mxu0 %vm583_vm1, %v23609_v31  ;;  %14714 = vmatprep.mubr.msk.f32.mxu1 %vm583_vm1, %v23610_v47  ;;  %v20261_v31 = vsel %vm446_vm3, %v2300_v38, %v2302_v20  ;;  %v20276_v38 = vsel %vm4897_vm2, %v7875_v10, %v7877_v36  ;;  %v20285_v20 = vld [vmem:[%s22565_s4 + $0x1c] sm:$0xf]  ;;  %v23621_v10 = vld [vmem:[#allocation81_spill] sm:$0xff]  ;;  %v23622_v36 = vld [vmem:[#allocation174_spill] sm:$0xff] }
 0x194   : > { %23617 = vst [vmem:[#allocation209_spill] sm:$0xff] %v20276_v38 }
 0x196   : > { %15612 = vmatmul.mubr.msk.f32.gmra.mrb[26].mxu0 %vm583_vm1, %v23611_v23  ;;  %14715 = vmatmul.mubr.msk.f32.gmra.mrb[28].mxu1 %vm583_vm1, %v23612_v34  ;;  %v23628_v23 = vld [vmem:[#allocation180_spill] sm:$0xff] }
 0x197   : > { %15614 = vmatprep.mubr.msk.f32.mxu0 %vm583_vm1, %v23613_v54  ;;  %14717 = vmatprep.mubr.msk.f32.mxu1 %vm583_vm1, %v20248_v35  ;;  %v23616_v54 = vld [vmem:[#allocation168_spill] sm:$0xff] }
 0x19a   : > { %15615 = vmatmul.mubr.msk.f32.gmra.mrb[28].mxu0 %vm583_vm1, %v23615_v63  ;;  %14718 = vmatmul.mubr.msk.f32.gmra.mrb[30].mxu1 %vm583_vm1, %v20261_v31  ;;  %v23619_v63 = vld [vmem:[#allocation37_spill] sm:$0xff] }
 0x19b   : > { %15617 = vmatprep.mubr.msk.f32.mxu0 %vm583_vm1, %v20265_v25  ;;  %14722 = vmatprep.mubr.msk.f32.mxu1 %vm583_vm1, %v23616_v54  ;;  %v23620_v25 = vld [vmem:[#allocation172_spill] sm:$0xff]  ;;  %v20298_v54 = vld [vmem:[%s22566_s5 + $0x40] sm:$0xf] }
 0x19e   : > { %15618 = vmatmul.mubr.msk.f32.gmra.mrb[30].mxu0 %vm583_vm1, %v20276_v38  ;;  %14723 = vmatmul.mubr.msk.f32.vlgmr.msra.gmra.mrb[0].mxu1 %vm583_vm1, %v23618_v4  ;;  %v23623_v4 = vld [vmem:[#allocation82_spill] sm:$0xff] }
 0x19f   : > { %15622 = vmatprep.mubr.msk.f32.mxu0 %vm583_vm1, %v23619_v63  ;;  %14725 = vmatprep.mubr.msk.f32.mxu1 %vm583_vm1, %v23620_v25  ;;  %v23625_v63 = vld [vmem:[#allocation86_spill] sm:$0xff] }
 0x1a0   : > { %14771 = vmatpush3.msk.msra.mxu1 %vm680_vm0, %v20118_v14  ;;  %v23624_v14 = vld [vmem:[#allocation176_spill] sm:$0xff]  ;;  %v23626_v38 = vld [vmem:[#allocation178_spill] sm:$0xff] }
 0x1a1   : > { %14820 = vmatprep.subr.msk.mxu1 %vm680_vm0, %v20285_v20 }
 0x1a2   : > { %15623 = vmatmul.mubr.msk.f32.vlgmr.msra.gmra.mrb[0].mxu0 %vm583_vm1, %v23621_v10  ;;  %14726 = vmatmul.mubr.msk.f32.gmra.mrb[2].mxu1 %vm583_vm1, %v23622_v36  ;;  %v23627_v10 = vld [vmem:[#allocation89_spill] sm:$0xff] }
 0x1a3   : > { %15671 = vmatpush3.msk.msra.mxu0 %vm680_vm0, %v20131_v29  ;;  %15625 = vmatprep.mubr.msk.f32.mxu0 %vm583_vm1, %v23623_v4  ;;  %v23629_v29 = vld [vmem:[#allocation90_spill] sm:$0xff] }
 0x1a4   : > { %14728 = vmatprep.mubr.msk.f32.mxu1 %vm583_vm1, %v23624_v14  ;;  %15720 = vmatprep.subr.msk.mxu0 %vm680_vm0, %v20298_v54  ;;  %v23630_v4 = vld [vmem:[#allocation182_spill] sm:$0xff] }
 0x1a6   : > { %15626 = vmatmul.mubr.msk.f32.gmra.mrb[2].mxu0 %vm583_vm1, %v23625_v63  ;;  %14729 = vmatmul.mubr.msk.f32.gmra.mrb[4].mxu1 %vm583_vm1, %v23626_v38  ;;  %v23633_v63 = vld [vmem:[#allocation95_spill] sm:$0xff] }
 0x1a7   : > { %15628 = vmatprep.mubr.msk.f32.mxu0 %vm583_vm1, %v23627_v10  ;;  %14731 = vmatprep.mubr.msk.f32.mxu1 %vm583_vm1, %v23628_v23  ;;  %v23635_v10 = vld [vmem:[#allocation97_spill] sm:$0xff]  ;;  %v23674_v23 = vld [vmem:[#allocation63_spill] sm:$0xff] }
 0x1aa   : > { %15629 = vmatmul.mubr.msk.f32.gmra.mrb[4].mxu0 %vm583_vm1, %v23629_v29  ;;  %14732 = vmatmul.mubr.msk.f32.gmra.mrb[6].mxu1 %vm583_vm1, %v23630_v4  ;;  %v23637_v29 = vld [vmem:[#allocation98_spill] sm:$0xff] }
 0x1ab   : > { %15631 = vmatprep.mubr.msk.f32.mxu0 %vm583_vm1, %v23631_v22  ;;  %14734 = vmatprep.mubr.msk.f32.mxu1 %vm583_vm1, %v23632_v27  ;;  %v23638_v4 = vld [vmem:[#allocation190_spill] sm:$0xff]  ;;  %v23639_v22 = vld [vmem:[#allocation101_spill] sm:$0xff]  ;;  %v23640_v27 = vld [vmem:[#allocation192_spill] sm:$0xff] }
 0x1ae   : > { %15632 = vmatmul.mubr.msk.f32.gmra.mrb[6].mxu0 %vm583_vm1, %v23633_v63  ;;  %14735 = vmatmul.mubr.msk.f32.gmra.mrb[8].mxu1 %vm583_vm1, %v23634_v9  ;;  %v23641_v63 = vld [vmem:[#allocation103_spill] sm:$0xff]  ;;  %v23642_v9 = vld [vmem:[#allocation194_spill] sm:$0xff] }
 0x1af   : > { %15634 = vmatprep.mubr.msk.f32.mxu0 %vm583_vm1, %v23635_v10  ;;  %14737 = vmatprep.mubr.msk.f32.mxu1 %vm583_vm1, %v23636_v15  ;;  %v23643_v10 = vld [vmem:[#allocation19_spill] sm:$0xff]  ;;  %v23644_v15 = vld [vmem:[#allocation196_spill] sm:$0xff] }
 0x1b2   : > { %15635 = vmatmul.mubr.msk.f32.gmra.mrb[8].mxu0 %vm583_vm1, %v23637_v29  ;;  %14738 = vmatmul.mubr.msk.f32.gmra.mrb[10].mxu1 %vm583_vm1, %v23638_v4  ;;  %v23645_v29 = vld [vmem:[#allocation104_spill] sm:$0xff]  ;;  %v23646_v4 = vld [vmem:[#allocation198_spill] sm:$0xff] }
 0x1b3   : > { %15637 = vmatprep.mubr.msk.f32.mxu0 %vm583_vm1, %v23639_v22  ;;  %14740 = vmatprep.mubr.msk.f32.mxu1 %vm583_vm1, %v23640_v27  ;;  %v23647_v22 = vld [vmem:[#allocation105_spill] sm:$0xff]  ;;  %v23648_v27 = vld [vmem:[#allocation148_spill] sm:$0xff] }
 0x1b6   : > { %15638 = vmatmul.mubr.msk.f32.gmra.mrb[10].mxu0 %vm583_vm1, %v23641_v63  ;;  %14741 = vmatmul.mubr.msk.f32.gmra.mrb[12].mxu1 %vm583_vm1, %v23642_v9  ;;  %v23649_v63 = vld [vmem:[#allocation22_spill] sm:$0xff]  ;;  %v23650_v9 = vld [vmem:[#allocation200_spill] sm:$0xff] }
 0x1b7   : > { %15640 = vmatprep.mubr.msk.f32.mxu0 %vm583_vm1, %v23643_v10  ;;  %14743 = vmatprep.mubr.msk.f32.mxu1 %vm583_vm1, %v23644_v15  ;;  %v23651_v10 = vld [vmem:[#allocation106_spill] sm:$0xff]  ;;  %v23652_v15 = vld [vmem:[#allocation137_spill] sm:$0xff] }
 0x1ba   : > { %15641 = vmatmul.mubr.msk.f32.gmra.mrb[12].mxu0 %vm583_vm1, %v23645_v29  ;;  %14744 = vmatmul.mubr.msk.f32.gmra.mrb[14].mxu1 %vm583_vm1, %v23646_v4  ;;  %v23653_v29 = vld [vmem:[#allocation28_spill] sm:$0xff] }
 0x1bb   : > { %15643 = vmatprep.mubr.msk.f32.mxu0 %vm583_vm1, %v23647_v22  ;;  %14746 = vmatprep.mubr.msk.f32.mxu1 %vm583_vm1, %v23648_v27  ;;  %v23654_v4 = vld [vmem:[#allocation204_spill] sm:$0xff]  ;;  %v23656_v27 = vld [vmem:[#allocation205_spill] sm:$0xff] }
 0x1bc   : > { %v23655_v22 = vld [vmem:[#allocation108_spill] sm:$0xff] }
 0x1be   : > { %15644 = vmatmul.mubr.msk.f32.gmra.mrb[14].mxu0 %vm583_vm1, %v23649_v63  ;;  %14747 = vmatmul.mubr.msk.f32.gmra.mrb[16].mxu1 %vm583_vm1, %v23650_v9  ;;  %v23657_v63 = vld [vmem:[#allocation32_spill] sm:$0xff]  ;;  %v23658_v9 = vld [vmem:[#allocation207_spill] sm:$0xff] }
 0x1bf   : > { %15646 = vmatprep.mubr.msk.f32.mxu0 %vm583_vm1, %v23651_v10  ;;  %14749 = vmatprep.mubr.msk.f32.mxu1 %vm583_vm1, %v23652_v15  ;;  %v23659_v10 = vld [vmem:[#allocation36_spill] sm:$0xff]  ;;  %v23660_v15 = vld [vmem:[#allocation62_spill] sm:$0xff] }
 0x1c2   : > { %15647 = vmatmul.mubr.msk.f32.gmra.mrb[16].mxu0 %vm583_vm1, %v23653_v29  ;;  %14750 = vmatmul.mubr.msk.f32.gmra.mrb[18].mxu1 %vm583_vm1, %v23654_v4  ;;  %v23661_v29 = vld [vmem:[#allocation38_spill] sm:$0xff]  ;;  %v23662_v4 = vld [vmem:[#allocation211_spill] sm:$0xff] }
 0x1c3   : > { %15649 = vmatprep.mubr.msk.f32.mxu0 %vm583_vm1, %v23655_v22  ;;  %14752 = vmatprep.mubr.msk.f32.mxu1 %vm583_vm1, %v23656_v27  ;;  %v23663_v22 = vld [vmem:[#allocation39_spill] sm:$0xff]  ;;  %v23669_v27 = vld [vmem:[#allocation57_spill] sm:$0xff] }
 0x1c6   : > { %15650 = vmatmul.mubr.msk.f32.gmra.mrb[18].mxu0 %vm583_vm1, %v23657_v63  ;;  %14753 = vmatmul.mubr.msk.f32.gmra.mrb[20].mxu1 %vm583_vm1, %v23658_v9  ;;  %v23664_v63 = vld [vmem:[#allocation213_spill] sm:$0xff]  ;;  %v23665_v9 = vld [vmem:[#allocation44_spill] sm:$0xff] }
 0x1c7   : > { %15652 = vmatprep.mubr.msk.f32.mxu0 %vm583_vm1, %v23659_v10  ;;  %14755 = vmatprep.mubr.msk.f32.mxu1 %vm583_vm1, %v23660_v15  ;;  %v23666_v10 = vld [vmem:[#allocation216_spill] sm:$0xff] }
 0x1c8   : > { %v23667_v15 = vld [vmem:[#allocation56_spill] sm:$0xff] }
 0x1ca   : > { %15653 = vmatmul.mubr.msk.f32.gmra.mrb[20].mxu0 %vm583_vm1, %v23661_v29  ;;  %14756 = vmatmul.mubr.msk.f32.gmra.mrb[22].mxu1 %vm583_vm1, %v23662_v4  ;;  %v23668_v29 = vld [vmem:[#allocation218_spill] sm:$0xff]  ;;  %v2570_v4 = vrot.slane %v20078_v33, 2 }
 0x1cb   : > { %15655 = vmatprep.mubr.msk.f32.mxu0 %vm583_vm1, %v23663_v22  ;;  %14758 = vmatprep.mubr.msk.f32.mxu1 %vm583_vm1, %v23664_v63  ;;  %v2571_v22 = vrot.slane %v20094_v5, 2  ;;  %v23670_v63 = vld [vmem:[#allocation222_spill] sm:$0xff] }
 0x1ce   : > { %15656 = vmatmul.mubr.msk.f32.gmra.mrb[22].mxu0 %vm583_vm1, %v23665_v9  ;;  %14759 = vmatmul.mubr.msk.f32.gmra.mrb[24].mxu1 %vm583_vm1, %v23666_v10  ;;  %v23671_v9 = vld [vmem:[#allocation60_spill] sm:$0xff] }
 0x1cf   : > { %15658 = vmatprep.mubr.msk.f32.mxu0 %vm583_vm1, %v23667_v15  ;;  %14761 = vmatprep.mubr.msk.f32.mxu1 %vm583_vm1, %v23668_v29  ;;  %v2573_v15 = vrot.slane %v20236_v30, 2  ;;  %v20412_v29 = vsel %vm1623_vm4, %v2570_v4, %v2571_v22  ;;  %v20415_v10 = vld [vmem:[%s17739_s20 + $0x198] sm:$0xff]  ;;  %v23675_v30 = vld [vmem:[#allocation109_spill] sm:$0xff] }
 0x1d0   : > { %23672 = vst [vmem:[#allocation164_spill] sm:$0xff] %v20415_v10  ;;  %v8145_v50 = vrot.slane %v20415_v10, 4 }
 0x1d1   : > { %v20431_v4 = vsel %vm1623_vm4, %v2571_v22, %v2573_v15  ;;  %v20458_v22 = vld [vmem:[%s17739_s20 + $0x48] sm:$0xff] }
 0x1d2   : > { %15659 = vmatmul.mubr.msk.f32.gmra.mrb[24].mxu0 %vm583_vm1, %v23669_v27  ;;  %14762 = vmatmul.mubr.msk.f32.gmra.mrb[26].mxu1 %vm583_vm1, %v23670_v63  ;;  %v20419_v27 = vld [vmem:[%s17739_s20 + $0x1a0] sm:$0xff] }
 0x1d3   : > { %15661 = vmatprep.mubr.msk.f32.mxu0 %vm583_vm1, %v23671_v9  ;;  %14764 = vmatprep.mubr.msk.f32.mxu1 %vm583_vm1, %v19779_v32  ;;  %23673 = vst [vmem:[#allocation214_spill] sm:$0xff] %v20419_v27  ;;  %v8146_v63 = vrot.slane %v20419_v27, 4  ;;  %v8148_v9 = vrot.slane %v19784_v46, 4  ;;  %v17463_v46 = vld [vmem:[%s17734_s17 + $0x38] sm:$0xff] }
 0x1d5   : > { %v20435_v32 = vsel %vm680_vm0, %v8145_v50, %v8146_v63  ;;  %v20446_v15 = vsel %vm680_vm0, %v8146_v63, %v8148_v9  ;;  %v20455_v50 = vld [vmem:[%s22565_s4 + $0x20] sm:$0xf]  ;;  %v17465_v9 = vld [vmem:[%s17734_s17 + $0x48] sm:$0xff]  ;;  %v20471_v63 = vld [vmem:[%s22566_s5 + $0x44] sm:$0xf] }
 0x1d6   : > { %15662 = vmatmul.mubr.msk.f32.gmra.mrb[26].mxu0 %vm583_vm1, %v23674_v23  ;;  %14765 = vmatmul.mubr.msk.f32.gmra.mrb[28].mxu1 %vm583_vm1, %v19798_v39  ;;  %23676 = vst [vmem:[#allocation219_spill] sm:$0xff] %v20435_v32  ;;  %v23677_v23 = vld [vmem:[#allocation6_spill] sm:$0xff]  ;;  %23678 = vst [vmem:[#allocation166_spill] sm:$0xff] %v20446_v15 }
 0x1d7   : > { %15664 = vmatprep.mubr.msk.f32.mxu0 %vm583_vm1, %v23675_v30  ;;  %14767 = vmatprep.mubr.msk.f32.mxu1 %vm583_vm1, %v20412_v29  ;;  %v17462_v30 = vld [vmem:[%s17734_s17 + $0x30] sm:$0xff] }
 0x1da   : > { %15665 = vmatmul.mubr.msk.f32.gmra.mrb[28].mxu0 %vm583_vm1, %v23677_v23  ;;  %14768 = vmatmul.mubr.msk.f32.gmra.mrb[30].mxu1 %vm583_vm1, %v20431_v4  ;;  %v17475_v23 = vld [vmem:[%s17734_s17 + $0x80] sm:$0xff] }
 0x1db   : > { %15667 = vmatprep.mubr.msk.f32.mxu0 %vm583_vm1, %v20435_v32  ;;  %14772 = vmatprep.mubr.msk.f32.mxu1 %vm583_vm1, %v17462_v30  ;;  %v20474_v30 = vld [vmem:[%s17739_s20 + $0x50] sm:$0xff]  ;;  %v20506_v32 = vld [vmem:[%s17739_s20 + $0x80] sm:$0xff] }
 0x1dc   : > { %23680 = vst [vmem:[#allocation5_spill] sm:$0xff] %v20506_v32 }
 0x1de   : > { %15668 = vmatmul.mubr.msk.f32.gmra.mrb[30].mxu0 %vm583_vm1, %v20446_v15  ;;  %14773 = vmatmul.mubr.msk.f32.vlgmr.msra.gmra.mrb[0].mxu1 %vm583_vm1, %v17463_v46  ;;  %v17467_v46 = vld [vmem:[%s17734_s17 + $0x50] sm:$0xff]  ;;  %v20492_v15 = vld [vmem:[%s17739_s20 + $0x68] sm:$0xff] }
 0x1df   : > { %15672 = vmatprep.mubr.msk.f32.mxu0 %vm583_vm1, %v20458_v22  ;;  %14775 = vmatprep.mubr.msk.f32.mxu1 %vm583_vm1, %v17465_v9  ;;  %v17469_v9 = vld [vmem:[%s17734_s17 + $0x60] sm:$0xff] }
 0x1e0   : > { %14821 = vmatpush3.msk.msra.mxu1 %vm680_vm0, %v20285_v20  ;;  %v20483_v20 = vld [vmem:[%s17739_s20 + $0x60] sm:$0xff] }
 0x1e1   : > { %14870 = vmatprep.subr.msk.mxu1 %vm680_vm0, %v20455_v50 }
 0x1e2   : > { %15673 = vmatmul.mubr.msk.f32.vlgmr.msra.gmra.mrb[0].mxu0 %vm583_vm1, %v20474_v30  ;;  %14776 = vmatmul.mubr.msk.f32.gmra.mrb[2].mxu1 %vm583_vm1, %v17467_v46  ;;  %v20499_v46 = vld [vmem:[%s17739_s20 + $0x78] sm:$0xff] }
 0x1e3   : > { %15721 = vmatpush3.msk.msra.mxu0 %vm680_vm0, %v20298_v54  ;;  %15675 = vmatprep.mubr.msk.f32.mxu0 %vm583_vm1, %v20483_v20  ;;  %v17471_v54 = vld [vmem:[%s17734_s17 + $0x68] sm:$0xff]  ;;  %23679 = vst [vmem:[#allocation220_spill] sm:$0xff] %v20499_v46 }
 0x1e4   : > { %14778 = vmatprep.mubr.msk.f32.mxu1 %vm583_vm1, %v17469_v9  ;;  %15770 = vmatprep.subr.msk.mxu0 %vm680_vm0, %v20471_v63  ;;  %v17473_v9 = vld [vmem:[%s17734_s17 + $0x78] sm:$0xff] }
 0x1e6   : > { %15676 = vmatmul.mubr.msk.f32.gmra.mrb[2].mxu0 %vm583_vm1, %v20492_v15  ;;  %14779 = vmatmul.mubr.msk.f32.gmra.mrb[4].mxu1 %vm583_vm1, %v17471_v54  ;;  %v20513_v54 = vld [vmem:[%s17739_s20 + $0x90] sm:$0xff] }
 0x1e7   : > { %15678 = vmatprep.mubr.msk.f32.mxu0 %vm583_vm1, %v20499_v46  ;;  %14781 = vmatprep.mubr.msk.f32.mxu1 %vm583_vm1, %v17473_v9  ;;  %23681 = vst [vmem:[#allocation112_spill] sm:$0xff] %v20513_v54  ;;  %v17477_v46 = vld [vmem:[%s17734_s17 + $0x90] sm:$0xff]  ;;  %v20520_v9 = vld [vmem:[%s17739_s20 + $0x98] sm:$0xff] }
 0x1e8   : > { %23682 = vst [vmem:[#allocation115_spill] sm:$0xff] %v20520_v9 }
 0x1ea   : > { %15679 = vmatmul.mubr.msk.f32.gmra.mrb[4].mxu0 %vm583_vm1, %v20506_v32  ;;  %14782 = vmatmul.mubr.msk.f32.gmra.mrb[6].mxu1 %vm583_vm1, %v17475_v23  ;;  %v17479_v32 = vld [vmem:[%s17734_s17 + $0x98] sm:$0xff]  ;;  %v20527_v23 = vld [vmem:[%s17739_s20 + $0xa8] sm:$0xff] }
 0x1eb   : > { %15681 = vmatprep.mubr.msk.f32.mxu0 %vm583_vm1, %v20513_v54  ;;  %14784 = vmatprep.mubr.msk.f32.mxu1 %vm583_vm1, %v17477_v46  ;;  %23683 = vst [vmem:[#allocation117_spill] sm:$0xff] %v20527_v23  ;;  %v17481_v54 = vld [vmem:[%s17734_s17 + $0xa8] sm:$0xff]  ;;  %v20534_v46 = vld [vmem:[%s17739_s20 + $0xb0] sm:$0xff] }
 0x1ec   : > { %23684 = vst [vmem:[#allocation118_spill] sm:$0xff] %v20534_v46 }
 0x1ee   : > { %15682 = vmatmul.mubr.msk.f32.gmra.mrb[6].mxu0 %vm583_vm1, %v20520_v9  ;;  %14785 = vmatmul.mubr.msk.f32.gmra.mrb[8].mxu1 %vm583_vm1, %v17479_v32  ;;  %v17483_v9 = vld [vmem:[%s17734_s17 + $0xb0] sm:$0xff]  ;;  %v20541_v32 = vld [vmem:[%s17739_s20 + $0xc0] sm:$0xff] }
 0x1ef   : > { %15684 = vmatprep.mubr.msk.f32.mxu0 %vm583_vm1, %v20527_v23  ;;  %14787 = vmatprep.mubr.msk.f32.mxu1 %vm583_vm1, %v17481_v54  ;;  %23685 = vst [vmem:[#allocation119_spill] sm:$0xff] %v20541_v32  ;;  %v17485_v23 = vld [vmem:[%s17734_s17 + $0xc0] sm:$0xff]  ;;  %v20548_v54 = vld [vmem:[%s17739_s20 + $0xc8] sm:$0xff] }
 0x1f0   : > { %23686 = vst [vmem:[#allocation120_spill] sm:$0xff] %v20548_v54 }
 0x1f2   : > { %15685 = vmatmul.mubr.msk.f32.gmra.mrb[8].mxu0 %vm583_vm1, %v20534_v46  ;;  %14788 = vmatmul.mubr.msk.f32.gmra.mrb[10].mxu1 %vm583_vm1, %v17483_v9  ;;  %v17487_v46 = vld [vmem:[%s17734_s17 + $0xc8] sm:$0xff]  ;;  %v20555_v9 = vld [vmem:[%s17739_s20 + $0xd8] sm:$0xff] }
 0x1f3   : > { %15687 = vmatprep.mubr.msk.f32.mxu0 %vm583_vm1, %v20541_v32  ;;  %14790 = vmatprep.mubr.msk.f32.mxu1 %vm583_vm1, %v17485_v23  ;;  %23687 = vst [vmem:[#allocation121_spill] sm:$0xff] %v20555_v9  ;;  %v17489_v32 = vld [vmem:[%s17734_s17 + $0xd8] sm:$0xff]  ;;  %v20562_v23 = vld [vmem:[%s17739_s20 + $0xe0] sm:$0xff] }
 0x1f4   : > { %23688 = vst [vmem:[#allocation122_spill] sm:$0xff] %v20562_v23 }
 0x1f6   : > { %15688 = vmatmul.mubr.msk.f32.gmra.mrb[10].mxu0 %vm583_vm1, %v20548_v54  ;;  %14791 = vmatmul.mubr.msk.f32.gmra.mrb[12].mxu1 %vm583_vm1, %v17487_v46  ;;  %v17491_v54 = vld [vmem:[%s17734_s17 + $0xe0] sm:$0xff]  ;;  %v20569_v46 = vld [vmem:[%s17739_s20 + $0xf0] sm:$0xff] }
 0x1f7   : > { %15690 = vmatprep.mubr.msk.f32.mxu0 %vm583_vm1, %v20555_v9  ;;  %14793 = vmatprep.mubr.msk.f32.mxu1 %vm583_vm1, %v17489_v32  ;;  %23689 = vst [vmem:[#allocation123_spill] sm:$0xff] %v20569_v46  ;;  %v17493_v9 = vld [vmem:[%s17734_s17 + $0xf0] sm:$0xff]  ;;  %v20576_v32 = vld [vmem:[%s17739_s20 + $0xf8] sm:$0xff] }
 0x1f8   : > { %23690 = vst [vmem:[#allocation124_spill] sm:$0xff] %v20576_v32 }
 0x1fa   : > { %15691 = vmatmul.mubr.msk.f32.gmra.mrb[12].mxu0 %vm583_vm1, %v20562_v23  ;;  %14794 = vmatmul.mubr.msk.f32.gmra.mrb[14].mxu1 %vm583_vm1, %v17491_v54  ;;  %v17495_v23 = vld [vmem:[%s17734_s17 + $0xf8] sm:$0xff]  ;;  %v20583_v54 = vld [vmem:[%s17739_s20 + $0x108] sm:$0xff] }
 0x1fb   : > { %15693 = vmatprep.mubr.msk.f32.mxu0 %vm583_vm1, %v20569_v46  ;;  %14796 = vmatprep.mubr.msk.f32.mxu1 %vm583_vm1, %v17493_v9  ;;  %23691 = vst [vmem:[#allocation125_spill] sm:$0xff] %v20583_v54  ;;  %v17497_v46 = vld [vmem:[%s17734_s17 + $0x108] sm:$0xff]  ;;  %v20590_v9 = vld [vmem:[%s17739_s20 + $0x110] sm:$0xff] }
 0x1fc   : > { %23692 = vst [vmem:[#allocation126_spill] sm:$0xff] %v20590_v9 }
 0x1fe   : > { %15694 = vmatmul.mubr.msk.f32.gmra.mrb[14].mxu0 %vm583_vm1, %v20576_v32  ;;  %14797 = vmatmul.mubr.msk.f32.gmra.mrb[16].mxu1 %vm583_vm1, %v17495_v23  ;;  %v17499_v32 = vld [vmem:[%s17734_s17 + $0x110] sm:$0xff]  ;;  %v20597_v23 = vld [vmem:[%s17739_s20 + $0x120] sm:$0xff] }
 0x1ff   : > { %15696 = vmatprep.mubr.msk.f32.mxu0 %vm583_vm1, %v20583_v54  ;;  %14799 = vmatprep.mubr.msk.f32.mxu1 %vm583_vm1, %v17497_v46  ;;  %23693 = vst [vmem:[#allocation128_spill] sm:$0xff] %v20597_v23  ;;  %v17501_v54 = vld [vmem:[%s17734_s17 + $0x120] sm:$0xff]  ;;  %v20604_v46 = vld [vmem:[%s17739_s20 + $0x128] sm:$0xff] }
 0x200   : > { %23694 = vst [vmem:[#allocation129_spill] sm:$0xff] %v20604_v46 }
 0x202   : > { %15697 = vmatmul.mubr.msk.f32.gmra.mrb[16].mxu0 %vm583_vm1, %v20590_v9  ;;  %14800 = vmatmul.mubr.msk.f32.gmra.mrb[18].mxu1 %vm583_vm1, %v17499_v32  ;;  %v20611_v9 = vld [vmem:[%s17739_s20 + $0x138] sm:$0xff] }
 0x203   : > { %15699 = vmatprep.mubr.msk.f32.mxu0 %vm583_vm1, %v20597_v23  ;;  %14802 = vmatprep.mubr.msk.f32.mxu1 %vm583_vm1, %v17501_v54  ;;  %23695 = vst [vmem:[#allocation133_spill] sm:$0xff] %v20611_v9  ;;  %v17504_v32 = vld [vmem:[%s17734_s17 + $0x138] sm:$0xff]  ;;  %v20618_v54 = vld [vmem:[%s17739_s20 + $0x140] sm:$0xff] }
 0x204   : > { %23696 = vst [vmem:[#allocation134_spill] sm:$0xff] %v20618_v54 }
 0x206   : > { %15700 = vmatmul.mubr.msk.f32.gmra.mrb[18].mxu0 %vm583_vm1, %v20604_v46  ;;  %14803 = vmatmul.mubr.msk.f32.gmra.mrb[20].mxu1 %vm583_vm1, %v23537_v24  ;;  %v20625_v24 = vld [vmem:[%s17739_s20 + $0x150] sm:$0xff] }
 0x207   : > { %15702 = vmatprep.mubr.msk.f32.mxu0 %vm583_vm1, %v20611_v9  ;;  %14805 = vmatprep.mubr.msk.f32.mxu1 %vm583_vm1, %v17504_v32  ;;  %23697 = vst [vmem:[#allocation138_spill] sm:$0xff] %v20625_v24  ;;  %v20632_v32 = vld [vmem:[%s17739_s20 + $0x158] sm:$0xff] }
 0x208   : > { %23698 = vst [vmem:[#allocation139_spill] sm:$0xff] %v20632_v32 }
 0x20a   : > { %15703 = vmatmul.mubr.msk.f32.gmra.mrb[20].mxu0 %vm583_vm1, %v20618_v54  ;;  %14806 = vmatmul.mubr.msk.f32.gmra.mrb[22].mxu1 %vm583_vm1, %v23542_v17  ;;  %v20639_v17 = vld [vmem:[%s17739_s20 + $0x168] sm:$0xff] }
 0x20b   : > { %15705 = vmatprep.mubr.msk.f32.mxu0 %vm583_vm1, %v20625_v24  ;;  %14808 = vmatprep.mubr.msk.f32.mxu1 %vm583_vm1, %v19714_v40  ;;  %23699 = vst [vmem:[#allocation145_spill] sm:$0xff] %v20639_v17  ;;  %v20646_v24 = vld [vmem:[%s17739_s20 + $0x170] sm:$0xff]  ;;  %v20653_v40 = vld [vmem:[%s17739_s20 + $0x180] sm:$0xff] }
 0x20c   : > { %23700 = vst [vmem:[#allocation146_spill] sm:$0xff] %v20653_v40 }
 0x20e   : > { %15706 = vmatmul.mubr.msk.f32.gmra.mrb[22].mxu0 %vm583_vm1, %v20632_v32  ;;  %14809 = vmatmul.mubr.msk.f32.gmra.mrb[24].mxu1 %vm583_vm1, %v23546_v0  ;;  %v20660_v0 = vld [vmem:[%s17734_s17 + $0x198] sm:$0xff] }
 0x20f   : > { %15708 = vmatprep.mubr.msk.f32.mxu0 %vm583_vm1, %v20639_v17  ;;  %14811 = vmatprep.mubr.msk.f32.mxu1 %vm583_vm1, %v23547_v53  ;;  %v20663_v53 = vld [vmem:[%s17739_s20 + $0x188] sm:$0xff] }
 0x210   : > { %23701 = vst [vmem:[#allocation150_spill] sm:$0xff] %v20663_v53 }
 0x212   : > { %15709 = vmatmul.mubr.msk.f32.gmra.mrb[24].mxu0 %vm583_vm1, %v20646_v24  ;;  %14812 = vmatmul.mubr.msk.f32.gmra.mrb[26].mxu1 %vm583_vm1, %v23551_v52  ;;  %v20674_v52 = vld [vmem:[%s17734_s17 + $0x1a0] sm:$0xff] }
 0x213   : > { %15711 = vmatprep.mubr.msk.f32.mxu0 %vm583_vm1, %v20653_v40  ;;  %14814 = vmatprep.mubr.msk.f32.mxu1 %vm583_vm1, %v20078_v33  ;;  %v20677_v40 = vld [vmem:[%s17739_s20 + $0x1b0] sm:$0xff]  ;;  %v20688_v33 = vld [vmem:[%s17739_s20 + $0x1b8] sm:$0xff] }
 0x216   : > { %15712 = vmatmul.mubr.msk.f32.gmra.mrb[26].mxu0 %vm583_vm1, %v20663_v53  ;;  %14815 = vmatmul.mubr.msk.f32.gmra.mrb[28].mxu1 %vm583_vm1, %v20094_v5  ;;  %v20697_v5 = vld [vmem:[%s22566_s5] sm:$0xf]  ;;  %v20815_v53 = vld [vmem:[%s17734_s17 + $0x1a8] sm:$0x3] }
 0x217   : > { %15714 = vmatprep.mubr.msk.f32.mxu0 %vm583_vm1, %v20415_v10  ;;  %14817 = vmatprep.mubr.msk.f32.mxu1 %vm583_vm1, %v20660_v0  ;;  %v23706_v10 = vld [vmem:[#allocation179_spill] sm:$0xff] }
 0x21a   : > { %15715 = vmatmul.mubr.msk.f32.gmra.mrb[28].mxu0 %vm583_vm1, %v20419_v27  ;;  %14818 = vmatmul.mubr.msk.f32.gmra.mrb[30].mxu1 %vm583_vm1, %v20674_v52  ;;  %v23702_v27 = vld [vmem:[#allocation171_spill] sm:$0xff] }
 0x21b   : > { %15717 = vmatprep.mubr.msk.f32.mxu0 %vm583_vm1, %v20677_v40  ;;  %14822 = vmatprep.mubr.msk.f32.mxu1 %vm583_vm1, %v23558_v42  ;;  %v20710_v42 = vld [vmem:[%s22566_s5 + $0x48] sm:$0xf] }
 0x21e   : > { %15718 = vmatmul.mubr.msk.f32.gmra.mrb[30].mxu0 %vm583_vm1, %v20688_v33  ;;  %14823 = vmatmul.mubr.msk.f32.vlgmr.msra.gmra.mrb[0].mxu1 %vm583_vm1, %v23560_v7  ;;  %v23703_v7 = vld [vmem:[#allocation173_spill] sm:$0xff] }
 0x21f   : > { %15722 = vmatprep.mubr.msk.f32.mxu0 %vm583_vm1, %v23702_v27  ;;  %14825 = vmatprep.mubr.msk.f32.mxu1 %vm583_vm1, %v23562_v49  ;;  %v23704_v49 = vld [vmem:[#allocation175_spill] sm:$0xff] }
 0x220   : > { %14871 = vmatpush3.msk.msra.mxu1 %vm680_vm0, %v20455_v50  ;;  %v23705_v50 = vld [vmem:[#allocation177_spill] sm:$0xff] }
 0x221   : > { %14920 = vmatprep.subr.msk.mxu1 %vm680_vm0, %v20697_v5 }
 0x222   : > { %15723 = vmatmul.mubr.msk.f32.vlgmr.msra.gmra.mrb[0].mxu0 %vm583_vm1, %v23703_v7  ;;  %14826 = vmatmul.mubr.msk.f32.gmra.mrb[2].mxu1 %vm583_vm1, %v23564_v13  ;;  %v23707_v13 = vld [vmem:[#allocation181_spill] sm:$0xff] }
 0x223   : > { %15771 = vmatpush3.msk.msra.mxu0 %vm680_vm0, %v20471_v63  ;;  %15725 = vmatprep.mubr.msk.f32.mxu0 %vm583_vm1, %v23704_v49  ;;  %v23709_v63 = vld [vmem:[#allocation185_spill] sm:$0xff] }
 0x224   : > { %14828 = vmatprep.mubr.msk.f32.mxu1 %vm583_vm1, %v23566_v57  ;;  %15820 = vmatprep.subr.msk.mxu0 %vm680_vm0, %v20710_v42  ;;  %v23708_v57 = vld [vmem:[#allocation183_spill] sm:$0xff] }
 0x226   : > { %15726 = vmatmul.mubr.msk.f32.gmra.mrb[2].mxu0 %vm583_vm1, %v23705_v50  ;;  %14829 = vmatmul.mubr.msk.f32.gmra.mrb[4].mxu1 %vm583_vm1, %v23568_v51  ;;  %v23710_v51 = vld [vmem:[#allocation187_spill] sm:$0xff] }
 0x227   : > { %15728 = vmatprep.mubr.msk.f32.mxu0 %vm583_vm1, %v23706_v10  ;;  %14831 = vmatprep.mubr.msk.f32.mxu1 %vm583_vm1, %v23570_v59  ;;  %v23711_v59 = vld [vmem:[#allocation189_spill] sm:$0xff] }
 0x22a   : > { %15729 = vmatmul.mubr.msk.f32.gmra.mrb[4].mxu0 %vm583_vm1, %v23707_v13  ;;  %14832 = vmatmul.mubr.msk.f32.gmra.mrb[6].mxu1 %vm583_vm1, %v23572_v11  ;;  %v23712_v11 = vld [vmem:[#allocation191_spill] sm:$0xff] }
 0x22b   : > { %15731 = vmatprep.mubr.msk.f32.mxu0 %vm583_vm1, %v23708_v57  ;;  %14834 = vmatprep.mubr.msk.f32.mxu1 %vm583_vm1, %v23574_v41  ;;  %v23713_v41 = vld [vmem:[#allocation193_spill] sm:$0xff] }
 0x22e   : > { %15732 = vmatmul.mubr.msk.f32.gmra.mrb[6].mxu0 %vm583_vm1, %v23709_v63  ;;  %14835 = vmatmul.mubr.msk.f32.gmra.mrb[8].mxu1 %vm583_vm1, %v23576_v58  ;;  %v23714_v58 = vld [vmem:[#allocation195_spill] sm:$0xff] }
 0x22f   : > { %15734 = vmatprep.mubr.msk.f32.mxu0 %vm583_vm1, %v23710_v51  ;;  %14837 = vmatprep.mubr.msk.f32.mxu1 %vm583_vm1, %v23578_v12  ;;  %v23715_v12 = vld [vmem:[#allocation132_spill] sm:$0xff] }
 0x232   : > { %15735 = vmatmul.mubr.msk.f32.gmra.mrb[8].mxu0 %vm583_vm1, %v23711_v59  ;;  %14838 = vmatmul.mubr.msk.f32.gmra.mrb[10].mxu1 %vm583_vm1, %v23580_v2  ;;  %v23716_v2 = vld [vmem:[#allocation144_spill] sm:$0xff] }
 0x233   : > { %15737 = vmatprep.mubr.msk.f32.mxu0 %vm583_vm1, %v23712_v11  ;;  %14840 = vmatprep.mubr.msk.f32.mxu1 %vm583_vm1, %v23582_v8  ;;  %v23717_v8 = vld [vmem:[#allocation199_spill] sm:$0xff] }
 0x236   : > { %15738 = vmatmul.mubr.msk.f32.gmra.mrb[10].mxu0 %vm583_vm1, %v23713_v41  ;;  %14841 = vmatmul.mubr.msk.f32.gmra.mrb[12].mxu1 %vm583_vm1, %v23584_v45  ;;  %v23718_v45 = vld [vmem:[#allocation201_spill] sm:$0xff] }
 0x237   : > { %15740 = vmatprep.mubr.msk.f32.mxu0 %vm583_vm1, %v23714_v58  ;;  %14843 = vmatprep.mubr.msk.f32.mxu1 %vm583_vm1, %v23586_v18  ;;  %v23719_v18 = vld [vmem:[#allocation142_spill] sm:$0xff] }
 0x23a   : > { %15741 = vmatmul.mubr.msk.f32.gmra.mrb[12].mxu0 %vm583_vm1, %v23715_v12  ;;  %14844 = vmatmul.mubr.msk.f32.gmra.mrb[14].mxu1 %vm583_vm1, %v23588_v61  ;;  %v23720_v61 = vld [vmem:[#allocation154_spill] sm:$0xff] }
 0x23b   : > { %15743 = vmatprep.mubr.msk.f32.mxu0 %vm583_vm1, %v23716_v2  ;;  %14846 = vmatprep.mubr.msk.f32.mxu1 %vm583_vm1, %v23590_v48  ;;  %v23724_v48 = vld [vmem:[#allocation212_spill] sm:$0xff] }
 0x23e   : > { %15744 = vmatmul.mubr.msk.f32.gmra.mrb[14].mxu0 %vm583_vm1, %v23717_v8  ;;  %14847 = vmatmul.mubr.msk.f32.gmra.mrb[16].mxu1 %vm583_vm1, %v23592_v16  ;;  %v23721_v16 = vld [vmem:[#allocation206_spill] sm:$0xff] }
 0x23f   : > { %15746 = vmatprep.mubr.msk.f32.mxu0 %vm583_vm1, %v23718_v45  ;;  %14849 = vmatprep.mubr.msk.f32.mxu1 %vm583_vm1, %v23594_v19  ;;  %v23722_v19 = vld [vmem:[#allocation208_spill] sm:$0xff] }
 0x242   : > { %15747 = vmatmul.mubr.msk.f32.gmra.mrb[16].mxu0 %vm583_vm1, %v23719_v18  ;;  %14850 = vmatmul.mubr.msk.f32.gmra.mrb[18].mxu1 %vm583_vm1, %v23596_v28  ;;  %v23723_v28 = vld [vmem:[#allocation68_spill] sm:$0xff] }
 0x243   : > { %15749 = vmatprep.mubr.msk.f32.mxu0 %vm583_vm1, %v23720_v61  ;;  %14852 = vmatprep.mubr.msk.f32.mxu1 %vm583_vm1, %v23598_v1  ;;  %v23725_v1 = vld [vmem:[#allocation215_spill] sm:$0xff] }
 0x246   : > { %15750 = vmatmul.mubr.msk.f32.gmra.mrb[18].mxu0 %vm583_vm1, %v23721_v16  ;;  %14853 = vmatmul.mubr.msk.f32.gmra.mrb[20].mxu1 %vm583_vm1, %v23600_v37  ;;  %v3111_v37 = vrot.slane %v20674_v52, 1 }
 0x247   : > { %15752 = vmatprep.mubr.msk.f32.mxu0 %vm583_vm1, %v23722_v19  ;;  %14855 = vmatprep.mubr.msk.f32.mxu1 %vm583_vm1, %v23602_v56  ;;  %v23726_v56 = vld [vmem:[#allocation217_spill] sm:$0xff] }
 0x24a   : > { %15753 = vmatmul.mubr.msk.f32.gmra.mrb[20].mxu0 %vm583_vm1, %v23723_v28  ;;  %14856 = vmatmul.mubr.msk.f32.gmra.mrb[22].mxu1 %vm583_vm1, %v23604_v55  ;;  %v3110_v55 = vrot.slane %v20660_v0, 1 }
 0x24b   : > { %15755 = vmatprep.mubr.msk.f32.mxu0 %vm583_vm1, %v23724_v48  ;;  %14858 = vmatprep.mubr.msk.f32.mxu1 %vm583_vm1, %v23606_v6  ;;  %v23727_v6 = vld [vmem:[#allocation221_spill] sm:$0xff] }
 0x24c   : > { %v20830_v48 = vld [vmem:[%s17739_s20 + $0x1c0] sm:$0xf] }
 0x24e   : > { %15756 = vmatmul.mubr.msk.f32.gmra.mrb[22].mxu0 %vm583_vm1, %v23725_v1  ;;  %14859 = vmatmul.mubr.msk.f32.gmra.mrb[24].mxu1 %vm583_vm1, %v23608_v26  ;;  %v3112_v26 = vsel %vm446_vm3, %v3110_v55, %v3111_v37  ;;  %v8686_v1 = vrot.slane %v20688_v33, 1 }
 0x24f   : > { %15758 = vmatprep.mubr.msk.f32.mxu0 %vm583_vm1, %v23726_v56  ;;  %14861 = vmatprep.mubr.msk.f32.mxu1 %vm583_vm1, %v23610_v47  ;;  %v3113_v47 = vrot.slane %v20815_v53, 1  ;;  %v8685_v56 = vrot.slane %v20677_v40, 1 }
 0x251   : > { %v20842_v55 = vsel %vm446_vm3, %v8685_v56, %v8686_v1  ;;  %v20861_v56 = vld [vmem:[%s22566_s5 + $0x4] sm:$0xf] }
 0x252   : > { %15759 = vmatmul.mubr.msk.f32.gmra.mrb[24].mxu0 %vm583_vm1, %v23727_v6  ;;  %14862 = vmatmul.mubr.msk.f32.gmra.mrb[26].mxu1 %vm583_vm1, %v23612_v34  ;;  %v23728_v6 = vld [vmem:[#allocation163_spill] sm:$0xff]  ;;  %v8688_v34 = vrot.slane %v20830_v48, 1  ;;  %23729 = vst [vmem:[#allocation151_spill] sm:$0xff] %v20842_v55 }
 0x253   : > { %15761 = vmatprep.mubr.msk.f32.mxu0 %vm583_vm1, %v19776_v60  ;;  %14864 = vmatprep.mubr.msk.f32.mxu1 %vm583_vm1, %v20248_v35  ;;  %v3114_v35 = vsel %vm446_vm3, %v3111_v37, %v3113_v47  ;;  %v23737_v37 = vld [vmem:[#allocation186_spill] sm:$0xff]  ;;  %v23738_v47 = vld [vmem:[#allocation225_spill] sm:$0xff] }
 0x254   : > { %v23756_v60 = vld [vmem:[#allocation130_spill] sm:$0xff] }
 0x256   : > { %15762 = vmatmul.mubr.msk.f32.gmra.mrb[26].mxu0 %vm583_vm1, %v23728_v6  ;;  %14865 = vmatmul.mubr.msk.f32.gmra.mrb[28].mxu1 %vm583_vm1, %v20261_v31  ;;  %v20852_v31 = vsel %vm446_vm3, %v8686_v1, %v8688_v34  ;;  %v23734_v1 = vld [vmem:[#allocation113_spill] sm:$0xff]  ;;  %v23741_v34 = vld [vmem:[#allocation190_spill] sm:$0xff]  ;;  %v23754_v6 = vld [vmem:[#allocation127_spill] sm:$0xff] }
 0x257   : > { %15764 = vmatprep.mubr.msk.f32.mxu0 %vm583_vm1, %v19802_v43  ;;  %14867 = vmatprep.mubr.msk.f32.mxu1 %vm583_vm1, %v3112_v26  ;;  %23730 = vst [vmem:[#allocation155_spill] sm:$0xff] %v20852_v31  ;;  %v23739_v26 = vld [vmem:[#allocation188_spill] sm:$0xff]  ;;  %v23752_v43 = vld [vmem:[#allocation143_spill] sm:$0xff] }
 0x25a   : > { %15765 = vmatmul.mubr.msk.f32.gmra.mrb[28].mxu0 %vm583_vm1, %v19815_v44  ;;  %14868 = vmatmul.mubr.msk.f32.gmra.mrb[30].mxu1 %vm583_vm1, %v3114_v35  ;;  %v23740_v35 = vld [vmem:[#allocation226_spill] sm:$0xff]  ;;  %v23750_v44 = vld [vmem:[#allocation231_spill] sm:$0xff] }
 0x25b   : > { %15767 = vmatprep.mubr.msk.f32.mxu0 %vm583_vm1, %v20842_v55  ;;  %14872 = vmatprep.mubr.msk.f32.mxu1 %vm583_vm1, %v23620_v25  ;;  %v20874_v25 = vld [vmem:[%s22566_s5 + $0x4c] sm:$0xf] }
 0x25c   : > { %v23748_v55 = vld [vmem:[#allocation230_spill] sm:$0xff] }
 0x25e   : > { %15768 = vmatmul.mubr.msk.f32.gmra.mrb[30].mxu0 %vm583_vm1, %v20852_v31  ;;  %14873 = vmatmul.mubr.msk.f32.vlgmr.msra.gmra.mrb[0].mxu1 %vm583_vm1, %v23622_v36  ;;  %v23731_v36 = vld [vmem:[#allocation180_spill] sm:$0xff]  ;;  %v23746_v31 = vld [vmem:[#allocation229_spill] sm:$0xff] }
 0x25f   : > { %15772 = vmatprep.mubr.msk.f32.mxu0 %vm583_vm1, %v19843_v21  ;;  %14875 = vmatprep.mubr.msk.f32.mxu1 %vm583_vm1, %v23624_v14  ;;  %v23732_v14 = vld [vmem:[#allocation110_spill] sm:$0xff] }
 0x260   : > { %14921 = vmatpush3.msk.msra.mxu1 %vm680_vm0, %v20697_v5  ;;  %v23733_v5 = vld [vmem:[#allocation182_spill] sm:$0xff] }
 0x261   : > { %14970 = vmatprep.subr.msk.mxu1 %vm680_vm0, %v20861_v56 }
 0x262   : > { %15773 = vmatmul.mubr.msk.f32.vlgmr.msra.gmra.mrb[0].mxu0 %vm583_vm1, %v19863_v3  ;;  %14876 = vmatmul.mubr.msk.f32.gmra.mrb[2].mxu1 %vm583_vm1, %v23626_v38  ;;  %v23735_v38 = vld [vmem:[#allocation184_spill] sm:$0xff] }
 0x263   : > { %15821 = vmatpush3.msk.msra.mxu0 %vm680_vm0, %v20710_v42  ;;  %15775 = vmatprep.mubr.msk.f32.mxu0 %vm583_vm1, %v19869_v62  ;;  %v23736_v42 = vld [vmem:[#allocation114_spill] sm:$0xff] }
 0x264   : > { %14878 = vmatprep.mubr.msk.f32.mxu1 %vm583_vm1, %v23731_v36  ;;  %15870 = vmatprep.subr.msk.mxu0 %vm680_vm0, %v20874_v25  ;;  %v23742_v36 = vld [vmem:[#allocation227_spill] sm:$0xff] }
 0x266   : > { %15776 = vmatmul.mubr.msk.f32.gmra.mrb[2].mxu0 %vm583_vm1, %v23732_v14  ;;  %14879 = vmatmul.mubr.msk.f32.gmra.mrb[4].mxu1 %vm583_vm1, %v23733_v5  ;;  %v23743_v5 = vld [vmem:[#allocation192_spill] sm:$0xff] }
 0x267   : > { %15778 = vmatprep.mubr.msk.f32.mxu0 %vm583_vm1, %v23734_v1  ;;  %14881 = vmatprep.mubr.msk.f32.mxu1 %vm583_vm1, %v23735_v38  ;;  %v23744_v38 = vld [vmem:[#allocation228_spill] sm:$0xff] }
 0x26a   : > { %15779 = vmatmul.mubr.msk.f32.gmra.mrb[4].mxu0 %vm583_vm1, %v23736_v42  ;;  %14882 = vmatmul.mubr.msk.f32.gmra.mrb[6].mxu1 %vm583_vm1, %v23737_v37  ;;  %v23745_v37 = vld [vmem:[#allocation194_spill] sm:$0xff] }
 0x26b   : > { %15781 = vmatprep.mubr.msk.f32.mxu0 %vm583_vm1, %v23738_v47  ;;  %14884 = vmatprep.mubr.msk.f32.mxu1 %vm583_vm1, %v23739_v26  ;;  %v23747_v26 = vld [vmem:[#allocation196_spill] sm:$0xff] }
 0x26e   : > { %15782 = vmatmul.mubr.msk.f32.gmra.mrb[6].mxu0 %vm583_vm1, %v23740_v35  ;;  %14885 = vmatmul.mubr.msk.f32.gmra.mrb[8].mxu1 %vm583_vm1, %v23741_v34  ;;  %v23749_v34 = vld [vmem:[#allocation198_spill] sm:$0xff]  ;;  %v23819_v35 = vld [vmem:[#allocation125_spill] sm:$0xff] }
 0x26f   : > { %15784 = vmatprep.mubr.msk.f32.mxu0 %vm583_vm1, %v23742_v36  ;;  %14887 = vmatprep.mubr.msk.f32.mxu1 %vm583_vm1, %v23743_v5  ;;  %v23751_v5 = vld [vmem:[#allocation148_spill] sm:$0xff] }
 0x270   : > { %v23817_v36 = vld [vmem:[#allocation124_spill] sm:$0xff] }
 0x272   : > { %15785 = vmatmul.mubr.msk.f32.gmra.mrb[8].mxu0 %vm583_vm1, %v23744_v38  ;;  %14888 = vmatmul.mubr.msk.f32.gmra.mrb[10].mxu1 %vm583_vm1, %v23745_v37  ;;  %v23753_v37 = vld [vmem:[#allocation200_spill] sm:$0xff]  ;;  %v23815_v38 = vld [vmem:[#allocation123_spill] sm:$0xff] }
 0x273   : > { %15787 = vmatprep.mubr.msk.f32.mxu0 %vm583_vm1, %v23746_v31  ;;  %14890 = vmatprep.mubr.msk.f32.mxu1 %vm583_vm1, %v23747_v26  ;;  %v23755_v26 = vld [vmem:[#allocation137_spill] sm:$0xff]  ;;  %v23813_v31 = vld [vmem:[#allocation122_spill] sm:$0xff] }
 0x276   : > { %15788 = vmatmul.mubr.msk.f32.gmra.mrb[10].mxu0 %vm583_vm1, %v23748_v55  ;;  %14891 = vmatmul.mubr.msk.f32.gmra.mrb[12].mxu1 %vm583_vm1, %v23749_v34  ;;  %v23757_v34 = vld [vmem:[#allocation204_spill] sm:$0xff]  ;;  %v23811_v55 = vld [vmem:[#allocation121_spill] sm:$0xff] }
 0x277   : > { %15790 = vmatprep.mubr.msk.f32.mxu0 %vm583_vm1, %v23750_v44  ;;  %14893 = vmatprep.mubr.msk.f32.mxu1 %vm583_vm1, %v23751_v5  ;;  %v23758_v44 = vld [vmem:[#allocation197_spill] sm:$0xff] }
 0x278   : > { %v23759_v5 = vld [vmem:[#allocation205_spill] sm:$0xff] }
 0x27a   : > { %15791 = vmatmul.mubr.msk.f32.gmra.mrb[12].mxu0 %vm583_vm1, %v23752_v43  ;;  %14894 = vmatmul.mubr.msk.f32.gmra.mrb[14].mxu1 %vm583_vm1, %v23753_v37  ;;  %v23760_v43 = vld [vmem:[#allocation131_spill] sm:$0xff] }
 0x27b   : > { %15793 = vmatprep.mubr.msk.f32.mxu0 %vm583_vm1, %v23754_v6  ;;  %14896 = vmatprep.mubr.msk.f32.mxu1 %vm583_vm1, %v23755_v26  ;;  %v23761_v37 = vld [vmem:[#allocation207_spill] sm:$0xff]  ;;  %v23763_v26 = vld [vmem:[#allocation62_spill] sm:$0xff] }
 0x27c   : > { %v23762_v6 = vld [vmem:[#allocation135_spill] sm:$0xff] }
 0x27e   : > { %15794 = vmatmul.mubr.msk.f32.gmra.mrb[14].mxu0 %vm583_vm1, %v23756_v60  ;;  %14897 = vmatmul.mubr.msk.f32.gmra.mrb[16].mxu1 %vm583_vm1, %v23757_v34  ;;  %v23764_v60 = vld [vmem:[#allocation202_spill] sm:$0xff]  ;;  %v23765_v34 = vld [vmem:[#allocation211_spill] sm:$0xff] }
 0x27f   : > { %15796 = vmatprep.mubr.msk.f32.mxu0 %vm583_vm1, %v23758_v44  ;;  %14899 = vmatprep.mubr.msk.f32.mxu1 %vm583_vm1, %v23759_v5  ;;  %v23766_v44 = vld [vmem:[#allocation149_spill] sm:$0xff] }
 0x280   : > { %v23767_v5 = vld [vmem:[#allocation213_spill] sm:$0xff] }
 0x282   : > { %15797 = vmatmul.mubr.msk.f32.gmra.mrb[16].mxu0 %vm583_vm1, %v23760_v43  ;;  %14900 = vmatmul.mubr.msk.f32.gmra.mrb[18].mxu1 %vm583_vm1, %v23761_v37  ;;  %v23768_v43 = vld [vmem:[#allocation153_spill] sm:$0xff]  ;;  %v23769_v37 = vld [vmem:[#allocation216_spill] sm:$0xff] }
 0x283   : > { %15799 = vmatprep.mubr.msk.f32.mxu0 %vm583_vm1, %v23762_v6  ;;  %14902 = vmatprep.mubr.msk.f32.mxu1 %vm583_vm1, %v23763_v26  ;;  %v23770_v6 = vld [vmem:[#allocation136_spill] sm:$0xff]  ;;  %v23771_v26 = vld [vmem:[#allocation218_spill] sm:$0xff] }
 0x286   : > { %15800 = vmatmul.mubr.msk.f32.gmra.mrb[18].mxu0 %vm583_vm1, %v23764_v60  ;;  %14903 = vmatmul.mubr.msk.f32.gmra.mrb[20].mxu1 %vm583_vm1, %v23765_v34  ;;  %v23772_v60 = vld [vmem:[#allocation140_spill] sm:$0xff]  ;;  %v23773_v34 = vld [vmem:[#allocation222_spill] sm:$0xff] }
 0x287   : > { %15802 = vmatprep.mubr.msk.f32.mxu0 %vm583_vm1, %v23766_v44  ;;  %14905 = vmatprep.mubr.msk.f32.mxu1 %vm583_vm1, %v23767_v5  ;;  %v23774_v44 = vld [vmem:[#allocation203_spill] sm:$0xff] }
 0x288   : > { %v23775_v5 = vld [vmem:[#allocation223_spill] sm:$0xff] }
 0x28a   : > { %15803 = vmatmul.mubr.msk.f32.gmra.mrb[20].mxu0 %vm583_vm1, %v23768_v43  ;;  %14906 = vmatmul.mubr.msk.f32.gmra.mrb[22].mxu1 %vm583_vm1, %v23769_v37  ;;  %v3381_v37 = vrot.slane %v20660_v0, 2  ;;  %v3382_v43 = vrot.slane %v20674_v52, 2  ;;  %v8956_v0 = vrot.slane %v20677_v40, 2  ;;  %v8957_v52 = vrot.slane %v20688_v33, 2 }
 0x28b   : > { %15805 = vmatprep.mubr.msk.f32.mxu0 %vm583_vm1, %v23770_v6  ;;  %14908 = vmatprep.mubr.msk.f32.mxu1 %vm583_vm1, %v23771_v26  ;;  %v23776_v6 = vld [vmem:[#allocation141_spill] sm:$0xff]  ;;  %v23777_v26 = vld [vmem:[#allocation71_spill] sm:$0xff] }
 0x28e   : > { %15806 = vmatmul.mubr.msk.f32.gmra.mrb[22].mxu0 %vm583_vm1, %v23772_v60  ;;  %14909 = vmatmul.mubr.msk.f32.gmra.mrb[24].mxu1 %vm583_vm1, %v23773_v34  ;;  %v3384_v34 = vrot.slane %v20815_v53, 2  ;;  %v8959_v53 = vrot.slane %v20830_v48, 2  ;;  %v23809_v60 = vld [vmem:[#allocation120_spill] sm:$0xff] }
 0x28f   : > { %15808 = vmatprep.mubr.msk.f32.mxu0 %vm583_vm1, %v23774_v44  ;;  %14911 = vmatprep.mubr.msk.f32.mxu1 %vm583_vm1, %v23775_v5  ;;  %v3383_v5 = vsel %vm1623_vm4, %v3381_v37, %v3382_v43  ;;  %v23778_v44 = vld [vmem:[#allocation159_spill] sm:$0xff]  ;;  %v21000_v37 = vsel %vm1623_vm4, %v8956_v0, %v8957_v52  ;;  %v21030_v0 = vld [vmem:[%s17739_s20 + $0x18] sm:$0xff] }
 0x290   : > { %23780 = vst [vmem:[#allocation156_spill] sm:$0xff] %v21000_v37 }
 0x292   : > { %15809 = vmatmul.mubr.msk.f32.gmra.mrb[24].mxu0 %vm583_vm1, %v23776_v6  ;;  %14912 = vmatmul.mubr.msk.f32.gmra.mrb[26].mxu1 %vm583_vm1, %v19798_v39  ;;  %v23779_v39 = vld [vmem:[#allocation147_spill] sm:$0xff]  ;;  %v23781_v6 = vld [vmem:[#allocation152_spill] sm:$0xff] }
 0x293   : > { %15811 = vmatprep.mubr.msk.f32.mxu0 %vm583_vm1, %v23777_v26  ;;  %14914 = vmatprep.mubr.msk.f32.mxu1 %vm583_vm1, %v20412_v29  ;;  %v3385_v29 = vsel %vm1623_vm4, %v3382_v43, %v3384_v34  ;;  %v21003_v26 = vld [vmem:[%s17739_s20] sm:$0xff]  ;;  %v21013_v43 = vsel %vm1623_vm4, %v8957_v52, %v8959_v53  ;;  %v21025_v34 = vld [vmem:[%s22566_s5 + $0x8] sm:$0xf]  ;;  %v21041_v52 = vld [vmem:[%s22566_s5 + $0x50] sm:$0xf] }
 0x294   : > { %23782 = vst [vmem:[#allocation157_spill] sm:$0xff] %v21013_v43  ;;  %v21046_v53 = vld [vmem:[%s17739_s20 + $0x20] sm:$0xff] }
 0x295   : > { %23785 = vst [vmem:[#allocation158_spill] sm:$0xff] %v21046_v53 }
 0x296   : > { %15812 = vmatmul.mubr.msk.f32.gmra.mrb[26].mxu0 %vm583_vm1, %v23778_v44  ;;  %14915 = vmatmul.mubr.msk.f32.gmra.mrb[28].mxu1 %vm583_vm1, %v20431_v4  ;;  %v21016_v4 = vld [vmem:[%s17739_s20 + $0x8] sm:$0xff] }
 0x297   : > { %15814 = vmatprep.mubr.msk.f32.mxu0 %vm583_vm1, %v23779_v39  ;;  %14917 = vmatprep.mubr.msk.f32.mxu1 %vm583_vm1, %v3383_v5  ;;  %v23783_v5 = vld [vmem:[#allocation11_spill] sm:$0xff]  ;;  %v23791_v39 = vld [vmem:[#allocation16_spill] sm:$0xff]  ;;  %v23793_v44 = vld [vmem:[#allocation26_spill] sm:$0xff] }
 0x29a   : > { %15815 = vmatmul.mubr.msk.f32.gmra.mrb[28].mxu0 %vm583_vm1, %v23781_v6  ;;  %14918 = vmatmul.mubr.msk.f32.gmra.mrb[30].mxu1 %vm583_vm1, %v3385_v29  ;;  %v23784_v29 = vld [vmem:[#allocation12_spill] sm:$0xff] }
 0x29b   : > { %15817 = vmatprep.mubr.msk.f32.mxu0 %vm583_vm1, %v21000_v37  ;;  %14922 = vmatprep.mubr.msk.f32.mxu1 %vm583_vm1, %v21003_v26  ;;  %v23788_v37 = vld [vmem:[#allocation14_spill] sm:$0xff]  ;;  %v21064_v6 = vld [vmem:[%s17739_s20 + $0x38] sm:$0xff] }
 0x29c   : > { %23789 = vst [vmem:[#allocation161_spill] sm:$0xff] %v21064_v6 }
 0x29e   : > { %15818 = vmatmul.mubr.msk.f32.gmra.mrb[30].mxu0 %vm583_vm1, %v21013_v43  ;;  %14923 = vmatmul.mubr.msk.f32.vlgmr.msra.gmra.mrb[0].mxu1 %vm583_vm1, %v21016_v4  ;;  %v21055_v43 = vld [vmem:[%s17739_s20 + $0x30] sm:$0xff] }
 0x29f   : > { %15822 = vmatprep.mubr.msk.f32.mxu0 %vm583_vm1, %v23783_v5  ;;  %14925 = vmatprep.mubr.msk.f32.mxu1 %vm583_vm1, %v21030_v0  ;;  %23787 = vst [vmem:[#allocation160_spill] sm:$0xff] %v21055_v43  ;;  %v23807_v5 = vld [vmem:[#allocation119_spill] sm:$0xff] }
 0x2a0   : > { %14971 = vmatpush3.msk.msra.mxu1 %vm680_vm0, %v20861_v56  ;;  %v23786_v56 = vld [vmem:[#allocation13_spill] sm:$0xff] }
 0x2a1   : > { %15020 = vmatprep.subr.msk.mxu1 %vm680_vm0, %v21025_v34 }
 0x2a2   : > { %15823 = vmatmul.mubr.msk.f32.vlgmr.msra.gmra.mrb[0].mxu0 %vm583_vm1, %v23784_v29  ;;  %14926 = vmatmul.mubr.msk.f32.gmra.mrb[2].mxu1 %vm583_vm1, %v21046_v53  ;;  %v23805_v29 = vld [vmem:[#allocation118_spill] sm:$0xff] }
 0x2a3   : > { %15871 = vmatpush3.msk.msra.mxu0 %vm680_vm0, %v20874_v25  ;;  %15825 = vmatprep.mubr.msk.f32.mxu0 %vm583_vm1, %v23786_v56  ;;  %v23790_v25 = vld [vmem:[#allocation15_spill] sm:$0xff]  ;;  %v23803_v56 = vld [vmem:[#allocation117_spill] sm:$0xff] }
 0x2a4   : > { %14928 = vmatprep.mubr.msk.f32.mxu1 %vm583_vm1, %v21055_v43  ;;  %15920 = vmatprep.subr.msk.mxu0 %vm680_vm0, %v21041_v52  ;;  %v23792_v43 = vld [vmem:[#allocation18_spill] sm:$0xff] }
 0x2a6   : > { %15826 = vmatmul.mubr.msk.f32.gmra.mrb[2].mxu0 %vm583_vm1, %v23788_v37  ;;  %14929 = vmatmul.mubr.msk.f32.gmra.mrb[4].mxu1 %vm583_vm1, %v21064_v6  ;;  %v23794_v6 = vld [vmem:[#allocation31_spill] sm:$0xff] }
 0x2a7   : > { %15828 = vmatprep.mubr.msk.f32.mxu0 %vm583_vm1, %v23790_v25  ;;  %14931 = vmatprep.mubr.msk.f32.mxu1 %vm583_vm1, %v20458_v22  ;;  %v23795_v22 = vld [vmem:[#allocation220_spill] sm:$0xff]  ;;  %v23801_v37 = vld [vmem:[#allocation115_spill] sm:$0xff] }
 0x2a8   : > { %v23799_v25 = vld [vmem:[#allocation112_spill] sm:$0xff] }
 0x2aa   : > { %15829 = vmatmul.mubr.msk.f32.gmra.mrb[4].mxu0 %vm583_vm1, %v23791_v39  ;;  %14932 = vmatmul.mubr.msk.f32.gmra.mrb[6].mxu1 %vm583_vm1, %v20474_v30  ;;  %v23796_v39 = vld [vmem:[#allocation34_spill] sm:$0xff]  ;;  %v23797_v30 = vld [vmem:[#allocation5_spill] sm:$0xff] }
 0x2ab   : > { %15831 = vmatprep.mubr.msk.f32.mxu0 %vm583_vm1, %v23792_v43  ;;  %14934 = vmatprep.mubr.msk.f32.mxu1 %vm583_vm1, %v20483_v20  ;;  %v23798_v43 = vld [vmem:[#allocation35_spill] sm:$0xff] }
 0x2ae   : > { %15832 = vmatmul.mubr.msk.f32.gmra.mrb[6].mxu0 %vm583_vm1, %v23793_v44  ;;  %14935 = vmatmul.mubr.msk.f32.gmra.mrb[8].mxu1 %vm583_vm1, %v20492_v15  ;;  %v23800_v44 = vld [vmem:[#allocation40_spill] sm:$0xff] }
 0x2af   : > { %15834 = vmatprep.mubr.msk.f32.mxu0 %vm583_vm1, %v23794_v6  ;;  %14937 = vmatprep.mubr.msk.f32.mxu1 %vm583_vm1, %v23795_v22  ;;  %v23802_v6 = vld [vmem:[#allocation41_spill] sm:$0xff] }
 0x2b2   : > { %15835 = vmatmul.mubr.msk.f32.gmra.mrb[8].mxu0 %vm583_vm1, %v23796_v39  ;;  %14938 = vmatmul.mubr.msk.f32.gmra.mrb[10].mxu1 %vm583_vm1, %v23797_v30  ;;  %v23804_v39 = vld [vmem:[#allocation42_spill] sm:$0xff] }
 0x2b3   : > { %15837 = vmatprep.mubr.msk.f32.mxu0 %vm583_vm1, %v23798_v43  ;;  %14940 = vmatprep.mubr.msk.f32.mxu1 %vm583_vm1, %v23799_v25  ;;  %v23806_v43 = vld [vmem:[#allocation43_spill] sm:$0xff] }
 0x2b6   : > { %15838 = vmatmul.mubr.msk.f32.gmra.mrb[10].mxu0 %vm583_vm1, %v23800_v44  ;;  %14941 = vmatmul.mubr.msk.f32.gmra.mrb[12].mxu1 %vm583_vm1, %v23801_v37  ;;  %v23808_v44 = vld [vmem:[#allocation45_spill] sm:$0xff] }
 0x2b7   : > { %15840 = vmatprep.mubr.msk.f32.mxu0 %vm583_vm1, %v23802_v6  ;;  %14943 = vmatprep.mubr.msk.f32.mxu1 %vm583_vm1, %v23803_v56  ;;  %v23810_v6 = vld [vmem:[#allocation46_spill] sm:$0xff] }
 0x2ba   : > { %15841 = vmatmul.mubr.msk.f32.gmra.mrb[12].mxu0 %vm583_vm1, %v23804_v39  ;;  %14944 = vmatmul.mubr.msk.f32.gmra.mrb[14].mxu1 %vm583_vm1, %v23805_v29  ;;  %v23812_v39 = vld [vmem:[#allocation47_spill] sm:$0xff] }
 0x2bb   : > { %15843 = vmatprep.mubr.msk.f32.mxu0 %vm583_vm1, %v23806_v43  ;;  %14946 = vmatprep.mubr.msk.f32.mxu1 %vm583_vm1, %v23807_v5  ;;  %v23814_v43 = vld [vmem:[#allocation48_spill] sm:$0xff] }
 0x2be   : > { %15844 = vmatmul.mubr.msk.f32.gmra.mrb[14].mxu0 %vm583_vm1, %v23808_v44  ;;  %14947 = vmatmul.mubr.msk.f32.gmra.mrb[16].mxu1 %vm583_vm1, %v23809_v60  ;;  %v23816_v44 = vld [vmem:[#allocation50_spill] sm:$0xff] }
 0x2bf   : > { %15846 = vmatprep.mubr.msk.f32.mxu0 %vm583_vm1, %v23810_v6  ;;  %14949 = vmatprep.mubr.msk.f32.mxu1 %vm583_vm1, %v23811_v55  ;;  %v23818_v6 = vld [vmem:[#allocation51_spill] sm:$0xff] }
 0x2c2   : > { %15847 = vmatmul.mubr.msk.f32.gmra.mrb[16].mxu0 %vm583_vm1, %v23812_v39  ;;  %14950 = vmatmul.mubr.msk.f32.gmra.mrb[18].mxu1 %vm583_vm1, %v23813_v31  ;;  %v23820_v39 = vld [vmem:[#allocation66_spill] sm:$0xff] }
 0x2c3   : > { %15849 = vmatprep.mubr.msk.f32.mxu0 %vm583_vm1, %v23814_v43  ;;  %14952 = vmatprep.mubr.msk.f32.mxu1 %vm583_vm1, %v23815_v38  ;;  %v23821_v31 = vld [vmem:[#allocation126_spill] sm:$0xff]  ;;  %v23822_v43 = vld [vmem:[#allocation69_spill] sm:$0xff]  ;;  %v4091_v38 = vrot.slane %v21046_v53, 1 }
 0x2c6   : > { %15850 = vmatmul.mubr.msk.f32.gmra.mrb[18].mxu0 %vm583_vm1, %v23816_v44  ;;  %14953 = vmatmul.mubr.msk.f32.gmra.mrb[20].mxu1 %vm583_vm1, %v23817_v36  ;;  %v23823_v44 = vld [vmem:[#allocation72_spill] sm:$0xff] }
 0x2c7   : > { %15852 = vmatprep.mubr.msk.f32.mxu0 %vm583_vm1, %v23818_v6  ;;  %14955 = vmatprep.mubr.msk.f32.mxu1 %vm583_vm1, %v23819_v35  ;;  %v23824_v6 = vld [vmem:[#allocation74_spill] sm:$0xff] }
 0x2ca   : > { %15853 = vmatmul.mubr.msk.f32.gmra.mrb[20].mxu0 %vm583_vm1, %v23820_v39  ;;  %14956 = vmatmul.mubr.msk.f32.gmra.mrb[22].mxu1 %vm583_vm1, %v23821_v31  ;;  %v23825_v39 = vld [vmem:[#allocation78_spill] sm:$0xff]  ;;  %v21165_v31 = vld [vmem:[%s17739_s20 + $0x10] sm:$0xf] }
 0x2cb   : > { %15855 = vmatprep.mubr.msk.f32.mxu0 %vm583_vm1, %v23822_v43  ;;  %14958 = vmatprep.mubr.msk.f32.mxu1 %vm583_vm1, %v20597_v23  ;;  %v23826_v43 = vld [vmem:[#allocation80_spill] sm:$0xff]  ;;  %v23827_v23 = vld [vmem:[#allocation138_spill] sm:$0xff] }
 0x2ce   : > { %15856 = vmatmul.mubr.msk.f32.gmra.mrb[22].mxu0 %vm583_vm1, %v23823_v44  ;;  %14959 = vmatmul.mubr.msk.f32.gmra.mrb[24].mxu1 %vm583_vm1, %v20604_v46  ;;  %v9227_v44 = vrot.slane %v20677_v40, 3  ;;  %v9228_v46 = vrot.slane %v20688_v33, 3 }
 0x2cf   : > { %15858 = vmatprep.mubr.msk.f32.mxu0 %vm583_vm1, %v23824_v6  ;;  %14961 = vmatprep.mubr.msk.f32.mxu1 %vm583_vm1, %v20611_v9  ;;  %v4085_v6 = vrot.slane %v21003_v26, 1  ;;  %v4086_v9 = vrot.slane %v21016_v4, 1 }
 0x2d0   : > { %v21178_v35 = vsel %vm4897_vm2, %v9227_v44, %v9228_v46 }
 0x2d1   : > { %23830 = vst [vmem:[#allocation162_spill] sm:$0xff] %v21178_v35  ;;  %v4087_v36 = vsel %vm446_vm3, %v4085_v6, %v4086_v9 }
 0x2d2   : > { %15859 = vmatmul.mubr.msk.f32.gmra.mrb[24].mxu0 %vm583_vm1, %v23825_v39  ;;  %14962 = vmatmul.mubr.msk.f32.gmra.mrb[26].mxu1 %vm583_vm1, %v20618_v54  ;;  %v23828_v39 = vld [vmem:[#allocation83_spill] sm:$0xff]  ;;  %v4088_v54 = vrot.slane %v21165_v31, 1 }
 0x2d3   : > { %15861 = vmatprep.mubr.msk.f32.mxu0 %vm583_vm1, %v23826_v43  ;;  %14964 = vmatprep.mubr.msk.f32.mxu1 %vm583_vm1, %v23827_v23  ;;  %v23829_v43 = vld [vmem:[#allocation210_spill] sm:$0xff]  ;;  %v9230_v23 = vrot.slane %v20830_v48, 3 }
 0x2d4   : > { %v4089_v6 = vsel %vm446_vm3, %v4086_v9, %v4088_v54  ;;  %v23836_v54 = vld [vmem:[#allocation86_spill] sm:$0xff] }
 0x2d5   : > { %v21191_v44 = vsel %vm4897_vm2, %v9228_v46, %v9230_v23  ;;  %v23834_v23 = vld [vmem:[#allocation82_spill] sm:$0xff]  ;;  %v21223_v46 = vld [vmem:[%s22566_s5 + $0x54] sm:$0xf] }
 0x2d6   : > { %15862 = vmatmul.mubr.msk.f32.gmra.mrb[26].mxu0 %vm583_vm1, %v23828_v39  ;;  %14965 = vmatmul.mubr.msk.f32.gmra.mrb[28].mxu1 %vm583_vm1, %v20632_v32  ;;  %v4090_v39 = vrot.slane %v21030_v0, 1  ;;  %v23831_v32 = vld [vmem:[#allocation209_spill] sm:$0xff]  ;;  %23832 = vst [vmem:[#allocation168_spill] sm:$0xff] %v21191_v44 }
 0x2d7   : > { %15864 = vmatprep.mubr.msk.f32.mxu0 %vm583_vm1, %v23829_v43  ;;  %14967 = vmatprep.mubr.msk.f32.mxu1 %vm583_vm1, %v20639_v17  ;;  %v21195_v43 = vld [vmem:[%s17739_s20 + $0x28] sm:$0xf] }
 0x2d8   : > { %v4093_v17 = vrot.slane %v21195_v43, 1  ;;  %v21199_v47 = vsel %vm446_vm3, %v4090_v39, %v4091_v38  ;;  %v23839_v39 = vld [vmem:[#allocation90_spill] sm:$0xff] }
 0x2d9   : > { %23833 = vst [vmem:[#allocation170_spill] sm:$0xff] %v21199_v47 }
 0x2da   : > { %15865 = vmatmul.mubr.msk.f32.gmra.mrb[28].mxu0 %vm583_vm1, %v23831_v32  ;;  %14968 = vmatmul.mubr.msk.f32.gmra.mrb[30].mxu1 %vm583_vm1, %v20646_v24  ;;  %v21214_v9 = vsel %vm446_vm3, %v4091_v38, %v4093_v17  ;;  %v23837_v17 = vld [vmem:[#allocation89_spill] sm:$0xff]  ;;  %v23838_v38 = vld [vmem:[#allocation167_spill] sm:$0xff]  ;;  %v23851_v32 = vld [vmem:[#allocation106_spill] sm:$0xff] }
 0x2db   : > { %15867 = vmatprep.mubr.msk.f32.mxu0 %vm583_vm1, %v21178_v35  ;;  %14972 = vmatprep.mubr.msk.f32.mxu1 %vm583_vm1, %v4087_v36  ;;  %v21207_v36 = vld [vmem:[%s22566_s5 + $0xc] sm:$0xf]  ;;  %23835 = vst [vmem:[#allocation172_spill] sm:$0xff] %v21214_v9 }
 0x2dc   : > { %v23850_v35 = vld [vmem:[#allocation22_spill] sm:$0xff] }
 0x2de   : > { %15868 = vmatmul.mubr.msk.f32.gmra.mrb[30].mxu0 %vm583_vm1, %v21191_v44  ;;  %14973 = vmatmul.mubr.msk.f32.vlgmr.msra.gmra.mrb[0].mxu1 %vm583_vm1, %v4089_v6  ;;  %v23841_v6 = vld [vmem:[#allocation92_spill] sm:$0xff]  ;;  %v23849_v44 = vld [vmem:[#allocation105_spill] sm:$0xff] }
 0x2df   : > { %15872 = vmatprep.mubr.msk.f32.mxu0 %vm583_vm1, %v23834_v23  ;;  %14975 = vmatprep.mubr.msk.f32.mxu1 %vm583_vm1, %v21199_v47  ;;  %v23848_v47 = vld [vmem:[#allocation104_spill] sm:$0xff]  ;;  %v23870_v23 = vld [vmem:[#allocation166_spill] sm:$0xff] }
 0x2e0   : > { %15021 = vmatpush3.msk.msra.mxu1 %vm680_vm0, %v21025_v34  ;;  %v23840_v34 = vld [vmem:[#allocation169_spill] sm:$0xff] }
 0x2e1   : > { %15070 = vmatprep.subr.msk.mxu1 %vm680_vm0, %v21207_v36 }
 0x2e2   : > { %15873 = vmatmul.mubr.msk.f32.vlgmr.msra.gmra.mrb[0].mxu0 %vm583_vm1, %v23836_v54  ;;  %14976 = vmatmul.mubr.msk.f32.gmra.mrb[2].mxu1 %vm583_vm1, %v21214_v9  ;;  %v23844_v9 = vld [vmem:[#allocation98_spill] sm:$0xff]  ;;  %v4497_v54 = vrot.slane %v21046_v53, 2 }
 0x2e3   : > { %15921 = vmatpush3.msk.msra.mxu0 %vm680_vm0, %v21041_v52  ;;  %15875 = vmatprep.mubr.msk.f32.mxu0 %vm583_vm1, %v23837_v17  ;;  %v23842_v52 = vld [vmem:[#allocation95_spill] sm:$0xff] }
 0x2e4   : > { %14978 = vmatprep.mubr.msk.f32.mxu1 %vm583_vm1, %v23838_v38  ;;  %15970 = vmatprep.subr.msk.mxu0 %vm680_vm0, %v21223_v46  ;;  %v23843_v38 = vld [vmem:[#allocation97_spill] sm:$0xff] }
 0x2e6   : > { %15876 = vmatmul.mubr.msk.f32.gmra.mrb[2].mxu0 %vm583_vm1, %v23839_v39  ;;  %14979 = vmatmul.mubr.msk.f32.gmra.mrb[4].mxu1 %vm583_vm1, %v23840_v34  ;;  %v23845_v34 = vld [vmem:[#allocation101_spill] sm:$0xff] }
 0x2e7   : > { %15878 = vmatprep.mubr.msk.f32.mxu0 %vm583_vm1, %v23841_v6  ;;  %14981 = vmatprep.mubr.msk.f32.mxu1 %vm583_vm1, %v23702_v27  ;;  %v23846_v27 = vld [vmem:[#allocation103_spill] sm:$0xff]  ;;  %v4494_v6 = vrot.slane %v21165_v31, 2 }
 0x2ea   : > { %15879 = vmatmul.mubr.msk.f32.gmra.mrb[4].mxu0 %vm583_vm1, %v23842_v52  ;;  %14982 = vmatmul.mubr.msk.f32.gmra.mrb[6].mxu1 %vm583_vm1, %v23703_v7  ;;  %v23847_v7 = vld [vmem:[#allocation19_spill] sm:$0xff]  ;;  %v9501_v52 = vrot.slane %v20830_v48, 4 }
 0x2eb   : > { %15881 = vmatprep.mubr.msk.f32.mxu0 %vm583_vm1, %v23843_v38  ;;  %14984 = vmatprep.mubr.msk.f32.mxu1 %vm583_vm1, %v23704_v49  ;;  %v23867_v38 = vld [vmem:[#allocation219_spill] sm:$0xff] }
 0x2ee   : > { %15882 = vmatmul.mubr.msk.f32.gmra.mrb[6].mxu0 %vm583_vm1, %v23844_v9  ;;  %14985 = vmatmul.mubr.msk.f32.gmra.mrb[8].mxu1 %vm583_vm1, %v23705_v50  ;;  %v23865_v9 = vld [vmem:[#allocation6_spill] sm:$0xff] }
 0x2ef   : > { %15884 = vmatprep.mubr.msk.f32.mxu0 %vm583_vm1, %v23845_v34  ;;  %14987 = vmatprep.mubr.msk.f32.mxu1 %vm583_vm1, %v23706_v10  ;;  %v4492_v34 = vrot.slane %v21016_v4, 2 }
 0x2f2   : > { %15885 = vmatmul.mubr.msk.f32.gmra.mrb[8].mxu0 %vm583_vm1, %v23846_v27  ;;  %14988 = vmatmul.mubr.msk.f32.gmra.mrb[10].mxu1 %vm583_vm1, %v23707_v13  ;;  %v9499_v27 = vrot.slane %v20688_v33, 4 }
 0x2f3   : > { %15887 = vmatprep.mubr.msk.f32.mxu0 %vm583_vm1, %v23847_v7  ;;  %14990 = vmatprep.mubr.msk.f32.mxu1 %vm583_vm1, %v23708_v57  ;;  %v23864_v7 = vld [vmem:[#allocation212_spill] sm:$0xff] }
 0x2f4   : > { %v21361_v48 = vsel %vm680_vm0, %v9499_v27, %v9501_v52  ;;  %v23893_v52 = vld [vmem:[#allocation127_spill] sm:$0xff] }
 0x2f5   : > { %23872 = vst [vmem:[#allocation176_spill] sm:$0xff] %v21361_v48 }
 0x2f6   : > { %15888 = vmatmul.mubr.msk.f32.gmra.mrb[10].mxu0 %vm583_vm1, %v23848_v47  ;;  %14991 = vmatmul.mubr.msk.f32.gmra.mrb[12].mxu1 %vm583_vm1, %v23709_v63  ;;  %v23852_v47 = vld [vmem:[#allocation28_spill] sm:$0xff] }
 0x2f7   : > { %15890 = vmatprep.mubr.msk.f32.mxu0 %vm583_vm1, %v23849_v44  ;;  %14993 = vmatprep.mubr.msk.f32.mxu1 %vm583_vm1, %v23710_v51  ;;  %v23853_v44 = vld [vmem:[#allocation108_spill] sm:$0xff] }
 0x2fa   : > { %15891 = vmatmul.mubr.msk.f32.gmra.mrb[12].mxu0 %vm583_vm1, %v23850_v35  ;;  %14994 = vmatmul.mubr.msk.f32.gmra.mrb[14].mxu1 %vm583_vm1, %v23711_v59  ;;  %v23854_v35 = vld [vmem:[#allocation32_spill] sm:$0xff] }
 0x2fb   : > { %15893 = vmatprep.mubr.msk.f32.mxu0 %vm583_vm1, %v23851_v32  ;;  %14996 = vmatprep.mubr.msk.f32.mxu1 %vm583_vm1, %v23712_v11  ;;  %v23855_v32 = vld [vmem:[#allocation36_spill] sm:$0xff] }
 0x2fe   : > { %15894 = vmatmul.mubr.msk.f32.gmra.mrb[14].mxu0 %vm583_vm1, %v23852_v47  ;;  %14997 = vmatmul.mubr.msk.f32.gmra.mrb[16].mxu1 %vm583_vm1, %v23713_v41  ;;  %v23856_v47 = vld [vmem:[#allocation38_spill] sm:$0xff] }
 0x2ff   : > { %15896 = vmatprep.mubr.msk.f32.mxu0 %vm583_vm1, %v23853_v44  ;;  %14999 = vmatprep.mubr.msk.f32.mxu1 %vm583_vm1, %v23714_v58  ;;  %v23857_v44 = vld [vmem:[#allocation39_spill] sm:$0xff] }
 0x302   : > { %15897 = vmatmul.mubr.msk.f32.gmra.mrb[16].mxu0 %vm583_vm1, %v23854_v35  ;;  %15000 = vmatmul.mubr.msk.f32.gmra.mrb[18].mxu1 %vm583_vm1, %v23715_v12  ;;  %v23858_v35 = vld [vmem:[#allocation44_spill] sm:$0xff] }
 0x303   : > { %15899 = vmatprep.mubr.msk.f32.mxu0 %vm583_vm1, %v23855_v32  ;;  %15002 = vmatprep.mubr.msk.f32.mxu1 %vm583_vm1, %v23716_v2  ;;  %v23859_v32 = vld [vmem:[#allocation56_spill] sm:$0xff] }
 0x306   : > { %15900 = vmatmul.mubr.msk.f32.gmra.mrb[18].mxu0 %vm583_vm1, %v23856_v47  ;;  %15003 = vmatmul.mubr.msk.f32.gmra.mrb[20].mxu1 %vm583_vm1, %v23717_v8  ;;  %v23860_v47 = vld [vmem:[#allocation57_spill] sm:$0xff] }
 0x307   : > { %15902 = vmatprep.mubr.msk.f32.mxu0 %vm583_vm1, %v23857_v44  ;;  %15005 = vmatprep.mubr.msk.f32.mxu1 %vm583_vm1, %v23718_v45  ;;  %v23861_v44 = vld [vmem:[#allocation60_spill] sm:$0xff] }
 0x30a   : > { %15903 = vmatmul.mubr.msk.f32.gmra.mrb[20].mxu0 %vm583_vm1, %v23858_v35  ;;  %15006 = vmatmul.mubr.msk.f32.gmra.mrb[22].mxu1 %vm583_vm1, %v23719_v18  ;;  %v23862_v35 = vld [vmem:[#allocation63_spill] sm:$0xff] }
 0x30b   : > { %15905 = vmatprep.mubr.msk.f32.mxu0 %vm583_vm1, %v23859_v32  ;;  %15008 = vmatprep.mubr.msk.f32.mxu1 %vm583_vm1, %v23720_v61  ;;  %v23863_v32 = vld [vmem:[#allocation109_spill] sm:$0xff] }
 0x30e   : > { %15906 = vmatmul.mubr.msk.f32.gmra.mrb[22].mxu0 %vm583_vm1, %v23860_v47  ;;  %15009 = vmatmul.mubr.msk.f32.gmra.mrb[24].mxu1 %vm583_vm1, %v23721_v16  ;;  %v9498_v47 = vrot.slane %v20677_v40, 4 }
 0x30f   : > { %15908 = vmatprep.mubr.msk.f32.mxu0 %vm583_vm1, %v23861_v44  ;;  %15011 = vmatprep.mubr.msk.f32.mxu1 %vm583_vm1, %v23722_v19  ;;  %v4491_v44 = vrot.slane %v21003_v26, 2 }
 0x310   : > { %v21348_v39 = vsel %vm680_vm0, %v9498_v47, %v9499_v27  ;;  %v4495_v47 = vsel %vm1623_vm4, %v4492_v34, %v4494_v6  ;;  %v23892_v6 = vld [vmem:[#allocation133_spill] sm:$0xff] }
 0x311   : > { %23869 = vst [vmem:[#allocation174_spill] sm:$0xff] %v21348_v39  ;;  %v4493_v17 = vsel %vm1623_vm4, %v4491_v44, %v4492_v34  ;;  %v4499_v44 = vrot.slane %v21195_v43, 2  ;;  %v21390_v43 = vld [vmem:[%s22566_s5 + $0x58] sm:$0xf]  ;;  %v23891_v34 = vld [vmem:[#allocation143_spill] sm:$0xff] }
 0x312   : > { %15909 = vmatmul.mubr.msk.f32.gmra.mrb[24].mxu0 %vm583_vm1, %v23862_v35  ;;  %15012 = vmatmul.mubr.msk.f32.gmra.mrb[26].mxu1 %vm583_vm1, %v23723_v28  ;;  %v23866_v35 = vld [vmem:[#allocation215_spill] sm:$0xff] }
 0x313   : > { %15911 = vmatprep.mubr.msk.f32.mxu0 %vm583_vm1, %v23863_v32  ;;  %15014 = vmatprep.mubr.msk.f32.mxu1 %vm583_vm1, %v23864_v7  ;;  %v23868_v32 = vld [vmem:[#allocation217_spill] sm:$0xff]  ;;  %v21381_v27 = vsel %vm1623_vm4, %v4497_v54, %v4499_v44  ;;  %v23895_v44 = vld [vmem:[#allocation130_spill] sm:$0xff] }
 0x314   : > { %23874 = vst [vmem:[#allocation180_spill] sm:$0xff] %v21381_v27 }
 0x316   : > { %15912 = vmatmul.mubr.msk.f32.gmra.mrb[26].mxu0 %vm583_vm1, %v23865_v9  ;;  %15015 = vmatmul.mubr.msk.f32.gmra.mrb[28].mxu1 %vm583_vm1, %v23866_v35  ;;  %v4496_v9 = vrot.slane %v21030_v0, 2 }
 0x317   : > { %15914 = vmatprep.mubr.msk.f32.mxu0 %vm583_vm1, %v23867_v38  ;;  %15017 = vmatprep.mubr.msk.f32.mxu1 %vm583_vm1, %v23868_v32  ;;  %v23871_v38 = vld [vmem:[#allocation221_spill] sm:$0xff] }
 0x318   : > { %v21366_v53 = vsel %vm1623_vm4, %v4496_v9, %v4497_v54  ;;  %v23887_v9 = vld [vmem:[#allocation230_spill] sm:$0xff]  ;;  %v23889_v54 = vld [vmem:[#allocation231_spill] sm:$0xff] }
 0x319   : > { %23873 = vst [vmem:[#allocation178_spill] sm:$0xff] %v21366_v53 }
 0x31a   : > { %15915 = vmatmul.mubr.msk.f32.gmra.mrb[28].mxu0 %vm583_vm1, %v23870_v23  ;;  %15018 = vmatmul.mubr.msk.f32.gmra.mrb[30].mxu1 %vm583_vm1, %v23871_v38  ;;  %v23926_v23 = vld [vmem:[#allocation34_spill] sm:$0xff] }
 0x31b   : > { %15917 = vmatprep.mubr.msk.f32.mxu0 %vm583_vm1, %v21348_v39  ;;  %15022 = vmatprep.mubr.msk.f32.mxu1 %vm583_vm1, %v4493_v17  ;;  %v21374_v39 = vld [vmem:[%s22566_s5 + $0x10] sm:$0xf]  ;;  %v23890_v17 = vld [vmem:[#allocation129_spill] sm:$0xff] }
 0x31e   : > { %15918 = vmatmul.mubr.msk.f32.gmra.mrb[30].mxu0 %vm583_vm1, %v21361_v48  ;;  %15023 = vmatmul.mubr.msk.f32.vlgmr.msra.gmra.mrb[0].mxu1 %vm583_vm1, %v4495_v47  ;;  %v23894_v47 = vld [vmem:[#allocation134_spill] sm:$0xff]  ;;  %v23925_v48 = vld [vmem:[#allocation31_spill] sm:$0xff] }
 0x31f   : > { %15922 = vmatprep.mubr.msk.f32.mxu0 %vm583_vm1, %v20483_v20  ;;  %15025 = vmatprep.mubr.msk.f32.mxu1 %vm583_vm1, %v21366_v53  ;;  %v23875_v20 = vld [vmem:[#allocation116_spill] sm:$0xff]  ;;  %v23912_v53 = vld [vmem:[#allocation141_spill] sm:$0xff] }
 0x320   : > { %15071 = vmatpush3.msk.msra.mxu1 %vm680_vm0, %v21207_v36  ;;  %v23876_v36 = vld [vmem:[#allocation64_spill] sm:$0xff] }
 0x321   : > { %15120 = vmatprep.subr.msk.mxu1 %vm680_vm0, %v21374_v39 }
 0x322   : > { %15923 = vmatmul.mubr.msk.f32.vlgmr.msra.gmra.mrb[0].mxu0 %vm583_vm1, %v20492_v15  ;;  %15026 = vmatmul.mubr.msk.f32.gmra.mrb[2].mxu1 %vm583_vm1, %v21381_v27  ;;  %v23877_v15 = vld [vmem:[#allocation225_spill] sm:$0xff] }
 0x323   : > { %15971 = vmatpush3.msk.msra.mxu0 %vm680_vm0, %v21223_v46  ;;  %15925 = vmatprep.mubr.msk.f32.mxu0 %vm583_vm1, %v23795_v22  ;;  %v23885_v22 = vld [vmem:[#allocation229_spill] sm:$0xff]  ;;  %v23888_v46 = vld [vmem:[#allocation128_spill] sm:$0xff] }
 0x324   : > { %15028 = vmatprep.mubr.msk.f32.mxu1 %vm583_vm1, %v23875_v20  ;;  %16020 = vmatprep.subr.msk.mxu0 %vm680_vm0, %v21390_v43  ;;  %v21512_v20 = vld [vmem:[%s17739_s20 + $0x1c8] sm:$0xff] }
 0x326   : > { %15926 = vmatmul.mubr.msk.f32.gmra.mrb[2].mxu0 %vm583_vm1, %v23797_v30  ;;  %15029 = vmatmul.mubr.msk.f32.gmra.mrb[4].mxu1 %vm583_vm1, %v23876_v36  ;;  %v23886_v30 = vld [vmem:[#allocation126_spill] sm:$0xff]  ;;  %v23910_v36 = vld [vmem:[#allocation140_spill] sm:$0xff] }
 0x327   : > { %15928 = vmatprep.mubr.msk.f32.mxu0 %vm583_vm1, %v23799_v25  ;;  %15031 = vmatprep.mubr.msk.f32.mxu1 %vm583_vm1, %v19843_v21  ;;  %v23883_v25 = vld [vmem:[#allocation228_spill] sm:$0xff]  ;;  %v23909_v21 = vld [vmem:[#allocation214_spill] sm:$0xff] }
 0x32a   : > { %15929 = vmatmul.mubr.msk.f32.gmra.mrb[4].mxu0 %vm583_vm1, %v23801_v37  ;;  %15032 = vmatmul.mubr.msk.f32.gmra.mrb[6].mxu1 %vm583_vm1, %v19863_v3  ;;  %v23878_v37 = vld [vmem:[#allocation122_spill] sm:$0xff]  ;;  %v4898_v3 = vrot.slane %v21003_v26, 3 }
 0x32b   : > { %15931 = vmatprep.mubr.msk.f32.mxu0 %vm583_vm1, %v23803_v56  ;;  %15034 = vmatprep.mubr.msk.f32.mxu1 %vm583_vm1, %v19869_v62  ;;  %v23881_v56 = vld [vmem:[#allocation227_spill] sm:$0xff] }
 0x32e   : > { %15932 = vmatmul.mubr.msk.f32.gmra.mrb[6].mxu0 %vm583_vm1, %v23805_v29  ;;  %15035 = vmatmul.mubr.msk.f32.gmra.mrb[8].mxu1 %vm583_vm1, %v23732_v14  ;;  %v23879_v29 = vld [vmem:[#allocation226_spill] sm:$0xff] }
 0x32f   : > { %15934 = vmatprep.mubr.msk.f32.mxu0 %vm583_vm1, %v23807_v5  ;;  %15037 = vmatprep.mubr.msk.f32.mxu1 %vm583_vm1, %v23734_v1  ;;  %v23880_v5 = vld [vmem:[#allocation123_spill] sm:$0xff] }
 0x332   : > { %15935 = vmatmul.mubr.msk.f32.gmra.mrb[8].mxu0 %vm583_vm1, %v23809_v60  ;;  %15038 = vmatmul.mubr.msk.f32.gmra.mrb[10].mxu1 %vm583_vm1, %v23736_v42  ;;  %v23882_v60 = vld [vmem:[#allocation124_spill] sm:$0xff] }
 0x333   : > { %15937 = vmatprep.mubr.msk.f32.mxu0 %vm583_vm1, %v23811_v55  ;;  %15040 = vmatprep.mubr.msk.f32.mxu1 %vm583_vm1, %v23877_v15  ;;  %v23884_v55 = vld [vmem:[#allocation125_spill] sm:$0xff] }
 0x336   : > { %15938 = vmatmul.mubr.msk.f32.gmra.mrb[10].mxu0 %vm583_vm1, %v23878_v37  ;;  %15041 = vmatmul.mubr.msk.f32.gmra.mrb[12].mxu1 %vm583_vm1, %v23879_v29  ;;  %v23896_v37 = vld [vmem:[#allocation138_spill] sm:$0xff] }
 0x337   : > { %15940 = vmatprep.mubr.msk.f32.mxu0 %vm583_vm1, %v23880_v5  ;;  %15043 = vmatprep.mubr.msk.f32.mxu1 %vm583_vm1, %v23881_v56  ;;  %v23897_v5 = vld [vmem:[#allocation197_spill] sm:$0xff] }
 0x33a   : > { %15941 = vmatmul.mubr.msk.f32.gmra.mrb[12].mxu0 %vm583_vm1, %v23882_v60  ;;  %15044 = vmatmul.mubr.msk.f32.gmra.mrb[14].mxu1 %vm583_vm1, %v23883_v25  ;;  %v23898_v60 = vld [vmem:[#allocation139_spill] sm:$0xff] }
 0x33b   : > { %15943 = vmatprep.mubr.msk.f32.mxu0 %vm583_vm1, %v23884_v55  ;;  %15046 = vmatprep.mubr.msk.f32.mxu1 %vm583_vm1, %v23885_v22  ;;  %v23899_v55 = vld [vmem:[#allocation131_spill] sm:$0xff] }
 0x33e   : > { %15944 = vmatmul.mubr.msk.f32.gmra.mrb[14].mxu0 %vm583_vm1, %v23886_v30  ;;  %15047 = vmatmul.mubr.msk.f32.gmra.mrb[16].mxu1 %vm583_vm1, %v23887_v9  ;;  %v23900_v30 = vld [vmem:[#allocation145_spill] sm:$0xff] }
 0x33f   : > { %15946 = vmatprep.mubr.msk.f32.mxu0 %vm583_vm1, %v23888_v46  ;;  %15049 = vmatprep.mubr.msk.f32.mxu1 %vm583_vm1, %v23889_v54  ;;  %v23901_v46 = vld [vmem:[#allocation135_spill] sm:$0xff] }
 0x342   : > { %15947 = vmatmul.mubr.msk.f32.gmra.mrb[16].mxu0 %vm583_vm1, %v23890_v17  ;;  %15050 = vmatmul.mubr.msk.f32.gmra.mrb[18].mxu1 %vm583_vm1, %v23891_v34  ;;  %v23902_v17 = vld [vmem:[#allocation202_spill] sm:$0xff] }
 0x343   : > { %15949 = vmatprep.mubr.msk.f32.mxu0 %vm583_vm1, %v23892_v6  ;;  %15052 = vmatprep.mubr.msk.f32.mxu1 %vm583_vm1, %v23893_v52  ;;  %v23903_v6 = vld [vmem:[#allocation146_spill] sm:$0xff] }
 0x346   : > { %15950 = vmatmul.mubr.msk.f32.gmra.mrb[18].mxu0 %vm583_vm1, %v23894_v47  ;;  %15053 = vmatmul.mubr.msk.f32.gmra.mrb[20].mxu1 %vm583_vm1, %v23895_v44  ;;  %v23904_v47 = vld [vmem:[#allocation149_spill] sm:$0xff] }
 0x347   : > { %15952 = vmatprep.mubr.msk.f32.mxu0 %vm583_vm1, %v23896_v37  ;;  %15055 = vmatprep.mubr.msk.f32.mxu1 %vm583_vm1, %v23897_v5  ;;  %v23905_v37 = vld [vmem:[#allocation150_spill] sm:$0xff] }
 0x34a   : > { %15953 = vmatmul.mubr.msk.f32.gmra.mrb[20].mxu0 %vm583_vm1, %v23898_v60  ;;  %15056 = vmatmul.mubr.msk.f32.gmra.mrb[22].mxu1 %vm583_vm1, %v23899_v55  ;;  %v23906_v60 = vld [vmem:[#allocation153_spill] sm:$0xff] }
 0x34b   : > { %15955 = vmatprep.mubr.msk.f32.mxu0 %vm583_vm1, %v23900_v30  ;;  %15058 = vmatprep.mubr.msk.f32.mxu1 %vm583_vm1, %v23901_v46  ;;  %v23907_v30 = vld [vmem:[#allocation164_spill] sm:$0xff] }
 0x34e   : > { %15956 = vmatmul.mubr.msk.f32.gmra.mrb[22].mxu0 %vm583_vm1, %v20646_v24  ;;  %15059 = vmatmul.mubr.msk.f32.gmra.mrb[24].mxu1 %vm583_vm1, %v23902_v17  ;;  %v23908_v24 = vld [vmem:[#allocation136_spill] sm:$0xff] }
 0x34f   : > { %15958 = vmatprep.mubr.msk.f32.mxu0 %vm583_vm1, %v23903_v6  ;;  %15061 = vmatprep.mubr.msk.f32.mxu1 %vm583_vm1, %v23904_v47  ;;  %v4899_v6 = vrot.slane %v21016_v4, 3 }
 0x351   : > { %v4900_v27 = vsel %vm4897_vm2, %v4898_v3, %v4899_v6  ;;  %v21532_v3 = vld [vmem:[%s22566_s5 + $0x14] sm:$0xf] }
 0x352   : > { %15959 = vmatmul.mubr.msk.f32.gmra.mrb[24].mxu0 %vm583_vm1, %v23905_v37  ;;  %15062 = vmatmul.mubr.msk.f32.gmra.mrb[26].mxu1 %vm583_vm1, %v23906_v60  ;;  %v23911_v37 = vld [vmem:[#allocation203_spill] sm:$0xff] }
 0x353   : > { %15961 = vmatprep.mubr.msk.f32.mxu0 %vm583_vm1, %v23907_v30  ;;  %15064 = vmatprep.mubr.msk.f32.mxu1 %vm583_vm1, %v23908_v24  ;;  %v4901_v30 = vrot.slane %v21165_v31, 3 }
 0x356   : > { %15962 = vmatmul.mubr.msk.f32.gmra.mrb[26].mxu0 %vm583_vm1, %v23909_v21  ;;  %15065 = vmatmul.mubr.msk.f32.gmra.mrb[28].mxu1 %vm583_vm1, %v23910_v36  ;;  %v21523_v21 = vld [vmem:[%s17739_s20 + $0x1d0] sm:$0xff] }
 0x357   : > { %15964 = vmatprep.mubr.msk.f32.mxu0 %vm583_vm1, %v20677_v40  ;;  %15067 = vmatprep.mubr.msk.f32.mxu1 %vm583_vm1, %v23911_v37  ;;  %v4902_v40 = vsel %vm4897_vm2, %v4899_v6, %v4901_v30  ;;  %v23914_v6 = vld [vmem:[#allocation8_spill] sm:$0xff]  ;;  %v23916_v30 = vld [vmem:[#allocation10_spill] sm:$0xff] }
 0x35a   : > { %15965 = vmatmul.mubr.msk.f32.gmra.mrb[28].mxu0 %vm583_vm1, %v20688_v33  ;;  %15068 = vmatmul.mubr.msk.f32.gmra.mrb[30].mxu1 %vm583_vm1, %v23912_v53  ;;  %v23913_v33 = vld [vmem:[#allocation7_spill] sm:$0xff] }
 0x35b   : > { %15967 = vmatprep.mubr.msk.f32.mxu0 %vm583_vm1, %v21512_v20  ;;  %15072 = vmatprep.mubr.msk.f32.mxu1 %vm583_vm1, %v4900_v27  ;;  %v21545_v27 = vld [vmem:[%s22566_s5 + $0x5c] sm:$0xf] }
 0x35e   : > { %15968 = vmatmul.mubr.msk.f32.gmra.mrb[30].mxu0 %vm583_vm1, %v21523_v21  ;;  %15073 = vmatmul.mubr.msk.f32.vlgmr.msra.gmra.mrb[0].mxu1 %vm583_vm1, %v4902_v40  ;;  %v23917_v40 = vld [vmem:[#allocation11_spill] sm:$0xff] }
 0x35f   : > { %15972 = vmatprep.mubr.msk.f32.mxu0 %vm583_vm1, %v23704_v49  ;;  %15075 = vmatprep.mubr.msk.f32.mxu1 %vm583_vm1, %v23913_v33  ;;  %v23919_v33 = vld [vmem:[#allocation13_spill] sm:$0xff] }
 0x360   : > { %15121 = vmatpush3.msk.msra.mxu1 %vm680_vm0, %v21374_v39  ;;  %v23915_v39 = vld [vmem:[#allocation9_spill] sm:$0xff] }
 0x361   : > { %15170 = vmatprep.subr.msk.mxu1 %vm680_vm0, %v21532_v3 }
 0x362   : > { %15973 = vmatmul.mubr.msk.f32.vlgmr.msra.gmra.mrb[0].mxu0 %vm583_vm1, %v23705_v50  ;;  %15076 = vmatmul.mubr.msk.f32.gmra.mrb[2].mxu1 %vm583_vm1, %v23914_v6  ;;  %v23920_v6 = vld [vmem:[#allocation14_spill] sm:$0xff] }
 0x363   : > { %16021 = vmatpush3.msk.msra.mxu0 %vm680_vm0, %v21390_v43  ;;  %15975 = vmatprep.mubr.msk.f32.mxu0 %vm583_vm1, %v23706_v10  ;;  %v23918_v43 = vld [vmem:[#allocation12_spill] sm:$0xff]  ;;  %v23946_v10 = vld [vmem:[#allocation74_spill] sm:$0xff] }
 0x364   : > { %15078 = vmatprep.mubr.msk.f32.mxu1 %vm583_vm1, %v23915_v39  ;;  %16070 = vmatprep.subr.msk.mxu0 %vm680_vm0, %v21545_v27  ;;  %v23921_v39 = vld [vmem:[#allocation15_spill] sm:$0xff] }
 0x366   : > { %15976 = vmatmul.mubr.msk.f32.gmra.mrb[2].mxu0 %vm583_vm1, %v23707_v13  ;;  %15079 = vmatmul.mubr.msk.f32.gmra.mrb[4].mxu1 %vm583_vm1, %v23916_v30  ;;  %v23922_v30 = vld [vmem:[#allocation16_spill] sm:$0xff] }
 0x367   : > { %15978 = vmatprep.mubr.msk.f32.mxu0 %vm583_vm1, %v23708_v57  ;;  %15081 = vmatprep.mubr.msk.f32.mxu1 %vm583_vm1, %v23917_v40  ;;  %v23923_v40 = vld [vmem:[#allocation18_spill] sm:$0xff]  ;;  %v21660_v57 = vld [vmem:[%s17739_s20 + $0x1d8] sm:$0xf] }
 0x368   : > { %v23944_v13 = vld [vmem:[#allocation72_spill] sm:$0xff]  ;;  %v10041_v50 = vrot.slane %v21660_v57, 1 }
 0x36a   : > { %15979 = vmatmul.mubr.msk.f32.gmra.mrb[4].mxu0 %vm583_vm1, %v23709_v63  ;;  %15082 = vmatmul.mubr.msk.f32.gmra.mrb[6].mxu1 %vm583_vm1, %v23918_v43  ;;  %v23924_v43 = vld [vmem:[#allocation26_spill] sm:$0xff]  ;;  %v5305_v63 = vrot.slane %v21016_v4, 4 }
 0x36b   : > { %15981 = vmatprep.mubr.msk.f32.mxu0 %vm583_vm1, %v23710_v51  ;;  %15084 = vmatprep.mubr.msk.f32.mxu1 %vm583_vm1, %v23919_v33  ;;  %v10039_v51 = vrot.slane %v21523_v21, 1 }
 0x36e   : > { %15982 = vmatmul.mubr.msk.f32.gmra.mrb[6].mxu0 %vm583_vm1, %v23711_v59  ;;  %15085 = vmatmul.mubr.msk.f32.gmra.mrb[8].mxu1 %vm583_vm1, %v23920_v6  ;;  %v23942_v59 = vld [vmem:[#allocation69_spill] sm:$0xff] }
 0x36f   : > { %15984 = vmatprep.mubr.msk.f32.mxu0 %vm583_vm1, %v23712_v11  ;;  %15087 = vmatprep.mubr.msk.f32.mxu1 %vm583_vm1, %v23921_v39  ;;  %v23940_v11 = vld [vmem:[#allocation66_spill] sm:$0xff] }
 0x372   : > { %15985 = vmatmul.mubr.msk.f32.gmra.mrb[8].mxu0 %vm583_vm1, %v23713_v41  ;;  %15088 = vmatmul.mubr.msk.f32.gmra.mrb[10].mxu1 %vm583_vm1, %v23922_v30  ;;  %v23939_v41 = vld [vmem:[#allocation163_spill] sm:$0xff] }
 0x373   : > { %15987 = vmatprep.mubr.msk.f32.mxu0 %vm583_vm1, %v23714_v58  ;;  %15090 = vmatprep.mubr.msk.f32.mxu1 %vm583_vm1, %v23923_v40  ;;  %v23927_v58 = vld [vmem:[#allocation35_spill] sm:$0xff] }
 0x376   : > { %15988 = vmatmul.mubr.msk.f32.gmra.mrb[10].mxu0 %vm583_vm1, %v23715_v12  ;;  %15091 = vmatmul.mubr.msk.f32.gmra.mrb[12].mxu1 %vm583_vm1, %v23924_v43  ;;  %v23928_v12 = vld [vmem:[#allocation40_spill] sm:$0xff] }
 0x377   : > { %15990 = vmatprep.mubr.msk.f32.mxu0 %vm583_vm1, %v23716_v2  ;;  %15093 = vmatprep.mubr.msk.f32.mxu1 %vm583_vm1, %v23925_v48  ;;  %v23929_v2 = vld [vmem:[#allocation41_spill] sm:$0xff] }
 0x37a   : > { %15991 = vmatmul.mubr.msk.f32.gmra.mrb[12].mxu0 %vm583_vm1, %v23717_v8  ;;  %15094 = vmatmul.mubr.msk.f32.gmra.mrb[14].mxu1 %vm583_vm1, %v23926_v23  ;;  %v23930_v8 = vld [vmem:[#allocation42_spill] sm:$0xff] }
 0x37b   : > { %15993 = vmatprep.mubr.msk.f32.mxu0 %vm583_vm1, %v23718_v45  ;;  %15096 = vmatprep.mubr.msk.f32.mxu1 %vm583_vm1, %v23927_v58  ;;  %v23931_v45 = vld [vmem:[#allocation43_spill] sm:$0xff] }
 0x37e   : > { %15994 = vmatmul.mubr.msk.f32.gmra.mrb[14].mxu0 %vm583_vm1, %v23719_v18  ;;  %15097 = vmatmul.mubr.msk.f32.gmra.mrb[16].mxu1 %vm583_vm1, %v23928_v12  ;;  %v23932_v18 = vld [vmem:[#allocation45_spill] sm:$0xff] }
 0x37f   : > { %15996 = vmatprep.mubr.msk.f32.mxu0 %vm583_vm1, %v23720_v61  ;;  %15099 = vmatprep.mubr.msk.f32.mxu1 %vm583_vm1, %v23929_v2  ;;  %v23933_v61 = vld [vmem:[#allocation46_spill] sm:$0xff] }
 0x382   : > { %15997 = vmatmul.mubr.msk.f32.gmra.mrb[16].mxu0 %vm583_vm1, %v23721_v16  ;;  %15100 = vmatmul.mubr.msk.f32.gmra.mrb[18].mxu1 %vm583_vm1, %v23930_v8  ;;  %v23934_v16 = vld [vmem:[#allocation47_spill] sm:$0xff] }
 0x383   : > { %15999 = vmatprep.mubr.msk.f32.mxu0 %vm583_vm1, %v23722_v19  ;;  %15102 = vmatprep.mubr.msk.f32.mxu1 %vm583_vm1, %v23931_v45  ;;  %v23937_v19 = vld [vmem:[#allocation75_spill] sm:$0xff] }
 0x386   : > { %16000 = vmatmul.mubr.msk.f32.gmra.mrb[18].mxu0 %vm583_vm1, %v23723_v28  ;;  %15103 = vmatmul.mubr.msk.f32.gmra.mrb[20].mxu1 %vm583_vm1, %v23932_v18  ;;  %v23935_v28 = vld [vmem:[#allocation48_spill] sm:$0xff] }
 0x387   : > { %16002 = vmatprep.mubr.msk.f32.mxu0 %vm583_vm1, %v23864_v7  ;;  %15105 = vmatprep.mubr.msk.f32.mxu1 %vm583_vm1, %v23933_v61  ;;  %v23936_v7 = vld [vmem:[#allocation50_spill] sm:$0xff] }
 0x38a   : > { %16003 = vmatmul.mubr.msk.f32.gmra.mrb[20].mxu0 %vm583_vm1, %v23866_v35  ;;  %15106 = vmatmul.mubr.msk.f32.gmra.mrb[22].mxu1 %vm583_vm1, %v23934_v16  ;;  %v23938_v35 = vld [vmem:[#allocation51_spill] sm:$0xff] }
 0x38b   : > { %16005 = vmatprep.mubr.msk.f32.mxu0 %vm583_vm1, %v23868_v32  ;;  %15108 = vmatprep.mubr.msk.f32.mxu1 %vm583_vm1, %v23935_v28  ;;  %v23941_v32 = vld [vmem:[#allocation224_spill] sm:$0xff] }
 0x38e   : > { %16006 = vmatmul.mubr.msk.f32.gmra.mrb[22].mxu0 %vm583_vm1, %v23871_v38  ;;  %15109 = vmatmul.mubr.msk.f32.gmra.mrb[24].mxu1 %vm583_vm1, %v23936_v7  ;;  %v10038_v38 = vrot.slane %v21512_v20, 1 }
 0x38f   : > { %16008 = vmatprep.mubr.msk.f32.mxu0 %vm583_vm1, %v23937_v19  ;;  %15111 = vmatprep.mubr.msk.f32.mxu1 %vm583_vm1, %v23938_v35  ;;  %v5304_v19 = vrot.slane %v21003_v26, 4  ;;  %v5307_v26 = vrot.slane %v21165_v31, 4  ;;  %v23954_v31 = vld [vmem:[#allocation86_spill] sm:$0xff] }
 0x390   : > { %v10040_v4 = vsel %vm446_vm3, %v10038_v38, %v10039_v51  ;;  %v23955_v38 = vld [vmem:[#allocation89_spill] sm:$0xff] }
 0x391   : > { %v5306_v49 = vsel %vm680_vm0, %v5304_v19, %v5305_v63  ;;  %v21687_v19 = vld [vmem:[%s22566_s5 + $0x18] sm:$0xf] }
 0x392   : > { %16009 = vmatmul.mubr.msk.f32.gmra.mrb[24].mxu0 %vm583_vm1, %v23939_v41  ;;  %15112 = vmatmul.mubr.msk.f32.gmra.mrb[26].mxu1 %vm583_vm1, %v23940_v11  ;;  %v23943_v41 = vld [vmem:[#allocation111_spill] sm:$0xff] }
 0x393   : > { %16011 = vmatprep.mubr.msk.f32.mxu0 %vm583_vm1, %v23941_v32  ;;  %15114 = vmatprep.mubr.msk.f32.mxu1 %vm583_vm1, %v23942_v59  ;;  %v23945_v32 = vld [vmem:[#allocation151_spill] sm:$0xff] }
 0x394   : > { %v23947_v59 = vld [vmem:[#allocation155_spill] sm:$0xff] }
 0x396   : > { %16012 = vmatmul.mubr.msk.f32.gmra.mrb[26].mxu0 %vm583_vm1, %v23943_v41  ;;  %15115 = vmatmul.mubr.msk.f32.gmra.mrb[28].mxu1 %vm583_vm1, %v23944_v13  ;;  %v23948_v41 = vld [vmem:[#allocation78_spill] sm:$0xff] }
 0x397   : > { %16014 = vmatprep.mubr.msk.f32.mxu0 %vm583_vm1, %v23945_v32  ;;  %15117 = vmatprep.mubr.msk.f32.mxu1 %vm583_vm1, %v23946_v10  ;;  %v10042_v32 = vsel %vm446_vm3, %v10039_v51, %v10041_v50  ;;  %v5308_v10 = vsel %vm680_vm0, %v5305_v63, %v5307_v26  ;;  %v23951_v50 = vld [vmem:[#allocation37_spill] sm:$0xff]  ;;  %v23953_v51 = vld [vmem:[#allocation82_spill] sm:$0xff]  ;;  %v23958_v26 = vld [vmem:[#allocation95_spill] sm:$0xff] }
 0x398   : > { %v23952_v63 = vld [vmem:[#allocation81_spill] sm:$0xff] }
 0x39a   : > { %16015 = vmatmul.mubr.msk.f32.gmra.mrb[28].mxu0 %vm583_vm1, %v23947_v59  ;;  %15118 = vmatmul.mubr.msk.f32.gmra.mrb[30].mxu1 %vm583_vm1, %v23948_v41  ;;  %v23949_v59 = vld [vmem:[#allocation25_spill] sm:$0xff] }
 0x39b   : > { %16017 = vmatprep.mubr.msk.f32.mxu0 %vm583_vm1, %v10040_v4  ;;  %15122 = vmatprep.mubr.msk.f32.mxu1 %vm583_vm1, %v5306_v49  ;;  %v23950_v49 = vld [vmem:[#allocation30_spill] sm:$0xff]  ;;  %v23959_v4 = vld [vmem:[#allocation97_spill] sm:$0xff] }
 0x39e   : > { %16018 = vmatmul.mubr.msk.f32.gmra.mrb[30].mxu0 %vm583_vm1, %v10042_v32  ;;  %15123 = vmatmul.mubr.msk.f32.vlgmr.msra.gmra.mrb[0].mxu1 %vm583_vm1, %v5308_v10  ;;  %v21700_v10 = vld [vmem:[%s22566_s5 + $0x60] sm:$0xf]  ;;  %v23960_v32 = vld [vmem:[#allocation98_spill] sm:$0xff] }
 0x39f   : > { %16022 = vmatprep.mubr.msk.f32.mxu0 %vm583_vm1, %v19869_v62  ;;  %15125 = vmatprep.mubr.msk.f32.mxu1 %vm583_vm1, %v23949_v59  ;;  %v23961_v59 = vld [vmem:[#allocation101_spill] sm:$0xff] }
 0x3a0   : > { %15171 = vmatpush3.msk.msra.mxu1 %vm680_vm0, %v21532_v3  ;;  %v23956_v3 = vld [vmem:[#allocation90_spill] sm:$0xff] }
 0x3a1   : > { %15220 = vmatprep.subr.msk.mxu1 %vm680_vm0, %v21687_v19 }
 0x3a2   : > { %16023 = vmatmul.mubr.msk.f32.vlgmr.msra.gmra.mrb[0].mxu0 %vm583_vm1, %v23732_v14  ;;  %15126 = vmatmul.mubr.msk.f32.gmra.mrb[2].mxu1 %vm583_vm1, %v23950_v49  ;;  %v23962_v49 = vld [vmem:[#allocation103_spill] sm:$0xff]  ;;  %v23987_v14 = vld [vmem:[#allocation157_spill] sm:$0xff] }
 0x3a3   : > { %16071 = vmatpush3.msk.msra.mxu0 %vm680_vm0, %v21545_v27  ;;  %16025 = vmatprep.mubr.msk.f32.mxu0 %vm583_vm1, %v23734_v1  ;;  %v23957_v27 = vld [vmem:[#allocation92_spill] sm:$0xff] }
 0x3a4   : > { %15128 = vmatprep.mubr.msk.f32.mxu1 %vm583_vm1, %v23951_v50  ;;  %16120 = vmatprep.subr.msk.mxu0 %vm680_vm0, %v21700_v10  ;;  %v23963_v50 = vld [vmem:[#allocation19_spill] sm:$0xff] }
 0x3a6   : > { %16026 = vmatmul.mubr.msk.f32.gmra.mrb[2].mxu0 %vm583_vm1, %v23736_v42  ;;  %15129 = vmatmul.mubr.msk.f32.gmra.mrb[4].mxu1 %vm583_vm1, %v23952_v63  ;;  %v23964_v63 = vld [vmem:[#allocation104_spill] sm:$0xff] }
 0x3a7   : > { %16028 = vmatprep.mubr.msk.f32.mxu0 %vm583_vm1, %v23877_v15  ;;  %15131 = vmatprep.mubr.msk.f32.mxu1 %vm583_vm1, %v23953_v51  ;;  %v23965_v51 = vld [vmem:[#allocation105_spill] sm:$0xff]  ;;  %v23980_v15 = vld [vmem:[#allocation147_spill] sm:$0xff]  ;;  %v23986_v42 = vld [vmem:[#allocation52_spill] sm:$0xff] }
 0x3aa   : > { %16029 = vmatmul.mubr.msk.f32.gmra.mrb[4].mxu0 %vm583_vm1, %v23879_v29  ;;  %15132 = vmatmul.mubr.msk.f32.gmra.mrb[6].mxu1 %vm583_vm1, %v23954_v31  ;;  %v23966_v31 = vld [vmem:[#allocation22_spill] sm:$0xff] }
 0x3ab   : > { %16031 = vmatprep.mubr.msk.f32.mxu0 %vm583_vm1, %v23881_v56  ;;  %15134 = vmatprep.mubr.msk.f32.mxu1 %vm583_vm1, %v23955_v38  ;;  %v23978_v56 = vld [vmem:[#allocation44_spill] sm:$0xff] }
 0x3ae   : > { %16032 = vmatmul.mubr.msk.f32.gmra.mrb[6].mxu0 %vm583_vm1, %v23883_v25  ;;  %15135 = vmatmul.mubr.msk.f32.gmra.mrb[8].mxu1 %vm583_vm1, %v23956_v3  ;;  %v23977_v25 = vld [vmem:[#allocation159_spill] sm:$0xff] }
 0x3af   : > { %16034 = vmatprep.mubr.msk.f32.mxu0 %vm583_vm1, %v23885_v22  ;;  %15137 = vmatprep.mubr.msk.f32.mxu1 %vm583_vm1, %v23957_v27  ;;  %v23976_v22 = vld [vmem:[#allocation39_spill] sm:$0xff] }
 0x3b2   : > { %16035 = vmatmul.mubr.msk.f32.gmra.mrb[8].mxu0 %vm583_vm1, %v23887_v9  ;;  %15138 = vmatmul.mubr.msk.f32.gmra.mrb[10].mxu1 %vm583_vm1, %v23958_v26  ;;  %v23975_v9 = vld [vmem:[#allocation71_spill] sm:$0xff] }
 0x3b3   : > { %16037 = vmatprep.mubr.msk.f32.mxu0 %vm583_vm1, %v23889_v54  ;;  %15140 = vmatprep.mubr.msk.f32.mxu1 %vm583_vm1, %v23959_v4 }
 0x3b6   : > { %16038 = vmatmul.mubr.msk.f32.gmra.mrb[10].mxu0 %vm583_vm1, %v23891_v34  ;;  %15141 = vmatmul.mubr.msk.f32.gmra.mrb[12].mxu1 %vm583_vm1, %v23960_v32 }
 0x3b7   : > { %16040 = vmatprep.mubr.msk.f32.mxu0 %vm583_vm1, %v23893_v52  ;;  %15143 = vmatprep.mubr.msk.f32.mxu1 %vm583_vm1, %v23961_v59  ;;  %v23973_v52 = vld [vmem:[#allocation49_spill] sm:$0xff] }
 0x3b8   : > { %v23974_v34 = vrot.slane %v23973_v52, 1 }
 0x3ba   : > { %16041 = vmatmul.mubr.msk.f32.gmra.mrb[12].mxu0 %vm583_vm1, %v23895_v44  ;;  %15144 = vmatmul.mubr.msk.f32.gmra.mrb[14].mxu1 %vm583_vm1, %v23962_v49 }
 0x3bb   : > { %16043 = vmatprep.mubr.msk.f32.mxu0 %vm583_vm1, %v23897_v5  ;;  %15146 = vmatprep.mubr.msk.f32.mxu1 %vm583_vm1, %v23963_v50  ;;  %v23967_v5 = vld [vmem:[#allocation106_spill] sm:$0xff] }
 0x3be   : > { %16044 = vmatmul.mubr.msk.f32.gmra.mrb[14].mxu0 %vm583_vm1, %v23899_v55  ;;  %15147 = vmatmul.mubr.msk.f32.gmra.mrb[16].mxu1 %vm583_vm1, %v23964_v63  ;;  %v23968_v55 = vld [vmem:[#allocation28_spill] sm:$0xff] }
 0x3bf   : > { %16046 = vmatprep.mubr.msk.f32.mxu0 %vm583_vm1, %v23901_v46  ;;  %15149 = vmatprep.mubr.msk.f32.mxu1 %vm583_vm1, %v23965_v51  ;;  %v23969_v46 = vld [vmem:[#allocation108_spill] sm:$0xff] }
 0x3c2   : > { %16047 = vmatmul.mubr.msk.f32.gmra.mrb[16].mxu0 %vm583_vm1, %v23902_v17  ;;  %15150 = vmatmul.mubr.msk.f32.gmra.mrb[18].mxu1 %vm583_vm1, %v23966_v31  ;;  %v344_v17 = vld [vmem:[%s18005_s13] sm:$0xff] }
 0x3c3   : > { %16049 = vmatprep.mubr.msk.f32.mxu0 %vm583_vm1, %v23904_v47  ;;  %15152 = vmatprep.mubr.msk.f32.mxu1 %vm583_vm1, %v23967_v5  ;;  %v23970_v47 = vld [vmem:[#allocation32_spill] sm:$0xff]  ;;  %v11128_v44 = vrot.slane %v344_v17, 1  ;;  %v11210_v54 = vrot.slane %v344_v17, 2 }
 0x3c6   : > { %16050 = vmatmul.mubr.msk.f32.gmra.mrb[18].mxu0 %vm583_vm1, %v23906_v60  ;;  %15153 = vmatmul.mubr.msk.f32.gmra.mrb[20].mxu1 %vm583_vm1, %v23968_v55  ;;  %v23971_v60 = vld [vmem:[#allocation36_spill] sm:$0xff] }
 0x3c7   : > { %16052 = vmatprep.mubr.msk.f32.mxu0 %vm583_vm1, %v23908_v24  ;;  %15155 = vmatprep.mubr.msk.f32.mxu1 %vm583_vm1, %v23969_v46  ;;  %v23972_v24 = vld [vmem:[#allocation38_spill] sm:$0xff] }
 0x3ca   : > { %16053 = vmatmul.mubr.msk.f32.gmra.mrb[20].mxu0 %vm583_vm1, %v23910_v36  ;;  %15156 = vmatmul.mubr.msk.f32.gmra.mrb[22].mxu1 %vm583_vm1, %v23970_v47  ;;  %v11130_v36 = vsel %vm446_vm3, %v11128_v44, %v23974_v34  ;;  %v23981_v34 = vld [vmem:[#allocation56_spill] sm:$0xff]  ;;  %v10309_v44 = vrot.slane %v21512_v20, 2 }
 0x3cb   : > { %16055 = vmatprep.mubr.msk.f32.mxu0 %vm583_vm1, %v23911_v37  ;;  %15158 = vmatprep.mubr.msk.f32.mxu1 %vm583_vm1, %v23971_v60  ;;  %v11174_v37 = vmax.f32 %v344_v17, %v11130_v36  ;;  %v10310_v36 = vrot.slane %v21523_v21, 2 }
 0x3ce   : > { %16056 = vmatmul.mubr.msk.f32.gmra.mrb[22].mxu0 %vm583_vm1, %v23912_v53  ;;  %15159 = vmatmul.mubr.msk.f32.gmra.mrb[24].mxu1 %vm583_vm1, %v23972_v24  ;;  %v23979_v53 = vrot.slane %v23973_v52, 2  ;;  %v23984_v52 = vld [vmem:[#allocation156_spill] sm:$0xff] }
 0x3cf   : > { %16058 = vmatprep.mubr.msk.f32.mxu0 %vm583_vm1, %v23975_v9  ;;  %15161 = vmatprep.mubr.msk.f32.mxu1 %vm583_vm1, %v23976_v22  ;;  %v23982_v9 = vld [vmem:[#allocation152_spill] sm:$0xff] }
 0x3d0   : > { %v11212_v29 = vsel %vm1623_vm4, %v11210_v54, %v23979_v53  ;;  %v23985_v53 = vld [vmem:[#allocation60_spill] sm:$0xff]  ;;  %v10311_v54 = vsel %vm1623_vm4, %v10309_v44, %v10310_v36  ;;  %v23990_v44 = vld [vmem:[#allocation54_spill] sm:$0xff] }
 0x3d1   : > { %v11336_v17 = vmax.f32 %v11174_v37, %v11212_v29  ;;  %v23988_v29 = vld [vmem:[#allocation63_spill] sm:$0xff]  ;;  %v23989_v37 = vld [vmem:[#allocation158_spill] sm:$0xff] }
 0x3d2   : > { %16059 = vmatmul.mubr.msk.f32.gmra.mrb[24].mxu0 %vm583_vm1, %v23977_v25  ;;  %15162 = vmatmul.mubr.msk.f32.gmra.mrb[26].mxu1 %vm583_vm1, %v23978_v56  ;;  %v23983_v25 = vld [vmem:[#allocation57_spill] sm:$0xff] }
 0x3d3   : > { %16061 = vmatprep.mubr.msk.f32.mxu0 %vm583_vm1, %v23980_v15  ;;  %15164 = vmatprep.mubr.msk.f32.mxu1 %vm583_vm1, %v23981_v34  ;;  %v10312_v15 = vrot.slane %v21660_v57, 2  ;;  %v11372_v1 = vmax.f32 %v11336_v17, %v23986_v42 }
 0x3d5   : > { %v21847_v17 = vmax.f32 %v11372_v1, %v23990_v44  ;;  %v11374_v1 = vmax.f32 %v23986_v42, %v23990_v44  ;;  %v17517_v42 = vld [vmem:[%s17739_s20 + $0x48] sm:$0xff] }
 0x3d6   : > { %16062 = vmatmul.mubr.msk.f32.gmra.mrb[26].mxu0 %vm583_vm1, %v23982_v9  ;;  %15165 = vmatmul.mubr.msk.f32.gmra.mrb[28].mxu1 %vm583_vm1, %v23983_v25  ;;  %v10313_v9 = vsel %vm1623_vm4, %v10310_v36, %v10312_v15  ;;  %v21860_v36 = vld [vmem:[%s22567_s6] sm:$0xf] }
 0x3d7   : > { %16064 = vmatprep.mubr.msk.f32.mxu0 %vm583_vm1, %v23984_v52  ;;  %15167 = vmatprep.mubr.msk.f32.mxu1 %vm583_vm1, %v23985_v53  ;;  %v23994_v52 = vld [vmem:[#allocation53_spill] sm:$0xff] }
 0x3da   : > { %16065 = vmatmul.mubr.msk.f32.gmra.mrb[28].mxu0 %vm583_vm1, %v23987_v14  ;;  %15168 = vmatmul.mubr.msk.f32.gmra.mrb[30].mxu1 %vm583_vm1, %v23988_v29  ;;  %v21844_v14 = vld [vmem:[%s22566_s5 + $0x1c] sm:$0xf] }
 0x3db   : > { %16067 = vmatprep.mubr.msk.f32.mxu0 %vm583_vm1, %v10311_v54  ;;  %15172 = vmatprep.mubr.msk.f32.mxu1 %vm583_vm1, %v21030_v0  ;;  %v23991_v0 = vld [vmem:[#allocation160_spill] sm:$0xff]  ;;  %v23995_v54 = vld [vmem:[#allocation58_spill] sm:$0xff] }
 0x3de   : > { %16068 = vmatmul.mubr.msk.f32.gmra.mrb[30].mxu0 %vm583_vm1, %v10313_v9  ;;  %15173 = vmatmul.mubr.msk.f32.vlgmr.msra.gmra.mrb[0].mxu1 %vm583_vm1, %v23989_v37  ;;  %v21875_v9 = vmax.f32 %v11374_v1, %v23995_v54  ;;  %v17519_v1 = vld [vmem:[%s17739_s20 + $0x60] sm:$0xff] }
 0x3df   : > { %16072 = vmatprep.mubr.msk.f32.mxu0 %vm583_vm1, %v23919_v33  ;;  %15175 = vmatprep.mubr.msk.f32.mxu1 %vm583_vm1, %v23991_v0  ;;  %v23992_v33 = vld [vmem:[#allocation161_spill] sm:$0xff]  ;;  %v11376_v0 = vmax.f32 %v23990_v44, %v23995_v54  ;;  %v23998_v44 = vld [vmem:[#allocation67_spill] sm:$0xff] }
 0x3e0   : > { %15221 = vmatpush3.msk.msra.mxu1 %vm680_vm0, %v21687_v19  ;;  %v23993_v19 = vld [vmem:[#allocation55_spill] sm:$0xff] }
 0x3e1   : > { %15270 = vmatprep.subr.msk.mxu1 %vm680_vm0, %v21844_v14  ;;  %v11375_v15 = vmax.f32 %v23994_v52, %v23993_v19 }
 0x3e2   : > { %16073 = vmatmul.mubr.msk.f32.vlgmr.msra.gmra.mrb[0].mxu0 %vm583_vm1, %v23920_v6  ;;  %15176 = vmatmul.mubr.msk.f32.gmra.mrb[2].mxu1 %vm583_vm1, %v23992_v33  ;;  %v23996_v6 = vld [vmem:[#allocation61_spill] sm:$0xff] }
 0x3e3   : > { %16121 = vmatpush3.msk.msra.mxu0 %vm680_vm0, %v21700_v10  ;;  %16075 = vmatprep.mubr.msk.f32.mxu0 %vm583_vm1, %v23921_v39  ;;  %v21882_v37 = vmax.f32 %v11375_v15, %v23996_v6  ;;  %v17518_v39 = vld [vmem:[%s17739_s20 + $0x50] sm:$0xff]  ;;  %v11377_v10 = vmax.f32 %v23993_v19, %v23996_v6  ;;  %v23997_v33 = vld [vmem:[#allocation65_spill] sm:$0xff]  ;;  %v17520_v19 = vld [vmem:[%s17739_s20 + $0x68] sm:$0xff] }
 0x3e4   : > { %15178 = vmatprep.mubr.msk.f32.mxu1 %vm583_vm1, %v17517_v42  ;;  %16170 = vmatprep.subr.msk.mxu0 %vm680_vm0, %v21860_v36  ;;  %v21897_v52 = vmax.f32 %v11376_v0, %v23997_v33  ;;  %v17521_v42 = vld [vmem:[%s17739_s20 + $0x78] sm:$0xff]  ;;  %v23999_v0 = vld [vmem:[#allocation73_spill] sm:$0xff] }
 0x3e5   : > { %v21900_v15 = vmax.f32 %v11377_v10, %v23998_v44 }
 0x3e6   : > { %16076 = vmatmul.mubr.msk.f32.gmra.mrb[2].mxu0 %vm583_vm1, %v23922_v30  ;;  %15179 = vmatmul.mubr.msk.f32.gmra.mrb[4].mxu1 %vm583_vm1, %v17518_v39  ;;  %v11378_v30 = vmax.f32 %v23995_v54, %v23997_v33  ;;  %v24000_v54 = vld [vmem:[#allocation76_spill] sm:$0xff] }
 0x3e7   : > { %16078 = vmatprep.mubr.msk.f32.mxu0 %vm583_vm1, %v23923_v40  ;;  %15181 = vmatprep.mubr.msk.f32.mxu1 %vm583_vm1, %v17519_v1  ;;  %v11379_v40 = vmax.f32 %v23996_v6, %v23998_v44  ;;  %v17522_v6 = vld [vmem:[%s17739_s20 + $0x80] sm:$0xff]  ;;  %v17523_v1 = vld [vmem:[%s17739_s20 + $0x90] sm:$0xff] }
 0x3e8   : > { %v21915_v39 = vmax.f32 %v11378_v30, %v23999_v0  ;;  %v24001_v30 = vld [vmem:[#allocation77_spill] sm:$0xff] }
 0x3e9   : > { %v21918_v10 = vmax.f32 %v11379_v40, %v24000_v54 }
 0x3ea   : > { %16079 = vmatmul.mubr.msk.f32.gmra.mrb[4].mxu0 %vm583_vm1, %v23924_v43  ;;  %15182 = vmatmul.mubr.msk.f32.gmra.mrb[6].mxu1 %vm583_vm1, %v17520_v19  ;;  %v11380_v43 = vmax.f32 %v23997_v33, %v23999_v0  ;;  %v24002_v33 = vld [vmem:[#allocation79_spill] sm:$0xff] }
 0x3eb   : > { %16081 = vmatprep.mubr.msk.f32.mxu0 %vm583_vm1, %v23925_v48  ;;  %15184 = vmatprep.mubr.msk.f32.mxu1 %vm583_vm1, %v17521_v42  ;;  %v11381_v48 = vmax.f32 %v23998_v44, %v24000_v54  ;;  %v17524_v44 = vld [vmem:[%s17739_s20 + $0x98] sm:$0xff]  ;;  %v17525_v42 = vld [vmem:[%s17739_s20 + $0xa8] sm:$0xff] }
 0x3ec   : > { %v21933_v19 = vmax.f32 %v11380_v43, %v24001_v30  ;;  %v24003_v43 = vld [vmem:[#allocation84_spill] sm:$0xff] }
 0x3ed   : > { %v21936_v40 = vmax.f32 %v11381_v48, %v24002_v33 }
 0x3ee   : > { %16082 = vmatmul.mubr.msk.f32.gmra.mrb[6].mxu0 %vm583_vm1, %v23926_v23  ;;  %15185 = vmatmul.mubr.msk.f32.gmra.mrb[8].mxu1 %vm583_vm1, %v17522_v6  ;;  %v11382_v23 = vmax.f32 %v23999_v0, %v24001_v30  ;;  %v24004_v0 = vld [vmem:[#allocation85_spill] sm:$0xff] }
 0x3ef   : > { %16084 = vmatprep.mubr.msk.f32.mxu0 %vm583_vm1, %v23927_v58  ;;  %15187 = vmatprep.mubr.msk.f32.mxu1 %vm583_vm1, %v17523_v1  ;;  %v11383_v58 = vmax.f32 %v24000_v54, %v24002_v33  ;;  %v17526_v54 = vld [vmem:[%s17739_s20 + $0xb0] sm:$0xff]  ;;  %v17527_v1 = vld [vmem:[%s17739_s20 + $0xc0] sm:$0xff] }
 0x3f0   : > { %v21951_v6 = vmax.f32 %v11382_v23, %v24003_v43  ;;  %v24005_v23 = vld [vmem:[#allocation87_spill] sm:$0xff] }
 0x3f1   : > { %v21954_v48 = vmax.f32 %v11383_v58, %v24004_v0 }
 0x3f2   : > { %16085 = vmatmul.mubr.msk.f32.gmra.mrb[8].mxu0 %vm583_vm1, %v23928_v12  ;;  %15188 = vmatmul.mubr.msk.f32.gmra.mrb[10].mxu1 %vm583_vm1, %v17524_v44  ;;  %v11384_v12 = vmax.f32 %v24001_v30, %v24003_v43  ;;  %v24006_v30 = vld [vmem:[#allocation88_spill] sm:$0xff] }
 0x3f3   : > { %16087 = vmatprep.mubr.msk.f32.mxu0 %vm583_vm1, %v23929_v2  ;;  %15190 = vmatprep.mubr.msk.f32.mxu1 %vm583_vm1, %v17525_v42  ;;  %v11385_v2 = vmax.f32 %v24002_v33, %v24004_v0  ;;  %v17528_v33 = vld [vmem:[%s17739_s20 + $0xc8] sm:$0xff]  ;;  %v17529_v42 = vld [vmem:[%s17739_s20 + $0xd8] sm:$0xff] }
 0x3f4   : > { %v21969_v44 = vmax.f32 %v11384_v12, %v24005_v23  ;;  %v24007_v12 = vld [vmem:[#allocation91_spill] sm:$0xff] }
 0x3f5   : > { %v21972_v58 = vmax.f32 %v11385_v2, %v24006_v30 }
 0x3f6   : > { %16088 = vmatmul.mubr.msk.f32.gmra.mrb[10].mxu0 %vm583_vm1, %v23930_v8  ;;  %15191 = vmatmul.mubr.msk.f32.gmra.mrb[12].mxu1 %vm583_vm1, %v17526_v54  ;;  %v11386_v8 = vmax.f32 %v24003_v43, %v24005_v23  ;;  %v24008_v43 = vld [vmem:[#allocation93_spill] sm:$0xff] }
 0x3f7   : > { %16090 = vmatprep.mubr.msk.f32.mxu0 %vm583_vm1, %v23931_v45  ;;  %15193 = vmatprep.mubr.msk.f32.mxu1 %vm583_vm1, %v17527_v1  ;;  %v11387_v45 = vmax.f32 %v24004_v0, %v24006_v30  ;;  %v17530_v0 = vld [vmem:[%s17739_s20 + $0xe0] sm:$0xff]  ;;  %v17531_v1 = vld [vmem:[%s17739_s20 + $0xf0] sm:$0xff] }
 0x3f8   : > { %v21987_v54 = vmax.f32 %v11386_v8, %v24007_v12  ;;  %v24009_v8 = vld [vmem:[#allocation94_spill] sm:$0xff] }
 0x3f9   : > { %v21990_v2 = vmax.f32 %v11387_v45, %v24008_v43 }
 0x3fa   : > { %16091 = vmatmul.mubr.msk.f32.gmra.mrb[12].mxu0 %vm583_vm1, %v23932_v18  ;;  %15194 = vmatmul.mubr.msk.f32.gmra.mrb[14].mxu1 %vm583_vm1, %v17528_v33  ;;  %v11388_v18 = vmax.f32 %v24005_v23, %v24007_v12  ;;  %v24010_v23 = vld [vmem:[#allocation96_spill] sm:$0xff] }
 0x3fb   : > { %16093 = vmatprep.mubr.msk.f32.mxu0 %vm583_vm1, %v23933_v61  ;;  %15196 = vmatprep.mubr.msk.f32.mxu1 %vm583_vm1, %v17529_v42  ;;  %v11389_v61 = vmax.f32 %v24006_v30, %v24008_v43  ;;  %v17532_v30 = vld [vmem:[%s17739_s20 + $0xf8] sm:$0xff]  ;;  %v17533_v42 = vld [vmem:[%s17739_s20 + $0x108] sm:$0xff] }
 0x3fc   : > { %v22005_v33 = vmax.f32 %v11388_v18, %v24009_v8  ;;  %v24011_v18 = vld [vmem:[#allocation99_spill] sm:$0xff] }
 0x3fd   : > { %v22008_v45 = vmax.f32 %v11389_v61, %v24010_v23 }
 0x3fe   : > { %16094 = vmatmul.mubr.msk.f32.gmra.mrb[14].mxu0 %vm583_vm1, %v23934_v16  ;;  %15197 = vmatmul.mubr.msk.f32.gmra.mrb[16].mxu1 %vm583_vm1, %v17530_v0  ;;  %v11390_v16 = vmax.f32 %v24007_v12, %v24009_v8  ;;  %v24012_v12 = vld [vmem:[#allocation100_spill] sm:$0xff] }
 0x3ff   : > { %16096 = vmatprep.mubr.msk.f32.mxu0 %vm583_vm1, %v23935_v28  ;;  %15199 = vmatprep.mubr.msk.f32.mxu1 %vm583_vm1, %v17531_v1  ;;  %v11391_v28 = vmax.f32 %v24008_v43, %v24010_v23  ;;  %v17534_v43 = vld [vmem:[%s17739_s20 + $0x110] sm:$0xff]  ;;  %v24013_v1 = vld [vmem:[#allocation69_spill] sm:$0xff] }
 0x400   : > { %v22023_v0 = vmax.f32 %v11390_v16, %v24011_v18  ;;  %v17535_v16 = vld [vmem:[%s17739_s20 + $0x120] sm:$0xff] }
 0x401   : > { %v22026_v61 = vmax.f32 %v11391_v28, %v24012_v12 }
 0x402   : > { %16097 = vmatmul.mubr.msk.f32.gmra.mrb[16].mxu0 %vm583_vm1, %v23936_v7  ;;  %15200 = vmatmul.mubr.msk.f32.gmra.mrb[18].mxu1 %vm583_vm1, %v17532_v30  ;;  %v11392_v7 = vmax.f32 %v24009_v8, %v24011_v18  ;;  %v24014_v30 = vld [vmem:[#allocation102_spill] sm:$0xff]  ;;  %v24016_v8 = vld [vmem:[#allocation17_spill] sm:$0xff] }
 0x403   : > { %16099 = vmatprep.mubr.msk.f32.mxu0 %vm583_vm1, %v23938_v35  ;;  %15202 = vmatprep.mubr.msk.f32.mxu1 %vm583_vm1, %v17533_v42  ;;  %v11393_v35 = vmax.f32 %v24010_v23, %v24012_v12  ;;  %v17536_v23 = vld [vmem:[%s17739_s20 + $0x128] sm:$0xff] }
 0x404   : > { %v22041_v28 = vmax.f32 %v11392_v7, %v24014_v30  ;;  %v17537_v7 = vld [vmem:[%s17739_s20 + $0x138] sm:$0xff] }
 0x405   : > { %v22044_v42 = vmax.f32 %v11393_v35, %v24016_v8  ;;  %v24019_v35 = vld [vmem:[#allocation20_spill] sm:$0xff] }
 0x406   : > { %16100 = vmatmul.mubr.msk.f32.gmra.mrb[18].mxu0 %vm583_vm1, %v23940_v11  ;;  %15203 = vmatmul.mubr.msk.f32.gmra.mrb[20].mxu1 %vm583_vm1, %v17534_v43  ;;  %24015 = vst [vmem:[#allocation182_spill] sm:$0xff] %v22041_v28  ;;  %v11394_v11 = vmax.f32 %v24011_v18, %v24014_v30  ;;  %v11395_v43 = vmax.f32 %v24012_v12, %v24016_v8  ;;  %v24021_v18 = vld [vmem:[#allocation21_spill] sm:$0xff] }
 0x407   : > { %16102 = vmatprep.mubr.msk.f32.mxu0 %vm583_vm1, %v24013_v1  ;;  %15205 = vmatprep.mubr.msk.f32.mxu1 %vm583_vm1, %v17535_v16  ;;  %24017 = vst [vmem:[#allocation184_spill] sm:$0xff] %v22044_v42  ;;  %v24018_v1 = vld [vmem:[#allocation74_spill] sm:$0xff]  ;;  %v17538_v12 = vld [vmem:[%s17739_s20 + $0x140] sm:$0xff] }
 0x408   : > { %v22059_v16 = vmax.f32 %v11394_v11, %v24019_v35  ;;  %v22062_v42 = vmax.f32 %v11395_v43, %v24021_v18  ;;  %v17539_v11 = vld [vmem:[%s17739_s20 + $0x150] sm:$0xff] }
 0x409   : > { %v24024_v43 = vld [vmem:[#allocation23_spill] sm:$0xff] }
 0x40a   : > { %16103 = vmatmul.mubr.msk.f32.gmra.mrb[20].mxu0 %vm583_vm1, %v23944_v13  ;;  %15206 = vmatmul.mubr.msk.f32.gmra.mrb[22].mxu1 %vm583_vm1, %v17536_v23  ;;  %24020 = vst [vmem:[#allocation186_spill] sm:$0xff] %v22059_v16  ;;  %24022 = vst [vmem:[#allocation188_spill] sm:$0xff] %v22062_v42  ;;  %v11396_v13 = vmax.f32 %v24014_v30, %v24019_v35  ;;  %v11397_v23 = vmax.f32 %v24016_v8, %v24021_v18  ;;  %v24026_v30 = vld [vmem:[#allocation24_spill] sm:$0xff] }
 0x40b   : > { %16105 = vmatprep.mubr.msk.f32.mxu0 %vm583_vm1, %v24018_v1  ;;  %15208 = vmatprep.mubr.msk.f32.mxu1 %vm583_vm1, %v17537_v7  ;;  %v24023_v1 = vld [vmem:[#allocation80_spill] sm:$0xff] }
 0x40c   : > { %v22077_v7 = vmax.f32 %v11396_v13, %v24024_v43  ;;  %v22080_v42 = vmax.f32 %v11397_v23, %v24026_v30  ;;  %v17540_v8 = vld [vmem:[%s17739_s20 + $0x158] sm:$0xff]  ;;  %v17541_v13 = vld [vmem:[%s17739_s20 + $0x168] sm:$0xff]  ;;  %v24030_v23 = vld [vmem:[#allocation27_spill] sm:$0xff] }
 0x40e   : > { %16106 = vmatmul.mubr.msk.f32.gmra.mrb[22].mxu0 %vm583_vm1, %v23948_v41  ;;  %15209 = vmatmul.mubr.msk.f32.gmra.mrb[24].mxu1 %vm583_vm1, %v17538_v12  ;;  %24025 = vst [vmem:[#allocation190_spill] sm:$0xff] %v22077_v7  ;;  %24027 = vst [vmem:[#allocation192_spill] sm:$0xff] %v22080_v42  ;;  %v11398_v41 = vmax.f32 %v24019_v35, %v24024_v43  ;;  %v24028_v12 = vld [vmem:[#allocation83_spill] sm:$0xff]  ;;  %v10580_v35 = vrot.slane %v21512_v20, 3 }
 0x40f   : > { %16108 = vmatprep.mubr.msk.f32.mxu0 %vm583_vm1, %v24023_v1  ;;  %15211 = vmatprep.mubr.msk.f32.mxu1 %vm583_vm1, %v17539_v11  ;;  %v11399_v1 = vmax.f32 %v24021_v18, %v24026_v30  ;;  %v24029_v11 = vld [vmem:[#allocation210_spill] sm:$0xff]  ;;  %v24032_v7 = vld [vmem:[#allocation107_spill] sm:$0xff]  ;;  %v11400_v18 = vmax.f32 %v24024_v43, %v24030_v23 }
 0x410   : > { %v22095_v42 = vmax.f32 %v11398_v41, %v24030_v23  ;;  %v11401_v41 = vmax.f32 %v24026_v30, %v24032_v7  ;;  %v17544_v30 = vld [vmem:[%s17739_s20 + $0x188] sm:$0xff] }
 0x411   : > { %v22100_v16 = vmax.f32 %v11399_v1, %v24032_v7  ;;  %v10583_v1 = vrot.slane %v21660_v57, 3 }
 0x412   : > { %16109 = vmatmul.mubr.msk.f32.gmra.mrb[24].mxu0 %vm583_vm1, %v24028_v12  ;;  %15212 = vmatmul.mubr.msk.f32.gmra.mrb[26].mxu1 %vm583_vm1, %v17540_v8  ;;  %24031 = vst [vmem:[#allocation194_spill] sm:$0xff] %v22095_v42  ;;  %v10581_v12 = vrot.slane %v21523_v21, 3  ;;  %v24034_v8 = vld [vmem:[#allocation209_spill] sm:$0xff] }
 0x413   : > { %16111 = vmatprep.mubr.msk.f32.mxu0 %vm583_vm1, %v24029_v11  ;;  %15214 = vmatprep.mubr.msk.f32.mxu1 %vm583_vm1, %v17541_v13  ;;  %24033 = vst [vmem:[#allocation196_spill] sm:$0xff] %v22100_v16  ;;  %v17542_v11 = vld [vmem:[%s17739_s20 + $0x170] sm:$0xff]  ;;  %v24035_v13 = vld [vmem:[#allocation162_spill] sm:$0xff]  ;;  %v17543_v42 = vld [vmem:[%s17739_s20 + $0x180] sm:$0xff]  ;;  %s326_s20 = sand.u32 1, %s17599_s28  }
 0x414   : > { %v24036_v16 = vld [vmem:[#allocation29_spill] sm:$0xff]  ;;  %v10582_v43 = vsel %vm4897_vm2, %v10580_v35, %v10581_v12  ;;  %v24041_v35 = vld [vmem:[#allocation167_spill] sm:$0xff]  ;;  %s12001_s10 = sshll.u32 %s326_s20, 8  ;;  %s22520_s9 = scalar_lea.sflag [#allocation3], %s326_s20 }
 0x415   : > { %v22116_v28 = vmax.f32 %v11400_v18, %v24036_v16  ;;  %v24040_v18 = vld [vmem:[#allocation172_spill] sm:$0xff]  ;;  %s22413_s12 = scalar_lea.vmem [#allocation2], %s12001_s10 }
 0x416   : > { %16112 = vmatmul.mubr.msk.f32.gmra.mrb[26].mxu0 %vm583_vm1, %v24034_v8  ;;  %15215 = vmatmul.mubr.msk.f32.gmra.mrb[28].mxu1 %vm583_vm1, %v17542_v11  ;;  %v24037_v8 = vld [vmem:[#allocation33_spill] sm:$0xff]  ;;  %v24038_v11 = vld [vmem:[#allocation168_spill] sm:$0xff]  ;;  %s11911_s26 = sshll.u32 %s22413_s12, 4  ;;  %s22512_s26 = int_to_ptr.vmem [resolvable:$true] %s11911_s26 }
 0x417   : > { %16114 = vmatprep.mubr.msk.f32.mxu0 %vm583_vm1, %v24035_v13  ;;  %15217 = vmatprep.mubr.msk.f32.mxu1 %vm583_vm1, %v17543_v42  ;;  %v22120_v23 = vmax.f32 %v11401_v41, %v24037_v8  ;;  %v24039_v13 = vld [vmem:[#allocation170_spill] sm:$0xff]  ;;  %v10584_v42 = vsel %vm4897_vm2, %v10581_v12, %v10583_v1  ;;  %v24042_v41 = vld [vmem:[#allocation169_spill] sm:$0xff]  ;;  %v24043_v12 = vld [vmem:[#allocation171_spill] sm:$0xff]  ;;  %s17545_s21 = scalar_lea.vmem %s22512_s26, 4096  ;;  %p17552_p0 = scmp.lt.s32.totalorder %s22512_s26, %s17550_s23 }
 0x418   : > { %v24068_v1 = vld [vmem:[#allocation215_spill] sm:$0xff]  ;;  %p17546_p11 = scmp.ne.s32.totalorder %s22512_s26, %s17545_s21 }
 0x41a   : > { %16115 = vmatmul.mubr.msk.f32.gmra.mrb[28].mxu0 %vm583_vm1, %v24038_v11  ;;  %15218 = vmatmul.mubr.msk.f32.gmra.mrb[30].mxu1 %vm583_vm1, %v17544_v30  ;;  %v10852_v11 = vrot.slane %v21523_v21, 4  ;;  %v24071_v30 = vld [vmem:[#allocation166_spill] sm:$0xff]  ;;  %p17547_p12 = pnand %p17546_p11, %p17695_p5 }
 0x41b   : > { %16117 = vmatprep.mubr.msk.f32.mxu0 %vm583_vm1, %v10582_v43  ;;  %15222 = vmatprep.mubr.msk.f32.mxu1 %vm583_vm1, %v24039_v13  ;;  %v24070_v43 = vld [vmem:[#allocation217_spill] sm:$0xff]  ;;  %v24077_v21 = vld [vmem:[#allocation178_spill] sm:$0xff] }
 0x41c   : > { %v24072_v13 = vld [vmem:[#allocation221_spill] sm:$0xff]  ;;  %p17548_p13 = pneg %p17547_p12 }
 0x41e   : > { %16118 = vmatmul.mubr.msk.f32.gmra.mrb[30].mxu0 %vm583_vm1, %v10584_v42  ;;  %15223 = vmatmul.mubr.msk.f32.vlgmr.msra.gmra.mrb[0].mxu1 %vm583_vm1, %v24040_v18  ;;  %v24073_v42 = vld [vmem:[#allocation174_spill] sm:$0xff]  ;;  %v24074_v18 = vld [vmem:[#allocation75_spill] sm:$0xff] }
 0x41f   : > { %16122 = vmatprep.mubr.msk.f32.mxu0 %vm583_vm1, %v23955_v38  ;;  %15225 = vmatprep.mubr.msk.f32.mxu1 %vm583_vm1, %v24041_v35  ;;  %v24044_v38 = vld [vmem:[#allocation173_spill] sm:$0xff]  ;;  %v10854_v35 = vrot.slane %v21660_v57, 4  ;;  %v24079_v57 = vld [vmem:[#allocation116_spill] sm:$0xff] }
 0x420   : > { %15271 = vmatpush3.msk.msra.mxu1 %vm680_vm0, %v21844_v14  ;;  %v24046_v14 = vld [vmem:[#allocation177_spill] sm:$0xff] }
 0x422   : > { %16123 = vmatmul.mubr.msk.f32.vlgmr.msra.gmra.mrb[0].mxu0 %vm583_vm1, %v23956_v3  ;;  %15226 = vmatmul.mubr.msk.f32.gmra.mrb[2].mxu1 %vm583_vm1, %v24042_v41  ;;  %v24045_v3 = vld [vmem:[#allocation175_spill] sm:$0xff] }
 0x423   : > { %16171 = vmatpush3.msk.msra.mxu0 %vm680_vm0, %v21860_v36  ;;  %16125 = vmatprep.mubr.msk.f32.mxu0 %vm583_vm1, %v23957_v27  ;;  %v24047_v27 = vld [vmem:[#allocation179_spill] sm:$0xff]  ;;  %v24066_v36 = vld [vmem:[#allocation212_spill] sm:$0xff] }
 0x424   : > { %15228 = vmatprep.mubr.msk.f32.mxu1 %vm583_vm1, %v24043_v12  ;;  %v24075_v12 = vld [vmem:[#allocation176_spill] sm:$0xff] }
 0x426   : > { %16126 = vmatmul.mubr.msk.f32.gmra.mrb[2].mxu0 %vm583_vm1, %v23958_v26  ;;  %15229 = vmatmul.mubr.msk.f32.gmra.mrb[4].mxu1 %vm583_vm1, %v24044_v38  ;;  %v24048_v26 = vld [vmem:[#allocation181_spill] sm:$0xff]  ;;  %v10855_v38 = vsel %vm680_vm0, %v10852_v11, %v10854_v35 }
 0x427   : > { %16128 = vmatprep.mubr.msk.f32.mxu0 %vm583_vm1, %v23959_v4  ;;  %15231 = vmatprep.mubr.msk.f32.mxu1 %vm583_vm1, %v24045_v3  ;;  %v24049_v4 = vld [vmem:[#allocation183_spill] sm:$0xff]  ;;  %v24078_v3 = vld [vmem:[#allocation180_spill] sm:$0xff] }
 0x42a   : > { %16129 = vmatmul.mubr.msk.f32.gmra.mrb[4].mxu0 %vm583_vm1, %v23960_v32  ;;  %15232 = vmatmul.mubr.msk.f32.gmra.mrb[6].mxu1 %vm583_vm1, %v24046_v14  ;;  %v24050_v32 = vld [vmem:[#allocation185_spill] sm:$0xff]  ;;  %v24080_v14 = vld [vmem:[#allocation59_spill] sm:$0xff] }
 0x42b   : > { %16131 = vmatprep.mubr.msk.f32.mxu0 %vm583_vm1, %v23961_v59  ;;  %15234 = vmatprep.mubr.msk.f32.mxu1 %vm583_vm1, %v24047_v27  ;;  %v24051_v59 = vld [vmem:[#allocation187_spill] sm:$0xff]  ;;  %v24081_v27 = vld [vmem:[#allocation64_spill] sm:$0xff] }
 0x42e   : > { %16132 = vmatmul.mubr.msk.f32.gmra.mrb[6].mxu0 %vm583_vm1, %v23962_v49  ;;  %15235 = vmatmul.mubr.msk.f32.gmra.mrb[8].mxu1 %vm583_vm1, %v24048_v26  ;;  %v24052_v49 = vld [vmem:[#allocation189_spill] sm:$0xff] }
 0x42f   : > { %16134 = vmatprep.mubr.msk.f32.mxu0 %vm583_vm1, %v23963_v50  ;;  %15237 = vmatprep.mubr.msk.f32.mxu1 %vm583_vm1, %v24049_v4  ;;  %v24053_v50 = vld [vmem:[#allocation191_spill] sm:$0xff]  ;;  %v24082_v26 = vld [vmem:[#allocation165_spill] sm:$0xff]  ;;  %v24083_v4 = vld [vmem:[#allocation70_spill] sm:$0xff] }
 0x432   : > { %16135 = vmatmul.mubr.msk.f32.gmra.mrb[8].mxu0 %vm583_vm1, %v23964_v63  ;;  %15238 = vmatmul.mubr.msk.f32.gmra.mrb[10].mxu1 %vm583_vm1, %v24050_v32  ;;  %v24054_v63 = vld [vmem:[#allocation193_spill] sm:$0xff]  ;;  %v24099_v32 = vld [vmem:[#allocation182_spill] sm:$0xff] }
 0x433   : > { %16137 = vmatprep.mubr.msk.f32.mxu0 %vm583_vm1, %v23965_v51  ;;  %15240 = vmatprep.mubr.msk.f32.mxu1 %vm583_vm1, %v24051_v59  ;;  %v24055_v51 = vld [vmem:[#allocation195_spill] sm:$0xff] }
 0x436   : > { %16138 = vmatmul.mubr.msk.f32.gmra.mrb[10].mxu0 %vm583_vm1, %v23966_v31  ;;  %15241 = vmatmul.mubr.msk.f32.gmra.mrb[12].mxu1 %vm583_vm1, %v24052_v49  ;;  %v24056_v31 = vld [vmem:[#allocation132_spill] sm:$0xff] }
 0x437   : > { %16140 = vmatprep.mubr.msk.f32.mxu0 %vm583_vm1, %v23967_v5  ;;  %15243 = vmatprep.mubr.msk.f32.mxu1 %vm583_vm1, %v24053_v50  ;;  %v24057_v5 = vld [vmem:[#allocation144_spill] sm:$0xff] }
 0x438   : > { %v24101_v50 = vld [vmem:[#allocation184_spill] sm:$0xff] }
 0x43a   : > { %16141 = vmatmul.mubr.msk.f32.gmra.mrb[12].mxu0 %vm583_vm1, %v23968_v55  ;;  %15244 = vmatmul.mubr.msk.f32.gmra.mrb[14].mxu1 %vm583_vm1, %v24054_v63  ;;  %v24058_v55 = vld [vmem:[#allocation199_spill] sm:$0xff]  ;;  %v24102_v63 = vld [vmem:[#allocation202_spill] sm:$0xff] }
 0x43b   : > { %16143 = vmatprep.mubr.msk.f32.mxu0 %vm583_vm1, %v23969_v46  ;;  %15246 = vmatprep.mubr.msk.f32.mxu1 %vm583_vm1, %v24055_v51  ;;  %v24059_v46 = vld [vmem:[#allocation201_spill] sm:$0xff]  ;;  %v24103_v51 = vld [vmem:[#allocation186_spill] sm:$0xff] }
 0x43e   : > { %16144 = vmatmul.mubr.msk.f32.gmra.mrb[14].mxu0 %vm583_vm1, %v23970_v47  ;;  %15247 = vmatmul.mubr.msk.f32.gmra.mrb[16].mxu1 %vm583_vm1, %v24056_v31  ;;  %v24060_v47 = vld [vmem:[#allocation142_spill] sm:$0xff] }
 0x43f   : > { %16146 = vmatprep.mubr.msk.f32.mxu0 %vm583_vm1, %v23971_v60  ;;  %15249 = vmatprep.mubr.msk.f32.mxu1 %vm583_vm1, %v24057_v5  ;;  %v24061_v60 = vld [vmem:[#allocation154_spill] sm:$0xff] }
 0x442   : > { %16147 = vmatmul.mubr.msk.f32.gmra.mrb[16].mxu0 %vm583_vm1, %v23972_v24  ;;  %15250 = vmatmul.mubr.msk.f32.gmra.mrb[18].mxu1 %vm583_vm1, %v24058_v55  ;;  %v24062_v24 = vld [vmem:[#allocation206_spill] sm:$0xff] }
 0x443   : > { %16149 = vmatprep.mubr.msk.f32.mxu0 %vm583_vm1, %v23976_v22  ;;  %15252 = vmatprep.mubr.msk.f32.mxu1 %vm583_vm1, %v24059_v46  ;;  %v24063_v22 = vld [vmem:[#allocation208_spill] sm:$0xff] }
 0x446   : > { %16150 = vmatmul.mubr.msk.f32.gmra.mrb[18].mxu0 %vm583_vm1, %v23978_v56  ;;  %15253 = vmatmul.mubr.msk.f32.gmra.mrb[20].mxu1 %vm583_vm1, %v24060_v47  ;;  %v24064_v56 = vld [vmem:[#allocation68_spill] sm:$0xff] }
 0x447   : > { %16152 = vmatprep.mubr.msk.f32.mxu0 %vm583_vm1, %v23981_v34  ;;  %15255 = vmatprep.mubr.msk.f32.mxu1 %vm583_vm1, %v24061_v60  ;;  %v24065_v34 = vld [vmem:[#allocation109_spill] sm:$0xff]  ;;  %v24105_v47 = vld [vmem:[#allocation188_spill] sm:$0xff] }
 0x448   : > { %v24106_v60 = vld [vmem:[#allocation153_spill] sm:$0xff] }
 0x44a   : > { %16153 = vmatmul.mubr.msk.f32.gmra.mrb[20].mxu0 %vm583_vm1, %v23983_v25  ;;  %15256 = vmatmul.mubr.msk.f32.gmra.mrb[22].mxu1 %vm583_vm1, %v24062_v24  ;;  %v24067_v25 = vld [vmem:[#allocation6_spill] sm:$0xff] }
 0x44b   : > { %16155 = vmatprep.mubr.msk.f32.mxu0 %vm583_vm1, %v23985_v53  ;;  %15258 = vmatprep.mubr.msk.f32.mxu1 %vm583_vm1, %v24063_v22  ;;  %v24069_v53 = vld [vmem:[#allocation219_spill] sm:$0xff]  ;;  %v24107_v24 = vld [vmem:[#allocation190_spill] sm:$0xff]  ;;  %v24108_v22 = vld [vmem:[#allocation136_spill] sm:$0xff] }
 0x44e   : > { %16156 = vmatmul.mubr.msk.f32.gmra.mrb[22].mxu0 %vm583_vm1, %v23988_v29  ;;  %15259 = vmatmul.mubr.msk.f32.gmra.mrb[24].mxu1 %vm583_vm1, %v24064_v56  ;;  %v10851_v29 = vrot.slane %v21512_v20, 4  ;;  %v24076_v20 = vld [vmem:[#allocation163_spill] sm:$0xff] }
 0x44f   : > { %16158 = vmatprep.mubr.msk.f32.mxu0 %vm583_vm1, %v24065_v34  ;;  %15261 = vmatprep.mubr.msk.f32.mxu1 %vm583_vm1, %v24066_v36 }
 0x450   : > { %v10853_v41 = vsel %vm680_vm0, %v10851_v29, %v10852_v11  ;;  %v24111_v29 = vld [vmem:[#allocation194_spill] sm:$0xff]  ;;  %v24112_v11 = vld [vmem:[#allocation203_spill] sm:$0xff] }
 0x452   : > { %16159 = vmatmul.mubr.msk.f32.gmra.mrb[24].mxu0 %vm583_vm1, %v24067_v25  ;;  %15262 = vmatmul.mubr.msk.f32.gmra.mrb[26].mxu1 %vm583_vm1, %v24068_v1  ;;  %v24109_v1 = vld [vmem:[#allocation192_spill] sm:$0xff] }
 0x453   : > { %16161 = vmatprep.mubr.msk.f32.mxu0 %vm583_vm1, %v24069_v53  ;;  %15264 = vmatprep.mubr.msk.f32.mxu1 %vm583_vm1, %v24070_v43  ;;  %v24110_v53 = vld [vmem:[#allocation140_spill] sm:$0xff] }
 0x456   : > { %16162 = vmatmul.mubr.msk.f32.gmra.mrb[26].mxu0 %vm583_vm1, %v24071_v30  ;;  %15265 = vmatmul.mubr.msk.f32.gmra.mrb[28].mxu1 %vm583_vm1, %v24072_v13 }
 0x457   : > { %16164 = vmatprep.mubr.msk.f32.mxu0 %vm583_vm1, %v24073_v42  ;;  %15267 = vmatprep.mubr.msk.f32.mxu1 %vm583_vm1, %v24074_v18  ;;  %v24113_v42 = vld [vmem:[#allocation196_spill] sm:$0xff]  ;;  %v24114_v18 = vld [vmem:[#allocation141_spill] sm:$0xff] }
 0x45a   : > { %16165 = vmatmul.mubr.msk.f32.gmra.mrb[28].mxu0 %vm583_vm1, %v24075_v12  ;;  %15268 = vmatmul.mubr.msk.f32.gmra.mrb[30].mxu1 %vm583_vm1, %v24076_v20  ;;  %v24116_v12 = vld [vmem:[#allocation27_spill] sm:$0xff] }
 0x45b   : > { %16167 = vmatprep.mubr.msk.f32.mxu0 %vm583_vm1, %v10853_v41  ;;  %15272 = vmatprep.mubr.msk.f32.mxu1 %vm583_vm1, %v24077_v21  ;;  %v24115_v41 = vld [vmem:[#allocation71_spill] sm:$0xff]  ;;  %v24117_v20 = vmax.f32 %v24116_v12, %v24036_v16  ;;  %v22407_v16 = vld [vmem:[%s22568_s7] ss:$0 sm:$0xff] }
 0x45e   : > { %16168 = vmatmul.mubr.msk.f32.gmra.mrb[30].mxu0 %vm583_vm1, %v10855_v38  ;;  %15273 = vmatmul.mubr.msk.f32.vlgmr.msra.gmra.mrb[0].mxu1 %vm583_vm1, %v24078_v3  ;;  %v24118_v38 = vld [vmem:[#allocation159_spill] sm:$0xff]  ;;  %v24119_v3 = vmax.f32 %v24032_v7, %v24037_v8 }
 0x45f   : > { %16172 = vmatprep.mubr.msk.f32.mxu0 %vm583_vm1, %v21847_v17  ;;  %15275 = vmatprep.mubr.msk.f32.mxu1 %vm583_vm1, %v24079_v57  ;;  %v24084_v17 = vld [vmem:[#allocation110_spill] sm:$0xff] }
 0x462   : > { %16173 = vmatmul.mubr.msk.f32.vlgmr.msra.gmra.mrb[0].mxu0 %vm583_vm1, %v24080_v14  ;;  %15276 = vmatmul.mubr.msk.f32.gmra.mrb[2].mxu1 %vm583_vm1, %v24081_v27 }
 0x463   : > { %16175 = vmatprep.mubr.msk.f32.mxu0 %vm583_vm1, %v21875_v9  ;;  %15278 = vmatprep.mubr.msk.f32.mxu1 %vm583_vm1, %v24082_v26  ;;  %v24085_v9 = vld [vmem:[#allocation113_spill] sm:$0xff] }
 0x466   : > { %16176 = vmatmul.mubr.msk.f32.gmra.mrb[2].mxu0 %vm583_vm1, %v21882_v37  ;;  %15279 = vmatmul.mubr.msk.f32.gmra.mrb[4].mxu1 %vm583_vm1, %v24083_v4  ;;  %v24086_v37 = vld [vmem:[#allocation114_spill] sm:$0xff] }
 0x467   : > { %16178 = vmatprep.mubr.msk.f32.mxu0 %vm583_vm1, %v21897_v52  ;;  %15281 = vmatprep.mubr.msk.f32.mxu1 %vm583_vm1, %v19869_v62  ;;  %v24087_v62 = vld [vmem:[#allocation225_spill] sm:$0xff]  ;;  %v24088_v52 = vld [vmem:[#allocation226_spill] sm:$0xff] }
 0x46a   : > { %16179 = vmatmul.mubr.msk.f32.gmra.mrb[4].mxu0 %vm583_vm1, %v21900_v15  ;;  %15282 = vmatmul.mubr.msk.f32.gmra.mrb[6].mxu1 %vm583_vm1, %v24084_v17  ;;  %v24089_v15 = vld [vmem:[#allocation227_spill] sm:$0xff] }
 0x46b   : > { %16181 = vmatprep.mubr.msk.f32.mxu0 %vm583_vm1, %v21915_v39  ;;  %15284 = vmatprep.mubr.msk.f32.mxu1 %vm583_vm1, %v24085_v9  ;;  %v24090_v39 = vld [vmem:[#allocation228_spill] sm:$0xff] }
 0x46e   : > { %16182 = vmatmul.mubr.msk.f32.gmra.mrb[6].mxu0 %vm583_vm1, %v21918_v10  ;;  %15285 = vmatmul.mubr.msk.f32.gmra.mrb[8].mxu1 %vm583_vm1, %v24086_v37  ;;  %v24091_v10 = vld [vmem:[#allocation229_spill] sm:$0xff] }
 0x46f   : > { %16184 = vmatprep.mubr.msk.f32.mxu0 %vm583_vm1, %v21933_v19  ;;  %15287 = vmatprep.mubr.msk.f32.mxu1 %vm583_vm1, %v24087_v62  ;;  %v24092_v19 = vld [vmem:[#allocation230_spill] sm:$0xff] }
 0x472   : > { %16185 = vmatmul.mubr.msk.f32.gmra.mrb[8].mxu0 %vm583_vm1, %v21936_v40  ;;  %15288 = vmatmul.mubr.msk.f32.gmra.mrb[10].mxu1 %vm583_vm1, %v24088_v52  ;;  %v24093_v40 = vld [vmem:[#allocation231_spill] sm:$0xff] }
 0x473   : > { %16187 = vmatprep.mubr.msk.f32.mxu0 %vm583_vm1, %v21951_v6  ;;  %15290 = vmatprep.mubr.msk.f32.mxu1 %vm583_vm1, %v24089_v15  ;;  %v24094_v6 = vld [vmem:[#allocation143_spill] sm:$0xff] }
 0x476   : > { %16188 = vmatmul.mubr.msk.f32.gmra.mrb[10].mxu0 %vm583_vm1, %v21954_v48  ;;  %15291 = vmatmul.mubr.msk.f32.gmra.mrb[12].mxu1 %vm583_vm1, %v24090_v39  ;;  %v24095_v48 = vld [vmem:[#allocation127_spill] sm:$0xff] }
 0x477   : > { %16190 = vmatprep.mubr.msk.f32.mxu0 %vm583_vm1, %v21969_v44  ;;  %15293 = vmatprep.mubr.msk.f32.mxu1 %vm583_vm1, %v24091_v10  ;;  %v24096_v44 = vld [vmem:[#allocation130_spill] sm:$0xff] }
 0x47a   : > { %16191 = vmatmul.mubr.msk.f32.gmra.mrb[12].mxu0 %vm583_vm1, %v21972_v58  ;;  %15294 = vmatmul.mubr.msk.f32.gmra.mrb[14].mxu1 %vm583_vm1, %v24092_v19  ;;  %v24097_v58 = vld [vmem:[#allocation197_spill] sm:$0xff] }
 0x47b   : > { %16193 = vmatprep.mubr.msk.f32.mxu0 %vm583_vm1, %v21987_v54  ;;  %15296 = vmatprep.mubr.msk.f32.mxu1 %vm583_vm1, %v24093_v40  ;;  %v395_v54 = vld [vmem:[%s18005_s13 + $0x198] sm:$0xff] }
 0x47c   : > { %v11133_v59 = vrot.slane %v395_v54, 1  ;;  %v11295_v55 = vrot.slane %v395_v54, 2 }
 0x47e   : > { %16194 = vmatmul.mubr.msk.f32.gmra.mrb[14].mxu0 %vm583_vm1, %v21990_v2  ;;  %15297 = vmatmul.mubr.msk.f32.gmra.mrb[16].mxu1 %vm583_vm1, %v24094_v6  ;;  %v396_v2 = vld [vmem:[%s18005_s13 + $0x1a0] sm:$0xff] }
 0x47f   : > { %16196 = vmatprep.mubr.msk.f32.mxu0 %vm583_vm1, %v22005_v33  ;;  %15299 = vmatprep.mubr.msk.f32.mxu1 %vm583_vm1, %v24095_v48  ;;  %v24098_v33 = vld [vmem:[#allocation131_spill] sm:$0xff]  ;;  %v11134_v49 = vrot.slane %v396_v2, 1  ;;  %v11296_v46 = vrot.slane %v396_v2, 2 }
 0x481   : > { %v11135_v5 = vsel %vm446_vm3, %v11133_v59, %v11134_v49  ;;  %v11297_v25 = vsel %vm1623_vm4, %v11295_v55, %v11296_v46 }
 0x482   : > { %16197 = vmatmul.mubr.msk.f32.gmra.mrb[16].mxu0 %vm583_vm1, %v22008_v45  ;;  %15300 = vmatmul.mubr.msk.f32.gmra.mrb[18].mxu1 %vm583_vm1, %v24096_v44  ;;  %v24100_v45 = vld [vmem:[#allocation135_spill] sm:$0xff]  ;;  %v11208_v56 = vmax.f32 %v395_v54, %v11135_v5 }
 0x483   : > { %16199 = vmatprep.mubr.msk.f32.mxu0 %vm583_vm1, %v22023_v0  ;;  %15302 = vmatprep.mubr.msk.f32.mxu1 %vm583_vm1, %v24097_v58  ;;  %v397_v0 = vld [vmem:[%s18005_s13 + $0x1a8] sm:$0x3]  ;;  %s17551_s13 = scalar_lea.vmem %s17550_s23, 8192 }
 0x484   : > { %v11136_v31 = vrot.slane %v397_v0, 1  ;;  %v11298_v36 = vrot.slane %v397_v0, 2  ;;  %v11370_v30 = vmax.f32 %v11208_v56, %v11297_v25  ;;  %p17553_p1 = scmp.lt.s32.totalorder %s17551_s13, %s17545_s21 }
 0x486   : > { %16200 = vmatmul.mubr.msk.f32.gmra.mrb[18].mxu0 %vm583_vm1, %v22026_v61  ;;  %15303 = vmatmul.mubr.msk.f32.gmra.mrb[20].mxu1 %vm583_vm1, %v24098_v33  ;;  %v24104_v61 = vld [vmem:[#allocation149_spill] sm:$0xff]  ;;  %v11137_v34 = vsel %vm446_vm3, %v11134_v49, %v11136_v31  ;;  %v11299_v13 = vsel %vm1623_vm4, %v11296_v46, %v11298_v36  ;;  %v11434_v21 = vmax.f32 %v24117_v20, %v11370_v30  ;;  %p17554_p2 = por %p17553_p1, %p17552_p0 }
 0x487   : > { %16202 = vmatprep.mubr.msk.f32.mxu0 %vm583_vm1, %v24099_v32  ;;  %15305 = vmatprep.mubr.msk.f32.mxu1 %vm583_vm1, %v24100_v45  ;;  %v11209_v43 = vmax.f32 %v396_v2, %v11137_v34 }
 0x488   : > { %p17555_p3 = pnand %p17554_p2, %p17548_p13 }
 0x489   : > { %v11371_v35 = vmax.f32 %v11209_v43, %v11299_v13 }
 0x48a   : > { %16203 = vmatmul.mubr.msk.f32.gmra.mrb[20].mxu0 %vm583_vm1, %v24101_v50  ;;  %15306 = vmatmul.mubr.msk.f32.gmra.mrb[22].mxu1 %vm583_vm1, %v24102_v63 }
 0x48b   : > { %16205 = vmatprep.mubr.msk.f32.mxu0 %vm583_vm1, %v24103_v51  ;;  %15308 = vmatprep.mubr.msk.f32.mxu1 %vm583_vm1, %v24104_v61  ;;  %v11435_v57 = vmax.f32 %v24119_v3, %v11371_v35 }
 0x48e   : > { %16206 = vmatmul.mubr.msk.f32.gmra.mrb[22].mxu0 %vm583_vm1, %v24105_v47  ;;  %15309 = vmatmul.mubr.msk.f32.gmra.mrb[24].mxu1 %vm583_vm1, %v24106_v60 }
 0x48f   : > { %16208 = vmatprep.mubr.msk.f32.mxu0 %vm583_vm1, %v24107_v24  ;;  %15311 = vmatprep.mubr.msk.f32.mxu1 %vm583_vm1, %v24108_v22 }
 0x492   : > { %16209 = vmatmul.mubr.msk.f32.gmra.mrb[24].mxu0 %vm583_vm1, %v24109_v1  ;;  %15312 = vmatmul.mubr.msk.f32.gmra.mrb[26].mxu1 %vm583_vm1, %v24110_v53 }
 0x493   : > { %16211 = vmatprep.mubr.msk.f32.mxu0 %vm583_vm1, %v24111_v29  ;;  %15314 = vmatprep.mubr.msk.f32.mxu1 %vm583_vm1, %v24112_v11 }
 0x496   : > { %16212 = vmatmul.mubr.msk.f32.gmra.mrb[26].mxu0 %vm583_vm1, %v24113_v42  ;;  %15315 = vmatmul.mubr.msk.f32.gmra.mrb[28].mxu1 %vm583_vm1, %v24114_v18 }
 0x497   : > { %16214 = vmatprep.mubr.msk.f32.mxu0 %vm583_vm1, %v22116_v28  ;;  %15317 = vmatprep.mubr.msk.f32.mxu1 %vm583_vm1, %v24115_v41 }
 0x49a   : > { %16215 = vmatmul.mubr.msk.f32.gmra.mrb[28].mxu0 %vm583_vm1, %v22120_v23  ;;  %15318 = vmatmul.mubr.msk.f32.gmra.mrb[30].mxu1 %vm583_vm1, %v24118_v38 }
 0x49b   : > { %16217 = vmatprep.mubr.msk.f32.mxu0 %vm583_vm1, %v11434_v21 }
 0x49e   : > { %16218 = vmatmul.mubr.msk.f32.gmra.mrb[30].mxu0 %vm583_vm1, %v11435_v57 }
 0x531   : > { %v15274_v28 = vpop.f32.mrb[0].mxu1 }
 0x532   : > { %v6330_v14 = vpop.f32.mrb[1].mxu1 }
 0x535   : > { %v16174_v27 = vpop.f32.mrb[0].mxu0  ;;  %v15277_v23 = vpop.f32.mrb[2].mxu1 }
 0x536   : > { %v16220_v26 = vadd.f32 %v16174_v27, %v15274_v28  ;;  %v11602_v4 = vpop.f32.mrb[1].mxu0  ;;  %v6340_v7 = vpop.f32.mrb[3].mxu1 }
 0x537   : > { %v16221_v8 = vadd.f32 %v11602_v4, %v6330_v14 }
 0x538   : > { %v11801_v17 = vadd.f32 %v16220_v26, %v22407_v16 }
 0x539   : > { %v11800_v9 = vadd.f32 %v16221_v8, %v22407_v16  ;;  %v16177_v37 = vpop.f32.mrb[2].mxu0  ;;  %v15280_v62 = vpop.f32.mrb[4].mxu1 }
 0x53a   : > { %v11833_v52 = vmax.f32 %v11801_v17, 0.0  ;;  %v16222_v15 = vadd.f32 %v16177_v37, %v15277_v23  ;;  %v11612_v39 = vpop.f32.mrb[3].mxu0  ;;  %v6350_v10 = vpop.f32.mrb[5].mxu1 }
 0x53b   : > { %v11832_v19 = vmax.f32 %v11800_v9, 0.0  ;;  %v16223_v40 = vadd.f32 %v11612_v39, %v6340_v7 }
 0x53c   : > { %11866 = vst.msk [vmem:[%s22413_s12 + $0x8] sm:$0xff] %vm11864_vm5, %v11833_v52  ;;  %v11803_v6 = vadd.f32 %v16222_v15, %v22407_v16 }
 0x53d   : > { %11865 = vst.msk [vmem:[%s22413_s12] sm:$0xff] %vm11864_vm5, %v11832_v19  ;;  %v11802_v48 = vadd.f32 %v16223_v40, %v22407_v16  ;;  %v16180_v44 = vpop.f32.mrb[4].mxu0  ;;  %v15283_v58 = vpop.f32.mrb[6].mxu1 }
 0x53e   : > { %v11835_v54 = vmax.f32 %v11803_v6, 0.0  ;;  %v16224_v2 = vadd.f32 %v16180_v44, %v15280_v62  ;;  %v11622_v33 = vpop.f32.mrb[5].mxu0  ;;  %v6360_v32 = vpop.f32.mrb[7].mxu1 }
 0x53f   : > { %v11834_v45 = vmax.f32 %v11802_v48, 0.0  ;;  %v16225_v59 = vadd.f32 %v11622_v33, %v6350_v10 }
 0x540   : > { %11868 = vst.msk [vmem:[%s22413_s12 + $0x18] sm:$0xff] %vm11864_vm5, %v11835_v54  ;;  %v11805_v49 = vadd.f32 %v16224_v2, %v22407_v16 }
 0x541   : > { %11867 = vst.msk [vmem:[%s22413_s12 + $0x10] sm:$0xff] %vm11864_vm5, %v11834_v45  ;;  %v11804_v0 = vadd.f32 %v16225_v59, %v22407_v16  ;;  %v16183_v50 = vpop.f32.mrb[6].mxu0  ;;  %v15286_v63 = vpop.f32.mrb[8].mxu1 }
 0x542   : > { %v11837_v51 = vmax.f32 %v11805_v49, 0.0  ;;  %v16226_v61 = vadd.f32 %v16183_v50, %v15283_v58  ;;  %v11632_v31 = vpop.f32.mrb[7].mxu0  ;;  %v6370_v5 = vpop.f32.mrb[9].mxu1 }
 0x543   : > { %v11836_v55 = vmax.f32 %v11804_v0, 0.0  ;;  %v16227_v46 = vadd.f32 %v11632_v31, %v6360_v32 }
 0x544   : > { %11870 = vst.msk [vmem:[%s22413_s12 + $0x28] sm:$0xff] %vm11864_vm5, %v11837_v51  ;;  %v11807_v47 = vadd.f32 %v16226_v61, %v22407_v16 }
 0x545   : > { %11869 = vst.msk [vmem:[%s22413_s12 + $0x20] sm:$0xff] %vm11864_vm5, %v11836_v55  ;;  %v11806_v60 = vadd.f32 %v16227_v46, %v22407_v16  ;;  %v16186_v24 = vpop.f32.mrb[8].mxu0  ;;  %v15289_v22 = vpop.f32.mrb[10].mxu1 }
 0x546   : > { %v11839_v56 = vmax.f32 %v11807_v47, 0.0  ;;  %v16228_v34 = vadd.f32 %v16186_v24, %v15286_v63  ;;  %v11642_v36 = vpop.f32.mrb[9].mxu0  ;;  %v6380_v25 = vpop.f32.mrb[11].mxu1 }
 0x547   : > { %v11838_v1 = vmax.f32 %v11806_v60, 0.0  ;;  %v16229_v53 = vadd.f32 %v11642_v36, %v6370_v5 }
 0x548   : > { %11872 = vst.msk [vmem:[%s22413_s12 + $0x38] sm:$0xff] %vm11864_vm5, %v11839_v56  ;;  %v11809_v43 = vadd.f32 %v16228_v34, %v22407_v16 }
 0x549   : > { %11871 = vst.msk [vmem:[%s22413_s12 + $0x30] sm:$0xff] %vm11864_vm5, %v11838_v1  ;;  %v11808_v29 = vadd.f32 %v16229_v53, %v22407_v16  ;;  %v16189_v11 = vpop.f32.mrb[10].mxu0  ;;  %v15292_v30 = vpop.f32.mrb[12].mxu1 }
 0x54a   : > { %v11841_v13 = vmax.f32 %v11809_v43, 0.0  ;;  %v16230_v42 = vadd.f32 %v16189_v11, %v15289_v22  ;;  %v11652_v18 = vpop.f32.mrb[11].mxu0  ;;  %v6390_v35 = vpop.f32.mrb[13].mxu1 }
 0x54b   : > { %v11840_v41 = vmax.f32 %v11808_v29, 0.0  ;;  %v16231_v12 = vadd.f32 %v11652_v18, %v6380_v25 }
 0x54c   : > { %11874 = vst.msk [vmem:[%s22413_s12 + $0x48] sm:$0xff] %vm11864_vm5, %v11841_v13  ;;  %v11811_v20 = vadd.f32 %v16230_v42, %v22407_v16 }
 0x54d   : > { %11873 = vst.msk [vmem:[%s22413_s12 + $0x40] sm:$0xff] %vm11864_vm5, %v11840_v41  ;;  %v11810_v21 = vadd.f32 %v16231_v12, %v22407_v16  ;;  %v16192_v38 = vpop.f32.mrb[12].mxu0  ;;  %v15295_v3 = vpop.f32.mrb[14].mxu1 }
 0x54e   : > { %v11843_v57 = vmax.f32 %v11811_v20, 0.0  ;;  %v16232_v28 = vadd.f32 %v16192_v38, %v15292_v30  ;;  %v11662_v14 = vpop.f32.mrb[13].mxu0  ;;  %v6400_v27 = vpop.f32.mrb[15].mxu1 }
 0x54f   : > { %v11842_v23 = vmax.f32 %v11810_v21, 0.0  ;;  %v16233_v26 = vadd.f32 %v11662_v14, %v6390_v35 }
 0x550   : > { %11876 = vst.msk [vmem:[%s22413_s12 + $0x58] sm:$0xff] %vm11864_vm5, %v11843_v57  ;;  %v11813_v4 = vadd.f32 %v16232_v28, %v22407_v16 }
 0x551   : > { %11875 = vst.msk [vmem:[%s22413_s12 + $0x50] sm:$0xff] %vm11864_vm5, %v11842_v23  ;;  %v11812_v7 = vadd.f32 %v16233_v26, %v22407_v16  ;;  %v16195_v8 = vpop.f32.mrb[14].mxu0  ;;  %v15298_v17 = vpop.f32.mrb[16].mxu1 }
 0x552   : > { %v11845_v9 = vmax.f32 %v11813_v4, 0.0  ;;  %v16234_v37 = vadd.f32 %v16195_v8, %v15295_v3  ;;  %v11672_v62 = vpop.f32.mrb[15].mxu0  ;;  %v6410_v52 = vpop.f32.mrb[17].mxu1 }
 0x553   : > { %v11844_v15 = vmax.f32 %v11812_v7, 0.0  ;;  %v16235_v39 = vadd.f32 %v11672_v62, %v6400_v27 }
 0x554   : > { %11878 = vst.msk [vmem:[%s22413_s12 + $0x68] sm:$0xff] %vm11864_vm5, %v11845_v9  ;;  %v11815_v10 = vadd.f32 %v16234_v37, %v22407_v16 }
 0x555   : > { %11877 = vst.msk [vmem:[%s22413_s12 + $0x60] sm:$0xff] %vm11864_vm5, %v11844_v15  ;;  %v11814_v19 = vadd.f32 %v16235_v39, %v22407_v16  ;;  %v16198_v40 = vpop.f32.mrb[16].mxu0  ;;  %v15301_v6 = vpop.f32.mrb[18].mxu1 }
 0x556   : > { %v11847_v48 = vmax.f32 %v11815_v10, 0.0  ;;  %v16236_v44 = vadd.f32 %v16198_v40, %v15298_v17  ;;  %v11682_v58 = vpop.f32.mrb[17].mxu0  ;;  %v6420_v54 = vpop.f32.mrb[19].mxu1 }
 0x557   : > { %v11846_v2 = vmax.f32 %v11814_v19, 0.0  ;;  %v16237_v33 = vadd.f32 %v11682_v58, %v6410_v52 }
 0x558   : > { %11880 = vst.msk [vmem:[%s22413_s12 + $0x78] sm:$0xff] %vm11864_vm5, %v11847_v48  ;;  %v11817_v32 = vadd.f32 %v16236_v44, %v22407_v16 }
 0x559   : > { %11879 = vst.msk [vmem:[%s22413_s12 + $0x70] sm:$0xff] %vm11864_vm5, %v11846_v2  ;;  %v11816_v45 = vadd.f32 %v16237_v33, %v22407_v16  ;;  %v16201_v59 = vpop.f32.mrb[18].mxu0  ;;  %v15304_v49 = vpop.f32.mrb[20].mxu1 }
 0x55a   : > { %v11849_v0 = vmax.f32 %v11817_v32, 0.0  ;;  %v16238_v50 = vadd.f32 %v16201_v59, %v15301_v6  ;;  %v11692_v63 = vpop.f32.mrb[19].mxu0  ;;  %v6430_v51 = vpop.f32.mrb[21].mxu1 }
 0x55b   : > { %v11848_v61 = vmax.f32 %v11816_v45, 0.0  ;;  %v16239_v31 = vadd.f32 %v11692_v63, %v6420_v54 }
 0x55c   : > { %11882 = vst.msk [vmem:[%s22413_s12 + $0x88] sm:$0xff] %vm11864_vm5, %v11849_v0  ;;  %v11819_v5 = vadd.f32 %v16238_v50, %v22407_v16 }
 0x55d   : > { %11881 = vst.msk [vmem:[%s22413_s12 + $0x80] sm:$0xff] %vm11864_vm5, %v11848_v61  ;;  %v11818_v55 = vadd.f32 %v16239_v31, %v22407_v16  ;;  %v16204_v46 = vpop.f32.mrb[20].mxu0  ;;  %v15307_v47 = vpop.f32.mrb[22].mxu1 }
 0x55e   : > { %v11851_v60 = vmax.f32 %v11819_v5, 0.0  ;;  %v16240_v24 = vadd.f32 %v16204_v46, %v15304_v49  ;;  %v11702_v22 = vpop.f32.mrb[21].mxu0  ;;  %v6440_v56 = vpop.f32.mrb[23].mxu1 }
 0x55f   : > { %v11850_v34 = vmax.f32 %v11818_v55, 0.0  ;;  %v16241_v36 = vadd.f32 %v11702_v22, %v6430_v51 }
 0x560   : > { %11884 = vst.msk [vmem:[%s22413_s12 + $0x98] sm:$0xff] %vm11864_vm5, %v11851_v60  ;;  %v11821_v25 = vadd.f32 %v16240_v24, %v22407_v16 }
 0x561   : > { %11883 = vst.msk [vmem:[%s22413_s12 + $0x90] sm:$0xff] %vm11864_vm5, %v11850_v34  ;;  %v11820_v1 = vadd.f32 %v16241_v36, %v22407_v16  ;;  %v16207_v53 = vpop.f32.mrb[22].mxu0  ;;  %v15310_v43 = vpop.f32.mrb[24].mxu1 }
 0x562   : > { %v11853_v29 = vmax.f32 %v11821_v25, 0.0  ;;  %v16242_v11 = vadd.f32 %v16207_v53, %v15307_v47  ;;  %v11712_v30 = vpop.f32.mrb[23].mxu0  ;;  %v6450_v13 = vpop.f32.mrb[25].mxu1 }
 0x563   : > { %v11852_v42 = vmax.f32 %v11820_v1, 0.0  ;;  %v16243_v18 = vadd.f32 %v11712_v30, %v6440_v56 }
 0x564   : > { %11886 = vst.msk [vmem:[%s22413_s12 + $0xa8] sm:$0xff] %vm11864_vm5, %v11853_v29  ;;  %v11823_v35 = vadd.f32 %v16242_v11, %v22407_v16 }
 0x565   : > { %11885 = vst.msk [vmem:[%s22413_s12 + $0xa0] sm:$0xff] %vm11864_vm5, %v11852_v42  ;;  %v11822_v41 = vadd.f32 %v16243_v18, %v22407_v16  ;;  %v16210_v12 = vpop.f32.mrb[24].mxu0  ;;  %v15313_v20 = vpop.f32.mrb[26].mxu1 }
 0x566   : > { %v11855_v21 = vmax.f32 %v11823_v35, 0.0  ;;  %v16244_v38 = vadd.f32 %v16210_v12, %v15310_v43  ;;  %v11722_v3 = vpop.f32.mrb[25].mxu0  ;;  %v6460_v57 = vpop.f32.mrb[27].mxu1 }
 0x567   : > { %v11854_v28 = vmax.f32 %v11822_v41, 0.0  ;;  %v16245_v14 = vadd.f32 %v11722_v3, %v6450_v13 }
 0x568   : > { %11888 = vst.msk [vmem:[%s22413_s12 + $0xb8] sm:$0xff] %vm11864_vm5, %v11855_v21  ;;  %v11825_v27 = vadd.f32 %v16244_v38, %v22407_v16 }
 0x569   : > { %11887 = vst.msk [vmem:[%s22413_s12 + $0xb0] sm:$0xff] %vm11864_vm5, %v11854_v28  ;;  %v11824_v23 = vadd.f32 %v16245_v14, %v22407_v16  ;;  %v16213_v26 = vpop.f32.mrb[26].mxu0  ;;  %v15316_v4 = vpop.f32.mrb[28].mxu1 }
 0x56a   : > { %v11857_v7 = vmax.f32 %v11825_v27, 0.0  ;;  %v16246_v8 = vadd.f32 %v16213_v26, %v15313_v20  ;;  %v11732_v17 = vpop.f32.mrb[27].mxu0  ;;  %v6470_v9 = vpop.f32.mrb[29].mxu1 }
 0x56b   : > { %v11856_v37 = vmax.f32 %v11824_v23, 0.0  ;;  %v16247_v62 = vadd.f32 %v11732_v17, %v6460_v57 }
 0x56c   : > { %11890 = vst.msk [vmem:[%s22413_s12 + $0xc8] sm:$0xff] %vm11864_vm5, %v11857_v7  ;;  %v11827_v52 = vadd.f32 %v16246_v8, %v22407_v16 }
 0x56d   : > { %11889 = vst.msk [vmem:[%s22413_s12 + $0xc0] sm:$0xff] %vm11864_vm5, %v11856_v37  ;;  %v11826_v15 = vadd.f32 %v16247_v62, %v22407_v16  ;;  %v16216_v39 = vpop.f32.mrb[28].mxu0  ;;  %v15319_v10 = vpop.f32.mrb[30].mxu1 }
 0x56e   : > { %v11859_v19 = vmax.f32 %v11827_v52, 0.0  ;;  %v16248_v40 = vadd.f32 %v16216_v39, %v15316_v4  ;;  %v11742_v6 = vpop.f32.mrb[29].mxu0  ;;  %v6480_v48 = vpop.f32.mrb[31].mxu1 }
 0x56f   : > { %v11858_v44 = vmax.f32 %v11826_v15, 0.0  ;;  %v16249_v58 = vadd.f32 %v11742_v6, %v6470_v9 }
 0x570   : > { %11892 = vst.msk [vmem:[%s22413_s12 + $0xd8] sm:$0xff] %vm11864_vm5, %v11859_v19  ;;  %v11829_v54 = vadd.f32 %v16248_v40, %v22407_v16 }
 0x571   : > { %11891 = vst.msk [vmem:[%s22413_s12 + $0xd0] sm:$0xff] %vm11864_vm5, %v11858_v44  ;;  %v11828_v2 = vadd.f32 %v16249_v58, %v22407_v16  ;;  %v16219_v33 = vpop.f32.mrb[30].mxu0 }
 0x572   : > { %v11861_v32 = vmax.f32 %v11829_v54, 0.0  ;;  %v16250_v45 = vadd.f32 %v16219_v33, %v15319_v10  ;;  %v11752_v59 = vpop.f32.mrb[31].mxu0 }
 0x573   : > { %v11860_v49 = vmax.f32 %v11828_v2, 0.0  ;;  %v16251_v0 = vadd.f32 %v11752_v59, %v6480_v48 }
 0x574   : > { %11894 = vst.msk [vmem:[%s22413_s12 + $0xe8] sm:$0xff] %vm11864_vm5, %v11861_v32  ;;  %v11831_v50 = vadd.f32 %v16250_v45, %v22407_v16 }
 0x575   : > { %11893 = vst.msk [vmem:[%s22413_s12 + $0xe0] sm:$0xff] %vm11864_vm5, %v11860_v49  ;;  %v11830_v63 = vadd.f32 %v16251_v0, %v22407_v16 }
 0x576   : > { %v11863_v51 = vmax.f32 %v11831_v50, 0.0 }
 0x577   : > { %v11862_v61 = vmax.f32 %v11830_v63, 0.0 }
 0x578   : > { %11896 = vst.msk [vmem:[%s22413_s12 + $0xf8] sm:$0xff] %vm11864_vm5, %v11863_v51 }
 0x579   : > { %11895 = vst.msk [vmem:[%s22413_s12 + $0xf0] sm:$0xff] %vm11864_vm5, %v11862_v61 }
 0x57a   : > { %17558 = shalt.err (!%p17555_p3)
}
 0x57b   : > { %s17559_s20 = scalar_lea.hbm %s22510_s19, 4096  ;;  %s17563_s12 = scalar_lea.hbm %s22569_s8, 8192 }
 0x57c   : > { %p17560_p4 = scmp.ne.s32.totalorder %s22510_s19, %s17559_s20  ;;  %p17564_p9 = scmp.lt.u32.totalorder %s22510_s19, %s22569_s8 }
 0x57d   : > { %p17565_p10 = scmp.lt.u32.totalorder %s17563_s12, %s17559_s20  ;;  %p17567_p12 = scmp.lt.u32.totalorder %s17559_s20, %s22510_s19 }
 0x57e   : > { %p17561_p7 = pnand %p17560_p4, %p17695_p5 }
 0x57f   : > { %p17566_p11 = por %p17565_p10, %p17564_p9 }
 0x580   : > { %p17562_p8 = pneg %p17561_p7 }
 0x581   : > { %p17568_p13 = por %p17567_p12, %p17566_p11 }
 0x583   : > { %p17569_p0 = pnand %p17568_p13, %p17562_p8 }
 0x585   : > { %17572 = shalt.err (!%p17569_p0)
}
 0x586   : > { %s17610_s18 = smov 128   ;;  %s17611_s21 = smov 8  }
 0x587   : > { %17342 = dma.vmem_to_hbm [thread:$0]  (%p17695_p5), %s22512_s26, 4096, %s22510_s19, %s22520_s9, %s17610_s18, %s17610_s18, %s17611_s21  }
 0x588 PF: > { %p17348_p1 = scmp.ge.s32.totalorder %s17607_s30, 2  ;;  %s11926_s22 = sand.u32 1, %s17595_s27  }
 0x589   : > { %s11927_s23 = scalar_lea.sflag [#allocation3], %s11926_s22 }
 0x58a   : > { %p17345_p2 = pnand %p17348_p1, %p17699_p6 }
 0x58c   : > { %17590 = dma.done.wait (!%p17345_p2), %s11927_s23, 4096  }
 0x58d   : > { %17592 = vsyncadd (!%p17345_p2), %s11927_s23, 4294963200  ;;  %p18_p3 = scmp.ge.s32.totalorder %s17682_s11, 4   ;;  %s24120_s27 = smov %s17599_s28 }
 0x58e   : > { %s24121_s28 = smov %s17603_s29  ;;  %s24122_s29 = smov %s17693_s14 }
 0x58f   : > { %s24123_s30 = smov %s17682_s11  ;;  %20 = sbr.rel (!%p18_p3) target bundleno = 3 (0x3), region = 125 }
 0x596   :  { %11932 = vsyncpa [#allocation3], 1 }
 0x597   :  { %11934 = vsyncpa [#allocation3 + $0x1], 1 }

</bundles_post_ra>
